<compile_context>
chip_gen: v6e
topology: v6e:2x2x1
jax: 0.10.0
libtpu: 0.0.40
codegen_flags: <defaults>
</compile_context>

<pallas_src>
import functools
import math

import numpy as np

import jax
import jax.numpy as jnp
from jax.experimental import pallas as pl
from jax.experimental.pallas import tpu as pltpu


# ----------------------------- tiling helpers -----------------------------

def _cdiv(a, b):
    return -(-a // b)


def _pick_tile(L, max_off):
    """Lane tile: as big as useful, >=128, and >= the largest tap offset."""
    if L >= 1024:
        tl = 512
    elif L >= 256:
        tl = 256
    else:
        tl = 128
    tl = max(tl, _cdiv(max_off, 128) * 128)
    return tl


# ------------------------------ Pallas kernels -----------------------------

def _conv_kernel(*refs, offsets, tl, cout, prologue, use_mask, use_bias,
                 use_res, want_stats, act_tanh):
    """Fused tap-accumulation conv.

    ref order: x0, x1, [scale, shift, [m0, m1]], w, [bias], [res], [omask],
               y, [psum, psq]
    x0/x1 are tile i and tile i+1 of the flattened (Cin, L) input (halo).
    """
    it = iter(refs)
    x0_ref, x1_ref = next(it), next(it)
    if prologue:
        scale_ref, shift_ref = next(it), next(it)
        if use_mask:
            m0_ref, m1_ref = next(it), next(it)
    w_ref = next(it)
    b_ref = next(it) if use_bias else None
    r_ref = next(it) if use_res else None
    om_ref = next(it) if want_stats else None
    y_ref = next(it)
    if want_stats:
        ps_ref, pq_ref = next(it), next(it)

    # (Cin, 2*tl) window: current tile plus halo from the next tile.
    x = jnp.concatenate([x0_ref[...], x1_ref[...]], axis=1)
    if prologue:
        xf = x.astype(jnp.float32) * scale_ref[...] + shift_ref[...]
        xf = jnp.maximum(xf, 0.0)
        if use_mask:
            xf = xf * jnp.concatenate([m0_ref[...], m1_ref[...]], axis=1)
        x = xf.astype(jnp.bfloat16)

    w = w_ref[...]                           # (T, Cout, Cin) bf16
    cin = x.shape[0]
    acc = jnp.zeros((cout, tl), jnp.float32)
    for t, off in enumerate(offsets):        # static unroll over taps
        xs = x[:, off:off + tl]              # static lane-offset slice
        acc = acc + jnp.dot(w[t], xs, preferred_element_type=jnp.float32)

    if use_bias:
        acc = acc + b_ref[...]
    if use_res:
        acc = acc + r_ref[...].astype(jnp.float32)
    if act_tanh:
        acc = jnp.tanh(acc)
    y_ref[...] = acc.astype(y_ref.dtype)

    if want_stats:
        # per-tile partial per-channel sums over valid output pixels only
        am = acc * om_ref[...]
        ps_ref[...] = jnp.sum(am, axis=1, keepdims=True)[None]
        pq_ref[...] = jnp.sum(am * acc, axis=1, keepdims=True)[None]


def _bn_relu_kernel(*refs, want_stats):
    """Standalone BN-apply + ReLU (used where the prologue fusion can't)."""
    it = iter(refs)
    x_ref, scale_ref, shift_ref = next(it), next(it), next(it)
    om_ref = next(it) if want_stats else None
    o_ref = next(it)
    if want_stats:
        ps_ref, pq_ref = next(it), next(it)

    y = jnp.maximum(x_ref[...].astype(jnp.float32) * scale_ref[...]
                    + shift_ref[...], 0.0)
    o_ref[...] = y.astype(o_ref.dtype)
    if want_stats:
        ym = y * om_ref[...]
        ps_ref[...] = jnp.sum(ym, axis=1, keepdims=True)[None]
        pq_ref[...] = jnp.sum(ym * y, axis=1, keepdims=True)[None]


# ------------------------------ kernel wrappers -----------------------------

def fused_conv(xpad, wt, offsets, out_hw, *, scale=None, shift=None,
               inmask=None, bias=None, residual=None, want_stats=False,
               act_tanh=False, out_dtype=jnp.bfloat16):
    """Fused (BN+ReLU prologue) stride-1 conv (+bias +residual +tanh +BN stats).

    xpad:    (Cin, N, Hp, Wp) activation already spatially padded / phase-split.
    wt:      (T, Cout, Cin) tap-stacked weights.
    offsets: static flat pixel offset per tap (di*Wp + dj).
    out_hw:  valid (Hout, Wout) window inside the (Hp, Wp) grid.
    inmask:  np.ndarray (Hp, Wp) zero-padding mask (needed for zero-padded
             convs when the BN prologue is fused; reflection pad needs none).
    """
    Cin, N, Hp, Wp = xpad.shape
    T, Cout, Cin2 = wt.shape
    assert Cin2 == Cin and len(offsets) == T
    Hout, Wout = out_hw
    L = N * Hp * Wp
    max_off = int(max(offsets))
    tl = _pick_tile(L, max_off)
    nt = _cdiv(L, tl)
    Lout, Lin = nt * tl, (nt + 1) * tl

    x_flat = jnp.pad(xpad.reshape(Cin, L).astype(jnp.bfloat16),
                     ((0, 0), (0, Lin - L)))

    prologue = scale is not None
    use_mask = prologue and inmask is not None
    use_bias = bias is not None
    use_res = residual is not None

    inputs = [x_flat, x_flat]
    in_specs = [pl.BlockSpec((Cin, tl), lambda i: (0, i)),
                pl.BlockSpec((Cin, tl), lambda i: (0, i + 1))]
    if prologue:
        inputs += [scale.astype(jnp.float32).reshape(Cin, 1),
                   shift.astype(jnp.float32).reshape(Cin, 1)]
        in_specs += [pl.BlockSpec((Cin, 1), lambda i: (0, 0))] * 2
        if use_mask:
            m = np.zeros((1, Lin), np.float32)
            m[0, :L] = np.tile(np.asarray(inmask, np.float32).reshape(-1), N)
            m = jnp.asarray(m)
            inputs += [m, m]
            in_specs += [pl.BlockSpec((1, tl), lambda i: (0, i)),
                         pl.BlockSpec((1, tl), lambda i: (0, i + 1))]
    inputs.append(wt.astype(jnp.bfloat16))
    in_specs.append(pl.BlockSpec((T, Cout, Cin), lambda i: (0, 0, 0)))
    if use_bias:
        inputs.append(bias.astype(jnp.float32).reshape(Cout, 1))
        in_specs.append(pl.BlockSpec((Cout, 1), lambda i: (0, 0)))
    if use_res:
        r_flat = jnp.pad(residual.reshape(Cout, L).astype(jnp.bfloat16),
                         ((0, 0), (0, Lout - L)))
        inputs.append(r_flat)
        in_specs.append(pl.BlockSpec((Cout, tl), lambda i: (0, i)))
    if want_stats:
        om = np.zeros((1, Lout), np.float32)
        pos = np.arange(L)
        hh = (pos % (Hp * Wp)) // Wp
        ww = pos % Wp
        om[0, :L] = ((hh < Hout) & (ww < Wout)).astype(np.float32)
        inputs.append(jnp.asarray(om))
        in_specs.append(pl.BlockSpec((1, tl), lambda i: (0, i)))

    out_shapes = [jax.ShapeDtypeStruct((Cout, Lout), out_dtype)]
    out_specs = [pl.BlockSpec((Cout, tl), lambda i: (0, i))]
    if want_stats:
        out_shapes += [jax.ShapeDtypeStruct((nt, Cout, 1), jnp.float32)] * 2
        out_specs += [pl.BlockSpec((1, Cout, 1), lambda i: (i, 0, 0))] * 2

    kernel = functools.partial(
        _conv_kernel, offsets=tuple(int(o) for o in offsets), tl=tl, cout=Cout,
        prologue=prologue, use_mask=use_mask, use_bias=use_bias,
        use_res=use_res, want_stats=want_stats, act_tanh=act_tanh)

    outs = pl.pallas_call(
        kernel,
        out_shape=tuple(out_shapes),
        grid=(nt,),
        in_specs=in_specs,
        out_specs=tuple(out_specs),
        compiler_params=pltpu.CompilerParams(
            dimension_semantics=("parallel",),
            vmem_limit_bytes=32 * 1024 * 1024),
    )(*inputs)

    y = outs[0][:, :L].reshape(Cout, N, Hp, Wp)[:, :, :Hout, :Wout]
    if want_stats:
        s = jnp.sum(outs[1], axis=0)[:, 0]
        q = jnp.sum(outs[2], axis=0)[:, 0]
        return y, s, q
    return y


def bn_relu(x4, scale, shift, want_stats=False):
    """Standalone lane-dense BN-apply + ReLU on a (C, N, H, W) activation."""
    C, N, H, W = x4.shape
    M = N * H * W
    tl = 512 if M >= 1024 else (256 if M >= 256 else 128)
    nt = _cdiv(M, tl)
    Mp = nt * tl

    xf = jnp.pad(x4.reshape(C, M).astype(jnp.bfloat16), ((0, 0), (0, Mp - M)))
    inputs = [xf, scale.astype(jnp.float32).reshape(C, 1),
              shift.astype(jnp.float32).reshape(C, 1)]
    in_specs = [pl.BlockSpec((C, tl), lambda i: (0, i)),
                pl.BlockSpec((C, 1), lambda i: (0, 0)),
                pl.BlockSpec((C, 1), lambda i: (0, 0))]
    if want_stats:
        om = np.zeros((1, Mp), np.float32)
        om[0, :M] = 1.0
        inputs.append(jnp.asarray(om))
        in_specs.append(pl.BlockSpec((1, tl), lambda i: (0, i)))

    out_shapes = [jax.ShapeDtypeStruct((C, Mp), jnp.bfloat16)]
    out_specs = [pl.BlockSpec((C, tl), lambda i: (0, i))]
    if want_stats:
        out_shapes += [jax.ShapeDtypeStruct((nt, C, 1), jnp.float32)] * 2
        out_specs += [pl.BlockSpec((1, C, 1), lambda i: (i, 0, 0))] * 2

    outs = pl.pallas_call(
        functools.partial(_bn_relu_kernel, want_stats=want_stats),
        out_shape=tuple(out_shapes),
        grid=(nt,),
        in_specs=in_specs,
        out_specs=tuple(out_specs),
        compiler_params=pltpu.CompilerParams(
            dimension_semantics=("parallel",),
            vmem_limit_bytes=32 * 1024 * 1024),
    )(*inputs)

    y = outs[0][:, :M].reshape(C, N, H, W)
    if want_stats:
        return y, jnp.sum(outs[1], axis=0)[:, 0], jnp.sum(outs[2], axis=0)[:, 0]
    return y


# ------------------------- layout / weight helpers -------------------------

def bn_scale_shift(ssum, ssq, count, gamma, beta, eps=1e-5):
    # f32 sum / sum-of-squares from the conv epilogue accumulator; clamp var to
    # guard the E[x^2]-E[x]^2 cancellation at these small, O(1) activations.
    mean = ssum / count
    var = jnp.maximum(ssq / count - mean * mean, 0.0)
    inv = gamma.astype(jnp.float32) / jnp.sqrt(var + eps)
    return inv, beta.astype(jnp.float32) - mean * inv


def conv_tap_weights(w):
    # PyTorch (Cout, Cin, kh, kw) -> (kh*kw, Cout, Cin), row-major taps
    Cout, Cin, kh, kw = w.shape
    return jnp.transpose(w, (2, 3, 0, 1)).reshape(kh * kw, Cout, Cin)


def phase_split(xpad):
    # (C, N, Hp, Wp) -> (4*C, N, Hp/2, Wp/2), phase-major channel order
    C, N, Hp, Wp = xpad.shape
    x = xpad.reshape(C, N, Hp // 2, 2, Wp // 2, 2)
    x = jnp.transpose(x, (3, 5, 0, 1, 2, 4))
    return x.reshape(4 * C, N, Hp // 2, Wp // 2)


def down_eq_weights(w):
    # stride-2 3x3 conv == 2x2 stride-1 conv over the phase-split input
    Cout, Cin, _, _ = w.shape
    wt = jnp.zeros((4, Cout, 4 * Cin), w.dtype)
    for a in range(2):
        for b in range(2):
            for p in range(2):
                for q in range(2):
                    di, dj = 2 * a + p, 2 * b + q
                    if di < 3 and dj < 3:
                        wt = wt.at[a * 2 + b, :,
                                   (p * 2 + q) * Cin:(p * 2 + q + 1) * Cin].set(
                            w[:, :, di, dj])
    return wt


def convT_eq_weights(w):
    # ConvTranspose2d(k=3, s=2, p=1, op=1) == 4 sub-pixel stride-1 convs
    # (2x2 taps over the input padded by (0,1) bottom/right); output channels
    # are phase-major: (p*2+q)*Cout + cout.
    Cin, Cout, _, _ = w.shape
    wt = jnp.zeros((4, 4 * Cout, Cin), w.dtype)
    entries = [
        (0, 0, 0, 0, 1, 1),
        (0, 1, 0, 0, 1, 2), (0, 1, 0, 1, 1, 0),
        (1, 0, 0, 0, 2, 1), (1, 0, 1, 0, 0, 1),
        (1, 1, 0, 0, 2, 2), (1, 1, 0, 1, 2, 0),
        (1, 1, 1, 0, 0, 2), (1, 1, 1, 1, 0, 0),
    ]
    for p, q, a, b, kh, kw in entries:
        wt = wt.at[a * 2 + b,
                   (p * 2 + q) * Cout:(p * 2 + q + 1) * Cout, :].set(
            jnp.transpose(w[:, :, kh, kw]))
    return wt


# ------------------------------ parameter init ------------------------------

def _init_conv(key, cout, cin, kh, kw, use_bias):
    k1, k2 = jax.random.split(key)
    fan_in = cin * kh * kw
    w = jax.random.normal(k1, (cout, cin, kh, kw), jnp.float32) / math.sqrt(fan_in)
    b = 0.1 * jax.random.normal(k2, (cout,), jnp.float32) if use_bias else None
    return {"w": w, "b": b}


def _init_convT(key, cin, cout, kh, kw, use_bias):
    k1, k2 = jax.random.split(key)
    fan_in = cin * kh * kw
    w = jax.random.normal(k1, (cin, cout, kh, kw), jnp.float32) / math.sqrt(fan_in)
    b = 0.1 * jax.random.normal(k2, (cout,), jnp.float32) if use_bias else None
    return {"w": w, "b": b}


def _init_bn(key, c):
    k1, k2 = jax.random.split(key)
    gamma = 1.0 + 0.1 * jax.random.normal(k1, (c,), jnp.float32)
    beta = 0.1 * jax.random.normal(k2, (c,), jnp.float32)
    return {"gamma": gamma, "beta": beta}


def init_generator_params(key, channels=4, n_res_blocks=2, use_bias=False, ngf=8):
    keys = iter(jax.random.split(key, 128))
    params = {
        "stem_conv": _init_conv(next(keys), ngf, channels, 7, 7, use_bias),
        "stem_bn": _init_bn(next(keys), ngf),
        "down": [],
        "res": [],
        "up": [],
    }
    n_downsampling = 2
    for i in range(n_downsampling):
        mult = 2 ** i
        params["down"].append({
            "conv": _init_conv(next(keys), ngf * mult * 2, ngf * mult, 3, 3, use_bias),
            "bn": _init_bn(next(keys), ngf * mult * 2),
        })
    mult = 2 ** n_downsampling
    for _ in range(n_res_blocks):
        params["res"].append({
            "bn1": _init_bn(next(keys), ngf * mult),
            "conv1": _init_conv(next(keys), ngf * mult, ngf * mult, 3, 3, True),
            "bn2": _init_bn(next(keys), ngf * mult),
            "conv2": _init_conv(next(keys), ngf * mult, ngf * mult, 3, 3, True),
        })
    for i in range(n_downsampling):
        mult = 2 ** (n_downsampling - i)
        params["up"].append({
            "conv": _init_convT(next(keys), ngf * mult, ngf * mult // 2, 3, 3, use_bias),
            "bn": _init_bn(next(keys), ngf * mult // 2),
        })
    params["final_conv"] = _init_conv(next(keys), channels, ngf, 7, 7, True)
    return params


# --------------------------------- forward ---------------------------------

def generator_forward(x_nchw, params):
    N, C, H, W = x_nchw.shape
    # NCHW -> channel-major (C, N, H, W), bf16 inter-layer activations
    x4 = jnp.transpose(x_nchw.astype(jnp.float32), (1, 0, 2, 3)).astype(jnp.bfloat16)

    # ---- stem: ReflectionPad(3) -> Conv7 (no bias); BN stats fused in epilogue
    xp = jnp.pad(x4, ((0, 0), (0, 0), (3, 3), (3, 3)), mode="reflect")
    Wp = W + 6
    offs7 = tuple(di * Wp + dj for di in range(7) for dj in range(7))
    cur, s, q = fused_conv(xp, conv_tap_weights(params["stem_conv"]["w"]), offs7,
                           (H, W), bias=params["stem_conv"]["b"], want_stats=True)
    cnt = N * H * W
    scale, shift = bn_scale_shift(s, q, cnt, params["stem_bn"]["gamma"],
                                  params["stem_bn"]["beta"])

    # ---- downsampling: BN+ReLU, then stride-2 conv as a 2x2 phase conv
    h, w = H, W
    for d in params["down"]:
        a = bn_relu(cur, scale, shift)
        ap = jnp.pad(a, ((0, 0), (0, 0), (1, 1), (1, 1)))     # zero pad post-ReLU
        xin = phase_split(ap)
        Wpp = w // 2 + 1
        offs = (0, 1, Wpp, Wpp + 1)
        h, w = h // 2, w // 2
        cur, s, q = fused_conv(xin, down_eq_weights(d["conv"]["w"]), offs,
                               (h, w), bias=d["conv"]["b"], want_stats=True)
        cnt = N * h * w
        scale, shift = bn_scale_shift(s, q, cnt, d["bn"]["gamma"], d["bn"]["beta"])

    # ---- ResNet blocks (BN,ReLU,Conv,BN,ReLU,Conv + skip)
    # Materialize the block input ReLU(BN(x)) once; it is also the first skip.
    cur, s, q = bn_relu(cur, scale, shift, want_stats=True)
    Wpb = w + 2
    offs3 = tuple(di * Wpb + dj for di in range(3) for dj in range(3))
    inmask = np.zeros((h + 2, w + 2), np.float32)
    inmask[1:-1, 1:-1] = 1.0
    for r in params["res"]:
        sc1, sh1 = bn_scale_shift(s, q, cnt, r["bn1"]["gamma"], r["bn1"]["beta"])
        xp1 = jnp.pad(cur, ((0, 0), (0, 0), (1, 1), (1, 1)))
        hmid, s1, q1 = fused_conv(xp1, conv_tap_weights(r["conv1"]["w"]), offs3,
                                  (h, w), scale=sc1, shift=sh1, inmask=inmask,
                                  bias=r["conv1"]["b"], want_stats=True)
        sc2, sh2 = bn_scale_shift(s1, q1, cnt, r["bn2"]["gamma"], r["bn2"]["beta"])
        xp2 = jnp.pad(hmid, ((0, 0), (0, 0), (1, 1), (1, 1)))
        respad = jnp.pad(cur, ((0, 0), (0, 0), (1, 1), (1, 1)))
        cur, s, q = fused_conv(xp2, conv_tap_weights(r["conv2"]["w"]), offs3,
                               (h, w), scale=sc2, shift=sh2, inmask=inmask,
                               bias=r["conv2"]["b"], residual=respad,
                               want_stats=True)

    # ---- upsampling: ConvTranspose2d(k3,s2,p1,op1) as 4 sub-pixel phase convs
    for ui, u in enumerate(params["up"]):
        if ui > 0:
            cur = bn_relu(cur, scale, shift)
        Cout_u = u["conv"]["w"].shape[1]
        xp = jnp.pad(cur, ((0, 0), (0, 0), (0, 1), (0, 1)))   # bottom/right halo
        Wpu = w + 1
        offs = (0, 1, Wpu, Wpu + 1)
        yph, s, q = fused_conv(xp, convT_eq_weights(u["conv"]["w"]), offs,
                               (h, w), bias=u["conv"]["b"], want_stats=True)
        yph = yph.reshape(2, 2, Cout_u, N, h, w)
        cur = jnp.transpose(yph, (2, 3, 4, 0, 5, 1)).reshape(Cout_u, N, 2 * h, 2 * w)
        h, w = 2 * h, 2 * w
        cnt = N * h * w
        s = jnp.sum(s.reshape(4, Cout_u), axis=0)
        q = jnp.sum(q.reshape(4, Cout_u), axis=0)
        scale, shift = bn_scale_shift(s, q, cnt, u["bn"]["gamma"], u["bn"]["beta"])

    # ---- final: BN+ReLU (fused prologue, reflection pad commutes) ->
    #      ReflectionPad(3) -> Conv7 (+bias) -> Tanh, all in one kernel
    xp = jnp.pad(cur, ((0, 0), (0, 0), (3, 3), (3, 3)), mode="reflect")
    Wpf = w + 6
    offs7f = tuple(di * Wpf + dj for di in range(7) for dj in range(7))
    y = fused_conv(xp, conv_tap_weights(params["final_conv"]["w"]), offs7f,
                   (h, w), scale=scale, shift=shift,
                   bias=params["final_conv"]["b"], act_tanh=True,
                   want_stats=False, out_dtype=jnp.float32)

    return jnp.transpose(y, (1, 0, 2, 3))  # (C, N, H, W) -> NCHW


if __name__ == "__main__":
    key = jax.random.PRNGKey(0)
    kx, kp = jax.random.split(key)
    # PyTorch-style NCHW input
    x = jax.random.normal(kx, (2, 4, 16, 16), jnp.float32)
    params = init_generator_params(kp, channels=4, n_res_blocks=2,
                                   use_bias=False, ngf=8)

    fwd = jax.jit(generator_forward)
    y = fwd(x, params)
    jax.block_until_ready(y)
    assert y.shape == (2, 4, 16, 16), y.shape
    assert bool(jnp.all(jnp.isfinite(y)))
    assert bool(jnp.all(jnp.abs(y) <= 1.0))  # tanh output range
    print("KERNEL_OK")
</pallas_src>

<mosaic_0001>
module attributes {stable_mosaic.version = 11 : i64} {
  func.func @_conv_kernel(%arg0: i32, %arg1: memref<4x256xbf16, #tpu.memory_space<vmem>>, %arg2: memref<4x256xbf16, #tpu.memory_space<vmem>>, %arg3: memref<49x8x4xbf16, #tpu.memory_space<vmem>>, %arg4: memref<1x256xf32, #tpu.memory_space<vmem>>, %arg5: memref<8x256xbf16, #tpu.memory_space<vmem>>, %arg6: memref<1x8x1xf32, #tpu.memory_space<vmem>>, %arg7: memref<1x8x1xf32, #tpu.memory_space<vmem>>) attributes {dimension_semantics = [#tpu.dimension_semantics<parallel>], iteration_bounds = array<i64: 4>, scalar_prefetch = 0 : i64, scratch_operands = 0 : i64, tpu.core_type = #tpu.core_type<tc>, window_params = [{transform_indices = @transform_0, window_bounds = array<i64: 4, 256>}, {transform_indices = @transform_1, window_bounds = array<i64: 4, 256>}, {pipeline_mode = #tpu.pipeline_mode<synchronous>, transform_indices = @transform_2, window_bounds = array<i64: 49, 8, 4>}, {transform_indices = @transform_3, window_bounds = array<i64: 1, 256>}, {transform_indices = @transform_4, window_bounds = array<i64: 8, 256>}, {transform_indices = @transform_5, window_bounds = array<i64: 1, 8, 1>}, {transform_indices = @transform_6, window_bounds = array<i64: 1, 8, 1>}]} {
    %c0 = arith.constant 0 : index
    %c0_0 = arith.constant 0 : index
    %0 = vector.load %arg1[%c0, %c0_0] : memref<4x256xbf16, #tpu.memory_space<vmem>>, vector<4x256xbf16>
    %c0_1 = arith.constant 0 : index
    %c0_2 = arith.constant 0 : index
    %1 = vector.load %arg2[%c0_1, %c0_2] : memref<4x256xbf16, #tpu.memory_space<vmem>>, vector<4x256xbf16>
    %2 = tpu.concatenate %0, %1 in 1 : vector<4x256xbf16>, vector<4x256xbf16> -> vector<4x512xbf16>
    %c0_3 = arith.constant 0 : index
    %c0_4 = arith.constant 0 : index
    %c0_5 = arith.constant 0 : index
    %3 = vector.load %arg3[%c0_3, %c0_4, %c0_5] : memref<49x8x4xbf16, #tpu.memory_space<vmem>>, vector<49x8x4xbf16>
    %cst = arith.constant 0.000000e+00 : f32
    %4 = vector.broadcast %cst : f32 to vector<8x256xf32>
    %5 = vector.extract_strided_slice %2 {offsets = [0, 0], sizes = [4, 256], strides = [1, 1]} : vector<4x512xbf16> to vector<4x256xbf16>
    %6 = vector.extract_strided_slice %3 {offsets = [0, 0, 0], sizes = [1, 8, 4], strides = [1, 1, 1]} : vector<49x8x4xbf16> to vector<1x8x4xbf16>
    %7 = vector.shape_cast %6 : vector<1x8x4xbf16> to vector<8x4xbf16>
    %cst_6 = arith.constant dense<0.000000e+00> : vector<8x256xf32>
    %8 = tpu.matmul %7, %5, %cst_6 {dimension_numbers = #tpu.dot_dimension_numbers<[1], [0], [0], [1], [0, 0, 1, 1], [], []>} : vector<8x4xbf16>, vector<4x256xbf16>, vector<8x256xf32> -> vector<8x256xf32>
    %9 = arith.addf %4, %8 : vector<8x256xf32>
    %10 = vector.extract_strided_slice %2 {offsets = [0, 1], sizes = [4, 256], strides = [1, 1]} : vector<4x512xbf16> to vector<4x256xbf16>
    %11 = vector.extract_strided_slice %3 {offsets = [1, 0, 0], sizes = [1, 8, 4], strides = [1, 1, 1]} : vector<49x8x4xbf16> to vector<1x8x4xbf16>
    %12 = vector.shape_cast %11 : vector<1x8x4xbf16> to vector<8x4xbf16>
    %cst_7 = arith.constant dense<0.000000e+00> : vector<8x256xf32>
    %13 = tpu.matmul %12, %10, %cst_7 {dimension_numbers = #tpu.dot_dimension_numbers<[1], [0], [0], [1], [0, 0, 1, 1], [], []>} : vector<8x4xbf16>, vector<4x256xbf16>, vector<8x256xf32> -> vector<8x256xf32>
    %14 = arith.addf %9, %13 : vector<8x256xf32>
    %15 = vector.extract_strided_slice %2 {offsets = [0, 2], sizes = [4, 256], strides = [1, 1]} : vector<4x512xbf16> to vector<4x256xbf16>
    %16 = vector.extract_strided_slice %3 {offsets = [2, 0, 0], sizes = [1, 8, 4], strides = [1, 1, 1]} : vector<49x8x4xbf16> to vector<1x8x4xbf16>
    %17 = vector.shape_cast %16 : vector<1x8x4xbf16> to vector<8x4xbf16>
    %cst_8 = arith.constant dense<0.000000e+00> : vector<8x256xf32>
    %18 = tpu.matmul %17, %15, %cst_8 {dimension_numbers = #tpu.dot_dimension_numbers<[1], [0], [0], [1], [0, 0, 1, 1], [], []>} : vector<8x4xbf16>, vector<4x256xbf16>, vector<8x256xf32> -> vector<8x256xf32>
    %19 = arith.addf %14, %18 : vector<8x256xf32>
    %20 = vector.extract_strided_slice %2 {offsets = [0, 3], sizes = [4, 256], strides = [1, 1]} : vector<4x512xbf16> to vector<4x256xbf16>
    %21 = vector.extract_strided_slice %3 {offsets = [3, 0, 0], sizes = [1, 8, 4], strides = [1, 1, 1]} : vector<49x8x4xbf16> to vector<1x8x4xbf16>
    %22 = vector.shape_cast %21 : vector<1x8x4xbf16> to vector<8x4xbf16>
    %cst_9 = arith.constant dense<0.000000e+00> : vector<8x256xf32>
    %23 = tpu.matmul %22, %20, %cst_9 {dimension_numbers = #tpu.dot_dimension_numbers<[1], [0], [0], [1], [0, 0, 1, 1], [], []>} : vector<8x4xbf16>, vector<4x256xbf16>, vector<8x256xf32> -> vector<8x256xf32>
    %24 = arith.addf %19, %23 : vector<8x256xf32>
    %25 = vector.extract_strided_slice %2 {offsets = [0, 4], sizes = [4, 256], strides = [1, 1]} : vector<4x512xbf16> to vector<4x256xbf16>
    %26 = vector.extract_strided_slice %3 {offsets = [4, 0, 0], sizes = [1, 8, 4], strides = [1, 1, 1]} : vector<49x8x4xbf16> to vector<1x8x4xbf16>
    %27 = vector.shape_cast %26 : vector<1x8x4xbf16> to vector<8x4xbf16>
    %cst_10 = arith.constant dense<0.000000e+00> : vector<8x256xf32>
    %28 = tpu.matmul %27, %25, %cst_10 {dimension_numbers = #tpu.dot_dimension_numbers<[1], [0], [0], [1], [0, 0, 1, 1], [], []>} : vector<8x4xbf16>, vector<4x256xbf16>, vector<8x256xf32> -> vector<8x256xf32>
    %29 = arith.addf %24, %28 : vector<8x256xf32>
    %30 = vector.extract_strided_slice %2 {offsets = [0, 5], sizes = [4, 256], strides = [1, 1]} : vector<4x512xbf16> to vector<4x256xbf16>
    %31 = vector.extract_strided_slice %3 {offsets = [5, 0, 0], sizes = [1, 8, 4], strides = [1, 1, 1]} : vector<49x8x4xbf16> to vector<1x8x4xbf16>
    %32 = vector.shape_cast %31 : vector<1x8x4xbf16> to vector<8x4xbf16>
    %cst_11 = arith.constant dense<0.000000e+00> : vector<8x256xf32>
    %33 = tpu.matmul %32, %30, %cst_11 {dimension_numbers = #tpu.dot_dimension_numbers<[1], [0], [0], [1], [0, 0, 1, 1], [], []>} : vector<8x4xbf16>, vector<4x256xbf16>, vector<8x256xf32> -> vector<8x256xf32>
    %34 = arith.addf %29, %33 : vector<8x256xf32>
    %35 = vector.extract_strided_slice %2 {offsets = [0, 6], sizes = [4, 256], strides = [1, 1]} : vector<4x512xbf16> to vector<4x256xbf16>
    %36 = vector.extract_strided_slice %3 {offsets = [6, 0, 0], sizes = [1, 8, 4], strides = [1, 1, 1]} : vector<49x8x4xbf16> to vector<1x8x4xbf16>
    %37 = vector.shape_cast %36 : vector<1x8x4xbf16> to vector<8x4xbf16>
    %cst_12 = arith.constant dense<0.000000e+00> : vector<8x256xf32>
    %38 = tpu.matmul %37, %35, %cst_12 {dimension_numbers = #tpu.dot_dimension_numbers<[1], [0], [0], [1], [0, 0, 1, 1], [], []>} : vector<8x4xbf16>, vector<4x256xbf16>, vector<8x256xf32> -> vector<8x256xf32>
    %39 = arith.addf %34, %38 : vector<8x256xf32>
    %40 = vector.extract_strided_slice %2 {offsets = [0, 22], sizes = [4, 256], strides = [1, 1]} : vector<4x512xbf16> to vector<4x256xbf16>
    %41 = vector.extract_strided_slice %3 {offsets = [7, 0, 0], sizes = [1, 8, 4], strides = [1, 1, 1]} : vector<49x8x4xbf16> to vector<1x8x4xbf16>
    %42 = vector.shape_cast %41 : vector<1x8x4xbf16> to vector<8x4xbf16>
    %cst_13 = arith.constant dense<0.000000e+00> : vector<8x256xf32>
    %43 = tpu.matmul %42, %40, %cst_13 {dimension_numbers = #tpu.dot_dimension_numbers<[1], [0], [0], [1], [0, 0, 1, 1], [], []>} : vector<8x4xbf16>, vector<4x256xbf16>, vector<8x256xf32> -> vector<8x256xf32>
    %44 = arith.addf %39, %43 : vector<8x256xf32>
    %45 = vector.extract_strided_slice %2 {offsets = [0, 23], sizes = [4, 256], strides = [1, 1]} : vector<4x512xbf16> to vector<4x256xbf16>
    %46 = vector.extract_strided_slice %3 {offsets = [8, 0, 0], sizes = [1, 8, 4], strides = [1, 1, 1]} : vector<49x8x4xbf16> to vector<1x8x4xbf16>
    %47 = vector.shape_cast %46 : vector<1x8x4xbf16> to vector<8x4xbf16>
    %cst_14 = arith.constant dense<0.000000e+00> : vector<8x256xf32>
    %48 = tpu.matmul %47, %45, %cst_14 {dimension_numbers = #tpu.dot_dimension_numbers<[1], [0], [0], [1], [0, 0, 1, 1], [], []>} : vector<8x4xbf16>, vector<4x256xbf16>, vector<8x256xf32> -> vector<8x256xf32>
    %49 = arith.addf %44, %48 : vector<8x256xf32>
    %50 = vector.extract_strided_slice %2 {offsets = [0, 24], sizes = [4, 256], strides = [1, 1]} : vector<4x512xbf16> to vector<4x256xbf16>
    %51 = vector.extract_strided_slice %3 {offsets = [9, 0, 0], sizes = [1, 8, 4], strides = [1, 1, 1]} : vector<49x8x4xbf16> to vector<1x8x4xbf16>
    %52 = vector.shape_cast %51 : vector<1x8x4xbf16> to vector<8x4xbf16>
    %cst_15 = arith.constant dense<0.000000e+00> : vector<8x256xf32>
    %53 = tpu.matmul %52, %50, %cst_15 {dimension_numbers = #tpu.dot_dimension_numbers<[1], [0], [0], [1], [0, 0, 1, 1], [], []>} : vector<8x4xbf16>, vector<4x256xbf16>, vector<8x256xf32> -> vector<8x256xf32>
    %54 = arith.addf %49, %53 : vector<8x256xf32>
    %55 = vector.extract_strided_slice %2 {offsets = [0, 25], sizes = [4, 256], strides = [1, 1]} : vector<4x512xbf16> to vector<4x256xbf16>
    %56 = vector.extract_strided_slice %3 {offsets = [10, 0, 0], sizes = [1, 8, 4], strides = [1, 1, 1]} : vector<49x8x4xbf16> to vector<1x8x4xbf16>
    %57 = vector.shape_cast %56 : vector<1x8x4xbf16> to vector<8x4xbf16>
    %cst_16 = arith.constant dense<0.000000e+00> : vector<8x256xf32>
    %58 = tpu.matmul %57, %55, %cst_16 {dimension_numbers = #tpu.dot_dimension_numbers<[1], [0], [0], [1], [0, 0, 1, 1], [], []>} : vector<8x4xbf16>, vector<4x256xbf16>, vector<8x256xf32> -> vector<8x256xf32>
    %59 = arith.addf %54, %58 : vector<8x256xf32>
    %60 = vector.extract_strided_slice %2 {offsets = [0, 26], sizes = [4, 256], strides = [1, 1]} : vector<4x512xbf16> to vector<4x256xbf16>
    %61 = vector.extract_strided_slice %3 {offsets = [11, 0, 0], sizes = [1, 8, 4], strides = [1, 1, 1]} : vector<49x8x4xbf16> to vector<1x8x4xbf16>
    %62 = vector.shape_cast %61 : vector<1x8x4xbf16> to vector<8x4xbf16>
    %cst_17 = arith.constant dense<0.000000e+00> : vector<8x256xf32>
    %63 = tpu.matmul %62, %60, %cst_17 {dimension_numbers = #tpu.dot_dimension_numbers<[1], [0], [0], [1], [0, 0, 1, 1], [], []>} : vector<8x4xbf16>, vector<4x256xbf16>, vector<8x256xf32> -> vector<8x256xf32>
    %64 = arith.addf %59, %63 : vector<8x256xf32>
    %65 = vector.extract_strided_slice %2 {offsets = [0, 27], sizes = [4, 256], strides = [1, 1]} : vector<4x512xbf16> to vector<4x256xbf16>
    %66 = vector.extract_strided_slice %3 {offsets = [12, 0, 0], sizes = [1, 8, 4], strides = [1, 1, 1]} : vector<49x8x4xbf16> to vector<1x8x4xbf16>
    %67 = vector.shape_cast %66 : vector<1x8x4xbf16> to vector<8x4xbf16>
    %cst_18 = arith.constant dense<0.000000e+00> : vector<8x256xf32>
    %68 = tpu.matmul %67, %65, %cst_18 {dimension_numbers = #tpu.dot_dimension_numbers<[1], [0], [0], [1], [0, 0, 1, 1], [], []>} : vector<8x4xbf16>, vector<4x256xbf16>, vector<8x256xf32> -> vector<8x256xf32>
    %69 = arith.addf %64, %68 : vector<8x256xf32>
    %70 = vector.extract_strided_slice %2 {offsets = [0, 28], sizes = [4, 256], strides = [1, 1]} : vector<4x512xbf16> to vector<4x256xbf16>
    %71 = vector.extract_strided_slice %3 {offsets = [13, 0, 0], sizes = [1, 8, 4], strides = [1, 1, 1]} : vector<49x8x4xbf16> to vector<1x8x4xbf16>
    %72 = vector.shape_cast %71 : vector<1x8x4xbf16> to vector<8x4xbf16>
    %cst_19 = arith.constant dense<0.000000e+00> : vector<8x256xf32>
    %73 = tpu.matmul %72, %70, %cst_19 {dimension_numbers = #tpu.dot_dimension_numbers<[1], [0], [0], [1], [0, 0, 1, 1], [], []>} : vector<8x4xbf16>, vector<4x256xbf16>, vector<8x256xf32> -> vector<8x256xf32>
    %74 = arith.addf %69, %73 : vector<8x256xf32>
    %75 = vector.extract_strided_slice %2 {offsets = [0, 44], sizes = [4, 256], strides = [1, 1]} : vector<4x512xbf16> to vector<4x256xbf16>
    %76 = vector.extract_strided_slice %3 {offsets = [14, 0, 0], sizes = [1, 8, 4], strides = [1, 1, 1]} : vector<49x8x4xbf16> to vector<1x8x4xbf16>
    %77 = vector.shape_cast %76 : vector<1x8x4xbf16> to vector<8x4xbf16>
    %cst_20 = arith.constant dense<0.000000e+00> : vector<8x256xf32>
    %78 = tpu.matmul %77, %75, %cst_20 {dimension_numbers = #tpu.dot_dimension_numbers<[1], [0], [0], [1], [0, 0, 1, 1], [], []>} : vector<8x4xbf16>, vector<4x256xbf16>, vector<8x256xf32> -> vector<8x256xf32>
    %79 = arith.addf %74, %78 : vector<8x256xf32>
    %80 = vector.extract_strided_slice %2 {offsets = [0, 45], sizes = [4, 256], strides = [1, 1]} : vector<4x512xbf16> to vector<4x256xbf16>
    %81 = vector.extract_strided_slice %3 {offsets = [15, 0, 0], sizes = [1, 8, 4], strides = [1, 1, 1]} : vector<49x8x4xbf16> to vector<1x8x4xbf16>
    %82 = vector.shape_cast %81 : vector<1x8x4xbf16> to vector<8x4xbf16>
    %cst_21 = arith.constant dense<0.000000e+00> : vector<8x256xf32>
    %83 = tpu.matmul %82, %80, %cst_21 {dimension_numbers = #tpu.dot_dimension_numbers<[1], [0], [0], [1], [0, 0, 1, 1], [], []>} : vector<8x4xbf16>, vector<4x256xbf16>, vector<8x256xf32> -> vector<8x256xf32>
    %84 = arith.addf %79, %83 : vector<8x256xf32>
    %85 = vector.extract_strided_slice %2 {offsets = [0, 46], sizes = [4, 256], strides = [1, 1]} : vector<4x512xbf16> to vector<4x256xbf16>
    %86 = vector.extract_strided_slice %3 {offsets = [16, 0, 0], sizes = [1, 8, 4], strides = [1, 1, 1]} : vector<49x8x4xbf16> to vector<1x8x4xbf16>
    %87 = vector.shape_cast %86 : vector<1x8x4xbf16> to vector<8x4xbf16>
    %cst_22 = arith.constant dense<0.000000e+00> : vector<8x256xf32>
    %88 = tpu.matmul %87, %85, %cst_22 {dimension_numbers = #tpu.dot_dimension_numbers<[1], [0], [0], [1], [0, 0, 1, 1], [], []>} : vector<8x4xbf16>, vector<4x256xbf16>, vector<8x256xf32> -> vector<8x256xf32>
    %89 = arith.addf %84, %88 : vector<8x256xf32>
    %90 = vector.extract_strided_slice %2 {offsets = [0, 47], sizes = [4, 256], strides = [1, 1]} : vector<4x512xbf16> to vector<4x256xbf16>
    %91 = vector.extract_strided_slice %3 {offsets = [17, 0, 0], sizes = [1, 8, 4], strides = [1, 1, 1]} : vector<49x8x4xbf16> to vector<1x8x4xbf16>
    %92 = vector.shape_cast %91 : vector<1x8x4xbf16> to vector<8x4xbf16>
    %cst_23 = arith.constant dense<0.000000e+00> : vector<8x256xf32>
    %93 = tpu.matmul %92, %90, %cst_23 {dimension_numbers = #tpu.dot_dimension_numbers<[1], [0], [0], [1], [0, 0, 1, 1], [], []>} : vector<8x4xbf16>, vector<4x256xbf16>, vector<8x256xf32> -> vector<8x256xf32>
    %94 = arith.addf %89, %93 : vector<8x256xf32>
    %95 = vector.extract_strided_slice %2 {offsets = [0, 48], sizes = [4, 256], strides = [1, 1]} : vector<4x512xbf16> to vector<4x256xbf16>
    %96 = vector.extract_strided_slice %3 {offsets = [18, 0, 0], sizes = [1, 8, 4], strides = [1, 1, 1]} : vector<49x8x4xbf16> to vector<1x8x4xbf16>
    %97 = vector.shape_cast %96 : vector<1x8x4xbf16> to vector<8x4xbf16>
    %cst_24 = arith.constant dense<0.000000e+00> : vector<8x256xf32>
    %98 = tpu.matmul %97, %95, %cst_24 {dimension_numbers = #tpu.dot_dimension_numbers<[1], [0], [0], [1], [0, 0, 1, 1], [], []>} : vector<8x4xbf16>, vector<4x256xbf16>, vector<8x256xf32> -> vector<8x256xf32>
    %99 = arith.addf %94, %98 : vector<8x256xf32>
    %100 = vector.extract_strided_slice %2 {offsets = [0, 49], sizes = [4, 256], strides = [1, 1]} : vector<4x512xbf16> to vector<4x256xbf16>
    %101 = vector.extract_strided_slice %3 {offsets = [19, 0, 0], sizes = [1, 8, 4], strides = [1, 1, 1]} : vector<49x8x4xbf16> to vector<1x8x4xbf16>
    %102 = vector.shape_cast %101 : vector<1x8x4xbf16> to vector<8x4xbf16>
    %cst_25 = arith.constant dense<0.000000e+00> : vector<8x256xf32>
    %103 = tpu.matmul %102, %100, %cst_25 {dimension_numbers = #tpu.dot_dimension_numbers<[1], [0], [0], [1], [0, 0, 1, 1], [], []>} : vector<8x4xbf16>, vector<4x256xbf16>, vector<8x256xf32> -> vector<8x256xf32>
    %104 = arith.addf %99, %103 : vector<8x256xf32>
    %105 = vector.extract_strided_slice %2 {offsets = [0, 50], sizes = [4, 256], strides = [1, 1]} : vector<4x512xbf16> to vector<4x256xbf16>
    %106 = vector.extract_strided_slice %3 {offsets = [20, 0, 0], sizes = [1, 8, 4], strides = [1, 1, 1]} : vector<49x8x4xbf16> to vector<1x8x4xbf16>
    %107 = vector.shape_cast %106 : vector<1x8x4xbf16> to vector<8x4xbf16>
    %cst_26 = arith.constant dense<0.000000e+00> : vector<8x256xf32>
    %108 = tpu.matmul %107, %105, %cst_26 {dimension_numbers = #tpu.dot_dimension_numbers<[1], [0], [0], [1], [0, 0, 1, 1], [], []>} : vector<8x4xbf16>, vector<4x256xbf16>, vector<8x256xf32> -> vector<8x256xf32>
    %109 = arith.addf %104, %108 : vector<8x256xf32>
    %110 = vector.extract_strided_slice %2 {offsets = [0, 66], sizes = [4, 256], strides = [1, 1]} : vector<4x512xbf16> to vector<4x256xbf16>
    %111 = vector.extract_strided_slice %3 {offsets = [21, 0, 0], sizes = [1, 8, 4], strides = [1, 1, 1]} : vector<49x8x4xbf16> to vector<1x8x4xbf16>
    %112 = vector.shape_cast %111 : vector<1x8x4xbf16> to vector<8x4xbf16>
    %cst_27 = arith.constant dense<0.000000e+00> : vector<8x256xf32>
    %113 = tpu.matmul %112, %110, %cst_27 {dimension_numbers = #tpu.dot_dimension_numbers<[1], [0], [0], [1], [0, 0, 1, 1], [], []>} : vector<8x4xbf16>, vector<4x256xbf16>, vector<8x256xf32> -> vector<8x256xf32>
    %114 = arith.addf %109, %113 : vector<8x256xf32>
    %115 = vector.extract_strided_slice %2 {offsets = [0, 67], sizes = [4, 256], strides = [1, 1]} : vector<4x512xbf16> to vector<4x256xbf16>
    %116 = vector.extract_strided_slice %3 {offsets = [22, 0, 0], sizes = [1, 8, 4], strides = [1, 1, 1]} : vector<49x8x4xbf16> to vector<1x8x4xbf16>
    %117 = vector.shape_cast %116 : vector<1x8x4xbf16> to vector<8x4xbf16>
    %cst_28 = arith.constant dense<0.000000e+00> : vector<8x256xf32>
    %118 = tpu.matmul %117, %115, %cst_28 {dimension_numbers = #tpu.dot_dimension_numbers<[1], [0], [0], [1], [0, 0, 1, 1], [], []>} : vector<8x4xbf16>, vector<4x256xbf16>, vector<8x256xf32> -> vector<8x256xf32>
    %119 = arith.addf %114, %118 : vector<8x256xf32>
    %120 = vector.extract_strided_slice %2 {offsets = [0, 68], sizes = [4, 256], strides = [1, 1]} : vector<4x512xbf16> to vector<4x256xbf16>
    %121 = vector.extract_strided_slice %3 {offsets = [23, 0, 0], sizes = [1, 8, 4], strides = [1, 1, 1]} : vector<49x8x4xbf16> to vector<1x8x4xbf16>
    %122 = vector.shape_cast %121 : vector<1x8x4xbf16> to vector<8x4xbf16>
    %cst_29 = arith.constant dense<0.000000e+00> : vector<8x256xf32>
    %123 = tpu.matmul %122, %120, %cst_29 {dimension_numbers = #tpu.dot_dimension_numbers<[1], [0], [0], [1], [0, 0, 1, 1], [], []>} : vector<8x4xbf16>, vector<4x256xbf16>, vector<8x256xf32> -> vector<8x256xf32>
    %124 = arith.addf %119, %123 : vector<8x256xf32>
    %125 = vector.extract_strided_slice %2 {offsets = [0, 69], sizes = [4, 256], strides = [1, 1]} : vector<4x512xbf16> to vector<4x256xbf16>
    %126 = vector.extract_strided_slice %3 {offsets = [24, 0, 0], sizes = [1, 8, 4], strides = [1, 1, 1]} : vector<49x8x4xbf16> to vector<1x8x4xbf16>
    %127 = vector.shape_cast %126 : vector<1x8x4xbf16> to vector<8x4xbf16>
    %cst_30 = arith.constant dense<0.000000e+00> : vector<8x256xf32>
    %128 = tpu.matmul %127, %125, %cst_30 {dimension_numbers = #tpu.dot_dimension_numbers<[1], [0], [0], [1], [0, 0, 1, 1], [], []>} : vector<8x4xbf16>, vector<4x256xbf16>, vector<8x256xf32> -> vector<8x256xf32>
    %129 = arith.addf %124, %128 : vector<8x256xf32>
    %130 = vector.extract_strided_slice %2 {offsets = [0, 70], sizes = [4, 256], strides = [1, 1]} : vector<4x512xbf16> to vector<4x256xbf16>
    %131 = vector.extract_strided_slice %3 {offsets = [25, 0, 0], sizes = [1, 8, 4], strides = [1, 1, 1]} : vector<49x8x4xbf16> to vector<1x8x4xbf16>
    %132 = vector.shape_cast %131 : vector<1x8x4xbf16> to vector<8x4xbf16>
    %cst_31 = arith.constant dense<0.000000e+00> : vector<8x256xf32>
    %133 = tpu.matmul %132, %130, %cst_31 {dimension_numbers = #tpu.dot_dimension_numbers<[1], [0], [0], [1], [0, 0, 1, 1], [], []>} : vector<8x4xbf16>, vector<4x256xbf16>, vector<8x256xf32> -> vector<8x256xf32>
    %134 = arith.addf %129, %133 : vector<8x256xf32>
    %135 = vector.extract_strided_slice %2 {offsets = [0, 71], sizes = [4, 256], strides = [1, 1]} : vector<4x512xbf16> to vector<4x256xbf16>
    %136 = vector.extract_strided_slice %3 {offsets = [26, 0, 0], sizes = [1, 8, 4], strides = [1, 1, 1]} : vector<49x8x4xbf16> to vector<1x8x4xbf16>
    %137 = vector.shape_cast %136 : vector<1x8x4xbf16> to vector<8x4xbf16>
    %cst_32 = arith.constant dense<0.000000e+00> : vector<8x256xf32>
    %138 = tpu.matmul %137, %135, %cst_32 {dimension_numbers = #tpu.dot_dimension_numbers<[1], [0], [0], [1], [0, 0, 1, 1], [], []>} : vector<8x4xbf16>, vector<4x256xbf16>, vector<8x256xf32> -> vector<8x256xf32>
    %139 = arith.addf %134, %138 : vector<8x256xf32>
    %140 = vector.extract_strided_slice %2 {offsets = [0, 72], sizes = [4, 256], strides = [1, 1]} : vector<4x512xbf16> to vector<4x256xbf16>
    %141 = vector.extract_strided_slice %3 {offsets = [27, 0, 0], sizes = [1, 8, 4], strides = [1, 1, 1]} : vector<49x8x4xbf16> to vector<1x8x4xbf16>
    %142 = vector.shape_cast %141 : vector<1x8x4xbf16> to vector<8x4xbf16>
    %cst_33 = arith.constant dense<0.000000e+00> : vector<8x256xf32>
    %143 = tpu.matmul %142, %140, %cst_33 {dimension_numbers = #tpu.dot_dimension_numbers<[1], [0], [0], [1], [0, 0, 1, 1], [], []>} : vector<8x4xbf16>, vector<4x256xbf16>, vector<8x256xf32> -> vector<8x256xf32>
    %144 = arith.addf %139, %143 : vector<8x256xf32>
    %145 = vector.extract_strided_slice %2 {offsets = [0, 88], sizes = [4, 256], strides = [1, 1]} : vector<4x512xbf16> to vector<4x256xbf16>
    %146 = vector.extract_strided_slice %3 {offsets = [28, 0, 0], sizes = [1, 8, 4], strides = [1, 1, 1]} : vector<49x8x4xbf16> to vector<1x8x4xbf16>
    %147 = vector.shape_cast %146 : vector<1x8x4xbf16> to vector<8x4xbf16>
    %cst_34 = arith.constant dense<0.000000e+00> : vector<8x256xf32>
    %148 = tpu.matmul %147, %145, %cst_34 {dimension_numbers = #tpu.dot_dimension_numbers<[1], [0], [0], [1], [0, 0, 1, 1], [], []>} : vector<8x4xbf16>, vector<4x256xbf16>, vector<8x256xf32> -> vector<8x256xf32>
    %149 = arith.addf %144, %148 : vector<8x256xf32>
    %150 = vector.extract_strided_slice %2 {offsets = [0, 89], sizes = [4, 256], strides = [1, 1]} : vector<4x512xbf16> to vector<4x256xbf16>
    %151 = vector.extract_strided_slice %3 {offsets = [29, 0, 0], sizes = [1, 8, 4], strides = [1, 1, 1]} : vector<49x8x4xbf16> to vector<1x8x4xbf16>
    %152 = vector.shape_cast %151 : vector<1x8x4xbf16> to vector<8x4xbf16>
    %cst_35 = arith.constant dense<0.000000e+00> : vector<8x256xf32>
    %153 = tpu.matmul %152, %150, %cst_35 {dimension_numbers = #tpu.dot_dimension_numbers<[1], [0], [0], [1], [0, 0, 1, 1], [], []>} : vector<8x4xbf16>, vector<4x256xbf16>, vector<8x256xf32> -> vector<8x256xf32>
    %154 = arith.addf %149, %153 : vector<8x256xf32>
    %155 = vector.extract_strided_slice %2 {offsets = [0, 90], sizes = [4, 256], strides = [1, 1]} : vector<4x512xbf16> to vector<4x256xbf16>
    %156 = vector.extract_strided_slice %3 {offsets = [30, 0, 0], sizes = [1, 8, 4], strides = [1, 1, 1]} : vector<49x8x4xbf16> to vector<1x8x4xbf16>
    %157 = vector.shape_cast %156 : vector<1x8x4xbf16> to vector<8x4xbf16>
    %cst_36 = arith.constant dense<0.000000e+00> : vector<8x256xf32>
    %158 = tpu.matmul %157, %155, %cst_36 {dimension_numbers = #tpu.dot_dimension_numbers<[1], [0], [0], [1], [0, 0, 1, 1], [], []>} : vector<8x4xbf16>, vector<4x256xbf16>, vector<8x256xf32> -> vector<8x256xf32>
    %159 = arith.addf %154, %158 : vector<8x256xf32>
    %160 = vector.extract_strided_slice %2 {offsets = [0, 91], sizes = [4, 256], strides = [1, 1]} : vector<4x512xbf16> to vector<4x256xbf16>
    %161 = vector.extract_strided_slice %3 {offsets = [31, 0, 0], sizes = [1, 8, 4], strides = [1, 1, 1]} : vector<49x8x4xbf16> to vector<1x8x4xbf16>
    %162 = vector.shape_cast %161 : vector<1x8x4xbf16> to vector<8x4xbf16>
    %cst_37 = arith.constant dense<0.000000e+00> : vector<8x256xf32>
    %163 = tpu.matmul %162, %160, %cst_37 {dimension_numbers = #tpu.dot_dimension_numbers<[1], [0], [0], [1], [0, 0, 1, 1], [], []>} : vector<8x4xbf16>, vector<4x256xbf16>, vector<8x256xf32> -> vector<8x256xf32>
    %164 = arith.addf %159, %163 : vector<8x256xf32>
    %165 = vector.extract_strided_slice %2 {offsets = [0, 92], sizes = [4, 256], strides = [1, 1]} : vector<4x512xbf16> to vector<4x256xbf16>
    %166 = vector.extract_strided_slice %3 {offsets = [32, 0, 0], sizes = [1, 8, 4], strides = [1, 1, 1]} : vector<49x8x4xbf16> to vector<1x8x4xbf16>
    %167 = vector.shape_cast %166 : vector<1x8x4xbf16> to vector<8x4xbf16>
    %cst_38 = arith.constant dense<0.000000e+00> : vector<8x256xf32>
    %168 = tpu.matmul %167, %165, %cst_38 {dimension_numbers = #tpu.dot_dimension_numbers<[1], [0], [0], [1], [0, 0, 1, 1], [], []>} : vector<8x4xbf16>, vector<4x256xbf16>, vector<8x256xf32> -> vector<8x256xf32>
    %169 = arith.addf %164, %168 : vector<8x256xf32>
    %170 = vector.extract_strided_slice %2 {offsets = [0, 93], sizes = [4, 256], strides = [1, 1]} : vector<4x512xbf16> to vector<4x256xbf16>
    %171 = vector.extract_strided_slice %3 {offsets = [33, 0, 0], sizes = [1, 8, 4], strides = [1, 1, 1]} : vector<49x8x4xbf16> to vector<1x8x4xbf16>
    %172 = vector.shape_cast %171 : vector<1x8x4xbf16> to vector<8x4xbf16>
    %cst_39 = arith.constant dense<0.000000e+00> : vector<8x256xf32>
    %173 = tpu.matmul %172, %170, %cst_39 {dimension_numbers = #tpu.dot_dimension_numbers<[1], [0], [0], [1], [0, 0, 1, 1], [], []>} : vector<8x4xbf16>, vector<4x256xbf16>, vector<8x256xf32> -> vector<8x256xf32>
    %174 = arith.addf %169, %173 : vector<8x256xf32>
    %175 = vector.extract_strided_slice %2 {offsets = [0, 94], sizes = [4, 256], strides = [1, 1]} : vector<4x512xbf16> to vector<4x256xbf16>
    %176 = vector.extract_strided_slice %3 {offsets = [34, 0, 0], sizes = [1, 8, 4], strides = [1, 1, 1]} : vector<49x8x4xbf16> to vector<1x8x4xbf16>
    %177 = vector.shape_cast %176 : vector<1x8x4xbf16> to vector<8x4xbf16>
    %cst_40 = arith.constant dense<0.000000e+00> : vector<8x256xf32>
    %178 = tpu.matmul %177, %175, %cst_40 {dimension_numbers = #tpu.dot_dimension_numbers<[1], [0], [0], [1], [0, 0, 1, 1], [], []>} : vector<8x4xbf16>, vector<4x256xbf16>, vector<8x256xf32> -> vector<8x256xf32>
    %179 = arith.addf %174, %178 : vector<8x256xf32>
    %180 = vector.extract_strided_slice %2 {offsets = [0, 110], sizes = [4, 256], strides = [1, 1]} : vector<4x512xbf16> to vector<4x256xbf16>
    %181 = vector.extract_strided_slice %3 {offsets = [35, 0, 0], sizes = [1, 8, 4], strides = [1, 1, 1]} : vector<49x8x4xbf16> to vector<1x8x4xbf16>
    %182 = vector.shape_cast %181 : vector<1x8x4xbf16> to vector<8x4xbf16>
    %cst_41 = arith.constant dense<0.000000e+00> : vector<8x256xf32>
    %183 = tpu.matmul %182, %180, %cst_41 {dimension_numbers = #tpu.dot_dimension_numbers<[1], [0], [0], [1], [0, 0, 1, 1], [], []>} : vector<8x4xbf16>, vector<4x256xbf16>, vector<8x256xf32> -> vector<8x256xf32>
    %184 = arith.addf %179, %183 : vector<8x256xf32>
    %185 = vector.extract_strided_slice %2 {offsets = [0, 111], sizes = [4, 256], strides = [1, 1]} : vector<4x512xbf16> to vector<4x256xbf16>
    %186 = vector.extract_strided_slice %3 {offsets = [36, 0, 0], sizes = [1, 8, 4], strides = [1, 1, 1]} : vector<49x8x4xbf16> to vector<1x8x4xbf16>
    %187 = vector.shape_cast %186 : vector<1x8x4xbf16> to vector<8x4xbf16>
    %cst_42 = arith.constant dense<0.000000e+00> : vector<8x256xf32>
    %188 = tpu.matmul %187, %185, %cst_42 {dimension_numbers = #tpu.dot_dimension_numbers<[1], [0], [0], [1], [0, 0, 1, 1], [], []>} : vector<8x4xbf16>, vector<4x256xbf16>, vector<8x256xf32> -> vector<8x256xf32>
    %189 = arith.addf %184, %188 : vector<8x256xf32>
    %190 = vector.extract_strided_slice %2 {offsets = [0, 112], sizes = [4, 256], strides = [1, 1]} : vector<4x512xbf16> to vector<4x256xbf16>
    %191 = vector.extract_strided_slice %3 {offsets = [37, 0, 0], sizes = [1, 8, 4], strides = [1, 1, 1]} : vector<49x8x4xbf16> to vector<1x8x4xbf16>
    %192 = vector.shape_cast %191 : vector<1x8x4xbf16> to vector<8x4xbf16>
    %cst_43 = arith.constant dense<0.000000e+00> : vector<8x256xf32>
    %193 = tpu.matmul %192, %190, %cst_43 {dimension_numbers = #tpu.dot_dimension_numbers<[1], [0], [0], [1], [0, 0, 1, 1], [], []>} : vector<8x4xbf16>, vector<4x256xbf16>, vector<8x256xf32> -> vector<8x256xf32>
    %194 = arith.addf %189, %193 : vector<8x256xf32>
    %195 = vector.extract_strided_slice %2 {offsets = [0, 113], sizes = [4, 256], strides = [1, 1]} : vector<4x512xbf16> to vector<4x256xbf16>
    %196 = vector.extract_strided_slice %3 {offsets = [38, 0, 0], sizes = [1, 8, 4], strides = [1, 1, 1]} : vector<49x8x4xbf16> to vector<1x8x4xbf16>
    %197 = vector.shape_cast %196 : vector<1x8x4xbf16> to vector<8x4xbf16>
    %cst_44 = arith.constant dense<0.000000e+00> : vector<8x256xf32>
    %198 = tpu.matmul %197, %195, %cst_44 {dimension_numbers = #tpu.dot_dimension_numbers<[1], [0], [0], [1], [0, 0, 1, 1], [], []>} : vector<8x4xbf16>, vector<4x256xbf16>, vector<8x256xf32> -> vector<8x256xf32>
    %199 = arith.addf %194, %198 : vector<8x256xf32>
    %200 = vector.extract_strided_slice %2 {offsets = [0, 114], sizes = [4, 256], strides = [1, 1]} : vector<4x512xbf16> to vector<4x256xbf16>
    %201 = vector.extract_strided_slice %3 {offsets = [39, 0, 0], sizes = [1, 8, 4], strides = [1, 1, 1]} : vector<49x8x4xbf16> to vector<1x8x4xbf16>
    %202 = vector.shape_cast %201 : vector<1x8x4xbf16> to vector<8x4xbf16>
    %cst_45 = arith.constant dense<0.000000e+00> : vector<8x256xf32>
    %203 = tpu.matmul %202, %200, %cst_45 {dimension_numbers = #tpu.dot_dimension_numbers<[1], [0], [0], [1], [0, 0, 1, 1], [], []>} : vector<8x4xbf16>, vector<4x256xbf16>, vector<8x256xf32> -> vector<8x256xf32>
    %204 = arith.addf %199, %203 : vector<8x256xf32>
    %205 = vector.extract_strided_slice %2 {offsets = [0, 115], sizes = [4, 256], strides = [1, 1]} : vector<4x512xbf16> to vector<4x256xbf16>
    %206 = vector.extract_strided_slice %3 {offsets = [40, 0, 0], sizes = [1, 8, 4], strides = [1, 1, 1]} : vector<49x8x4xbf16> to vector<1x8x4xbf16>
    %207 = vector.shape_cast %206 : vector<1x8x4xbf16> to vector<8x4xbf16>
    %cst_46 = arith.constant dense<0.000000e+00> : vector<8x256xf32>
    %208 = tpu.matmul %207, %205, %cst_46 {dimension_numbers = #tpu.dot_dimension_numbers<[1], [0], [0], [1], [0, 0, 1, 1], [], []>} : vector<8x4xbf16>, vector<4x256xbf16>, vector<8x256xf32> -> vector<8x256xf32>
    %209 = arith.addf %204, %208 : vector<8x256xf32>
    %210 = vector.extract_strided_slice %2 {offsets = [0, 116], sizes = [4, 256], strides = [1, 1]} : vector<4x512xbf16> to vector<4x256xbf16>
    %211 = vector.extract_strided_slice %3 {offsets = [41, 0, 0], sizes = [1, 8, 4], strides = [1, 1, 1]} : vector<49x8x4xbf16> to vector<1x8x4xbf16>
    %212 = vector.shape_cast %211 : vector<1x8x4xbf16> to vector<8x4xbf16>
    %cst_47 = arith.constant dense<0.000000e+00> : vector<8x256xf32>
    %213 = tpu.matmul %212, %210, %cst_47 {dimension_numbers = #tpu.dot_dimension_numbers<[1], [0], [0], [1], [0, 0, 1, 1], [], []>} : vector<8x4xbf16>, vector<4x256xbf16>, vector<8x256xf32> -> vector<8x256xf32>
    %214 = arith.addf %209, %213 : vector<8x256xf32>
    %215 = vector.extract_strided_slice %2 {offsets = [0, 132], sizes = [4, 256], strides = [1, 1]} : vector<4x512xbf16> to vector<4x256xbf16>
    %216 = vector.extract_strided_slice %3 {offsets = [42, 0, 0], sizes = [1, 8, 4], strides = [1, 1, 1]} : vector<49x8x4xbf16> to vector<1x8x4xbf16>
    %217 = vector.shape_cast %216 : vector<1x8x4xbf16> to vector<8x4xbf16>
    %cst_48 = arith.constant dense<0.000000e+00> : vector<8x256xf32>
    %218 = tpu.matmul %217, %215, %cst_48 {dimension_numbers = #tpu.dot_dimension_numbers<[1], [0], [0], [1], [0, 0, 1, 1], [], []>} : vector<8x4xbf16>, vector<4x256xbf16>, vector<8x256xf32> -> vector<8x256xf32>
    %219 = arith.addf %214, %218 : vector<8x256xf32>
    %220 = vector.extract_strided_slice %2 {offsets = [0, 133], sizes = [4, 256], strides = [1, 1]} : vector<4x512xbf16> to vector<4x256xbf16>
    %221 = vector.extract_strided_slice %3 {offsets = [43, 0, 0], sizes = [1, 8, 4], strides = [1, 1, 1]} : vector<49x8x4xbf16> to vector<1x8x4xbf16>
    %222 = vector.shape_cast %221 : vector<1x8x4xbf16> to vector<8x4xbf16>
    %cst_49 = arith.constant dense<0.000000e+00> : vector<8x256xf32>
    %223 = tpu.matmul %222, %220, %cst_49 {dimension_numbers = #tpu.dot_dimension_numbers<[1], [0], [0], [1], [0, 0, 1, 1], [], []>} : vector<8x4xbf16>, vector<4x256xbf16>, vector<8x256xf32> -> vector<8x256xf32>
    %224 = arith.addf %219, %223 : vector<8x256xf32>
    %225 = vector.extract_strided_slice %2 {offsets = [0, 134], sizes = [4, 256], strides = [1, 1]} : vector<4x512xbf16> to vector<4x256xbf16>
    %226 = vector.extract_strided_slice %3 {offsets = [44, 0, 0], sizes = [1, 8, 4], strides = [1, 1, 1]} : vector<49x8x4xbf16> to vector<1x8x4xbf16>
    %227 = vector.shape_cast %226 : vector<1x8x4xbf16> to vector<8x4xbf16>
    %cst_50 = arith.constant dense<0.000000e+00> : vector<8x256xf32>
    %228 = tpu.matmul %227, %225, %cst_50 {dimension_numbers = #tpu.dot_dimension_numbers<[1], [0], [0], [1], [0, 0, 1, 1], [], []>} : vector<8x4xbf16>, vector<4x256xbf16>, vector<8x256xf32> -> vector<8x256xf32>
    %229 = arith.addf %224, %228 : vector<8x256xf32>
    %230 = vector.extract_strided_slice %2 {offsets = [0, 135], sizes = [4, 256], strides = [1, 1]} : vector<4x512xbf16> to vector<4x256xbf16>
    %231 = vector.extract_strided_slice %3 {offsets = [45, 0, 0], sizes = [1, 8, 4], strides = [1, 1, 1]} : vector<49x8x4xbf16> to vector<1x8x4xbf16>
    %232 = vector.shape_cast %231 : vector<1x8x4xbf16> to vector<8x4xbf16>
    %cst_51 = arith.constant dense<0.000000e+00> : vector<8x256xf32>
    %233 = tpu.matmul %232, %230, %cst_51 {dimension_numbers = #tpu.dot_dimension_numbers<[1], [0], [0], [1], [0, 0, 1, 1], [], []>} : vector<8x4xbf16>, vector<4x256xbf16>, vector<8x256xf32> -> vector<8x256xf32>
    %234 = arith.addf %229, %233 : vector<8x256xf32>
    %235 = vector.extract_strided_slice %2 {offsets = [0, 136], sizes = [4, 256], strides = [1, 1]} : vector<4x512xbf16> to vector<4x256xbf16>
    %236 = vector.extract_strided_slice %3 {offsets = [46, 0, 0], sizes = [1, 8, 4], strides = [1, 1, 1]} : vector<49x8x4xbf16> to vector<1x8x4xbf16>
    %237 = vector.shape_cast %236 : vector<1x8x4xbf16> to vector<8x4xbf16>
    %cst_52 = arith.constant dense<0.000000e+00> : vector<8x256xf32>
    %238 = tpu.matmul %237, %235, %cst_52 {dimension_numbers = #tpu.dot_dimension_numbers<[1], [0], [0], [1], [0, 0, 1, 1], [], []>} : vector<8x4xbf16>, vector<4x256xbf16>, vector<8x256xf32> -> vector<8x256xf32>
    %239 = arith.addf %234, %238 : vector<8x256xf32>
    %240 = vector.extract_strided_slice %2 {offsets = [0, 137], sizes = [4, 256], strides = [1, 1]} : vector<4x512xbf16> to vector<4x256xbf16>
    %241 = vector.extract_strided_slice %3 {offsets = [47, 0, 0], sizes = [1, 8, 4], strides = [1, 1, 1]} : vector<49x8x4xbf16> to vector<1x8x4xbf16>
    %242 = vector.shape_cast %241 : vector<1x8x4xbf16> to vector<8x4xbf16>
    %cst_53 = arith.constant dense<0.000000e+00> : vector<8x256xf32>
    %243 = tpu.matmul %242, %240, %cst_53 {dimension_numbers = #tpu.dot_dimension_numbers<[1], [0], [0], [1], [0, 0, 1, 1], [], []>} : vector<8x4xbf16>, vector<4x256xbf16>, vector<8x256xf32> -> vector<8x256xf32>
    %244 = arith.addf %239, %243 : vector<8x256xf32>
    %245 = vector.extract_strided_slice %2 {offsets = [0, 138], sizes = [4, 256], strides = [1, 1]} : vector<4x512xbf16> to vector<4x256xbf16>
    %246 = vector.extract_strided_slice %3 {offsets = [48, 0, 0], sizes = [1, 8, 4], strides = [1, 1, 1]} : vector<49x8x4xbf16> to vector<1x8x4xbf16>
    %247 = vector.shape_cast %246 : vector<1x8x4xbf16> to vector<8x4xbf16>
    %cst_54 = arith.constant dense<0.000000e+00> : vector<8x256xf32>
    %248 = tpu.matmul %247, %245, %cst_54 {dimension_numbers = #tpu.dot_dimension_numbers<[1], [0], [0], [1], [0, 0, 1, 1], [], []>} : vector<8x4xbf16>, vector<4x256xbf16>, vector<8x256xf32> -> vector<8x256xf32>
    %249 = arith.addf %244, %248 : vector<8x256xf32>
    %250 = arith.truncf %249 : vector<8x256xf32> to vector<8x256xbf16>
    %c0_55 = arith.constant 0 : index
    %c0_56 = arith.constant 0 : index
    %251 = vector.load %arg5[%c0_55, %c0_56] : memref<8x256xbf16, #tpu.memory_space<vmem>>, vector<8x256xbf16>
    tpu.vector_store %arg5[%c0_55, %c0_56], %250 {strides = array<i32>} : memref<8x256xbf16, #tpu.memory_space<vmem>>, vector<8x256xbf16>,
    %c0_57 = arith.constant 0 : index
    %c0_58 = arith.constant 0 : index
    %252 = vector.load %arg4[%c0_57, %c0_58] : memref<1x256xf32, #tpu.memory_space<vmem>>, vector<1x256xf32>
    %253 = vector.broadcast %252 : vector<1x256xf32> to vector<8x256xf32>
    %254 = arith.mulf %249, %253 : vector<8x256xf32>
    %cst_59 = arith.constant dense<0.000000e+00> : vector<8xf32>
    %255 = vector.multi_reduction <add>, %254, %cst_59 [1] : vector<8x256xf32> to vector<8xf32>
    %256 = vector.shape_cast %255 : vector<8xf32> to vector<8x1xf32>
    %257 = vector.shape_cast %256 : vector<8x1xf32> to vector<1x8x1xf32>
    %c0_60 = arith.constant 0 : index
    %c0_61 = arith.constant 0 : index
    %c0_62 = arith.constant 0 : index
    %258 = vector.load %arg6[%c0_60, %c0_61, %c0_62] : memref<1x8x1xf32, #tpu.memory_space<vmem>>, vector<1x8x1xf32>
    tpu.vector_store %arg6[%c0_60, %c0_61, %c0_62], %257 {strides = array<i32>} : memref<1x8x1xf32, #tpu.memory_space<vmem>>, vector<1x8x1xf32>,
    %259 = arith.mulf %254, %249 : vector<8x256xf32>
    %cst_63 = arith.constant dense<0.000000e+00> : vector<8xf32>
    %260 = vector.multi_reduction <add>, %259, %cst_63 [1] : vector<8x256xf32> to vector<8xf32>
    %261 = vector.shape_cast %260 : vector<8xf32> to vector<8x1xf32>
    %262 = vector.shape_cast %261 : vector<8x1xf32> to vector<1x8x1xf32>
    %c0_64 = arith.constant 0 : index
    %c0_65 = arith.constant 0 : index
    %c0_66 = arith.constant 0 : index
    %263 = vector.load %arg7[%c0_64, %c0_65, %c0_66] : memref<1x8x1xf32, #tpu.memory_space<vmem>>, vector<1x8x1xf32>
    tpu.vector_store %arg7[%c0_64, %c0_65, %c0_66], %262 {strides = array<i32>} : memref<1x8x1xf32, #tpu.memory_space<vmem>>, vector<1x8x1xf32>,
    return
  }
  func.func @transform_0(%arg0: i32) -> (i32, i32) {
    %c0_i32 = arith.constant 0 : i32
    %c0_i32_0 = arith.constant 0 : i32
    return %c0_i32, %arg0 : i32, i32
  }
  func.func @transform_1(%arg0: i32) -> (i32, i32) {
    %c1_i32 = arith.constant 1 : i32
    %0 = arith.addi %arg0, %c1_i32 : i32
    %c0_i32 = arith.constant 0 : i32
    %c0_i32_0 = arith.constant 0 : i32
    return %c0_i32, %0 : i32, i32
  }
  func.func @transform_2(%arg0: i32) -> (i32, i32, i32) {
    %c0_i32 = arith.constant 0 : i32
    %c0_i32_0 = arith.constant 0 : i32
    %c0_i32_1 = arith.constant 0 : i32
    %c0_i32_2 = arith.constant 0 : i32
    return %c0_i32, %c0_i32_0, %c0_i32_1 : i32, i32, i32
  }
  func.func @transform_3(%arg0: i32) -> (i32, i32) {
    %c0_i32 = arith.constant 0 : i32
    %c0_i32_0 = arith.constant 0 : i32
    return %c0_i32, %arg0 : i32, i32
  }
  func.func @transform_4(%arg0: i32) -> (i32, i32) {
    %c0_i32 = arith.constant 0 : i32
    %c0_i32_0 = arith.constant 0 : i32
    return %c0_i32, %arg0 : i32, i32
  }
  func.func @transform_5(%arg0: i32) -> (i32, i32, i32) {
    %c0_i32 = arith.constant 0 : i32
    %c0_i32_0 = arith.constant 0 : i32
    %c0_i32_1 = arith.constant 0 : i32
    return %arg0, %c0_i32, %c0_i32_0 : i32, i32, i32
  }
  func.func @transform_6(%arg0: i32) -> (i32, i32, i32) {
    %c0_i32 = arith.constant 0 : i32
    %c0_i32_0 = arith.constant 0 : i32
    %c0_i32_1 = arith.constant 0 : i32
    return %arg0, %c0_i32, %c0_i32_0 : i32, i32, i32
  }
}

module attributes {stable_mosaic.version = 11 : i64} {
  func.func @_bn_relu_kernel(%arg0: i32, %arg1: memref<8x256xbf16, #tpu.memory_space<vmem>>, %arg2: memref<8x1xf32, #tpu.memory_space<vmem>>, %arg3: memref<8x1xf32, #tpu.memory_space<vmem>>, %arg4: memref<8x256xbf16, #tpu.memory_space<vmem>>) attributes {dimension_semantics = [#tpu.dimension_semantics<parallel>], iteration_bounds = array<i64: 2>, scalar_prefetch = 0 : i64, scratch_operands = 0 : i64, tpu.core_type = #tpu.core_type<tc>, window_params = [{transform_indices = @transform_0, window_bounds = array<i64: 8, 256>}, {pipeline_mode = #tpu.pipeline_mode<synchronous>, transform_indices = @transform_1, window_bounds = array<i64: 8, 1>}, {pipeline_mode = #tpu.pipeline_mode<synchronous>, transform_indices = @transform_2, window_bounds = array<i64: 8, 1>}, {transform_indices = @transform_3, window_bounds = array<i64: 8, 256>}]} {
    %c0 = arith.constant 0 : index
    %c0_0 = arith.constant 0 : index
    %0 = vector.load %arg1[%c0, %c0_0] : memref<8x256xbf16, #tpu.memory_space<vmem>>, vector<8x256xbf16>
    %1 = arith.extf %0 : vector<8x256xbf16> to vector<8x256xf32>
    %c0_1 = arith.constant 0 : index
    %c0_2 = arith.constant 0 : index
    %2 = vector.load %arg2[%c0_1, %c0_2] : memref<8x1xf32, #tpu.memory_space<vmem>>, vector<8x1xf32>
    %3 = vector.broadcast %2 : vector<8x1xf32> to vector<8x256xf32>
    %4 = arith.mulf %1, %3 : vector<8x256xf32>
    %c0_3 = arith.constant 0 : index
    %c0_4 = arith.constant 0 : index
    %5 = vector.load %arg3[%c0_3, %c0_4] : memref<8x1xf32, #tpu.memory_space<vmem>>, vector<8x1xf32>
    %6 = vector.broadcast %5 : vector<8x1xf32> to vector<8x256xf32>
    %7 = arith.addf %4, %6 : vector<8x256xf32>
    %cst = arith.constant 0.000000e+00 : f32
    %8 = vector.broadcast %cst : f32 to vector<8x256xf32>
    %9 = arith.maximumf %7, %8 : vector<8x256xf32>
    %10 = arith.truncf %9 : vector<8x256xf32> to vector<8x256xbf16>
    %c0_5 = arith.constant 0 : index
    %c0_6 = arith.constant 0 : index
    %11 = vector.load %arg4[%c0_5, %c0_6] : memref<8x256xbf16, #tpu.memory_space<vmem>>, vector<8x256xbf16>
    tpu.vector_store %arg4[%c0_5, %c0_6], %10 {strides = array<i32>} : memref<8x256xbf16, #tpu.memory_space<vmem>>, vector<8x256xbf16>,
    return
  }
  func.func @transform_0(%arg0: i32) -> (i32, i32) {
    %c0_i32 = arith.constant 0 : i32
    %c0_i32_0 = arith.constant 0 : i32
    return %c0_i32, %arg0 : i32, i32
  }
  func.func @transform_1(%arg0: i32) -> (i32, i32) {
    %c0_i32 = arith.constant 0 : i32
    %c0_i32_0 = arith.constant 0 : i32
    %c0_i32_1 = arith.constant 0 : i32
    return %c0_i32, %c0_i32_0 : i32, i32
  }
  func.func @transform_2(%arg0: i32) -> (i32, i32) {
    %c0_i32 = arith.constant 0 : i32
    %c0_i32_0 = arith.constant 0 : i32
    %c0_i32_1 = arith.constant 0 : i32
    return %c0_i32, %c0_i32_0 : i32, i32
  }
  func.func @transform_3(%arg0: i32) -> (i32, i32) {
    %c0_i32 = arith.constant 0 : i32
    %c0_i32_0 = arith.constant 0 : i32
    return %c0_i32, %arg0 : i32, i32
  }
}

module attributes {stable_mosaic.version = 11 : i64} {
  func.func @_conv_kernel(%arg0: i32, %arg1: memref<32x128xbf16, #tpu.memory_space<vmem>>, %arg2: memref<32x128xbf16, #tpu.memory_space<vmem>>, %arg3: memref<4x16x32xbf16, #tpu.memory_space<vmem>>, %arg4: memref<1x128xf32, #tpu.memory_space<vmem>>, %arg5: memref<16x128xbf16, #tpu.memory_space<vmem>>, %arg6: memref<1x16x1xf32, #tpu.memory_space<vmem>>, %arg7: memref<1x16x1xf32, #tpu.memory_space<vmem>>) attributes {dimension_semantics = [#tpu.dimension_semantics<parallel>], iteration_bounds = array<i64: 2>, scalar_prefetch = 0 : i64, scratch_operands = 0 : i64, tpu.core_type = #tpu.core_type<tc>, window_params = [{transform_indices = @transform_0, window_bounds = array<i64: 32, 128>}, {transform_indices = @transform_1, window_bounds = array<i64: 32, 128>}, {pipeline_mode = #tpu.pipeline_mode<synchronous>, transform_indices = @transform_2, window_bounds = array<i64: 4, 16, 32>}, {transform_indices = @transform_3, window_bounds = array<i64: 1, 128>}, {transform_indices = @transform_4, window_bounds = array<i64: 16, 128>}, {transform_indices = @transform_5, window_bounds = array<i64: 1, 16, 1>}, {transform_indices = @transform_6, window_bounds = array<i64: 1, 16, 1>}]} {
    %c0 = arith.constant 0 : index
    %c0_0 = arith.constant 0 : index
    %0 = vector.load %arg1[%c0, %c0_0] : memref<32x128xbf16, #tpu.memory_space<vmem>>, vector<32x128xbf16>
    %c0_1 = arith.constant 0 : index
    %c0_2 = arith.constant 0 : index
    %1 = vector.load %arg2[%c0_1, %c0_2] : memref<32x128xbf16, #tpu.memory_space<vmem>>, vector<32x128xbf16>
    %2 = tpu.concatenate %0, %1 in 1 : vector<32x128xbf16>, vector<32x128xbf16> -> vector<32x256xbf16>
    %c0_3 = arith.constant 0 : index
    %c0_4 = arith.constant 0 : index
    %c0_5 = arith.constant 0 : index
    %3 = vector.load %arg3[%c0_3, %c0_4, %c0_5] : memref<4x16x32xbf16, #tpu.memory_space<vmem>>, vector<4x16x32xbf16>
    %cst = arith.constant 0.000000e+00 : f32
    %4 = vector.broadcast %cst : f32 to vector<16x128xf32>
    %5 = vector.extract_strided_slice %2 {offsets = [0, 0], sizes = [32, 128], strides = [1, 1]} : vector<32x256xbf16> to vector<32x128xbf16>
    %6 = vector.extract_strided_slice %3 {offsets = [0, 0, 0], sizes = [1, 16, 32], strides = [1, 1, 1]} : vector<4x16x32xbf16> to vector<1x16x32xbf16>
    %7 = vector.shape_cast %6 : vector<1x16x32xbf16> to vector<16x32xbf16>
    %cst_6 = arith.constant dense<0.000000e+00> : vector<16x128xf32>
    %8 = tpu.matmul %7, %5, %cst_6 {dimension_numbers = #tpu.dot_dimension_numbers<[1], [0], [0], [1], [0, 0, 1, 1], [], []>} : vector<16x32xbf16>, vector<32x128xbf16>, vector<16x128xf32> -> vector<16x128xf32>
    %9 = arith.addf %4, %8 : vector<16x128xf32>
    %10 = vector.extract_strided_slice %2 {offsets = [0, 1], sizes = [32, 128], strides = [1, 1]} : vector<32x256xbf16> to vector<32x128xbf16>
    %11 = vector.extract_strided_slice %3 {offsets = [1, 0, 0], sizes = [1, 16, 32], strides = [1, 1, 1]} : vector<4x16x32xbf16> to vector<1x16x32xbf16>
    %12 = vector.shape_cast %11 : vector<1x16x32xbf16> to vector<16x32xbf16>
    %cst_7 = arith.constant dense<0.000000e+00> : vector<16x128xf32>
    %13 = tpu.matmul %12, %10, %cst_7 {dimension_numbers = #tpu.dot_dimension_numbers<[1], [0], [0], [1], [0, 0, 1, 1], [], []>} : vector<16x32xbf16>, vector<32x128xbf16>, vector<16x128xf32> -> vector<16x128xf32>
    %14 = arith.addf %9, %13 : vector<16x128xf32>
    %15 = vector.extract_strided_slice %2 {offsets = [0, 9], sizes = [32, 128], strides = [1, 1]} : vector<32x256xbf16> to vector<32x128xbf16>
    %16 = vector.extract_strided_slice %3 {offsets = [2, 0, 0], sizes = [1, 16, 32], strides = [1, 1, 1]} : vector<4x16x32xbf16> to vector<1x16x32xbf16>
    %17 = vector.shape_cast %16 : vector<1x16x32xbf16> to vector<16x32xbf16>
    %cst_8 = arith.constant dense<0.000000e+00> : vector<16x128xf32>
    %18 = tpu.matmul %17, %15, %cst_8 {dimension_numbers = #tpu.dot_dimension_numbers<[1], [0], [0], [1], [0, 0, 1, 1], [], []>} : vector<16x32xbf16>, vector<32x128xbf16>, vector<16x128xf32> -> vector<16x128xf32>
    %19 = arith.addf %14, %18 : vector<16x128xf32>
    %20 = vector.extract_strided_slice %2 {offsets = [0, 10], sizes = [32, 128], strides = [1, 1]} : vector<32x256xbf16> to vector<32x128xbf16>
    %21 = vector.extract_strided_slice %3 {offsets = [3, 0, 0], sizes = [1, 16, 32], strides = [1, 1, 1]} : vector<4x16x32xbf16> to vector<1x16x32xbf16>
    %22 = vector.shape_cast %21 : vector<1x16x32xbf16> to vector<16x32xbf16>
    %cst_9 = arith.constant dense<0.000000e+00> : vector<16x128xf32>
    %23 = tpu.matmul %22, %20, %cst_9 {dimension_numbers = #tpu.dot_dimension_numbers<[1], [0], [0], [1], [0, 0, 1, 1], [], []>} : vector<16x32xbf16>, vector<32x128xbf16>, vector<16x128xf32> -> vector<16x128xf32>
    %24 = arith.addf %19, %23 : vector<16x128xf32>
    %25 = arith.truncf %24 : vector<16x128xf32> to vector<16x128xbf16>
    %c0_10 = arith.constant 0 : index
    %c0_11 = arith.constant 0 : index
    %26 = vector.load %arg5[%c0_10, %c0_11] : memref<16x128xbf16, #tpu.memory_space<vmem>>, vector<16x128xbf16>
    tpu.vector_store %arg5[%c0_10, %c0_11], %25 {strides = array<i32>} : memref<16x128xbf16, #tpu.memory_space<vmem>>, vector<16x128xbf16>,
    %c0_12 = arith.constant 0 : index
    %c0_13 = arith.constant 0 : index
    %27 = vector.load %arg4[%c0_12, %c0_13] : memref<1x128xf32, #tpu.memory_space<vmem>>, vector<1x128xf32>
    %28 = vector.broadcast %27 : vector<1x128xf32> to vector<16x128xf32>
    %29 = arith.mulf %24, %28 : vector<16x128xf32>
    %cst_14 = arith.constant dense<0.000000e+00> : vector<16xf32>
    %30 = vector.multi_reduction <add>, %29, %cst_14 [1] : vector<16x128xf32> to vector<16xf32>
    %31 = vector.shape_cast %30 : vector<16xf32> to vector<16x1xf32>
    %32 = vector.shape_cast %31 : vector<16x1xf32> to vector<1x16x1xf32>
    %c0_15 = arith.constant 0 : index
    %c0_16 = arith.constant 0 : index
    %c0_17 = arith.constant 0 : index
    %33 = vector.load %arg6[%c0_15, %c0_16, %c0_17] : memref<1x16x1xf32, #tpu.memory_space<vmem>>, vector<1x16x1xf32>
    tpu.vector_store %arg6[%c0_15, %c0_16, %c0_17], %32 {strides = array<i32>} : memref<1x16x1xf32, #tpu.memory_space<vmem>>, vector<1x16x1xf32>,
    %34 = arith.mulf %29, %24 : vector<16x128xf32>
    %cst_18 = arith.constant dense<0.000000e+00> : vector<16xf32>
    %35 = vector.multi_reduction <add>, %34, %cst_18 [1] : vector<16x128xf32> to vector<16xf32>
    %36 = vector.shape_cast %35 : vector<16xf32> to vector<16x1xf32>
    %37 = vector.shape_cast %36 : vector<16x1xf32> to vector<1x16x1xf32>
    %c0_19 = arith.constant 0 : index
    %c0_20 = arith.constant 0 : index
    %c0_21 = arith.constant 0 : index
    %38 = vector.load %arg7[%c0_19, %c0_20, %c0_21] : memref<1x16x1xf32, #tpu.memory_space<vmem>>, vector<1x16x1xf32>
    tpu.vector_store %arg7[%c0_19, %c0_20, %c0_21], %37 {strides = array<i32>} : memref<1x16x1xf32, #tpu.memory_space<vmem>>, vector<1x16x1xf32>,
    return
  }
  func.func @transform_0(%arg0: i32) -> (i32, i32) {
    %c0_i32 = arith.constant 0 : i32
    %c0_i32_0 = arith.constant 0 : i32
    return %c0_i32, %arg0 : i32, i32
  }
  func.func @transform_1(%arg0: i32) -> (i32, i32) {
    %c1_i32 = arith.constant 1 : i32
    %0 = arith.addi %arg0, %c1_i32 : i32
    %c0_i32 = arith.constant 0 : i32
    %c0_i32_0 = arith.constant 0 : i32
    return %c0_i32, %0 : i32, i32
  }
  func.func @transform_2(%arg0: i32) -> (i32, i32, i32) {
    %c0_i32 = arith.constant 0 : i32
    %c0_i32_0 = arith.constant 0 : i32
    %c0_i32_1 = arith.constant 0 : i32
    %c0_i32_2 = arith.constant 0 : i32
    return %c0_i32, %c0_i32_0, %c0_i32_1 : i32, i32, i32
  }
  func.func @transform_3(%arg0: i32) -> (i32, i32) {
    %c0_i32 = arith.constant 0 : i32
    %c0_i32_0 = arith.constant 0 : i32
    return %c0_i32, %arg0 : i32, i32
  }
  func.func @transform_4(%arg0: i32) -> (i32, i32) {
    %c0_i32 = arith.constant 0 : i32
    %c0_i32_0 = arith.constant 0 : i32
    return %c0_i32, %arg0 : i32, i32
  }
  func.func @transform_5(%arg0: i32) -> (i32, i32, i32) {
    %c0_i32 = arith.constant 0 : i32
    %c0_i32_0 = arith.constant 0 : i32
    %c0_i32_1 = arith.constant 0 : i32
    return %arg0, %c0_i32, %c0_i32_0 : i32, i32, i32
  }
  func.func @transform_6(%arg0: i32) -> (i32, i32, i32) {
    %c0_i32 = arith.constant 0 : i32
    %c0_i32_0 = arith.constant 0 : i32
    %c0_i32_1 = arith.constant 0 : i32
    return %arg0, %c0_i32, %c0_i32_0 : i32, i32, i32
  }
}

module attributes {stable_mosaic.version = 11 : i64} {
  func.func @_bn_relu_kernel(%arg0: i32, %arg1: memref<16x128xbf16, #tpu.memory_space<vmem>>, %arg2: memref<16x1xf32, #tpu.memory_space<vmem>>, %arg3: memref<16x1xf32, #tpu.memory_space<vmem>>, %arg4: memref<16x128xbf16, #tpu.memory_space<vmem>>) attributes {dimension_semantics = [#tpu.dimension_semantics<parallel>], iteration_bounds = array<i64: 1>, scalar_prefetch = 0 : i64, scratch_operands = 0 : i64, tpu.core_type = #tpu.core_type<tc>, window_params = [{transform_indices = @transform_0, window_bounds = array<i64: 16, 128>}, {pipeline_mode = #tpu.pipeline_mode<synchronous>, transform_indices = @transform_1, window_bounds = array<i64: 16, 1>}, {pipeline_mode = #tpu.pipeline_mode<synchronous>, transform_indices = @transform_2, window_bounds = array<i64: 16, 1>}, {transform_indices = @transform_3, window_bounds = array<i64: 16, 128>}]} {
    %c0 = arith.constant 0 : index
    %c0_0 = arith.constant 0 : index
    %0 = vector.load %arg1[%c0, %c0_0] : memref<16x128xbf16, #tpu.memory_space<vmem>>, vector<16x128xbf16>
    %1 = arith.extf %0 : vector<16x128xbf16> to vector<16x128xf32>
    %c0_1 = arith.constant 0 : index
    %c0_2 = arith.constant 0 : index
    %2 = vector.load %arg2[%c0_1, %c0_2] : memref<16x1xf32, #tpu.memory_space<vmem>>, vector<16x1xf32>
    %3 = vector.broadcast %2 : vector<16x1xf32> to vector<16x128xf32>
    %4 = arith.mulf %1, %3 : vector<16x128xf32>
    %c0_3 = arith.constant 0 : index
    %c0_4 = arith.constant 0 : index
    %5 = vector.load %arg3[%c0_3, %c0_4] : memref<16x1xf32, #tpu.memory_space<vmem>>, vector<16x1xf32>
    %6 = vector.broadcast %5 : vector<16x1xf32> to vector<16x128xf32>
    %7 = arith.addf %4, %6 : vector<16x128xf32>
    %cst = arith.constant 0.000000e+00 : f32
    %8 = vector.broadcast %cst : f32 to vector<16x128xf32>
    %9 = arith.maximumf %7, %8 : vector<16x128xf32>
    %10 = arith.truncf %9 : vector<16x128xf32> to vector<16x128xbf16>
    %c0_5 = arith.constant 0 : index
    %c0_6 = arith.constant 0 : index
    %11 = vector.load %arg4[%c0_5, %c0_6] : memref<16x128xbf16, #tpu.memory_space<vmem>>, vector<16x128xbf16>
    tpu.vector_store %arg4[%c0_5, %c0_6], %10 {strides = array<i32>} : memref<16x128xbf16, #tpu.memory_space<vmem>>, vector<16x128xbf16>,
    return
  }
  func.func @transform_0(%arg0: i32) -> (i32, i32) {
    %c0_i32 = arith.constant 0 : i32
    %c0_i32_0 = arith.constant 0 : i32
    return %c0_i32, %arg0 : i32, i32
  }
  func.func @transform_1(%arg0: i32) -> (i32, i32) {
    %c0_i32 = arith.constant 0 : i32
    %c0_i32_0 = arith.constant 0 : i32
    %c0_i32_1 = arith.constant 0 : i32
    return %c0_i32, %c0_i32_0 : i32, i32
  }
  func.func @transform_2(%arg0: i32) -> (i32, i32) {
    %c0_i32 = arith.constant 0 : i32
    %c0_i32_0 = arith.constant 0 : i32
    %c0_i32_1 = arith.constant 0 : i32
    return %c0_i32, %c0_i32_0 : i32, i32
  }
  func.func @transform_3(%arg0: i32) -> (i32, i32) {
    %c0_i32 = arith.constant 0 : i32
    %c0_i32_0 = arith.constant 0 : i32
    return %c0_i32, %arg0 : i32, i32
  }
}

module attributes {stable_mosaic.version = 11 : i64} {
  func.func @_conv_kernel(%arg0: i32, %arg1: memref<64x128xbf16, #tpu.memory_space<vmem>>, %arg2: memref<64x128xbf16, #tpu.memory_space<vmem>>, %arg3: memref<4x32x64xbf16, #tpu.memory_space<vmem>>, %arg4: memref<1x128xf32, #tpu.memory_space<vmem>>, %arg5: memref<32x128xbf16, #tpu.memory_space<vmem>>, %arg6: memref<1x32x1xf32, #tpu.memory_space<vmem>>, %arg7: memref<1x32x1xf32, #tpu.memory_space<vmem>>) attributes {dimension_semantics = [#tpu.dimension_semantics<parallel>], iteration_bounds = array<i64: 1>, scalar_prefetch = 0 : i64, scratch_operands = 0 : i64, tpu.core_type = #tpu.core_type<tc>, window_params = [{transform_indices = @transform_0, window_bounds = array<i64: 64, 128>}, {transform_indices = @transform_1, window_bounds = array<i64: 64, 128>}, {pipeline_mode = #tpu.pipeline_mode<synchronous>, transform_indices = @transform_2, window_bounds = array<i64: 4, 32, 64>}, {transform_indices = @transform_3, window_bounds = array<i64: 1, 128>}, {transform_indices = @transform_4, window_bounds = array<i64: 32, 128>}, {transform_indices = @transform_5, window_bounds = array<i64: 1, 32, 1>}, {transform_indices = @transform_6, window_bounds = array<i64: 1, 32, 1>}]} {
    %c0 = arith.constant 0 : index
    %c0_0 = arith.constant 0 : index
    %0 = vector.load %arg1[%c0, %c0_0] : memref<64x128xbf16, #tpu.memory_space<vmem>>, vector<64x128xbf16>
    %c0_1 = arith.constant 0 : index
    %c0_2 = arith.constant 0 : index
    %1 = vector.load %arg2[%c0_1, %c0_2] : memref<64x128xbf16, #tpu.memory_space<vmem>>, vector<64x128xbf16>
    %2 = tpu.concatenate %0, %1 in 1 : vector<64x128xbf16>, vector<64x128xbf16> -> vector<64x256xbf16>
    %c0_3 = arith.constant 0 : index
    %c0_4 = arith.constant 0 : index
    %c0_5 = arith.constant 0 : index
    %3 = vector.load %arg3[%c0_3, %c0_4, %c0_5] : memref<4x32x64xbf16, #tpu.memory_space<vmem>>, vector<4x32x64xbf16>
    %cst = arith.constant 0.000000e+00 : f32
    %4 = vector.broadcast %cst : f32 to vector<32x128xf32>
    %5 = vector.extract_strided_slice %2 {offsets = [0, 0], sizes = [64, 128], strides = [1, 1]} : vector<64x256xbf16> to vector<64x128xbf16>
    %6 = vector.extract_strided_slice %3 {offsets = [0, 0, 0], sizes = [1, 32, 64], strides = [1, 1, 1]} : vector<4x32x64xbf16> to vector<1x32x64xbf16>
    %7 = vector.shape_cast %6 : vector<1x32x64xbf16> to vector<32x64xbf16>
    %cst_6 = arith.constant dense<0.000000e+00> : vector<32x128xf32>
    %8 = tpu.matmul %7, %5, %cst_6 {dimension_numbers = #tpu.dot_dimension_numbers<[1], [0], [0], [1], [0, 0, 1, 1], [], []>} : vector<32x64xbf16>, vector<64x128xbf16>, vector<32x128xf32> -> vector<32x128xf32>
    %9 = arith.addf %4, %8 : vector<32x128xf32>
    %10 = vector.extract_strided_slice %2 {offsets = [0, 1], sizes = [64, 128], strides = [1, 1]} : vector<64x256xbf16> to vector<64x128xbf16>
    %11 = vector.extract_strided_slice %3 {offsets = [1, 0, 0], sizes = [1, 32, 64], strides = [1, 1, 1]} : vector<4x32x64xbf16> to vector<1x32x64xbf16>
    %12 = vector.shape_cast %11 : vector<1x32x64xbf16> to vector<32x64xbf16>
    %cst_7 = arith.constant dense<0.000000e+00> : vector<32x128xf32>
    %13 = tpu.matmul %12, %10, %cst_7 {dimension_numbers = #tpu.dot_dimension_numbers<[1], [0], [0], [1], [0, 0, 1, 1], [], []>} : vector<32x64xbf16>, vector<64x128xbf16>, vector<32x128xf32> -> vector<32x128xf32>
    %14 = arith.addf %9, %13 : vector<32x128xf32>
    %15 = vector.extract_strided_slice %2 {offsets = [0, 5], sizes = [64, 128], strides = [1, 1]} : vector<64x256xbf16> to vector<64x128xbf16>
    %16 = vector.extract_strided_slice %3 {offsets = [2, 0, 0], sizes = [1, 32, 64], strides = [1, 1, 1]} : vector<4x32x64xbf16> to vector<1x32x64xbf16>
    %17 = vector.shape_cast %16 : vector<1x32x64xbf16> to vector<32x64xbf16>
    %cst_8 = arith.constant dense<0.000000e+00> : vector<32x128xf32>
    %18 = tpu.matmul %17, %15, %cst_8 {dimension_numbers = #tpu.dot_dimension_numbers<[1], [0], [0], [1], [0, 0, 1, 1], [], []>} : vector<32x64xbf16>, vector<64x128xbf16>, vector<32x128xf32> -> vector<32x128xf32>
    %19 = arith.addf %14, %18 : vector<32x128xf32>
    %20 = vector.extract_strided_slice %2 {offsets = [0, 6], sizes = [64, 128], strides = [1, 1]} : vector<64x256xbf16> to vector<64x128xbf16>
    %21 = vector.extract_strided_slice %3 {offsets = [3, 0, 0], sizes = [1, 32, 64], strides = [1, 1, 1]} : vector<4x32x64xbf16> to vector<1x32x64xbf16>
    %22 = vector.shape_cast %21 : vector<1x32x64xbf16> to vector<32x64xbf16>
    %cst_9 = arith.constant dense<0.000000e+00> : vector<32x128xf32>
    %23 = tpu.matmul %22, %20, %cst_9 {dimension_numbers = #tpu.dot_dimension_numbers<[1], [0], [0], [1], [0, 0, 1, 1], [], []>} : vector<32x64xbf16>, vector<64x128xbf16>, vector<32x128xf32> -> vector<32x128xf32>
    %24 = arith.addf %19, %23 : vector<32x128xf32>
    %25 = arith.truncf %24 : vector<32x128xf32> to vector<32x128xbf16>
    %c0_10 = arith.constant 0 : index
    %c0_11 = arith.constant 0 : index
    %26 = vector.load %arg5[%c0_10, %c0_11] : memref<32x128xbf16, #tpu.memory_space<vmem>>, vector<32x128xbf16>
    tpu.vector_store %arg5[%c0_10, %c0_11], %25 {strides = array<i32>} : memref<32x128xbf16, #tpu.memory_space<vmem>>, vector<32x128xbf16>,
    %c0_12 = arith.constant 0 : index
    %c0_13 = arith.constant 0 : index
    %27 = vector.load %arg4[%c0_12, %c0_13] : memref<1x128xf32, #tpu.memory_space<vmem>>, vector<1x128xf32>
    %28 = vector.broadcast %27 : vector<1x128xf32> to vector<32x128xf32>
    %29 = arith.mulf %24, %28 : vector<32x128xf32>
    %cst_14 = arith.constant dense<0.000000e+00> : vector<32xf32>
    %30 = vector.multi_reduction <add>, %29, %cst_14 [1] : vector<32x128xf32> to vector<32xf32>
    %31 = vector.shape_cast %30 : vector<32xf32> to vector<32x1xf32>
    %32 = vector.shape_cast %31 : vector<32x1xf32> to vector<1x32x1xf32>
    %c0_15 = arith.constant 0 : index
    %c0_16 = arith.constant 0 : index
    %c0_17 = arith.constant 0 : index
    %33 = vector.load %arg6[%c0_15, %c0_16, %c0_17] : memref<1x32x1xf32, #tpu.memory_space<vmem>>, vector<1x32x1xf32>
    tpu.vector_store %arg6[%c0_15, %c0_16, %c0_17], %32 {strides = array<i32>} : memref<1x32x1xf32, #tpu.memory_space<vmem>>, vector<1x32x1xf32>,
    %34 = arith.mulf %29, %24 : vector<32x128xf32>
    %cst_18 = arith.constant dense<0.000000e+00> : vector<32xf32>
    %35 = vector.multi_reduction <add>, %34, %cst_18 [1] : vector<32x128xf32> to vector<32xf32>
    %36 = vector.shape_cast %35 : vector<32xf32> to vector<32x1xf32>
    %37 = vector.shape_cast %36 : vector<32x1xf32> to vector<1x32x1xf32>
    %c0_19 = arith.constant 0 : index
    %c0_20 = arith.constant 0 : index
    %c0_21 = arith.constant 0 : index
    %38 = vector.load %arg7[%c0_19, %c0_20, %c0_21] : memref<1x32x1xf32, #tpu.memory_space<vmem>>, vector<1x32x1xf32>
    tpu.vector_store %arg7[%c0_19, %c0_20, %c0_21], %37 {strides = array<i32>} : memref<1x32x1xf32, #tpu.memory_space<vmem>>, vector<1x32x1xf32>,
    return
  }
  func.func @transform_0(%arg0: i32) -> (i32, i32) {
    %c0_i32 = arith.constant 0 : i32
    %c0_i32_0 = arith.constant 0 : i32
    return %c0_i32, %arg0 : i32, i32
  }
  func.func @transform_1(%arg0: i32) -> (i32, i32) {
    %c1_i32 = arith.constant 1 : i32
    %0 = arith.addi %arg0, %c1_i32 : i32
    %c0_i32 = arith.constant 0 : i32
    %c0_i32_0 = arith.constant 0 : i32
    return %c0_i32, %0 : i32, i32
  }
  func.func @transform_2(%arg0: i32) -> (i32, i32, i32) {
    %c0_i32 = arith.constant 0 : i32
    %c0_i32_0 = arith.constant 0 : i32
    %c0_i32_1 = arith.constant 0 : i32
    %c0_i32_2 = arith.constant 0 : i32
    return %c0_i32, %c0_i32_0, %c0_i32_1 : i32, i32, i32
  }
  func.func @transform_3(%arg0: i32) -> (i32, i32) {
    %c0_i32 = arith.constant 0 : i32
    %c0_i32_0 = arith.constant 0 : i32
    return %c0_i32, %arg0 : i32, i32
  }
  func.func @transform_4(%arg0: i32) -> (i32, i32) {
    %c0_i32 = arith.constant 0 : i32
    %c0_i32_0 = arith.constant 0 : i32
    return %c0_i32, %arg0 : i32, i32
  }
  func.func @transform_5(%arg0: i32) -> (i32, i32, i32) {
    %c0_i32 = arith.constant 0 : i32
    %c0_i32_0 = arith.constant 0 : i32
    %c0_i32_1 = arith.constant 0 : i32
    return %arg0, %c0_i32, %c0_i32_0 : i32, i32, i32
  }
  func.func @transform_6(%arg0: i32) -> (i32, i32, i32) {
    %c0_i32 = arith.constant 0 : i32
    %c0_i32_0 = arith.constant 0 : i32
    %c0_i32_1 = arith.constant 0 : i32
    return %arg0, %c0_i32, %c0_i32_0 : i32, i32, i32
  }
}

module attributes {stable_mosaic.version = 11 : i64} {
  func.func @_bn_relu_kernel(%arg0: i32, %arg1: memref<32x128xbf16, #tpu.memory_space<vmem>>, %arg2: memref<32x1xf32, #tpu.memory_space<vmem>>, %arg3: memref<32x1xf32, #tpu.memory_space<vmem>>, %arg4: memref<1x128xf32, #tpu.memory_space<vmem>>, %arg5: memref<32x128xbf16, #tpu.memory_space<vmem>>, %arg6: memref<1x32x1xf32, #tpu.memory_space<vmem>>, %arg7: memref<1x32x1xf32, #tpu.memory_space<vmem>>) attributes {dimension_semantics = [#tpu.dimension_semantics<parallel>], iteration_bounds = array<i64: 1>, scalar_prefetch = 0 : i64, scratch_operands = 0 : i64, tpu.core_type = #tpu.core_type<tc>, window_params = [{transform_indices = @transform_0, window_bounds = array<i64: 32, 128>}, {pipeline_mode = #tpu.pipeline_mode<synchronous>, transform_indices = @transform_1, window_bounds = array<i64: 32, 1>}, {pipeline_mode = #tpu.pipeline_mode<synchronous>, transform_indices = @transform_2, window_bounds = array<i64: 32, 1>}, {transform_indices = @transform_3, window_bounds = array<i64: 1, 128>}, {transform_indices = @transform_4, window_bounds = array<i64: 32, 128>}, {transform_indices = @transform_5, window_bounds = array<i64: 1, 32, 1>}, {transform_indices = @transform_6, window_bounds = array<i64: 1, 32, 1>}]} {
    %c0 = arith.constant 0 : index
    %c0_0 = arith.constant 0 : index
    %0 = vector.load %arg1[%c0, %c0_0] : memref<32x128xbf16, #tpu.memory_space<vmem>>, vector<32x128xbf16>
    %1 = arith.extf %0 : vector<32x128xbf16> to vector<32x128xf32>
    %c0_1 = arith.constant 0 : index
    %c0_2 = arith.constant 0 : index
    %2 = vector.load %arg2[%c0_1, %c0_2] : memref<32x1xf32, #tpu.memory_space<vmem>>, vector<32x1xf32>
    %3 = vector.broadcast %2 : vector<32x1xf32> to vector<32x128xf32>
    %4 = arith.mulf %1, %3 : vector<32x128xf32>
    %c0_3 = arith.constant 0 : index
    %c0_4 = arith.constant 0 : index
    %5 = vector.load %arg3[%c0_3, %c0_4] : memref<32x1xf32, #tpu.memory_space<vmem>>, vector<32x1xf32>
    %6 = vector.broadcast %5 : vector<32x1xf32> to vector<32x128xf32>
    %7 = arith.addf %4, %6 : vector<32x128xf32>
    %cst = arith.constant 0.000000e+00 : f32
    %8 = vector.broadcast %cst : f32 to vector<32x128xf32>
    %9 = arith.maximumf %7, %8 : vector<32x128xf32>
    %10 = arith.truncf %9 : vector<32x128xf32> to vector<32x128xbf16>
    %c0_5 = arith.constant 0 : index
    %c0_6 = arith.constant 0 : index
    %11 = vector.load %arg5[%c0_5, %c0_6] : memref<32x128xbf16, #tpu.memory_space<vmem>>, vector<32x128xbf16>
    tpu.vector_store %arg5[%c0_5, %c0_6], %10 {strides = array<i32>} : memref<32x128xbf16, #tpu.memory_space<vmem>>, vector<32x128xbf16>,
    %c0_7 = arith.constant 0 : index
    %c0_8 = arith.constant 0 : index
    %12 = vector.load %arg4[%c0_7, %c0_8] : memref<1x128xf32, #tpu.memory_space<vmem>>, vector<1x128xf32>
    %13 = vector.broadcast %12 : vector<1x128xf32> to vector<32x128xf32>
    %14 = arith.mulf %9, %13 : vector<32x128xf32>
    %cst_9 = arith.constant dense<0.000000e+00> : vector<32xf32>
    %15 = vector.multi_reduction <add>, %14, %cst_9 [1] : vector<32x128xf32> to vector<32xf32>
    %16 = vector.shape_cast %15 : vector<32xf32> to vector<32x1xf32>
    %17 = vector.shape_cast %16 : vector<32x1xf32> to vector<1x32x1xf32>
    %c0_10 = arith.constant 0 : index
    %c0_11 = arith.constant 0 : index
    %c0_12 = arith.constant 0 : index
    %18 = vector.load %arg6[%c0_10, %c0_11, %c0_12] : memref<1x32x1xf32, #tpu.memory_space<vmem>>, vector<1x32x1xf32>
    tpu.vector_store %arg6[%c0_10, %c0_11, %c0_12], %17 {strides = array<i32>} : memref<1x32x1xf32, #tpu.memory_space<vmem>>, vector<1x32x1xf32>,
    %19 = arith.mulf %14, %9 : vector<32x128xf32>
    %cst_13 = arith.constant dense<0.000000e+00> : vector<32xf32>
    %20 = vector.multi_reduction <add>, %19, %cst_13 [1] : vector<32x128xf32> to vector<32xf32>
    %21 = vector.shape_cast %20 : vector<32xf32> to vector<32x1xf32>
    %22 = vector.shape_cast %21 : vector<32x1xf32> to vector<1x32x1xf32>
    %c0_14 = arith.constant 0 : index
    %c0_15 = arith.constant 0 : index
    %c0_16 = arith.constant 0 : index
    %23 = vector.load %arg7[%c0_14, %c0_15, %c0_16] : memref<1x32x1xf32, #tpu.memory_space<vmem>>, vector<1x32x1xf32>
    tpu.vector_store %arg7[%c0_14, %c0_15, %c0_16], %22 {strides = array<i32>} : memref<1x32x1xf32, #tpu.memory_space<vmem>>, vector<1x32x1xf32>,
    return
  }
  func.func @transform_0(%arg0: i32) -> (i32, i32) {
    %c0_i32 = arith.constant 0 : i32
    %c0_i32_0 = arith.constant 0 : i32
    return %c0_i32, %arg0 : i32, i32
  }
  func.func @transform_1(%arg0: i32) -> (i32, i32) {
    %c0_i32 = arith.constant 0 : i32
    %c0_i32_0 = arith.constant 0 : i32
    %c0_i32_1 = arith.constant 0 : i32
    return %c0_i32, %c0_i32_0 : i32, i32
  }
  func.func @transform_2(%arg0: i32) -> (i32, i32) {
    %c0_i32 = arith.constant 0 : i32
    %c0_i32_0 = arith.constant 0 : i32
    %c0_i32_1 = arith.constant 0 : i32
    return %c0_i32, %c0_i32_0 : i32, i32
  }
  func.func @transform_3(%arg0: i32) -> (i32, i32) {
    %c0_i32 = arith.constant 0 : i32
    %c0_i32_0 = arith.constant 0 : i32
    return %c0_i32, %arg0 : i32, i32
  }
  func.func @transform_4(%arg0: i32) -> (i32, i32) {
    %c0_i32 = arith.constant 0 : i32
    %c0_i32_0 = arith.constant 0 : i32
    return %c0_i32, %arg0 : i32, i32
  }
  func.func @transform_5(%arg0: i32) -> (i32, i32, i32) {
    %c0_i32 = arith.constant 0 : i32
    %c0_i32_0 = arith.constant 0 : i32
    %c0_i32_1 = arith.constant 0 : i32
    return %arg0, %c0_i32, %c0_i32_0 : i32, i32, i32
  }
  func.func @transform_6(%arg0: i32) -> (i32, i32, i32) {
    %c0_i32 = arith.constant 0 : i32
    %c0_i32_0 = arith.constant 0 : i32
    %c0_i32_1 = arith.constant 0 : i32
    return %arg0, %c0_i32, %c0_i32_0 : i32, i32, i32
  }
}

module attributes {stable_mosaic.version = 11 : i64} {
  func.func @_conv_kernel(%arg0: i32, %arg1: memref<32x128xbf16, #tpu.memory_space<vmem>>, %arg2: memref<32x128xbf16, #tpu.memory_space<vmem>>, %arg3: memref<32x1xf32, #tpu.memory_space<vmem>>, %arg4: memref<32x1xf32, #tpu.memory_space<vmem>>, %arg5: memref<1x128xf32, #tpu.memory_space<vmem>>, %arg6: memref<1x128xf32, #tpu.memory_space<vmem>>, %arg7: memref<9x32x32xbf16, #tpu.memory_space<vmem>>, %arg8: memref<32x1xf32, #tpu.memory_space<vmem>>, %arg9: memref<1x128xf32, #tpu.memory_space<vmem>>, %arg10: memref<32x128xbf16, #tpu.memory_space<vmem>>, %arg11: memref<1x32x1xf32, #tpu.memory_space<vmem>>, %arg12: memref<1x32x1xf32, #tpu.memory_space<vmem>>) attributes {dimension_semantics = [#tpu.dimension_semantics<parallel>], iteration_bounds = array<i64: 1>, scalar_prefetch = 0 : i64, scratch_operands = 0 : i64, tpu.core_type = #tpu.core_type<tc>, window_params = [{transform_indices = @transform_0, window_bounds = array<i64: 32, 128>}, {transform_indices = @transform_1, window_bounds = array<i64: 32, 128>}, {pipeline_mode = #tpu.pipeline_mode<synchronous>, transform_indices = @transform_2, window_bounds = array<i64: 32, 1>}, {pipeline_mode = #tpu.pipeline_mode<synchronous>, transform_indices = @transform_3, window_bounds = array<i64: 32, 1>}, {transform_indices = @transform_4, window_bounds = array<i64: 1, 128>}, {transform_indices = @transform_5, window_bounds = array<i64: 1, 128>}, {pipeline_mode = #tpu.pipeline_mode<synchronous>, transform_indices = @transform_6, window_bounds = array<i64: 9, 32, 32>}, {pipeline_mode = #tpu.pipeline_mode<synchronous>, transform_indices = @transform_7, window_bounds = array<i64: 32, 1>}, {transform_indices = @transform_8, window_bounds = array<i64: 1, 128>}, {transform_indices = @transform_9, window_bounds = array<i64: 32, 128>}, {transform_indices = @transform_10, window_bounds = array<i64: 1, 32, 1>}, {transform_indices = @transform_11, window_bounds = array<i64: 1, 32, 1>}]} {
    %c0 = arith.constant 0 : index
    %c0_0 = arith.constant 0 : index
    %0 = vector.load %arg1[%c0, %c0_0] : memref<32x128xbf16, #tpu.memory_space<vmem>>, vector<32x128xbf16>
    %c0_1 = arith.constant 0 : index
    %c0_2 = arith.constant 0 : index
    %1 = vector.load %arg2[%c0_1, %c0_2] : memref<32x128xbf16, #tpu.memory_space<vmem>>, vector<32x128xbf16>
    %2 = tpu.concatenate %0, %1 in 1 : vector<32x128xbf16>, vector<32x128xbf16> -> vector<32x256xbf16>
    %3 = arith.extf %2 : vector<32x256xbf16> to vector<32x256xf32>
    %c0_3 = arith.constant 0 : index
    %c0_4 = arith.constant 0 : index
    %4 = vector.load %arg3[%c0_3, %c0_4] : memref<32x1xf32, #tpu.memory_space<vmem>>, vector<32x1xf32>
    %5 = vector.broadcast %4 : vector<32x1xf32> to vector<32x256xf32>
    %6 = arith.mulf %3, %5 : vector<32x256xf32>
    %c0_5 = arith.constant 0 : index
    %c0_6 = arith.constant 0 : index
    %7 = vector.load %arg4[%c0_5, %c0_6] : memref<32x1xf32, #tpu.memory_space<vmem>>, vector<32x1xf32>
    %8 = vector.broadcast %7 : vector<32x1xf32> to vector<32x256xf32>
    %9 = arith.addf %6, %8 : vector<32x256xf32>
    %cst = arith.constant 0.000000e+00 : f32
    %10 = vector.broadcast %cst : f32 to vector<32x256xf32>
    %11 = arith.maximumf %9, %10 : vector<32x256xf32>
    %c0_7 = arith.constant 0 : index
    %c0_8 = arith.constant 0 : index
    %12 = vector.load %arg5[%c0_7, %c0_8] : memref<1x128xf32, #tpu.memory_space<vmem>>, vector<1x128xf32>
    %c0_9 = arith.constant 0 : index
    %c0_10 = arith.constant 0 : index
    %13 = vector.load %arg6[%c0_9, %c0_10] : memref<1x128xf32, #tpu.memory_space<vmem>>, vector<1x128xf32>
    %14 = tpu.concatenate %12, %13 in 1 : vector<1x128xf32>, vector<1x128xf32> -> vector<1x256xf32>
    %15 = vector.broadcast %14 : vector<1x256xf32> to vector<32x256xf32>
    %16 = arith.mulf %11, %15 : vector<32x256xf32>
    %17 = arith.truncf %16 : vector<32x256xf32> to vector<32x256xbf16>
    %c0_11 = arith.constant 0 : index
    %c0_12 = arith.constant 0 : index
    %c0_13 = arith.constant 0 : index
    %18 = vector.load %arg7[%c0_11, %c0_12, %c0_13] : memref<9x32x32xbf16, #tpu.memory_space<vmem>>, vector<9x32x32xbf16>
    %cst_14 = arith.constant 0.000000e+00 : f32
    %19 = vector.broadcast %cst_14 : f32 to vector<32x128xf32>
    %20 = vector.extract_strided_slice %17 {offsets = [0, 0], sizes = [32, 128], strides = [1, 1]} : vector<32x256xbf16> to vector<32x128xbf16>
    %21 = vector.extract_strided_slice %18 {offsets = [0, 0, 0], sizes = [1, 32, 32], strides = [1, 1, 1]} : vector<9x32x32xbf16> to vector<1x32x32xbf16>
    %22 = vector.shape_cast %21 : vector<1x32x32xbf16> to vector<32x32xbf16>
    %cst_15 = arith.constant dense<0.000000e+00> : vector<32x128xf32>
    %23 = tpu.matmul %22, %20, %cst_15 {dimension_numbers = #tpu.dot_dimension_numbers<[1], [0], [0], [1], [0, 0, 1, 1], [], []>} : vector<32x32xbf16>, vector<32x128xbf16>, vector<32x128xf32> -> vector<32x128xf32>
    %24 = arith.addf %19, %23 : vector<32x128xf32>
    %25 = vector.extract_strided_slice %17 {offsets = [0, 1], sizes = [32, 128], strides = [1, 1]} : vector<32x256xbf16> to vector<32x128xbf16>
    %26 = vector.extract_strided_slice %18 {offsets = [1, 0, 0], sizes = [1, 32, 32], strides = [1, 1, 1]} : vector<9x32x32xbf16> to vector<1x32x32xbf16>
    %27 = vector.shape_cast %26 : vector<1x32x32xbf16> to vector<32x32xbf16>
    %cst_16 = arith.constant dense<0.000000e+00> : vector<32x128xf32>
    %28 = tpu.matmul %27, %25, %cst_16 {dimension_numbers = #tpu.dot_dimension_numbers<[1], [0], [0], [1], [0, 0, 1, 1], [], []>} : vector<32x32xbf16>, vector<32x128xbf16>, vector<32x128xf32> -> vector<32x128xf32>
    %29 = arith.addf %24, %28 : vector<32x128xf32>
    %30 = vector.extract_strided_slice %17 {offsets = [0, 2], sizes = [32, 128], strides = [1, 1]} : vector<32x256xbf16> to vector<32x128xbf16>
    %31 = vector.extract_strided_slice %18 {offsets = [2, 0, 0], sizes = [1, 32, 32], strides = [1, 1, 1]} : vector<9x32x32xbf16> to vector<1x32x32xbf16>
    %32 = vector.shape_cast %31 : vector<1x32x32xbf16> to vector<32x32xbf16>
    %cst_17 = arith.constant dense<0.000000e+00> : vector<32x128xf32>
    %33 = tpu.matmul %32, %30, %cst_17 {dimension_numbers = #tpu.dot_dimension_numbers<[1], [0], [0], [1], [0, 0, 1, 1], [], []>} : vector<32x32xbf16>, vector<32x128xbf16>, vector<32x128xf32> -> vector<32x128xf32>
    %34 = arith.addf %29, %33 : vector<32x128xf32>
    %35 = vector.extract_strided_slice %17 {offsets = [0, 6], sizes = [32, 128], strides = [1, 1]} : vector<32x256xbf16> to vector<32x128xbf16>
    %36 = vector.extract_strided_slice %18 {offsets = [3, 0, 0], sizes = [1, 32, 32], strides = [1, 1, 1]} : vector<9x32x32xbf16> to vector<1x32x32xbf16>
    %37 = vector.shape_cast %36 : vector<1x32x32xbf16> to vector<32x32xbf16>
    %cst_18 = arith.constant dense<0.000000e+00> : vector<32x128xf32>
    %38 = tpu.matmul %37, %35, %cst_18 {dimension_numbers = #tpu.dot_dimension_numbers<[1], [0], [0], [1], [0, 0, 1, 1], [], []>} : vector<32x32xbf16>, vector<32x128xbf16>, vector<32x128xf32> -> vector<32x128xf32>
    %39 = arith.addf %34, %38 : vector<32x128xf32>
    %40 = vector.extract_strided_slice %17 {offsets = [0, 7], sizes = [32, 128], strides = [1, 1]} : vector<32x256xbf16> to vector<32x128xbf16>
    %41 = vector.extract_strided_slice %18 {offsets = [4, 0, 0], sizes = [1, 32, 32], strides = [1, 1, 1]} : vector<9x32x32xbf16> to vector<1x32x32xbf16>
    %42 = vector.shape_cast %41 : vector<1x32x32xbf16> to vector<32x32xbf16>
    %cst_19 = arith.constant dense<0.000000e+00> : vector<32x128xf32>
    %43 = tpu.matmul %42, %40, %cst_19 {dimension_numbers = #tpu.dot_dimension_numbers<[1], [0], [0], [1], [0, 0, 1, 1], [], []>} : vector<32x32xbf16>, vector<32x128xbf16>, vector<32x128xf32> -> vector<32x128xf32>
    %44 = arith.addf %39, %43 : vector<32x128xf32>
    %45 = vector.extract_strided_slice %17 {offsets = [0, 8], sizes = [32, 128], strides = [1, 1]} : vector<32x256xbf16> to vector<32x128xbf16>
    %46 = vector.extract_strided_slice %18 {offsets = [5, 0, 0], sizes = [1, 32, 32], strides = [1, 1, 1]} : vector<9x32x32xbf16> to vector<1x32x32xbf16>
    %47 = vector.shape_cast %46 : vector<1x32x32xbf16> to vector<32x32xbf16>
    %cst_20 = arith.constant dense<0.000000e+00> : vector<32x128xf32>
    %48 = tpu.matmul %47, %45, %cst_20 {dimension_numbers = #tpu.dot_dimension_numbers<[1], [0], [0], [1], [0, 0, 1, 1], [], []>} : vector<32x32xbf16>, vector<32x128xbf16>, vector<32x128xf32> -> vector<32x128xf32>
    %49 = arith.addf %44, %48 : vector<32x128xf32>
    %50 = vector.extract_strided_slice %17 {offsets = [0, 12], sizes = [32, 128], strides = [1, 1]} : vector<32x256xbf16> to vector<32x128xbf16>
    %51 = vector.extract_strided_slice %18 {offsets = [6, 0, 0], sizes = [1, 32, 32], strides = [1, 1, 1]} : vector<9x32x32xbf16> to vector<1x32x32xbf16>
    %52 = vector.shape_cast %51 : vector<1x32x32xbf16> to vector<32x32xbf16>
    %cst_21 = arith.constant dense<0.000000e+00> : vector<32x128xf32>
    %53 = tpu.matmul %52, %50, %cst_21 {dimension_numbers = #tpu.dot_dimension_numbers<[1], [0], [0], [1], [0, 0, 1, 1], [], []>} : vector<32x32xbf16>, vector<32x128xbf16>, vector<32x128xf32> -> vector<32x128xf32>
    %54 = arith.addf %49, %53 : vector<32x128xf32>
    %55 = vector.extract_strided_slice %17 {offsets = [0, 13], sizes = [32, 128], strides = [1, 1]} : vector<32x256xbf16> to vector<32x128xbf16>
    %56 = vector.extract_strided_slice %18 {offsets = [7, 0, 0], sizes = [1, 32, 32], strides = [1, 1, 1]} : vector<9x32x32xbf16> to vector<1x32x32xbf16>
    %57 = vector.shape_cast %56 : vector<1x32x32xbf16> to vector<32x32xbf16>
    %cst_22 = arith.constant dense<0.000000e+00> : vector<32x128xf32>
    %58 = tpu.matmul %57, %55, %cst_22 {dimension_numbers = #tpu.dot_dimension_numbers<[1], [0], [0], [1], [0, 0, 1, 1], [], []>} : vector<32x32xbf16>, vector<32x128xbf16>, vector<32x128xf32> -> vector<32x128xf32>
    %59 = arith.addf %54, %58 : vector<32x128xf32>
    %60 = vector.extract_strided_slice %17 {offsets = [0, 14], sizes = [32, 128], strides = [1, 1]} : vector<32x256xbf16> to vector<32x128xbf16>
    %61 = vector.extract_strided_slice %18 {offsets = [8, 0, 0], sizes = [1, 32, 32], strides = [1, 1, 1]} : vector<9x32x32xbf16> to vector<1x32x32xbf16>
    %62 = vector.shape_cast %61 : vector<1x32x32xbf16> to vector<32x32xbf16>
    %cst_23 = arith.constant dense<0.000000e+00> : vector<32x128xf32>
    %63 = tpu.matmul %62, %60, %cst_23 {dimension_numbers = #tpu.dot_dimension_numbers<[1], [0], [0], [1], [0, 0, 1, 1], [], []>} : vector<32x32xbf16>, vector<32x128xbf16>, vector<32x128xf32> -> vector<32x128xf32>
    %64 = arith.addf %59, %63 : vector<32x128xf32>
    %c0_24 = arith.constant 0 : index
    %c0_25 = arith.constant 0 : index
    %65 = vector.load %arg8[%c0_24, %c0_25] : memref<32x1xf32, #tpu.memory_space<vmem>>, vector<32x1xf32>
    %66 = vector.broadcast %65 : vector<32x1xf32> to vector<32x128xf32>
    %67 = arith.addf %64, %66 : vector<32x128xf32>
    %68 = arith.truncf %67 : vector<32x128xf32> to vector<32x128xbf16>
    %c0_26 = arith.constant 0 : index
    %c0_27 = arith.constant 0 : index
    %69 = vector.load %arg10[%c0_26, %c0_27] : memref<32x128xbf16, #tpu.memory_space<vmem>>, vector<32x128xbf16>
    tpu.vector_store %arg10[%c0_26, %c0_27], %68 {strides = array<i32>} : memref<32x128xbf16, #tpu.memory_space<vmem>>, vector<32x128xbf16>,
    %c0_28 = arith.constant 0 : index
    %c0_29 = arith.constant 0 : index
    %70 = vector.load %arg9[%c0_28, %c0_29] : memref<1x128xf32, #tpu.memory_space<vmem>>, vector<1x128xf32>
    %71 = vector.broadcast %70 : vector<1x128xf32> to vector<32x128xf32>
    %72 = arith.mulf %67, %71 : vector<32x128xf32>
    %cst_30 = arith.constant dense<0.000000e+00> : vector<32xf32>
    %73 = vector.multi_reduction <add>, %72, %cst_30 [1] : vector<32x128xf32> to vector<32xf32>
    %74 = vector.shape_cast %73 : vector<32xf32> to vector<32x1xf32>
    %75 = vector.shape_cast %74 : vector<32x1xf32> to vector<1x32x1xf32>
    %c0_31 = arith.constant 0 : index
    %c0_32 = arith.constant 0 : index
    %c0_33 = arith.constant 0 : index
    %76 = vector.load %arg11[%c0_31, %c0_32, %c0_33] : memref<1x32x1xf32, #tpu.memory_space<vmem>>, vector<1x32x1xf32>
    tpu.vector_store %arg11[%c0_31, %c0_32, %c0_33], %75 {strides = array<i32>} : memref<1x32x1xf32, #tpu.memory_space<vmem>>, vector<1x32x1xf32>,
    %77 = arith.mulf %72, %67 : vector<32x128xf32>
    %cst_34 = arith.constant dense<0.000000e+00> : vector<32xf32>
    %78 = vector.multi_reduction <add>, %77, %cst_34 [1] : vector<32x128xf32> to vector<32xf32>
    %79 = vector.shape_cast %78 : vector<32xf32> to vector<32x1xf32>
    %80 = vector.shape_cast %79 : vector<32x1xf32> to vector<1x32x1xf32>
    %c0_35 = arith.constant 0 : index
    %c0_36 = arith.constant 0 : index
    %c0_37 = arith.constant 0 : index
    %81 = vector.load %arg12[%c0_35, %c0_36, %c0_37] : memref<1x32x1xf32, #tpu.memory_space<vmem>>, vector<1x32x1xf32>
    tpu.vector_store %arg12[%c0_35, %c0_36, %c0_37], %80 {strides = array<i32>} : memref<1x32x1xf32, #tpu.memory_space<vmem>>, vector<1x32x1xf32>,
    return
  }
  func.func @transform_0(%arg0: i32) -> (i32, i32) {
    %c0_i32 = arith.constant 0 : i32
    %c0_i32_0 = arith.constant 0 : i32
    return %c0_i32, %arg0 : i32, i32
  }
  func.func @transform_1(%arg0: i32) -> (i32, i32) {
    %c1_i32 = arith.constant 1 : i32
    %0 = arith.addi %arg0, %c1_i32 : i32
    %c0_i32 = arith.constant 0 : i32
    %c0_i32_0 = arith.constant 0 : i32
    return %c0_i32, %0 : i32, i32
  }
  func.func @transform_2(%arg0: i32) -> (i32, i32) {
    %c0_i32 = arith.constant 0 : i32
    %c0_i32_0 = arith.constant 0 : i32
    %c0_i32_1 = arith.constant 0 : i32
    return %c0_i32, %c0_i32_0 : i32, i32
  }
  func.func @transform_3(%arg0: i32) -> (i32, i32) {
    %c0_i32 = arith.constant 0 : i32
    %c0_i32_0 = arith.constant 0 : i32
    %c0_i32_1 = arith.constant 0 : i32
    return %c0_i32, %c0_i32_0 : i32, i32
  }
  func.func @transform_4(%arg0: i32) -> (i32, i32) {
    %c0_i32 = arith.constant 0 : i32
    %c0_i32_0 = arith.constant 0 : i32
    return %c0_i32, %arg0 : i32, i32
  }
  func.func @transform_5(%arg0: i32) -> (i32, i32) {
    %c1_i32 = arith.constant 1 : i32
    %0 = arith.addi %arg0, %c1_i32 : i32
    %c0_i32 = arith.constant 0 : i32
    %c0_i32_0 = arith.constant 0 : i32
    return %c0_i32, %0 : i32, i32
  }
  func.func @transform_6(%arg0: i32) -> (i32, i32, i32) {
    %c0_i32 = arith.constant 0 : i32
    %c0_i32_0 = arith.constant 0 : i32
    %c0_i32_1 = arith.constant 0 : i32
    %c0_i32_2 = arith.constant 0 : i32
    return %c0_i32, %c0_i32_0, %c0_i32_1 : i32, i32, i32
  }
  func.func @transform_7(%arg0: i32) -> (i32, i32) {
    %c0_i32 = arith.constant 0 : i32
    %c0_i32_0 = arith.constant 0 : i32
    %c0_i32_1 = arith.constant 0 : i32
    return %c0_i32, %c0_i32_0 : i32, i32
  }
  func.func @transform_8(%arg0: i32) -> (i32, i32) {
    %c0_i32 = arith.constant 0 : i32
    %c0_i32_0 = arith.constant 0 : i32
    return %c0_i32, %arg0 : i32, i32
  }
  func.func @transform_9(%arg0: i32) -> (i32, i32) {
    %c0_i32 = arith.constant 0 : i32
    %c0_i32_0 = arith.constant 0 : i32
    return %c0_i32, %arg0 : i32, i32
  }
  func.func @transform_10(%arg0: i32) -> (i32, i32, i32) {
    %c0_i32 = arith.constant 0 : i32
    %c0_i32_0 = arith.constant 0 : i32
    %c0_i32_1 = arith.constant 0 : i32
    return %arg0, %c0_i32, %c0_i32_0 : i32, i32, i32
  }
  func.func @transform_11(%arg0: i32) -> (i32, i32, i32) {
    %c0_i32 = arith.constant 0 : i32
    %c0_i32_0 = arith.constant 0 : i32
    %c0_i32_1 = arith.constant 0 : i32
    return %arg0, %c0_i32, %c0_i32_0 : i32, i32, i32
  }
}

module attributes {stable_mosaic.version = 11 : i64} {
  func.func @_conv_kernel(%arg0: i32, %arg1: memref<32x128xbf16, #tpu.memory_space<vmem>>, %arg2: memref<32x128xbf16, #tpu.memory_space<vmem>>, %arg3: memref<32x1xf32, #tpu.memory_space<vmem>>, %arg4: memref<32x1xf32, #tpu.memory_space<vmem>>, %arg5: memref<1x128xf32, #tpu.memory_space<vmem>>, %arg6: memref<1x128xf32, #tpu.memory_space<vmem>>, %arg7: memref<9x32x32xbf16, #tpu.memory_space<vmem>>, %arg8: memref<32x1xf32, #tpu.memory_space<vmem>>, %arg9: memref<32x128xbf16, #tpu.memory_space<vmem>>, %arg10: memref<1x128xf32, #tpu.memory_space<vmem>>, %arg11: memref<32x128xbf16, #tpu.memory_space<vmem>>, %arg12: memref<1x32x1xf32, #tpu.memory_space<vmem>>, %arg13: memref<1x32x1xf32, #tpu.memory_space<vmem>>) attributes {dimension_semantics = [#tpu.dimension_semantics<parallel>], iteration_bounds = array<i64: 1>, scalar_prefetch = 0 : i64, scratch_operands = 0 : i64, tpu.core_type = #tpu.core_type<tc>, window_params = [{transform_indices = @transform_0, window_bounds = array<i64: 32, 128>}, {transform_indices = @transform_1, window_bounds = array<i64: 32, 128>}, {pipeline_mode = #tpu.pipeline_mode<synchronous>, transform_indices = @transform_2, window_bounds = array<i64: 32, 1>}, {pipeline_mode = #tpu.pipeline_mode<synchronous>, transform_indices = @transform_3, window_bounds = array<i64: 32, 1>}, {transform_indices = @transform_4, window_bounds = array<i64: 1, 128>}, {transform_indices = @transform_5, window_bounds = array<i64: 1, 128>}, {pipeline_mode = #tpu.pipeline_mode<synchronous>, transform_indices = @transform_6, window_bounds = array<i64: 9, 32, 32>}, {pipeline_mode = #tpu.pipeline_mode<synchronous>, transform_indices = @transform_7, window_bounds = array<i64: 32, 1>}, {transform_indices = @transform_8, window_bounds = array<i64: 32, 128>}, {transform_indices = @transform_9, window_bounds = array<i64: 1, 128>}, {transform_indices = @transform_10, window_bounds = array<i64: 32, 128>}, {transform_indices = @transform_11, window_bounds = array<i64: 1, 32, 1>}, {transform_indices = @transform_12, window_bounds = array<i64: 1, 32, 1>}]} {
    %c0 = arith.constant 0 : index
    %c0_0 = arith.constant 0 : index
    %0 = vector.load %arg1[%c0, %c0_0] : memref<32x128xbf16, #tpu.memory_space<vmem>>, vector<32x128xbf16>
    %c0_1 = arith.constant 0 : index
    %c0_2 = arith.constant 0 : index
    %1 = vector.load %arg2[%c0_1, %c0_2] : memref<32x128xbf16, #tpu.memory_space<vmem>>, vector<32x128xbf16>
    %2 = tpu.concatenate %0, %1 in 1 : vector<32x128xbf16>, vector<32x128xbf16> -> vector<32x256xbf16>
    %3 = arith.extf %2 : vector<32x256xbf16> to vector<32x256xf32>
    %c0_3 = arith.constant 0 : index
    %c0_4 = arith.constant 0 : index
    %4 = vector.load %arg3[%c0_3, %c0_4] : memref<32x1xf32, #tpu.memory_space<vmem>>, vector<32x1xf32>
    %5 = vector.broadcast %4 : vector<32x1xf32> to vector<32x256xf32>
    %6 = arith.mulf %3, %5 : vector<32x256xf32>
    %c0_5 = arith.constant 0 : index
    %c0_6 = arith.constant 0 : index
    %7 = vector.load %arg4[%c0_5, %c0_6] : memref<32x1xf32, #tpu.memory_space<vmem>>, vector<32x1xf32>
    %8 = vector.broadcast %7 : vector<32x1xf32> to vector<32x256xf32>
    %9 = arith.addf %6, %8 : vector<32x256xf32>
    %cst = arith.constant 0.000000e+00 : f32
    %10 = vector.broadcast %cst : f32 to vector<32x256xf32>
    %11 = arith.maximumf %9, %10 : vector<32x256xf32>
    %c0_7 = arith.constant 0 : index
    %c0_8 = arith.constant 0 : index
    %12 = vector.load %arg5[%c0_7, %c0_8] : memref<1x128xf32, #tpu.memory_space<vmem>>, vector<1x128xf32>
    %c0_9 = arith.constant 0 : index
    %c0_10 = arith.constant 0 : index
    %13 = vector.load %arg6[%c0_9, %c0_10] : memref<1x128xf32, #tpu.memory_space<vmem>>, vector<1x128xf32>
    %14 = tpu.concatenate %12, %13 in 1 : vector<1x128xf32>, vector<1x128xf32> -> vector<1x256xf32>
    %15 = vector.broadcast %14 : vector<1x256xf32> to vector<32x256xf32>
    %16 = arith.mulf %11, %15 : vector<32x256xf32>
    %17 = arith.truncf %16 : vector<32x256xf32> to vector<32x256xbf16>
    %c0_11 = arith.constant 0 : index
    %c0_12 = arith.constant 0 : index
    %c0_13 = arith.constant 0 : index
    %18 = vector.load %arg7[%c0_11, %c0_12, %c0_13] : memref<9x32x32xbf16, #tpu.memory_space<vmem>>, vector<9x32x32xbf16>
    %cst_14 = arith.constant 0.000000e+00 : f32
    %19 = vector.broadcast %cst_14 : f32 to vector<32x128xf32>
    %20 = vector.extract_strided_slice %17 {offsets = [0, 0], sizes = [32, 128], strides = [1, 1]} : vector<32x256xbf16> to vector<32x128xbf16>
    %21 = vector.extract_strided_slice %18 {offsets = [0, 0, 0], sizes = [1, 32, 32], strides = [1, 1, 1]} : vector<9x32x32xbf16> to vector<1x32x32xbf16>
    %22 = vector.shape_cast %21 : vector<1x32x32xbf16> to vector<32x32xbf16>
    %cst_15 = arith.constant dense<0.000000e+00> : vector<32x128xf32>
    %23 = tpu.matmul %22, %20, %cst_15 {dimension_numbers = #tpu.dot_dimension_numbers<[1], [0], [0], [1], [0, 0, 1, 1], [], []>} : vector<32x32xbf16>, vector<32x128xbf16>, vector<32x128xf32> -> vector<32x128xf32>
    %24 = arith.addf %19, %23 : vector<32x128xf32>
    %25 = vector.extract_strided_slice %17 {offsets = [0, 1], sizes = [32, 128], strides = [1, 1]} : vector<32x256xbf16> to vector<32x128xbf16>
    %26 = vector.extract_strided_slice %18 {offsets = [1, 0, 0], sizes = [1, 32, 32], strides = [1, 1, 1]} : vector<9x32x32xbf16> to vector<1x32x32xbf16>
    %27 = vector.shape_cast %26 : vector<1x32x32xbf16> to vector<32x32xbf16>
    %cst_16 = arith.constant dense<0.000000e+00> : vector<32x128xf32>
    %28 = tpu.matmul %27, %25, %cst_16 {dimension_numbers = #tpu.dot_dimension_numbers<[1], [0], [0], [1], [0, 0, 1, 1], [], []>} : vector<32x32xbf16>, vector<32x128xbf16>, vector<32x128xf32> -> vector<32x128xf32>
    %29 = arith.addf %24, %28 : vector<32x128xf32>
    %30 = vector.extract_strided_slice %17 {offsets = [0, 2], sizes = [32, 128], strides = [1, 1]} : vector<32x256xbf16> to vector<32x128xbf16>
    %31 = vector.extract_strided_slice %18 {offsets = [2, 0, 0], sizes = [1, 32, 32], strides = [1, 1, 1]} : vector<9x32x32xbf16> to vector<1x32x32xbf16>
    %32 = vector.shape_cast %31 : vector<1x32x32xbf16> to vector<32x32xbf16>
    %cst_17 = arith.constant dense<0.000000e+00> : vector<32x128xf32>
    %33 = tpu.matmul %32, %30, %cst_17 {dimension_numbers = #tpu.dot_dimension_numbers<[1], [0], [0], [1], [0, 0, 1, 1], [], []>} : vector<32x32xbf16>, vector<32x128xbf16>, vector<32x128xf32> -> vector<32x128xf32>
    %34 = arith.addf %29, %33 : vector<32x128xf32>
    %35 = vector.extract_strided_slice %17 {offsets = [0, 6], sizes = [32, 128], strides = [1, 1]} : vector<32x256xbf16> to vector<32x128xbf16>
    %36 = vector.extract_strided_slice %18 {offsets = [3, 0, 0], sizes = [1, 32, 32], strides = [1, 1, 1]} : vector<9x32x32xbf16> to vector<1x32x32xbf16>
    %37 = vector.shape_cast %36 : vector<1x32x32xbf16> to vector<32x32xbf16>
    %cst_18 = arith.constant dense<0.000000e+00> : vector<32x128xf32>
    %38 = tpu.matmul %37, %35, %cst_18 {dimension_numbers = #tpu.dot_dimension_numbers<[1], [0], [0], [1], [0, 0, 1, 1], [], []>} : vector<32x32xbf16>, vector<32x128xbf16>, vector<32x128xf32> -> vector<32x128xf32>
    %39 = arith.addf %34, %38 : vector<32x128xf32>
    %40 = vector.extract_strided_slice %17 {offsets = [0, 7], sizes = [32, 128], strides = [1, 1]} : vector<32x256xbf16> to vector<32x128xbf16>
    %41 = vector.extract_strided_slice %18 {offsets = [4, 0, 0], sizes = [1, 32, 32], strides = [1, 1, 1]} : vector<9x32x32xbf16> to vector<1x32x32xbf16>
    %42 = vector.shape_cast %41 : vector<1x32x32xbf16> to vector<32x32xbf16>
    %cst_19 = arith.constant dense<0.000000e+00> : vector<32x128xf32>
    %43 = tpu.matmul %42, %40, %cst_19 {dimension_numbers = #tpu.dot_dimension_numbers<[1], [0], [0], [1], [0, 0, 1, 1], [], []>} : vector<32x32xbf16>, vector<32x128xbf16>, vector<32x128xf32> -> vector<32x128xf32>
    %44 = arith.addf %39, %43 : vector<32x128xf32>
    %45 = vector.extract_strided_slice %17 {offsets = [0, 8], sizes = [32, 128], strides = [1, 1]} : vector<32x256xbf16> to vector<32x128xbf16>
    %46 = vector.extract_strided_slice %18 {offsets = [5, 0, 0], sizes = [1, 32, 32], strides = [1, 1, 1]} : vector<9x32x32xbf16> to vector<1x32x32xbf16>
    %47 = vector.shape_cast %46 : vector<1x32x32xbf16> to vector<32x32xbf16>
    %cst_20 = arith.constant dense<0.000000e+00> : vector<32x128xf32>
    %48 = tpu.matmul %47, %45, %cst_20 {dimension_numbers = #tpu.dot_dimension_numbers<[1], [0], [0], [1], [0, 0, 1, 1], [], []>} : vector<32x32xbf16>, vector<32x128xbf16>, vector<32x128xf32> -> vector<32x128xf32>
    %49 = arith.addf %44, %48 : vector<32x128xf32>
    %50 = vector.extract_strided_slice %17 {offsets = [0, 12], sizes = [32, 128], strides = [1, 1]} : vector<32x256xbf16> to vector<32x128xbf16>
    %51 = vector.extract_strided_slice %18 {offsets = [6, 0, 0], sizes = [1, 32, 32], strides = [1, 1, 1]} : vector<9x32x32xbf16> to vector<1x32x32xbf16>
    %52 = vector.shape_cast %51 : vector<1x32x32xbf16> to vector<32x32xbf16>
    %cst_21 = arith.constant dense<0.000000e+00> : vector<32x128xf32>
    %53 = tpu.matmul %52, %50, %cst_21 {dimension_numbers = #tpu.dot_dimension_numbers<[1], [0], [0], [1], [0, 0, 1, 1], [], []>} : vector<32x32xbf16>, vector<32x128xbf16>, vector<32x128xf32> -> vector<32x128xf32>
    %54 = arith.addf %49, %53 : vector<32x128xf32>
    %55 = vector.extract_strided_slice %17 {offsets = [0, 13], sizes = [32, 128], strides = [1, 1]} : vector<32x256xbf16> to vector<32x128xbf16>
    %56 = vector.extract_strided_slice %18 {offsets = [7, 0, 0], sizes = [1, 32, 32], strides = [1, 1, 1]} : vector<9x32x32xbf16> to vector<1x32x32xbf16>
    %57 = vector.shape_cast %56 : vector<1x32x32xbf16> to vector<32x32xbf16>
    %cst_22 = arith.constant dense<0.000000e+00> : vector<32x128xf32>
    %58 = tpu.matmul %57, %55, %cst_22 {dimension_numbers = #tpu.dot_dimension_numbers<[1], [0], [0], [1], [0, 0, 1, 1], [], []>} : vector<32x32xbf16>, vector<32x128xbf16>, vector<32x128xf32> -> vector<32x128xf32>
    %59 = arith.addf %54, %58 : vector<32x128xf32>
    %60 = vector.extract_strided_slice %17 {offsets = [0, 14], sizes = [32, 128], strides = [1, 1]} : vector<32x256xbf16> to vector<32x128xbf16>
    %61 = vector.extract_strided_slice %18 {offsets = [8, 0, 0], sizes = [1, 32, 32], strides = [1, 1, 1]} : vector<9x32x32xbf16> to vector<1x32x32xbf16>
    %62 = vector.shape_cast %61 : vector<1x32x32xbf16> to vector<32x32xbf16>
    %cst_23 = arith.constant dense<0.000000e+00> : vector<32x128xf32>
    %63 = tpu.matmul %62, %60, %cst_23 {dimension_numbers = #tpu.dot_dimension_numbers<[1], [0], [0], [1], [0, 0, 1, 1], [], []>} : vector<32x32xbf16>, vector<32x128xbf16>, vector<32x128xf32> -> vector<32x128xf32>
    %64 = arith.addf %59, %63 : vector<32x128xf32>
    %c0_24 = arith.constant 0 : index
    %c0_25 = arith.constant 0 : index
    %65 = vector.load %arg8[%c0_24, %c0_25] : memref<32x1xf32, #tpu.memory_space<vmem>>, vector<32x1xf32>
    %66 = vector.broadcast %65 : vector<32x1xf32> to vector<32x128xf32>
    %67 = arith.addf %64, %66 : vector<32x128xf32>
    %c0_26 = arith.constant 0 : index
    %c0_27 = arith.constant 0 : index
    %68 = vector.load %arg9[%c0_26, %c0_27] : memref<32x128xbf16, #tpu.memory_space<vmem>>, vector<32x128xbf16>
    %69 = arith.extf %68 : vector<32x128xbf16> to vector<32x128xf32>
    %70 = arith.addf %67, %69 : vector<32x128xf32>
    %71 = arith.truncf %70 : vector<32x128xf32> to vector<32x128xbf16>
    %c0_28 = arith.constant 0 : index
    %c0_29 = arith.constant 0 : index
    %72 = vector.load %arg11[%c0_28, %c0_29] : memref<32x128xbf16, #tpu.memory_space<vmem>>, vector<32x128xbf16>
    tpu.vector_store %arg11[%c0_28, %c0_29], %71 {strides = array<i32>} : memref<32x128xbf16, #tpu.memory_space<vmem>>, vector<32x128xbf16>,
    %c0_30 = arith.constant 0 : index
    %c0_31 = arith.constant 0 : index
    %73 = vector.load %arg10[%c0_30, %c0_31] : memref<1x128xf32, #tpu.memory_space<vmem>>, vector<1x128xf32>
    %74 = vector.broadcast %73 : vector<1x128xf32> to vector<32x128xf32>
    %75 = arith.mulf %70, %74 : vector<32x128xf32>
    %cst_32 = arith.constant dense<0.000000e+00> : vector<32xf32>
    %76 = vector.multi_reduction <add>, %75, %cst_32 [1] : vector<32x128xf32> to vector<32xf32>
    %77 = vector.shape_cast %76 : vector<32xf32> to vector<32x1xf32>
    %78 = vector.shape_cast %77 : vector<32x1xf32> to vector<1x32x1xf32>
    %c0_33 = arith.constant 0 : index
    %c0_34 = arith.constant 0 : index
    %c0_35 = arith.constant 0 : index
    %79 = vector.load %arg12[%c0_33, %c0_34, %c0_35] : memref<1x32x1xf32, #tpu.memory_space<vmem>>, vector<1x32x1xf32>
    tpu.vector_store %arg12[%c0_33, %c0_34, %c0_35], %78 {strides = array<i32>} : memref<1x32x1xf32, #tpu.memory_space<vmem>>, vector<1x32x1xf32>,
    %80 = arith.mulf %75, %70 : vector<32x128xf32>
    %cst_36 = arith.constant dense<0.000000e+00> : vector<32xf32>
    %81 = vector.multi_reduction <add>, %80, %cst_36 [1] : vector<32x128xf32> to vector<32xf32>
    %82 = vector.shape_cast %81 : vector<32xf32> to vector<32x1xf32>
    %83 = vector.shape_cast %82 : vector<32x1xf32> to vector<1x32x1xf32>
    %c0_37 = arith.constant 0 : index
    %c0_38 = arith.constant 0 : index
    %c0_39 = arith.constant 0 : index
    %84 = vector.load %arg13[%c0_37, %c0_38, %c0_39] : memref<1x32x1xf32, #tpu.memory_space<vmem>>, vector<1x32x1xf32>
    tpu.vector_store %arg13[%c0_37, %c0_38, %c0_39], %83 {strides = array<i32>} : memref<1x32x1xf32, #tpu.memory_space<vmem>>, vector<1x32x1xf32>,
    return
  }
  func.func @transform_0(%arg0: i32) -> (i32, i32) {
    %c0_i32 = arith.constant 0 : i32
    %c0_i32_0 = arith.constant 0 : i32
    return %c0_i32, %arg0 : i32, i32
  }
  func.func @transform_1(%arg0: i32) -> (i32, i32) {
    %c1_i32 = arith.constant 1 : i32
    %0 = arith.addi %arg0, %c1_i32 : i32
    %c0_i32 = arith.constant 0 : i32
    %c0_i32_0 = arith.constant 0 : i32
    return %c0_i32, %0 : i32, i32
  }
  func.func @transform_2(%arg0: i32) -> (i32, i32) {
    %c0_i32 = arith.constant 0 : i32
    %c0_i32_0 = arith.constant 0 : i32
    %c0_i32_1 = arith.constant 0 : i32
    return %c0_i32, %c0_i32_0 : i32, i32
  }
  func.func @transform_3(%arg0: i32) -> (i32, i32) {
    %c0_i32 = arith.constant 0 : i32
    %c0_i32_0 = arith.constant 0 : i32
    %c0_i32_1 = arith.constant 0 : i32
    return %c0_i32, %c0_i32_0 : i32, i32
  }
  func.func @transform_4(%arg0: i32) -> (i32, i32) {
    %c0_i32 = arith.constant 0 : i32
    %c0_i32_0 = arith.constant 0 : i32
    return %c0_i32, %arg0 : i32, i32
  }
  func.func @transform_5(%arg0: i32) -> (i32, i32) {
    %c1_i32 = arith.constant 1 : i32
    %0 = arith.addi %arg0, %c1_i32 : i32
    %c0_i32 = arith.constant 0 : i32
    %c0_i32_0 = arith.constant 0 : i32
    return %c0_i32, %0 : i32, i32
  }
  func.func @transform_6(%arg0: i32) -> (i32, i32, i32) {
    %c0_i32 = arith.constant 0 : i32
    %c0_i32_0 = arith.constant 0 : i32
    %c0_i32_1 = arith.constant 0 : i32
    %c0_i32_2 = arith.constant 0 : i32
    return %c0_i32, %c0_i32_0, %c0_i32_1 : i32, i32, i32
  }
  func.func @transform_7(%arg0: i32) -> (i32, i32) {
    %c0_i32 = arith.constant 0 : i32
    %c0_i32_0 = arith.constant 0 : i32
    %c0_i32_1 = arith.constant 0 : i32
    return %c0_i32, %c0_i32_0 : i32, i32
  }
  func.func @transform_8(%arg0: i32) -> (i32, i32) {
    %c0_i32 = arith.constant 0 : i32
    %c0_i32_0 = arith.constant 0 : i32
    return %c0_i32, %arg0 : i32, i32
  }
  func.func @transform_9(%arg0: i32) -> (i32, i32) {
    %c0_i32 = arith.constant 0 : i32
    %c0_i32_0 = arith.constant 0 : i32
    return %c0_i32, %arg0 : i32, i32
  }
  func.func @transform_10(%arg0: i32) -> (i32, i32) {
    %c0_i32 = arith.constant 0 : i32
    %c0_i32_0 = arith.constant 0 : i32
    return %c0_i32, %arg0 : i32, i32
  }
  func.func @transform_11(%arg0: i32) -> (i32, i32, i32) {
    %c0_i32 = arith.constant 0 : i32
    %c0_i32_0 = arith.constant 0 : i32
    %c0_i32_1 = arith.constant 0 : i32
    return %arg0, %c0_i32, %c0_i32_0 : i32, i32, i32
  }
  func.func @transform_12(%arg0: i32) -> (i32, i32, i32) {
    %c0_i32 = arith.constant 0 : i32
    %c0_i32_0 = arith.constant 0 : i32
    %c0_i32_1 = arith.constant 0 : i32
    return %arg0, %c0_i32, %c0_i32_0 : i32, i32, i32
  }
}

module attributes {stable_mosaic.version = 11 : i64} {
  func.func @_conv_kernel(%arg0: i32, %arg1: memref<32x128xbf16, #tpu.memory_space<vmem>>, %arg2: memref<32x128xbf16, #tpu.memory_space<vmem>>, %arg3: memref<32x1xf32, #tpu.memory_space<vmem>>, %arg4: memref<32x1xf32, #tpu.memory_space<vmem>>, %arg5: memref<1x128xf32, #tpu.memory_space<vmem>>, %arg6: memref<1x128xf32, #tpu.memory_space<vmem>>, %arg7: memref<9x32x32xbf16, #tpu.memory_space<vmem>>, %arg8: memref<32x1xf32, #tpu.memory_space<vmem>>, %arg9: memref<32x128xbf16, #tpu.memory_space<vmem>>, %arg10: memref<1x128xf32, #tpu.memory_space<vmem>>, %arg11: memref<32x128xbf16, #tpu.memory_space<vmem>>, %arg12: memref<1x32x1xf32, #tpu.memory_space<vmem>>, %arg13: memref<1x32x1xf32, #tpu.memory_space<vmem>>) attributes {dimension_semantics = [#tpu.dimension_semantics<parallel>], iteration_bounds = array<i64: 1>, scalar_prefetch = 0 : i64, scratch_operands = 0 : i64, tpu.core_type = #tpu.core_type<tc>, window_params = [{transform_indices = @transform_0, window_bounds = array<i64: 32, 128>}, {transform_indices = @transform_1, window_bounds = array<i64: 32, 128>}, {pipeline_mode = #tpu.pipeline_mode<synchronous>, transform_indices = @transform_2, window_bounds = array<i64: 32, 1>}, {pipeline_mode = #tpu.pipeline_mode<synchronous>, transform_indices = @transform_3, window_bounds = array<i64: 32, 1>}, {transform_indices = @transform_4, window_bounds = array<i64: 1, 128>}, {transform_indices = @transform_5, window_bounds = array<i64: 1, 128>}, {pipeline_mode = #tpu.pipeline_mode<synchronous>, transform_indices = @transform_6, window_bounds = array<i64: 9, 32, 32>}, {pipeline_mode = #tpu.pipeline_mode<synchronous>, transform_indices = @transform_7, window_bounds = array<i64: 32, 1>}, {transform_indices = @transform_8, window_bounds = array<i64: 32, 128>}, {transform_indices = @transform_9, window_bounds = array<i64: 1, 128>}, {transform_indices = @transform_10, window_bounds = array<i64: 32, 128>}, {transform_indices = @transform_11, window_bounds = array<i64: 1, 32, 1>}, {transform_indices = @transform_12, window_bounds = array<i64: 1, 32, 1>}]} {
    %c0 = arith.constant 0 : index
    %c0_0 = arith.constant 0 : index
    %0 = vector.load %arg1[%c0, %c0_0] : memref<32x128xbf16, #tpu.memory_space<vmem>>, vector<32x128xbf16>
    %c0_1 = arith.constant 0 : index
    %c0_2 = arith.constant 0 : index
    %1 = vector.load %arg2[%c0_1, %c0_2] : memref<32x128xbf16, #tpu.memory_space<vmem>>, vector<32x128xbf16>
    %2 = tpu.concatenate %0, %1 in 1 : vector<32x128xbf16>, vector<32x128xbf16> -> vector<32x256xbf16>
    %3 = arith.extf %2 : vector<32x256xbf16> to vector<32x256xf32>
    %c0_3 = arith.constant 0 : index
    %c0_4 = arith.constant 0 : index
    %4 = vector.load %arg3[%c0_3, %c0_4] : memref<32x1xf32, #tpu.memory_space<vmem>>, vector<32x1xf32>
    %5 = vector.broadcast %4 : vector<32x1xf32> to vector<32x256xf32>
    %6 = arith.mulf %3, %5 : vector<32x256xf32>
    %c0_5 = arith.constant 0 : index
    %c0_6 = arith.constant 0 : index
    %7 = vector.load %arg4[%c0_5, %c0_6] : memref<32x1xf32, #tpu.memory_space<vmem>>, vector<32x1xf32>
    %8 = vector.broadcast %7 : vector<32x1xf32> to vector<32x256xf32>
    %9 = arith.addf %6, %8 : vector<32x256xf32>
    %cst = arith.constant 0.000000e+00 : f32
    %10 = vector.broadcast %cst : f32 to vector<32x256xf32>
    %11 = arith.maximumf %9, %10 : vector<32x256xf32>
    %c0_7 = arith.constant 0 : index
    %c0_8 = arith.constant 0 : index
    %12 = vector.load %arg5[%c0_7, %c0_8] : memref<1x128xf32, #tpu.memory_space<vmem>>, vector<1x128xf32>
    %c0_9 = arith.constant 0 : index
    %c0_10 = arith.constant 0 : index
    %13 = vector.load %arg6[%c0_9, %c0_10] : memref<1x128xf32, #tpu.memory_space<vmem>>, vector<1x128xf32>
    %14 = tpu.concatenate %12, %13 in 1 : vector<1x128xf32>, vector<1x128xf32> -> vector<1x256xf32>
    %15 = vector.broadcast %14 : vector<1x256xf32> to vector<32x256xf32>
    %16 = arith.mulf %11, %15 : vector<32x256xf32>
    %17 = arith.truncf %16 : vector<32x256xf32> to vector<32x256xbf16>
    %c0_11 = arith.constant 0 : index
    %c0_12 = arith.constant 0 : index
    %c0_13 = arith.constant 0 : index
    %18 = vector.load %arg7[%c0_11, %c0_12, %c0_13] : memref<9x32x32xbf16, #tpu.memory_space<vmem>>, vector<9x32x32xbf16>
    %cst_14 = arith.constant 0.000000e+00 : f32
    %19 = vector.broadcast %cst_14 : f32 to vector<32x128xf32>
    %20 = vector.extract_strided_slice %17 {offsets = [0, 0], sizes = [32, 128], strides = [1, 1]} : vector<32x256xbf16> to vector<32x128xbf16>
    %21 = vector.extract_strided_slice %18 {offsets = [0, 0, 0], sizes = [1, 32, 32], strides = [1, 1, 1]} : vector<9x32x32xbf16> to vector<1x32x32xbf16>
    %22 = vector.shape_cast %21 : vector<1x32x32xbf16> to vector<32x32xbf16>
    %cst_15 = arith.constant dense<0.000000e+00> : vector<32x128xf32>
    %23 = tpu.matmul %22, %20, %cst_15 {dimension_numbers = #tpu.dot_dimension_numbers<[1], [0], [0], [1], [0, 0, 1, 1], [], []>} : vector<32x32xbf16>, vector<32x128xbf16>, vector<32x128xf32> -> vector<32x128xf32>
    %24 = arith.addf %19, %23 : vector<32x128xf32>
    %25 = vector.extract_strided_slice %17 {offsets = [0, 1], sizes = [32, 128], strides = [1, 1]} : vector<32x256xbf16> to vector<32x128xbf16>
    %26 = vector.extract_strided_slice %18 {offsets = [1, 0, 0], sizes = [1, 32, 32], strides = [1, 1, 1]} : vector<9x32x32xbf16> to vector<1x32x32xbf16>
    %27 = vector.shape_cast %26 : vector<1x32x32xbf16> to vector<32x32xbf16>
    %cst_16 = arith.constant dense<0.000000e+00> : vector<32x128xf32>
    %28 = tpu.matmul %27, %25, %cst_16 {dimension_numbers = #tpu.dot_dimension_numbers<[1], [0], [0], [1], [0, 0, 1, 1], [], []>} : vector<32x32xbf16>, vector<32x128xbf16>, vector<32x128xf32> -> vector<32x128xf32>
    %29 = arith.addf %24, %28 : vector<32x128xf32>
    %30 = vector.extract_strided_slice %17 {offsets = [0, 2], sizes = [32, 128], strides = [1, 1]} : vector<32x256xbf16> to vector<32x128xbf16>
    %31 = vector.extract_strided_slice %18 {offsets = [2, 0, 0], sizes = [1, 32, 32], strides = [1, 1, 1]} : vector<9x32x32xbf16> to vector<1x32x32xbf16>
    %32 = vector.shape_cast %31 : vector<1x32x32xbf16> to vector<32x32xbf16>
    %cst_17 = arith.constant dense<0.000000e+00> : vector<32x128xf32>
    %33 = tpu.matmul %32, %30, %cst_17 {dimension_numbers = #tpu.dot_dimension_numbers<[1], [0], [0], [1], [0, 0, 1, 1], [], []>} : vector<32x32xbf16>, vector<32x128xbf16>, vector<32x128xf32> -> vector<32x128xf32>
    %34 = arith.addf %29, %33 : vector<32x128xf32>
    %35 = vector.extract_strided_slice %17 {offsets = [0, 6], sizes = [32, 128], strides = [1, 1]} : vector<32x256xbf16> to vector<32x128xbf16>
    %36 = vector.extract_strided_slice %18 {offsets = [3, 0, 0], sizes = [1, 32, 32], strides = [1, 1, 1]} : vector<9x32x32xbf16> to vector<1x32x32xbf16>
    %37 = vector.shape_cast %36 : vector<1x32x32xbf16> to vector<32x32xbf16>
    %cst_18 = arith.constant dense<0.000000e+00> : vector<32x128xf32>
    %38 = tpu.matmul %37, %35, %cst_18 {dimension_numbers = #tpu.dot_dimension_numbers<[1], [0], [0], [1], [0, 0, 1, 1], [], []>} : vector<32x32xbf16>, vector<32x128xbf16>, vector<32x128xf32> -> vector<32x128xf32>
    %39 = arith.addf %34, %38 : vector<32x128xf32>
    %40 = vector.extract_strided_slice %17 {offsets = [0, 7], sizes = [32, 128], strides = [1, 1]} : vector<32x256xbf16> to vector<32x128xbf16>
    %41 = vector.extract_strided_slice %18 {offsets = [4, 0, 0], sizes = [1, 32, 32], strides = [1, 1, 1]} : vector<9x32x32xbf16> to vector<1x32x32xbf16>
    %42 = vector.shape_cast %41 : vector<1x32x32xbf16> to vector<32x32xbf16>
    %cst_19 = arith.constant dense<0.000000e+00> : vector<32x128xf32>
    %43 = tpu.matmul %42, %40, %cst_19 {dimension_numbers = #tpu.dot_dimension_numbers<[1], [0], [0], [1], [0, 0, 1, 1], [], []>} : vector<32x32xbf16>, vector<32x128xbf16>, vector<32x128xf32> -> vector<32x128xf32>
    %44 = arith.addf %39, %43 : vector<32x128xf32>
    %45 = vector.extract_strided_slice %17 {offsets = [0, 8], sizes = [32, 128], strides = [1, 1]} : vector<32x256xbf16> to vector<32x128xbf16>
    %46 = vector.extract_strided_slice %18 {offsets = [5, 0, 0], sizes = [1, 32, 32], strides = [1, 1, 1]} : vector<9x32x32xbf16> to vector<1x32x32xbf16>
    %47 = vector.shape_cast %46 : vector<1x32x32xbf16> to vector<32x32xbf16>
    %cst_20 = arith.constant dense<0.000000e+00> : vector<32x128xf32>
    %48 = tpu.matmul %47, %45, %cst_20 {dimension_numbers = #tpu.dot_dimension_numbers<[1], [0], [0], [1], [0, 0, 1, 1], [], []>} : vector<32x32xbf16>, vector<32x128xbf16>, vector<32x128xf32> -> vector<32x128xf32>
    %49 = arith.addf %44, %48 : vector<32x128xf32>
    %50 = vector.extract_strided_slice %17 {offsets = [0, 12], sizes = [32, 128], strides = [1, 1]} : vector<32x256xbf16> to vector<32x128xbf16>
    %51 = vector.extract_strided_slice %18 {offsets = [6, 0, 0], sizes = [1, 32, 32], strides = [1, 1, 1]} : vector<9x32x32xbf16> to vector<1x32x32xbf16>
    %52 = vector.shape_cast %51 : vector<1x32x32xbf16> to vector<32x32xbf16>
    %cst_21 = arith.constant dense<0.000000e+00> : vector<32x128xf32>
    %53 = tpu.matmul %52, %50, %cst_21 {dimension_numbers = #tpu.dot_dimension_numbers<[1], [0], [0], [1], [0, 0, 1, 1], [], []>} : vector<32x32xbf16>, vector<32x128xbf16>, vector<32x128xf32> -> vector<32x128xf32>
    %54 = arith.addf %49, %53 : vector<32x128xf32>
    %55 = vector.extract_strided_slice %17 {offsets = [0, 13], sizes = [32, 128], strides = [1, 1]} : vector<32x256xbf16> to vector<32x128xbf16>
    %56 = vector.extract_strided_slice %18 {offsets = [7, 0, 0], sizes = [1, 32, 32], strides = [1, 1, 1]} : vector<9x32x32xbf16> to vector<1x32x32xbf16>
    %57 = vector.shape_cast %56 : vector<1x32x32xbf16> to vector<32x32xbf16>
    %cst_22 = arith.constant dense<0.000000e+00> : vector<32x128xf32>
    %58 = tpu.matmul %57, %55, %cst_22 {dimension_numbers = #tpu.dot_dimension_numbers<[1], [0], [0], [1], [0, 0, 1, 1], [], []>} : vector<32x32xbf16>, vector<32x128xbf16>, vector<32x128xf32> -> vector<32x128xf32>
    %59 = arith.addf %54, %58 : vector<32x128xf32>
    %60 = vector.extract_strided_slice %17 {offsets = [0, 14], sizes = [32, 128], strides = [1, 1]} : vector<32x256xbf16> to vector<32x128xbf16>
    %61 = vector.extract_strided_slice %18 {offsets = [8, 0, 0], sizes = [1, 32, 32], strides = [1, 1, 1]} : vector<9x32x32xbf16> to vector<1x32x32xbf16>
    %62 = vector.shape_cast %61 : vector<1x32x32xbf16> to vector<32x32xbf16>
    %cst_23 = arith.constant dense<0.000000e+00> : vector<32x128xf32>
    %63 = tpu.matmul %62, %60, %cst_23 {dimension_numbers = #tpu.dot_dimension_numbers<[1], [0], [0], [1], [0, 0, 1, 1], [], []>} : vector<32x32xbf16>, vector<32x128xbf16>, vector<32x128xf32> -> vector<32x128xf32>
    %64 = arith.addf %59, %63 : vector<32x128xf32>
    %c0_24 = arith.constant 0 : index
    %c0_25 = arith.constant 0 : index
    %65 = vector.load %arg8[%c0_24, %c0_25] : memref<32x1xf32, #tpu.memory_space<vmem>>, vector<32x1xf32>
    %66 = vector.broadcast %65 : vector<32x1xf32> to vector<32x128xf32>
    %67 = arith.addf %64, %66 : vector<32x128xf32>
    %c0_26 = arith.constant 0 : index
    %c0_27 = arith.constant 0 : index
    %68 = vector.load %arg9[%c0_26, %c0_27] : memref<32x128xbf16, #tpu.memory_space<vmem>>, vector<32x128xbf16>
    %69 = arith.extf %68 : vector<32x128xbf16> to vector<32x128xf32>
    %70 = arith.addf %67, %69 : vector<32x128xf32>
    %71 = arith.truncf %70 : vector<32x128xf32> to vector<32x128xbf16>
    %c0_28 = arith.constant 0 : index
    %c0_29 = arith.constant 0 : index
    %72 = vector.load %arg11[%c0_28, %c0_29] : memref<32x128xbf16, #tpu.memory_space<vmem>>, vector<32x128xbf16>
    tpu.vector_store %arg11[%c0_28, %c0_29], %71 {strides = array<i32>} : memref<32x128xbf16, #tpu.memory_space<vmem>>, vector<32x128xbf16>,
    %c0_30 = arith.constant 0 : index
    %c0_31 = arith.constant 0 : index
    %73 = vector.load %arg10[%c0_30, %c0_31] : memref<1x128xf32, #tpu.memory_space<vmem>>, vector<1x128xf32>
    %74 = vector.broadcast %73 : vector<1x128xf32> to vector<32x128xf32>
    %75 = arith.mulf %70, %74 : vector<32x128xf32>
    %cst_32 = arith.constant dense<0.000000e+00> : vector<32xf32>
    %76 = vector.multi_reduction <add>, %75, %cst_32 [1] : vector<32x128xf32> to vector<32xf32>
    %77 = vector.shape_cast %76 : vector<32xf32> to vector<32x1xf32>
    %78 = vector.shape_cast %77 : vector<32x1xf32> to vector<1x32x1xf32>
    %c0_33 = arith.constant 0 : index
    %c0_34 = arith.constant 0 : index
    %c0_35 = arith.constant 0 : index
    %79 = vector.load %arg12[%c0_33, %c0_34, %c0_35] : memref<1x32x1xf32, #tpu.memory_space<vmem>>, vector<1x32x1xf32>
    tpu.vector_store %arg12[%c0_33, %c0_34, %c0_35], %78 {strides = array<i32>} : memref<1x32x1xf32, #tpu.memory_space<vmem>>, vector<1x32x1xf32>,
    %80 = arith.mulf %75, %70 : vector<32x128xf32>
    %cst_36 = arith.constant dense<0.000000e+00> : vector<32xf32>
    %81 = vector.multi_reduction <add>, %80, %cst_36 [1] : vector<32x128xf32> to vector<32xf32>
    %82 = vector.shape_cast %81 : vector<32xf32> to vector<32x1xf32>
    %83 = vector.shape_cast %82 : vector<32x1xf32> to vector<1x32x1xf32>
    %c0_37 = arith.constant 0 : index
    %c0_38 = arith.constant 0 : index
    %c0_39 = arith.constant 0 : index
    %84 = vector.load %arg13[%c0_37, %c0_38, %c0_39] : memref<1x32x1xf32, #tpu.memory_space<vmem>>, vector<1x32x1xf32>
    tpu.vector_store %arg13[%c0_37, %c0_38, %c0_39], %83 {strides = array<i32>} : memref<1x32x1xf32, #tpu.memory_space<vmem>>, vector<1x32x1xf32>,
    return
  }
  func.func @transform_0(%arg0: i32) -> (i32, i32) {
    %c0_i32 = arith.constant 0 : i32
    %c0_i32_0 = arith.constant 0 : i32
    return %c0_i32, %arg0 : i32, i32
  }
  func.func @transform_1(%arg0: i32) -> (i32, i32) {
    %c1_i32 = arith.constant 1 : i32
    %0 = arith.addi %arg0, %c1_i32 : i32
    %c0_i32 = arith.constant 0 : i32
    %c0_i32_0 = arith.constant 0 : i32
    return %c0_i32, %0 : i32, i32
  }
  func.func @transform_2(%arg0: i32) -> (i32, i32) {
    %c0_i32 = arith.constant 0 : i32
    %c0_i32_0 = arith.constant 0 : i32
    %c0_i32_1 = arith.constant 0 : i32
    return %c0_i32, %c0_i32_0 : i32, i32
  }
  func.func @transform_3(%arg0: i32) -> (i32, i32) {
    %c0_i32 = arith.constant 0 : i32
    %c0_i32_0 = arith.constant 0 : i32
    %c0_i32_1 = arith.constant 0 : i32
    return %c0_i32, %c0_i32_0 : i32, i32
  }
  func.func @transform_4(%arg0: i32) -> (i32, i32) {
    %c0_i32 = arith.constant 0 : i32
    %c0_i32_0 = arith.constant 0 : i32
    return %c0_i32, %arg0 : i32, i32
  }
  func.func @transform_5(%arg0: i32) -> (i32, i32) {
    %c1_i32 = arith.constant 1 : i32
    %0 = arith.addi %arg0, %c1_i32 : i32
    %c0_i32 = arith.constant 0 : i32
    %c0_i32_0 = arith.constant 0 : i32
    return %c0_i32, %0 : i32, i32
  }
  func.func @transform_6(%arg0: i32) -> (i32, i32, i32) {
    %c0_i32 = arith.constant 0 : i32
    %c0_i32_0 = arith.constant 0 : i32
    %c0_i32_1 = arith.constant 0 : i32
    %c0_i32_2 = arith.constant 0 : i32
    return %c0_i32, %c0_i32_0, %c0_i32_1 : i32, i32, i32
  }
  func.func @transform_7(%arg0: i32) -> (i32, i32) {
    %c0_i32 = arith.constant 0 : i32
    %c0_i32_0 = arith.constant 0 : i32
    %c0_i32_1 = arith.constant 0 : i32
    return %c0_i32, %c0_i32_0 : i32, i32
  }
  func.func @transform_8(%arg0: i32) -> (i32, i32) {
    %c0_i32 = arith.constant 0 : i32
    %c0_i32_0 = arith.constant 0 : i32
    return %c0_i32, %arg0 : i32, i32
  }
  func.func @transform_9(%arg0: i32) -> (i32, i32) {
    %c0_i32 = arith.constant 0 : i32
    %c0_i32_0 = arith.constant 0 : i32
    return %c0_i32, %arg0 : i32, i32
  }
  func.func @transform_10(%arg0: i32) -> (i32, i32) {
    %c0_i32 = arith.constant 0 : i32
    %c0_i32_0 = arith.constant 0 : i32
    return %c0_i32, %arg0 : i32, i32
  }
  func.func @transform_11(%arg0: i32) -> (i32, i32, i32) {
    %c0_i32 = arith.constant 0 : i32
    %c0_i32_0 = arith.constant 0 : i32
    %c0_i32_1 = arith.constant 0 : i32
    return %arg0, %c0_i32, %c0_i32_0 : i32, i32, i32
  }
  func.func @transform_12(%arg0: i32) -> (i32, i32, i32) {
    %c0_i32 = arith.constant 0 : i32
    %c0_i32_0 = arith.constant 0 : i32
    %c0_i32_1 = arith.constant 0 : i32
    return %arg0, %c0_i32, %c0_i32_0 : i32, i32, i32
  }
}

module attributes {stable_mosaic.version = 11 : i64} {
  func.func @_conv_kernel(%arg0: i32, %arg1: memref<32x128xbf16, #tpu.memory_space<vmem>>, %arg2: memref<32x128xbf16, #tpu.memory_space<vmem>>, %arg3: memref<4x64x32xbf16, #tpu.memory_space<vmem>>, %arg4: memref<1x128xf32, #tpu.memory_space<vmem>>, %arg5: memref<64x128xbf16, #tpu.memory_space<vmem>>, %arg6: memref<1x64x1xf32, #tpu.memory_space<vmem>>, %arg7: memref<1x64x1xf32, #tpu.memory_space<vmem>>) attributes {dimension_semantics = [#tpu.dimension_semantics<parallel>], iteration_bounds = array<i64: 1>, scalar_prefetch = 0 : i64, scratch_operands = 0 : i64, tpu.core_type = #tpu.core_type<tc>, window_params = [{transform_indices = @transform_0, window_bounds = array<i64: 32, 128>}, {transform_indices = @transform_1, window_bounds = array<i64: 32, 128>}, {pipeline_mode = #tpu.pipeline_mode<synchronous>, transform_indices = @transform_2, window_bounds = array<i64: 4, 64, 32>}, {transform_indices = @transform_3, window_bounds = array<i64: 1, 128>}, {transform_indices = @transform_4, window_bounds = array<i64: 64, 128>}, {transform_indices = @transform_5, window_bounds = array<i64: 1, 64, 1>}, {transform_indices = @transform_6, window_bounds = array<i64: 1, 64, 1>}]} {
    %c0 = arith.constant 0 : index
    %c0_0 = arith.constant 0 : index
    %0 = vector.load %arg1[%c0, %c0_0] : memref<32x128xbf16, #tpu.memory_space<vmem>>, vector<32x128xbf16>
    %c0_1 = arith.constant 0 : index
    %c0_2 = arith.constant 0 : index
    %1 = vector.load %arg2[%c0_1, %c0_2] : memref<32x128xbf16, #tpu.memory_space<vmem>>, vector<32x128xbf16>
    %2 = tpu.concatenate %0, %1 in 1 : vector<32x128xbf16>, vector<32x128xbf16> -> vector<32x256xbf16>
    %c0_3 = arith.constant 0 : index
    %c0_4 = arith.constant 0 : index
    %c0_5 = arith.constant 0 : index
    %3 = vector.load %arg3[%c0_3, %c0_4, %c0_5] : memref<4x64x32xbf16, #tpu.memory_space<vmem>>, vector<4x64x32xbf16>
    %cst = arith.constant 0.000000e+00 : f32
    %4 = vector.broadcast %cst : f32 to vector<64x128xf32>
    %5 = vector.extract_strided_slice %2 {offsets = [0, 0], sizes = [32, 128], strides = [1, 1]} : vector<32x256xbf16> to vector<32x128xbf16>
    %6 = vector.extract_strided_slice %3 {offsets = [0, 0, 0], sizes = [1, 64, 32], strides = [1, 1, 1]} : vector<4x64x32xbf16> to vector<1x64x32xbf16>
    %7 = vector.shape_cast %6 : vector<1x64x32xbf16> to vector<64x32xbf16>
    %cst_6 = arith.constant dense<0.000000e+00> : vector<64x128xf32>
    %8 = tpu.matmul %7, %5, %cst_6 {dimension_numbers = #tpu.dot_dimension_numbers<[1], [0], [0], [1], [0, 0, 1, 1], [], []>} : vector<64x32xbf16>, vector<32x128xbf16>, vector<64x128xf32> -> vector<64x128xf32>
    %9 = arith.addf %4, %8 : vector<64x128xf32>
    %10 = vector.extract_strided_slice %2 {offsets = [0, 1], sizes = [32, 128], strides = [1, 1]} : vector<32x256xbf16> to vector<32x128xbf16>
    %11 = vector.extract_strided_slice %3 {offsets = [1, 0, 0], sizes = [1, 64, 32], strides = [1, 1, 1]} : vector<4x64x32xbf16> to vector<1x64x32xbf16>
    %12 = vector.shape_cast %11 : vector<1x64x32xbf16> to vector<64x32xbf16>
    %cst_7 = arith.constant dense<0.000000e+00> : vector<64x128xf32>
    %13 = tpu.matmul %12, %10, %cst_7 {dimension_numbers = #tpu.dot_dimension_numbers<[1], [0], [0], [1], [0, 0, 1, 1], [], []>} : vector<64x32xbf16>, vector<32x128xbf16>, vector<64x128xf32> -> vector<64x128xf32>
    %14 = arith.addf %9, %13 : vector<64x128xf32>
    %15 = vector.extract_strided_slice %2 {offsets = [0, 5], sizes = [32, 128], strides = [1, 1]} : vector<32x256xbf16> to vector<32x128xbf16>
    %16 = vector.extract_strided_slice %3 {offsets = [2, 0, 0], sizes = [1, 64, 32], strides = [1, 1, 1]} : vector<4x64x32xbf16> to vector<1x64x32xbf16>
    %17 = vector.shape_cast %16 : vector<1x64x32xbf16> to vector<64x32xbf16>
    %cst_8 = arith.constant dense<0.000000e+00> : vector<64x128xf32>
    %18 = tpu.matmul %17, %15, %cst_8 {dimension_numbers = #tpu.dot_dimension_numbers<[1], [0], [0], [1], [0, 0, 1, 1], [], []>} : vector<64x32xbf16>, vector<32x128xbf16>, vector<64x128xf32> -> vector<64x128xf32>
    %19 = arith.addf %14, %18 : vector<64x128xf32>
    %20 = vector.extract_strided_slice %2 {offsets = [0, 6], sizes = [32, 128], strides = [1, 1]} : vector<32x256xbf16> to vector<32x128xbf16>
    %21 = vector.extract_strided_slice %3 {offsets = [3, 0, 0], sizes = [1, 64, 32], strides = [1, 1, 1]} : vector<4x64x32xbf16> to vector<1x64x32xbf16>
    %22 = vector.shape_cast %21 : vector<1x64x32xbf16> to vector<64x32xbf16>
    %cst_9 = arith.constant dense<0.000000e+00> : vector<64x128xf32>
    %23 = tpu.matmul %22, %20, %cst_9 {dimension_numbers = #tpu.dot_dimension_numbers<[1], [0], [0], [1], [0, 0, 1, 1], [], []>} : vector<64x32xbf16>, vector<32x128xbf16>, vector<64x128xf32> -> vector<64x128xf32>
    %24 = arith.addf %19, %23 : vector<64x128xf32>
    %25 = arith.truncf %24 : vector<64x128xf32> to vector<64x128xbf16>
    %c0_10 = arith.constant 0 : index
    %c0_11 = arith.constant 0 : index
    %26 = vector.load %arg5[%c0_10, %c0_11] : memref<64x128xbf16, #tpu.memory_space<vmem>>, vector<64x128xbf16>
    tpu.vector_store %arg5[%c0_10, %c0_11], %25 {strides = array<i32>} : memref<64x128xbf16, #tpu.memory_space<vmem>>, vector<64x128xbf16>,
    %c0_12 = arith.constant 0 : index
    %c0_13 = arith.constant 0 : index
    %27 = vector.load %arg4[%c0_12, %c0_13] : memref<1x128xf32, #tpu.memory_space<vmem>>, vector<1x128xf32>
    %28 = vector.broadcast %27 : vector<1x128xf32> to vector<64x128xf32>
    %29 = arith.mulf %24, %28 : vector<64x128xf32>
    %cst_14 = arith.constant dense<0.000000e+00> : vector<64xf32>
    %30 = vector.multi_reduction <add>, %29, %cst_14 [1] : vector<64x128xf32> to vector<64xf32>
    %31 = vector.shape_cast %30 : vector<64xf32> to vector<64x1xf32>
    %32 = vector.shape_cast %31 : vector<64x1xf32> to vector<1x64x1xf32>
    %c0_15 = arith.constant 0 : index
    %c0_16 = arith.constant 0 : index
    %c0_17 = arith.constant 0 : index
    %33 = vector.load %arg6[%c0_15, %c0_16, %c0_17] : memref<1x64x1xf32, #tpu.memory_space<vmem>>, vector<1x64x1xf32>
    tpu.vector_store %arg6[%c0_15, %c0_16, %c0_17], %32 {strides = array<i32>} : memref<1x64x1xf32, #tpu.memory_space<vmem>>, vector<1x64x1xf32>,
    %34 = arith.mulf %29, %24 : vector<64x128xf32>
    %cst_18 = arith.constant dense<0.000000e+00> : vector<64xf32>
    %35 = vector.multi_reduction <add>, %34, %cst_18 [1] : vector<64x128xf32> to vector<64xf32>
    %36 = vector.shape_cast %35 : vector<64xf32> to vector<64x1xf32>
    %37 = vector.shape_cast %36 : vector<64x1xf32> to vector<1x64x1xf32>
    %c0_19 = arith.constant 0 : index
    %c0_20 = arith.constant 0 : index
    %c0_21 = arith.constant 0 : index
    %38 = vector.load %arg7[%c0_19, %c0_20, %c0_21] : memref<1x64x1xf32, #tpu.memory_space<vmem>>, vector<1x64x1xf32>
    tpu.vector_store %arg7[%c0_19, %c0_20, %c0_21], %37 {strides = array<i32>} : memref<1x64x1xf32, #tpu.memory_space<vmem>>, vector<1x64x1xf32>,
    return
  }
  func.func @transform_0(%arg0: i32) -> (i32, i32) {
    %c0_i32 = arith.constant 0 : i32
    %c0_i32_0 = arith.constant 0 : i32
    return %c0_i32, %arg0 : i32, i32
  }
  func.func @transform_1(%arg0: i32) -> (i32, i32) {
    %c1_i32 = arith.constant 1 : i32
    %0 = arith.addi %arg0, %c1_i32 : i32
    %c0_i32 = arith.constant 0 : i32
    %c0_i32_0 = arith.constant 0 : i32
    return %c0_i32, %0 : i32, i32
  }
  func.func @transform_2(%arg0: i32) -> (i32, i32, i32) {
    %c0_i32 = arith.constant 0 : i32
    %c0_i32_0 = arith.constant 0 : i32
    %c0_i32_1 = arith.constant 0 : i32
    %c0_i32_2 = arith.constant 0 : i32
    return %c0_i32, %c0_i32_0, %c0_i32_1 : i32, i32, i32
  }
  func.func @transform_3(%arg0: i32) -> (i32, i32) {
    %c0_i32 = arith.constant 0 : i32
    %c0_i32_0 = arith.constant 0 : i32
    return %c0_i32, %arg0 : i32, i32
  }
  func.func @transform_4(%arg0: i32) -> (i32, i32) {
    %c0_i32 = arith.constant 0 : i32
    %c0_i32_0 = arith.constant 0 : i32
    return %c0_i32, %arg0 : i32, i32
  }
  func.func @transform_5(%arg0: i32) -> (i32, i32, i32) {
    %c0_i32 = arith.constant 0 : i32
    %c0_i32_0 = arith.constant 0 : i32
    %c0_i32_1 = arith.constant 0 : i32
    return %arg0, %c0_i32, %c0_i32_0 : i32, i32, i32
  }
  func.func @transform_6(%arg0: i32) -> (i32, i32, i32) {
    %c0_i32 = arith.constant 0 : i32
    %c0_i32_0 = arith.constant 0 : i32
    %c0_i32_1 = arith.constant 0 : i32
    return %arg0, %c0_i32, %c0_i32_0 : i32, i32, i32
  }
}

module attributes {stable_mosaic.version = 11 : i64} {
  func.func @_conv_kernel(%arg0: i32, %arg1: memref<16x128xbf16, #tpu.memory_space<vmem>>, %arg2: memref<16x128xbf16, #tpu.memory_space<vmem>>, %arg3: memref<4x32x16xbf16, #tpu.memory_space<vmem>>, %arg4: memref<1x128xf32, #tpu.memory_space<vmem>>, %arg5: memref<32x128xbf16, #tpu.memory_space<vmem>>, %arg6: memref<1x32x1xf32, #tpu.memory_space<vmem>>, %arg7: memref<1x32x1xf32, #tpu.memory_space<vmem>>) attributes {dimension_semantics = [#tpu.dimension_semantics<parallel>], iteration_bounds = array<i64: 2>, scalar_prefetch = 0 : i64, scratch_operands = 0 : i64, tpu.core_type = #tpu.core_type<tc>, window_params = [{transform_indices = @transform_0, window_bounds = array<i64: 16, 128>}, {transform_indices = @transform_1, window_bounds = array<i64: 16, 128>}, {pipeline_mode = #tpu.pipeline_mode<synchronous>, transform_indices = @transform_2, window_bounds = array<i64: 4, 32, 16>}, {transform_indices = @transform_3, window_bounds = array<i64: 1, 128>}, {transform_indices = @transform_4, window_bounds = array<i64: 32, 128>}, {transform_indices = @transform_5, window_bounds = array<i64: 1, 32, 1>}, {transform_indices = @transform_6, window_bounds = array<i64: 1, 32, 1>}]} {
    %c0 = arith.constant 0 : index
    %c0_0 = arith.constant 0 : index
    %0 = vector.load %arg1[%c0, %c0_0] : memref<16x128xbf16, #tpu.memory_space<vmem>>, vector<16x128xbf16>
    %c0_1 = arith.constant 0 : index
    %c0_2 = arith.constant 0 : index
    %1 = vector.load %arg2[%c0_1, %c0_2] : memref<16x128xbf16, #tpu.memory_space<vmem>>, vector<16x128xbf16>
    %2 = tpu.concatenate %0, %1 in 1 : vector<16x128xbf16>, vector<16x128xbf16> -> vector<16x256xbf16>
    %c0_3 = arith.constant 0 : index
    %c0_4 = arith.constant 0 : index
    %c0_5 = arith.constant 0 : index
    %3 = vector.load %arg3[%c0_3, %c0_4, %c0_5] : memref<4x32x16xbf16, #tpu.memory_space<vmem>>, vector<4x32x16xbf16>
    %cst = arith.constant 0.000000e+00 : f32
    %4 = vector.broadcast %cst : f32 to vector<32x128xf32>
    %5 = vector.extract_strided_slice %2 {offsets = [0, 0], sizes = [16, 128], strides = [1, 1]} : vector<16x256xbf16> to vector<16x128xbf16>
    %6 = vector.extract_strided_slice %3 {offsets = [0, 0, 0], sizes = [1, 32, 16], strides = [1, 1, 1]} : vector<4x32x16xbf16> to vector<1x32x16xbf16>
    %7 = vector.shape_cast %6 : vector<1x32x16xbf16> to vector<32x16xbf16>
    %cst_6 = arith.constant dense<0.000000e+00> : vector<32x128xf32>
    %8 = tpu.matmul %7, %5, %cst_6 {dimension_numbers = #tpu.dot_dimension_numbers<[1], [0], [0], [1], [0, 0, 1, 1], [], []>} : vector<32x16xbf16>, vector<16x128xbf16>, vector<32x128xf32> -> vector<32x128xf32>
    %9 = arith.addf %4, %8 : vector<32x128xf32>
    %10 = vector.extract_strided_slice %2 {offsets = [0, 1], sizes = [16, 128], strides = [1, 1]} : vector<16x256xbf16> to vector<16x128xbf16>
    %11 = vector.extract_strided_slice %3 {offsets = [1, 0, 0], sizes = [1, 32, 16], strides = [1, 1, 1]} : vector<4x32x16xbf16> to vector<1x32x16xbf16>
    %12 = vector.shape_cast %11 : vector<1x32x16xbf16> to vector<32x16xbf16>
    %cst_7 = arith.constant dense<0.000000e+00> : vector<32x128xf32>
    %13 = tpu.matmul %12, %10, %cst_7 {dimension_numbers = #tpu.dot_dimension_numbers<[1], [0], [0], [1], [0, 0, 1, 1], [], []>} : vector<32x16xbf16>, vector<16x128xbf16>, vector<32x128xf32> -> vector<32x128xf32>
    %14 = arith.addf %9, %13 : vector<32x128xf32>
    %15 = vector.extract_strided_slice %2 {offsets = [0, 9], sizes = [16, 128], strides = [1, 1]} : vector<16x256xbf16> to vector<16x128xbf16>
    %16 = vector.extract_strided_slice %3 {offsets = [2, 0, 0], sizes = [1, 32, 16], strides = [1, 1, 1]} : vector<4x32x16xbf16> to vector<1x32x16xbf16>
    %17 = vector.shape_cast %16 : vector<1x32x16xbf16> to vector<32x16xbf16>
    %cst_8 = arith.constant dense<0.000000e+00> : vector<32x128xf32>
    %18 = tpu.matmul %17, %15, %cst_8 {dimension_numbers = #tpu.dot_dimension_numbers<[1], [0], [0], [1], [0, 0, 1, 1], [], []>} : vector<32x16xbf16>, vector<16x128xbf16>, vector<32x128xf32> -> vector<32x128xf32>
    %19 = arith.addf %14, %18 : vector<32x128xf32>
    %20 = vector.extract_strided_slice %2 {offsets = [0, 10], sizes = [16, 128], strides = [1, 1]} : vector<16x256xbf16> to vector<16x128xbf16>
    %21 = vector.extract_strided_slice %3 {offsets = [3, 0, 0], sizes = [1, 32, 16], strides = [1, 1, 1]} : vector<4x32x16xbf16> to vector<1x32x16xbf16>
    %22 = vector.shape_cast %21 : vector<1x32x16xbf16> to vector<32x16xbf16>
    %cst_9 = arith.constant dense<0.000000e+00> : vector<32x128xf32>
    %23 = tpu.matmul %22, %20, %cst_9 {dimension_numbers = #tpu.dot_dimension_numbers<[1], [0], [0], [1], [0, 0, 1, 1], [], []>} : vector<32x16xbf16>, vector<16x128xbf16>, vector<32x128xf32> -> vector<32x128xf32>
    %24 = arith.addf %19, %23 : vector<32x128xf32>
    %25 = arith.truncf %24 : vector<32x128xf32> to vector<32x128xbf16>
    %c0_10 = arith.constant 0 : index
    %c0_11 = arith.constant 0 : index
    %26 = vector.load %arg5[%c0_10, %c0_11] : memref<32x128xbf16, #tpu.memory_space<vmem>>, vector<32x128xbf16>
    tpu.vector_store %arg5[%c0_10, %c0_11], %25 {strides = array<i32>} : memref<32x128xbf16, #tpu.memory_space<vmem>>, vector<32x128xbf16>,
    %c0_12 = arith.constant 0 : index
    %c0_13 = arith.constant 0 : index
    %27 = vector.load %arg4[%c0_12, %c0_13] : memref<1x128xf32, #tpu.memory_space<vmem>>, vector<1x128xf32>
    %28 = vector.broadcast %27 : vector<1x128xf32> to vector<32x128xf32>
    %29 = arith.mulf %24, %28 : vector<32x128xf32>
    %cst_14 = arith.constant dense<0.000000e+00> : vector<32xf32>
    %30 = vector.multi_reduction <add>, %29, %cst_14 [1] : vector<32x128xf32> to vector<32xf32>
    %31 = vector.shape_cast %30 : vector<32xf32> to vector<32x1xf32>
    %32 = vector.shape_cast %31 : vector<32x1xf32> to vector<1x32x1xf32>
    %c0_15 = arith.constant 0 : index
    %c0_16 = arith.constant 0 : index
    %c0_17 = arith.constant 0 : index
    %33 = vector.load %arg6[%c0_15, %c0_16, %c0_17] : memref<1x32x1xf32, #tpu.memory_space<vmem>>, vector<1x32x1xf32>
    tpu.vector_store %arg6[%c0_15, %c0_16, %c0_17], %32 {strides = array<i32>} : memref<1x32x1xf32, #tpu.memory_space<vmem>>, vector<1x32x1xf32>,
    %34 = arith.mulf %29, %24 : vector<32x128xf32>
    %cst_18 = arith.constant dense<0.000000e+00> : vector<32xf32>
    %35 = vector.multi_reduction <add>, %34, %cst_18 [1] : vector<32x128xf32> to vector<32xf32>
    %36 = vector.shape_cast %35 : vector<32xf32> to vector<32x1xf32>
    %37 = vector.shape_cast %36 : vector<32x1xf32> to vector<1x32x1xf32>
    %c0_19 = arith.constant 0 : index
    %c0_20 = arith.constant 0 : index
    %c0_21 = arith.constant 0 : index
    %38 = vector.load %arg7[%c0_19, %c0_20, %c0_21] : memref<1x32x1xf32, #tpu.memory_space<vmem>>, vector<1x32x1xf32>
    tpu.vector_store %arg7[%c0_19, %c0_20, %c0_21], %37 {strides = array<i32>} : memref<1x32x1xf32, #tpu.memory_space<vmem>>, vector<1x32x1xf32>,
    return
  }
  func.func @transform_0(%arg0: i32) -> (i32, i32) {
    %c0_i32 = arith.constant 0 : i32
    %c0_i32_0 = arith.constant 0 : i32
    return %c0_i32, %arg0 : i32, i32
  }
  func.func @transform_1(%arg0: i32) -> (i32, i32) {
    %c1_i32 = arith.constant 1 : i32
    %0 = arith.addi %arg0, %c1_i32 : i32
    %c0_i32 = arith.constant 0 : i32
    %c0_i32_0 = arith.constant 0 : i32
    return %c0_i32, %0 : i32, i32
  }
  func.func @transform_2(%arg0: i32) -> (i32, i32, i32) {
    %c0_i32 = arith.constant 0 : i32
    %c0_i32_0 = arith.constant 0 : i32
    %c0_i32_1 = arith.constant 0 : i32
    %c0_i32_2 = arith.constant 0 : i32
    return %c0_i32, %c0_i32_0, %c0_i32_1 : i32, i32, i32
  }
  func.func @transform_3(%arg0: i32) -> (i32, i32) {
    %c0_i32 = arith.constant 0 : i32
    %c0_i32_0 = arith.constant 0 : i32
    return %c0_i32, %arg0 : i32, i32
  }
  func.func @transform_4(%arg0: i32) -> (i32, i32) {
    %c0_i32 = arith.constant 0 : i32
    %c0_i32_0 = arith.constant 0 : i32
    return %c0_i32, %arg0 : i32, i32
  }
  func.func @transform_5(%arg0: i32) -> (i32, i32, i32) {
    %c0_i32 = arith.constant 0 : i32
    %c0_i32_0 = arith.constant 0 : i32
    %c0_i32_1 = arith.constant 0 : i32
    return %arg0, %c0_i32, %c0_i32_0 : i32, i32, i32
  }
  func.func @transform_6(%arg0: i32) -> (i32, i32, i32) {
    %c0_i32 = arith.constant 0 : i32
    %c0_i32_0 = arith.constant 0 : i32
    %c0_i32_1 = arith.constant 0 : i32
    return %arg0, %c0_i32, %c0_i32_0 : i32, i32, i32
  }
}

module attributes {stable_mosaic.version = 11 : i64} {
  func.func @_conv_kernel(%arg0: i32, %arg1: memref<8x256xbf16, #tpu.memory_space<vmem>>, %arg2: memref<8x256xbf16, #tpu.memory_space<vmem>>, %arg3: memref<8x1xf32, #tpu.memory_space<vmem>>, %arg4: memref<8x1xf32, #tpu.memory_space<vmem>>, %arg5: memref<49x4x8xbf16, #tpu.memory_space<vmem>>, %arg6: memref<4x1xf32, #tpu.memory_space<vmem>>, %arg7: memref<4x256xf32, #tpu.memory_space<vmem>>) attributes {dimension_semantics = [#tpu.dimension_semantics<parallel>], iteration_bounds = array<i64: 4>, scalar_prefetch = 0 : i64, scratch_operands = 0 : i64, tpu.core_type = #tpu.core_type<tc>, window_params = [{transform_indices = @transform_0, window_bounds = array<i64: 8, 256>}, {transform_indices = @transform_1, window_bounds = array<i64: 8, 256>}, {pipeline_mode = #tpu.pipeline_mode<synchronous>, transform_indices = @transform_2, window_bounds = array<i64: 8, 1>}, {pipeline_mode = #tpu.pipeline_mode<synchronous>, transform_indices = @transform_3, window_bounds = array<i64: 8, 1>}, {pipeline_mode = #tpu.pipeline_mode<synchronous>, transform_indices = @transform_4, window_bounds = array<i64: 49, 4, 8>}, {pipeline_mode = #tpu.pipeline_mode<synchronous>, transform_indices = @transform_5, window_bounds = array<i64: 4, 1>}, {transform_indices = @transform_6, window_bounds = array<i64: 4, 256>}]} {
    %c0 = arith.constant 0 : index
    %c0_0 = arith.constant 0 : index
    %0 = vector.load %arg1[%c0, %c0_0] : memref<8x256xbf16, #tpu.memory_space<vmem>>, vector<8x256xbf16>
    %c0_1 = arith.constant 0 : index
    %c0_2 = arith.constant 0 : index
    %1 = vector.load %arg2[%c0_1, %c0_2] : memref<8x256xbf16, #tpu.memory_space<vmem>>, vector<8x256xbf16>
    %2 = tpu.concatenate %0, %1 in 1 : vector<8x256xbf16>, vector<8x256xbf16> -> vector<8x512xbf16>
    %3 = arith.extf %2 : vector<8x512xbf16> to vector<8x512xf32>
    %c0_3 = arith.constant 0 : index
    %c0_4 = arith.constant 0 : index
    %4 = vector.load %arg3[%c0_3, %c0_4] : memref<8x1xf32, #tpu.memory_space<vmem>>, vector<8x1xf32>
    %5 = vector.broadcast %4 : vector<8x1xf32> to vector<8x512xf32>
    %6 = arith.mulf %3, %5 : vector<8x512xf32>
    %c0_5 = arith.constant 0 : index
    %c0_6 = arith.constant 0 : index
    %7 = vector.load %arg4[%c0_5, %c0_6] : memref<8x1xf32, #tpu.memory_space<vmem>>, vector<8x1xf32>
    %8 = vector.broadcast %7 : vector<8x1xf32> to vector<8x512xf32>
    %9 = arith.addf %6, %8 : vector<8x512xf32>
    %cst = arith.constant 0.000000e+00 : f32
    %10 = vector.broadcast %cst : f32 to vector<8x512xf32>
    %11 = arith.maximumf %9, %10 : vector<8x512xf32>
    %12 = arith.truncf %11 : vector<8x512xf32> to vector<8x512xbf16>
    %c0_7 = arith.constant 0 : index
    %c0_8 = arith.constant 0 : index
    %c0_9 = arith.constant 0 : index
    %13 = vector.load %arg5[%c0_7, %c0_8, %c0_9] : memref<49x4x8xbf16, #tpu.memory_space<vmem>>, vector<49x4x8xbf16>
    %cst_10 = arith.constant 0.000000e+00 : f32
    %14 = vector.broadcast %cst_10 : f32 to vector<4x256xf32>
    %15 = vector.extract_strided_slice %12 {offsets = [0, 0], sizes = [8, 256], strides = [1, 1]} : vector<8x512xbf16> to vector<8x256xbf16>
    %16 = vector.extract_strided_slice %13 {offsets = [0, 0, 0], sizes = [1, 4, 8], strides = [1, 1, 1]} : vector<49x4x8xbf16> to vector<1x4x8xbf16>
    %17 = vector.shape_cast %16 : vector<1x4x8xbf16> to vector<4x8xbf16>
    %cst_11 = arith.constant dense<0.000000e+00> : vector<4x256xf32>
    %18 = tpu.matmul %17, %15, %cst_11 {dimension_numbers = #tpu.dot_dimension_numbers<[1], [0], [0], [1], [0, 0, 1, 1], [], []>} : vector<4x8xbf16>, vector<8x256xbf16>, vector<4x256xf32> -> vector<4x256xf32>
    %19 = arith.addf %14, %18 : vector<4x256xf32>
    %20 = vector.extract_strided_slice %12 {offsets = [0, 1], sizes = [8, 256], strides = [1, 1]} : vector<8x512xbf16> to vector<8x256xbf16>
    %21 = vector.extract_strided_slice %13 {offsets = [1, 0, 0], sizes = [1, 4, 8], strides = [1, 1, 1]} : vector<49x4x8xbf16> to vector<1x4x8xbf16>
    %22 = vector.shape_cast %21 : vector<1x4x8xbf16> to vector<4x8xbf16>
    %cst_12 = arith.constant dense<0.000000e+00> : vector<4x256xf32>
    %23 = tpu.matmul %22, %20, %cst_12 {dimension_numbers = #tpu.dot_dimension_numbers<[1], [0], [0], [1], [0, 0, 1, 1], [], []>} : vector<4x8xbf16>, vector<8x256xbf16>, vector<4x256xf32> -> vector<4x256xf32>
    %24 = arith.addf %19, %23 : vector<4x256xf32>
    %25 = vector.extract_strided_slice %12 {offsets = [0, 2], sizes = [8, 256], strides = [1, 1]} : vector<8x512xbf16> to vector<8x256xbf16>
    %26 = vector.extract_strided_slice %13 {offsets = [2, 0, 0], sizes = [1, 4, 8], strides = [1, 1, 1]} : vector<49x4x8xbf16> to vector<1x4x8xbf16>
    %27 = vector.shape_cast %26 : vector<1x4x8xbf16> to vector<4x8xbf16>
    %cst_13 = arith.constant dense<0.000000e+00> : vector<4x256xf32>
    %28 = tpu.matmul %27, %25, %cst_13 {dimension_numbers = #tpu.dot_dimension_numbers<[1], [0], [0], [1], [0, 0, 1, 1], [], []>} : vector<4x8xbf16>, vector<8x256xbf16>, vector<4x256xf32> -> vector<4x256xf32>
    %29 = arith.addf %24, %28 : vector<4x256xf32>
    %30 = vector.extract_strided_slice %12 {offsets = [0, 3], sizes = [8, 256], strides = [1, 1]} : vector<8x512xbf16> to vector<8x256xbf16>
    %31 = vector.extract_strided_slice %13 {offsets = [3, 0, 0], sizes = [1, 4, 8], strides = [1, 1, 1]} : vector<49x4x8xbf16> to vector<1x4x8xbf16>
    %32 = vector.shape_cast %31 : vector<1x4x8xbf16> to vector<4x8xbf16>
    %cst_14 = arith.constant dense<0.000000e+00> : vector<4x256xf32>
    %33 = tpu.matmul %32, %30, %cst_14 {dimension_numbers = #tpu.dot_dimension_numbers<[1], [0], [0], [1], [0, 0, 1, 1], [], []>} : vector<4x8xbf16>, vector<8x256xbf16>, vector<4x256xf32> -> vector<4x256xf32>
    %34 = arith.addf %29, %33 : vector<4x256xf32>
    %35 = vector.extract_strided_slice %12 {offsets = [0, 4], sizes = [8, 256], strides = [1, 1]} : vector<8x512xbf16> to vector<8x256xbf16>
    %36 = vector.extract_strided_slice %13 {offsets = [4, 0, 0], sizes = [1, 4, 8], strides = [1, 1, 1]} : vector<49x4x8xbf16> to vector<1x4x8xbf16>
    %37 = vector.shape_cast %36 : vector<1x4x8xbf16> to vector<4x8xbf16>
    %cst_15 = arith.constant dense<0.000000e+00> : vector<4x256xf32>
    %38 = tpu.matmul %37, %35, %cst_15 {dimension_numbers = #tpu.dot_dimension_numbers<[1], [0], [0], [1], [0, 0, 1, 1], [], []>} : vector<4x8xbf16>, vector<8x256xbf16>, vector<4x256xf32> -> vector<4x256xf32>
    %39 = arith.addf %34, %38 : vector<4x256xf32>
    %40 = vector.extract_strided_slice %12 {offsets = [0, 5], sizes = [8, 256], strides = [1, 1]} : vector<8x512xbf16> to vector<8x256xbf16>
    %41 = vector.extract_strided_slice %13 {offsets = [5, 0, 0], sizes = [1, 4, 8], strides = [1, 1, 1]} : vector<49x4x8xbf16> to vector<1x4x8xbf16>
    %42 = vector.shape_cast %41 : vector<1x4x8xbf16> to vector<4x8xbf16>
    %cst_16 = arith.constant dense<0.000000e+00> : vector<4x256xf32>
    %43 = tpu.matmul %42, %40, %cst_16 {dimension_numbers = #tpu.dot_dimension_numbers<[1], [0], [0], [1], [0, 0, 1, 1], [], []>} : vector<4x8xbf16>, vector<8x256xbf16>, vector<4x256xf32> -> vector<4x256xf32>
    %44 = arith.addf %39, %43 : vector<4x256xf32>
    %45 = vector.extract_strided_slice %12 {offsets = [0, 6], sizes = [8, 256], strides = [1, 1]} : vector<8x512xbf16> to vector<8x256xbf16>
    %46 = vector.extract_strided_slice %13 {offsets = [6, 0, 0], sizes = [1, 4, 8], strides = [1, 1, 1]} : vector<49x4x8xbf16> to vector<1x4x8xbf16>
    %47 = vector.shape_cast %46 : vector<1x4x8xbf16> to vector<4x8xbf16>
    %cst_17 = arith.constant dense<0.000000e+00> : vector<4x256xf32>
    %48 = tpu.matmul %47, %45, %cst_17 {dimension_numbers = #tpu.dot_dimension_numbers<[1], [0], [0], [1], [0, 0, 1, 1], [], []>} : vector<4x8xbf16>, vector<8x256xbf16>, vector<4x256xf32> -> vector<4x256xf32>
    %49 = arith.addf %44, %48 : vector<4x256xf32>
    %50 = vector.extract_strided_slice %12 {offsets = [0, 22], sizes = [8, 256], strides = [1, 1]} : vector<8x512xbf16> to vector<8x256xbf16>
    %51 = vector.extract_strided_slice %13 {offsets = [7, 0, 0], sizes = [1, 4, 8], strides = [1, 1, 1]} : vector<49x4x8xbf16> to vector<1x4x8xbf16>
    %52 = vector.shape_cast %51 : vector<1x4x8xbf16> to vector<4x8xbf16>
    %cst_18 = arith.constant dense<0.000000e+00> : vector<4x256xf32>
    %53 = tpu.matmul %52, %50, %cst_18 {dimension_numbers = #tpu.dot_dimension_numbers<[1], [0], [0], [1], [0, 0, 1, 1], [], []>} : vector<4x8xbf16>, vector<8x256xbf16>, vector<4x256xf32> -> vector<4x256xf32>
    %54 = arith.addf %49, %53 : vector<4x256xf32>
    %55 = vector.extract_strided_slice %12 {offsets = [0, 23], sizes = [8, 256], strides = [1, 1]} : vector<8x512xbf16> to vector<8x256xbf16>
    %56 = vector.extract_strided_slice %13 {offsets = [8, 0, 0], sizes = [1, 4, 8], strides = [1, 1, 1]} : vector<49x4x8xbf16> to vector<1x4x8xbf16>
    %57 = vector.shape_cast %56 : vector<1x4x8xbf16> to vector<4x8xbf16>
    %cst_19 = arith.constant dense<0.000000e+00> : vector<4x256xf32>
    %58 = tpu.matmul %57, %55, %cst_19 {dimension_numbers = #tpu.dot_dimension_numbers<[1], [0], [0], [1], [0, 0, 1, 1], [], []>} : vector<4x8xbf16>, vector<8x256xbf16>, vector<4x256xf32> -> vector<4x256xf32>
    %59 = arith.addf %54, %58 : vector<4x256xf32>
    %60 = vector.extract_strided_slice %12 {offsets = [0, 24], sizes = [8, 256], strides = [1, 1]} : vector<8x512xbf16> to vector<8x256xbf16>
    %61 = vector.extract_strided_slice %13 {offsets = [9, 0, 0], sizes = [1, 4, 8], strides = [1, 1, 1]} : vector<49x4x8xbf16> to vector<1x4x8xbf16>
    %62 = vector.shape_cast %61 : vector<1x4x8xbf16> to vector<4x8xbf16>
    %cst_20 = arith.constant dense<0.000000e+00> : vector<4x256xf32>
    %63 = tpu.matmul %62, %60, %cst_20 {dimension_numbers = #tpu.dot_dimension_numbers<[1], [0], [0], [1], [0, 0, 1, 1], [], []>} : vector<4x8xbf16>, vector<8x256xbf16>, vector<4x256xf32> -> vector<4x256xf32>
    %64 = arith.addf %59, %63 : vector<4x256xf32>
    %65 = vector.extract_strided_slice %12 {offsets = [0, 25], sizes = [8, 256], strides = [1, 1]} : vector<8x512xbf16> to vector<8x256xbf16>
    %66 = vector.extract_strided_slice %13 {offsets = [10, 0, 0], sizes = [1, 4, 8], strides = [1, 1, 1]} : vector<49x4x8xbf16> to vector<1x4x8xbf16>
    %67 = vector.shape_cast %66 : vector<1x4x8xbf16> to vector<4x8xbf16>
    %cst_21 = arith.constant dense<0.000000e+00> : vector<4x256xf32>
    %68 = tpu.matmul %67, %65, %cst_21 {dimension_numbers = #tpu.dot_dimension_numbers<[1], [0], [0], [1], [0, 0, 1, 1], [], []>} : vector<4x8xbf16>, vector<8x256xbf16>, vector<4x256xf32> -> vector<4x256xf32>
    %69 = arith.addf %64, %68 : vector<4x256xf32>
    %70 = vector.extract_strided_slice %12 {offsets = [0, 26], sizes = [8, 256], strides = [1, 1]} : vector<8x512xbf16> to vector<8x256xbf16>
    %71 = vector.extract_strided_slice %13 {offsets = [11, 0, 0], sizes = [1, 4, 8], strides = [1, 1, 1]} : vector<49x4x8xbf16> to vector<1x4x8xbf16>
    %72 = vector.shape_cast %71 : vector<1x4x8xbf16> to vector<4x8xbf16>
    %cst_22 = arith.constant dense<0.000000e+00> : vector<4x256xf32>
    %73 = tpu.matmul %72, %70, %cst_22 {dimension_numbers = #tpu.dot_dimension_numbers<[1], [0], [0], [1], [0, 0, 1, 1], [], []>} : vector<4x8xbf16>, vector<8x256xbf16>, vector<4x256xf32> -> vector<4x256xf32>
    %74 = arith.addf %69, %73 : vector<4x256xf32>
    %75 = vector.extract_strided_slice %12 {offsets = [0, 27], sizes = [8, 256], strides = [1, 1]} : vector<8x512xbf16> to vector<8x256xbf16>
    %76 = vector.extract_strided_slice %13 {offsets = [12, 0, 0], sizes = [1, 4, 8], strides = [1, 1, 1]} : vector<49x4x8xbf16> to vector<1x4x8xbf16>
    %77 = vector.shape_cast %76 : vector<1x4x8xbf16> to vector<4x8xbf16>
    %cst_23 = arith.constant dense<0.000000e+00> : vector<4x256xf32>
    %78 = tpu.matmul %77, %75, %cst_23 {dimension_numbers = #tpu.dot_dimension_numbers<[1], [0], [0], [1], [0, 0, 1, 1], [], []>} : vector<4x8xbf16>, vector<8x256xbf16>, vector<4x256xf32> -> vector<4x256xf32>
    %79 = arith.addf %74, %78 : vector<4x256xf32>
    %80 = vector.extract_strided_slice %12 {offsets = [0, 28], sizes = [8, 256], strides = [1, 1]} : vector<8x512xbf16> to vector<8x256xbf16>
    %81 = vector.extract_strided_slice %13 {offsets = [13, 0, 0], sizes = [1, 4, 8], strides = [1, 1, 1]} : vector<49x4x8xbf16> to vector<1x4x8xbf16>
    %82 = vector.shape_cast %81 : vector<1x4x8xbf16> to vector<4x8xbf16>
    %cst_24 = arith.constant dense<0.000000e+00> : vector<4x256xf32>
    %83 = tpu.matmul %82, %80, %cst_24 {dimension_numbers = #tpu.dot_dimension_numbers<[1], [0], [0], [1], [0, 0, 1, 1], [], []>} : vector<4x8xbf16>, vector<8x256xbf16>, vector<4x256xf32> -> vector<4x256xf32>
    %84 = arith.addf %79, %83 : vector<4x256xf32>
    %85 = vector.extract_strided_slice %12 {offsets = [0, 44], sizes = [8, 256], strides = [1, 1]} : vector<8x512xbf16> to vector<8x256xbf16>
    %86 = vector.extract_strided_slice %13 {offsets = [14, 0, 0], sizes = [1, 4, 8], strides = [1, 1, 1]} : vector<49x4x8xbf16> to vector<1x4x8xbf16>
    %87 = vector.shape_cast %86 : vector<1x4x8xbf16> to vector<4x8xbf16>
    %cst_25 = arith.constant dense<0.000000e+00> : vector<4x256xf32>
    %88 = tpu.matmul %87, %85, %cst_25 {dimension_numbers = #tpu.dot_dimension_numbers<[1], [0], [0], [1], [0, 0, 1, 1], [], []>} : vector<4x8xbf16>, vector<8x256xbf16>, vector<4x256xf32> -> vector<4x256xf32>
    %89 = arith.addf %84, %88 : vector<4x256xf32>
    %90 = vector.extract_strided_slice %12 {offsets = [0, 45], sizes = [8, 256], strides = [1, 1]} : vector<8x512xbf16> to vector<8x256xbf16>
    %91 = vector.extract_strided_slice %13 {offsets = [15, 0, 0], sizes = [1, 4, 8], strides = [1, 1, 1]} : vector<49x4x8xbf16> to vector<1x4x8xbf16>
    %92 = vector.shape_cast %91 : vector<1x4x8xbf16> to vector<4x8xbf16>
    %cst_26 = arith.constant dense<0.000000e+00> : vector<4x256xf32>
    %93 = tpu.matmul %92, %90, %cst_26 {dimension_numbers = #tpu.dot_dimension_numbers<[1], [0], [0], [1], [0, 0, 1, 1], [], []>} : vector<4x8xbf16>, vector<8x256xbf16>, vector<4x256xf32> -> vector<4x256xf32>
    %94 = arith.addf %89, %93 : vector<4x256xf32>
    %95 = vector.extract_strided_slice %12 {offsets = [0, 46], sizes = [8, 256], strides = [1, 1]} : vector<8x512xbf16> to vector<8x256xbf16>
    %96 = vector.extract_strided_slice %13 {offsets = [16, 0, 0], sizes = [1, 4, 8], strides = [1, 1, 1]} : vector<49x4x8xbf16> to vector<1x4x8xbf16>
    %97 = vector.shape_cast %96 : vector<1x4x8xbf16> to vector<4x8xbf16>
    %cst_27 = arith.constant dense<0.000000e+00> : vector<4x256xf32>
    %98 = tpu.matmul %97, %95, %cst_27 {dimension_numbers = #tpu.dot_dimension_numbers<[1], [0], [0], [1], [0, 0, 1, 1], [], []>} : vector<4x8xbf16>, vector<8x256xbf16>, vector<4x256xf32> -> vector<4x256xf32>
    %99 = arith.addf %94, %98 : vector<4x256xf32>
    %100 = vector.extract_strided_slice %12 {offsets = [0, 47], sizes = [8, 256], strides = [1, 1]} : vector<8x512xbf16> to vector<8x256xbf16>
    %101 = vector.extract_strided_slice %13 {offsets = [17, 0, 0], sizes = [1, 4, 8], strides = [1, 1, 1]} : vector<49x4x8xbf16> to vector<1x4x8xbf16>
    %102 = vector.shape_cast %101 : vector<1x4x8xbf16> to vector<4x8xbf16>
    %cst_28 = arith.constant dense<0.000000e+00> : vector<4x256xf32>
    %103 = tpu.matmul %102, %100, %cst_28 {dimension_numbers = #tpu.dot_dimension_numbers<[1], [0], [0], [1], [0, 0, 1, 1], [], []>} : vector<4x8xbf16>, vector<8x256xbf16>, vector<4x256xf32> -> vector<4x256xf32>
    %104 = arith.addf %99, %103 : vector<4x256xf32>
    %105 = vector.extract_strided_slice %12 {offsets = [0, 48], sizes = [8, 256], strides = [1, 1]} : vector<8x512xbf16> to vector<8x256xbf16>
    %106 = vector.extract_strided_slice %13 {offsets = [18, 0, 0], sizes = [1, 4, 8], strides = [1, 1, 1]} : vector<49x4x8xbf16> to vector<1x4x8xbf16>
    %107 = vector.shape_cast %106 : vector<1x4x8xbf16> to vector<4x8xbf16>
    %cst_29 = arith.constant dense<0.000000e+00> : vector<4x256xf32>
    %108 = tpu.matmul %107, %105, %cst_29 {dimension_numbers = #tpu.dot_dimension_numbers<[1], [0], [0], [1], [0, 0, 1, 1], [], []>} : vector<4x8xbf16>, vector<8x256xbf16>, vector<4x256xf32> -> vector<4x256xf32>
    %109 = arith.addf %104, %108 : vector<4x256xf32>
    %110 = vector.extract_strided_slice %12 {offsets = [0, 49], sizes = [8, 256], strides = [1, 1]} : vector<8x512xbf16> to vector<8x256xbf16>
    %111 = vector.extract_strided_slice %13 {offsets = [19, 0, 0], sizes = [1, 4, 8], strides = [1, 1, 1]} : vector<49x4x8xbf16> to vector<1x4x8xbf16>
    %112 = vector.shape_cast %111 : vector<1x4x8xbf16> to vector<4x8xbf16>
    %cst_30 = arith.constant dense<0.000000e+00> : vector<4x256xf32>
    %113 = tpu.matmul %112, %110, %cst_30 {dimension_numbers = #tpu.dot_dimension_numbers<[1], [0], [0], [1], [0, 0, 1, 1], [], []>} : vector<4x8xbf16>, vector<8x256xbf16>, vector<4x256xf32> -> vector<4x256xf32>
    %114 = arith.addf %109, %113 : vector<4x256xf32>
    %115 = vector.extract_strided_slice %12 {offsets = [0, 50], sizes = [8, 256], strides = [1, 1]} : vector<8x512xbf16> to vector<8x256xbf16>
    %116 = vector.extract_strided_slice %13 {offsets = [20, 0, 0], sizes = [1, 4, 8], strides = [1, 1, 1]} : vector<49x4x8xbf16> to vector<1x4x8xbf16>
    %117 = vector.shape_cast %116 : vector<1x4x8xbf16> to vector<4x8xbf16>
    %cst_31 = arith.constant dense<0.000000e+00> : vector<4x256xf32>
    %118 = tpu.matmul %117, %115, %cst_31 {dimension_numbers = #tpu.dot_dimension_numbers<[1], [0], [0], [1], [0, 0, 1, 1], [], []>} : vector<4x8xbf16>, vector<8x256xbf16>, vector<4x256xf32> -> vector<4x256xf32>
    %119 = arith.addf %114, %118 : vector<4x256xf32>
    %120 = vector.extract_strided_slice %12 {offsets = [0, 66], sizes = [8, 256], strides = [1, 1]} : vector<8x512xbf16> to vector<8x256xbf16>
    %121 = vector.extract_strided_slice %13 {offsets = [21, 0, 0], sizes = [1, 4, 8], strides = [1, 1, 1]} : vector<49x4x8xbf16> to vector<1x4x8xbf16>
    %122 = vector.shape_cast %121 : vector<1x4x8xbf16> to vector<4x8xbf16>
    %cst_32 = arith.constant dense<0.000000e+00> : vector<4x256xf32>
    %123 = tpu.matmul %122, %120, %cst_32 {dimension_numbers = #tpu.dot_dimension_numbers<[1], [0], [0], [1], [0, 0, 1, 1], [], []>} : vector<4x8xbf16>, vector<8x256xbf16>, vector<4x256xf32> -> vector<4x256xf32>
    %124 = arith.addf %119, %123 : vector<4x256xf32>
    %125 = vector.extract_strided_slice %12 {offsets = [0, 67], sizes = [8, 256], strides = [1, 1]} : vector<8x512xbf16> to vector<8x256xbf16>
    %126 = vector.extract_strided_slice %13 {offsets = [22, 0, 0], sizes = [1, 4, 8], strides = [1, 1, 1]} : vector<49x4x8xbf16> to vector<1x4x8xbf16>
    %127 = vector.shape_cast %126 : vector<1x4x8xbf16> to vector<4x8xbf16>
    %cst_33 = arith.constant dense<0.000000e+00> : vector<4x256xf32>
    %128 = tpu.matmul %127, %125, %cst_33 {dimension_numbers = #tpu.dot_dimension_numbers<[1], [0], [0], [1], [0, 0, 1, 1], [], []>} : vector<4x8xbf16>, vector<8x256xbf16>, vector<4x256xf32> -> vector<4x256xf32>
    %129 = arith.addf %124, %128 : vector<4x256xf32>
    %130 = vector.extract_strided_slice %12 {offsets = [0, 68], sizes = [8, 256], strides = [1, 1]} : vector<8x512xbf16> to vector<8x256xbf16>
    %131 = vector.extract_strided_slice %13 {offsets = [23, 0, 0], sizes = [1, 4, 8], strides = [1, 1, 1]} : vector<49x4x8xbf16> to vector<1x4x8xbf16>
    %132 = vector.shape_cast %131 : vector<1x4x8xbf16> to vector<4x8xbf16>
    %cst_34 = arith.constant dense<0.000000e+00> : vector<4x256xf32>
    %133 = tpu.matmul %132, %130, %cst_34 {dimension_numbers = #tpu.dot_dimension_numbers<[1], [0], [0], [1], [0, 0, 1, 1], [], []>} : vector<4x8xbf16>, vector<8x256xbf16>, vector<4x256xf32> -> vector<4x256xf32>
    %134 = arith.addf %129, %133 : vector<4x256xf32>
    %135 = vector.extract_strided_slice %12 {offsets = [0, 69], sizes = [8, 256], strides = [1, 1]} : vector<8x512xbf16> to vector<8x256xbf16>
    %136 = vector.extract_strided_slice %13 {offsets = [24, 0, 0], sizes = [1, 4, 8], strides = [1, 1, 1]} : vector<49x4x8xbf16> to vector<1x4x8xbf16>
    %137 = vector.shape_cast %136 : vector<1x4x8xbf16> to vector<4x8xbf16>
    %cst_35 = arith.constant dense<0.000000e+00> : vector<4x256xf32>
    %138 = tpu.matmul %137, %135, %cst_35 {dimension_numbers = #tpu.dot_dimension_numbers<[1], [0], [0], [1], [0, 0, 1, 1], [], []>} : vector<4x8xbf16>, vector<8x256xbf16>, vector<4x256xf32> -> vector<4x256xf32>
    %139 = arith.addf %134, %138 : vector<4x256xf32>
    %140 = vector.extract_strided_slice %12 {offsets = [0, 70], sizes = [8, 256], strides = [1, 1]} : vector<8x512xbf16> to vector<8x256xbf16>
    %141 = vector.extract_strided_slice %13 {offsets = [25, 0, 0], sizes = [1, 4, 8], strides = [1, 1, 1]} : vector<49x4x8xbf16> to vector<1x4x8xbf16>
    %142 = vector.shape_cast %141 : vector<1x4x8xbf16> to vector<4x8xbf16>
    %cst_36 = arith.constant dense<0.000000e+00> : vector<4x256xf32>
    %143 = tpu.matmul %142, %140, %cst_36 {dimension_numbers = #tpu.dot_dimension_numbers<[1], [0], [0], [1], [0, 0, 1, 1], [], []>} : vector<4x8xbf16>, vector<8x256xbf16>, vector<4x256xf32> -> vector<4x256xf32>
    %144 = arith.addf %139, %143 : vector<4x256xf32>
    %145 = vector.extract_strided_slice %12 {offsets = [0, 71], sizes = [8, 256], strides = [1, 1]} : vector<8x512xbf16> to vector<8x256xbf16>
    %146 = vector.extract_strided_slice %13 {offsets = [26, 0, 0], sizes = [1, 4, 8], strides = [1, 1, 1]} : vector<49x4x8xbf16> to vector<1x4x8xbf16>
    %147 = vector.shape_cast %146 : vector<1x4x8xbf16> to vector<4x8xbf16>
    %cst_37 = arith.constant dense<0.000000e+00> : vector<4x256xf32>
    %148 = tpu.matmul %147, %145, %cst_37 {dimension_numbers = #tpu.dot_dimension_numbers<[1], [0], [0], [1], [0, 0, 1, 1], [], []>} : vector<4x8xbf16>, vector<8x256xbf16>, vector<4x256xf32> -> vector<4x256xf32>
    %149 = arith.addf %144, %148 : vector<4x256xf32>
    %150 = vector.extract_strided_slice %12 {offsets = [0, 72], sizes = [8, 256], strides = [1, 1]} : vector<8x512xbf16> to vector<8x256xbf16>
    %151 = vector.extract_strided_slice %13 {offsets = [27, 0, 0], sizes = [1, 4, 8], strides = [1, 1, 1]} : vector<49x4x8xbf16> to vector<1x4x8xbf16>
    %152 = vector.shape_cast %151 : vector<1x4x8xbf16> to vector<4x8xbf16>
    %cst_38 = arith.constant dense<0.000000e+00> : vector<4x256xf32>
    %153 = tpu.matmul %152, %150, %cst_38 {dimension_numbers = #tpu.dot_dimension_numbers<[1], [0], [0], [1], [0, 0, 1, 1], [], []>} : vector<4x8xbf16>, vector<8x256xbf16>, vector<4x256xf32> -> vector<4x256xf32>
    %154 = arith.addf %149, %153 : vector<4x256xf32>
    %155 = vector.extract_strided_slice %12 {offsets = [0, 88], sizes = [8, 256], strides = [1, 1]} : vector<8x512xbf16> to vector<8x256xbf16>
    %156 = vector.extract_strided_slice %13 {offsets = [28, 0, 0], sizes = [1, 4, 8], strides = [1, 1, 1]} : vector<49x4x8xbf16> to vector<1x4x8xbf16>
    %157 = vector.shape_cast %156 : vector<1x4x8xbf16> to vector<4x8xbf16>
    %cst_39 = arith.constant dense<0.000000e+00> : vector<4x256xf32>
    %158 = tpu.matmul %157, %155, %cst_39 {dimension_numbers = #tpu.dot_dimension_numbers<[1], [0], [0], [1], [0, 0, 1, 1], [], []>} : vector<4x8xbf16>, vector<8x256xbf16>, vector<4x256xf32> -> vector<4x256xf32>
    %159 = arith.addf %154, %158 : vector<4x256xf32>
    %160 = vector.extract_strided_slice %12 {offsets = [0, 89], sizes = [8, 256], strides = [1, 1]} : vector<8x512xbf16> to vector<8x256xbf16>
    %161 = vector.extract_strided_slice %13 {offsets = [29, 0, 0], sizes = [1, 4, 8], strides = [1, 1, 1]} : vector<49x4x8xbf16> to vector<1x4x8xbf16>
    %162 = vector.shape_cast %161 : vector<1x4x8xbf16> to vector<4x8xbf16>
    %cst_40 = arith.constant dense<0.000000e+00> : vector<4x256xf32>
    %163 = tpu.matmul %162, %160, %cst_40 {dimension_numbers = #tpu.dot_dimension_numbers<[1], [0], [0], [1], [0, 0, 1, 1], [], []>} : vector<4x8xbf16>, vector<8x256xbf16>, vector<4x256xf32> -> vector<4x256xf32>
    %164 = arith.addf %159, %163 : vector<4x256xf32>
    %165 = vector.extract_strided_slice %12 {offsets = [0, 90], sizes = [8, 256], strides = [1, 1]} : vector<8x512xbf16> to vector<8x256xbf16>
    %166 = vector.extract_strided_slice %13 {offsets = [30, 0, 0], sizes = [1, 4, 8], strides = [1, 1, 1]} : vector<49x4x8xbf16> to vector<1x4x8xbf16>
    %167 = vector.shape_cast %166 : vector<1x4x8xbf16> to vector<4x8xbf16>
    %cst_41 = arith.constant dense<0.000000e+00> : vector<4x256xf32>
    %168 = tpu.matmul %167, %165, %cst_41 {dimension_numbers = #tpu.dot_dimension_numbers<[1], [0], [0], [1], [0, 0, 1, 1], [], []>} : vector<4x8xbf16>, vector<8x256xbf16>, vector<4x256xf32> -> vector<4x256xf32>
    %169 = arith.addf %164, %168 : vector<4x256xf32>
    %170 = vector.extract_strided_slice %12 {offsets = [0, 91], sizes = [8, 256], strides = [1, 1]} : vector<8x512xbf16> to vector<8x256xbf16>
    %171 = vector.extract_strided_slice %13 {offsets = [31, 0, 0], sizes = [1, 4, 8], strides = [1, 1, 1]} : vector<49x4x8xbf16> to vector<1x4x8xbf16>
    %172 = vector.shape_cast %171 : vector<1x4x8xbf16> to vector<4x8xbf16>
    %cst_42 = arith.constant dense<0.000000e+00> : vector<4x256xf32>
    %173 = tpu.matmul %172, %170, %cst_42 {dimension_numbers = #tpu.dot_dimension_numbers<[1], [0], [0], [1], [0, 0, 1, 1], [], []>} : vector<4x8xbf16>, vector<8x256xbf16>, vector<4x256xf32> -> vector<4x256xf32>
    %174 = arith.addf %169, %173 : vector<4x256xf32>
    %175 = vector.extract_strided_slice %12 {offsets = [0, 92], sizes = [8, 256], strides = [1, 1]} : vector<8x512xbf16> to vector<8x256xbf16>
    %176 = vector.extract_strided_slice %13 {offsets = [32, 0, 0], sizes = [1, 4, 8], strides = [1, 1, 1]} : vector<49x4x8xbf16> to vector<1x4x8xbf16>
    %177 = vector.shape_cast %176 : vector<1x4x8xbf16> to vector<4x8xbf16>
    %cst_43 = arith.constant dense<0.000000e+00> : vector<4x256xf32>
    %178 = tpu.matmul %177, %175, %cst_43 {dimension_numbers = #tpu.dot_dimension_numbers<[1], [0], [0], [1], [0, 0, 1, 1], [], []>} : vector<4x8xbf16>, vector<8x256xbf16>, vector<4x256xf32> -> vector<4x256xf32>
    %179 = arith.addf %174, %178 : vector<4x256xf32>
    %180 = vector.extract_strided_slice %12 {offsets = [0, 93], sizes = [8, 256], strides = [1, 1]} : vector<8x512xbf16> to vector<8x256xbf16>
    %181 = vector.extract_strided_slice %13 {offsets = [33, 0, 0], sizes = [1, 4, 8], strides = [1, 1, 1]} : vector<49x4x8xbf16> to vector<1x4x8xbf16>
    %182 = vector.shape_cast %181 : vector<1x4x8xbf16> to vector<4x8xbf16>
    %cst_44 = arith.constant dense<0.000000e+00> : vector<4x256xf32>
    %183 = tpu.matmul %182, %180, %cst_44 {dimension_numbers = #tpu.dot_dimension_numbers<[1], [0], [0], [1], [0, 0, 1, 1], [], []>} : vector<4x8xbf16>, vector<8x256xbf16>, vector<4x256xf32> -> vector<4x256xf32>
    %184 = arith.addf %179, %183 : vector<4x256xf32>
    %185 = vector.extract_strided_slice %12 {offsets = [0, 94], sizes = [8, 256], strides = [1, 1]} : vector<8x512xbf16> to vector<8x256xbf16>
    %186 = vector.extract_strided_slice %13 {offsets = [34, 0, 0], sizes = [1, 4, 8], strides = [1, 1, 1]} : vector<49x4x8xbf16> to vector<1x4x8xbf16>
    %187 = vector.shape_cast %186 : vector<1x4x8xbf16> to vector<4x8xbf16>
    %cst_45 = arith.constant dense<0.000000e+00> : vector<4x256xf32>
    %188 = tpu.matmul %187, %185, %cst_45 {dimension_numbers = #tpu.dot_dimension_numbers<[1], [0], [0], [1], [0, 0, 1, 1], [], []>} : vector<4x8xbf16>, vector<8x256xbf16>, vector<4x256xf32> -> vector<4x256xf32>
    %189 = arith.addf %184, %188 : vector<4x256xf32>
    %190 = vector.extract_strided_slice %12 {offsets = [0, 110], sizes = [8, 256], strides = [1, 1]} : vector<8x512xbf16> to vector<8x256xbf16>
    %191 = vector.extract_strided_slice %13 {offsets = [35, 0, 0], sizes = [1, 4, 8], strides = [1, 1, 1]} : vector<49x4x8xbf16> to vector<1x4x8xbf16>
    %192 = vector.shape_cast %191 : vector<1x4x8xbf16> to vector<4x8xbf16>
    %cst_46 = arith.constant dense<0.000000e+00> : vector<4x256xf32>
    %193 = tpu.matmul %192, %190, %cst_46 {dimension_numbers = #tpu.dot_dimension_numbers<[1], [0], [0], [1], [0, 0, 1, 1], [], []>} : vector<4x8xbf16>, vector<8x256xbf16>, vector<4x256xf32> -> vector<4x256xf32>
    %194 = arith.addf %189, %193 : vector<4x256xf32>
    %195 = vector.extract_strided_slice %12 {offsets = [0, 111], sizes = [8, 256], strides = [1, 1]} : vector<8x512xbf16> to vector<8x256xbf16>
    %196 = vector.extract_strided_slice %13 {offsets = [36, 0, 0], sizes = [1, 4, 8], strides = [1, 1, 1]} : vector<49x4x8xbf16> to vector<1x4x8xbf16>
    %197 = vector.shape_cast %196 : vector<1x4x8xbf16> to vector<4x8xbf16>
    %cst_47 = arith.constant dense<0.000000e+00> : vector<4x256xf32>
    %198 = tpu.matmul %197, %195, %cst_47 {dimension_numbers = #tpu.dot_dimension_numbers<[1], [0], [0], [1], [0, 0, 1, 1], [], []>} : vector<4x8xbf16>, vector<8x256xbf16>, vector<4x256xf32> -> vector<4x256xf32>
    %199 = arith.addf %194, %198 : vector<4x256xf32>
    %200 = vector.extract_strided_slice %12 {offsets = [0, 112], sizes = [8, 256], strides = [1, 1]} : vector<8x512xbf16> to vector<8x256xbf16>
    %201 = vector.extract_strided_slice %13 {offsets = [37, 0, 0], sizes = [1, 4, 8], strides = [1, 1, 1]} : vector<49x4x8xbf16> to vector<1x4x8xbf16>
    %202 = vector.shape_cast %201 : vector<1x4x8xbf16> to vector<4x8xbf16>
    %cst_48 = arith.constant dense<0.000000e+00> : vector<4x256xf32>
    %203 = tpu.matmul %202, %200, %cst_48 {dimension_numbers = #tpu.dot_dimension_numbers<[1], [0], [0], [1], [0, 0, 1, 1], [], []>} : vector<4x8xbf16>, vector<8x256xbf16>, vector<4x256xf32> -> vector<4x256xf32>
    %204 = arith.addf %199, %203 : vector<4x256xf32>
    %205 = vector.extract_strided_slice %12 {offsets = [0, 113], sizes = [8, 256], strides = [1, 1]} : vector<8x512xbf16> to vector<8x256xbf16>
    %206 = vector.extract_strided_slice %13 {offsets = [38, 0, 0], sizes = [1, 4, 8], strides = [1, 1, 1]} : vector<49x4x8xbf16> to vector<1x4x8xbf16>
    %207 = vector.shape_cast %206 : vector<1x4x8xbf16> to vector<4x8xbf16>
    %cst_49 = arith.constant dense<0.000000e+00> : vector<4x256xf32>
    %208 = tpu.matmul %207, %205, %cst_49 {dimension_numbers = #tpu.dot_dimension_numbers<[1], [0], [0], [1], [0, 0, 1, 1], [], []>} : vector<4x8xbf16>, vector<8x256xbf16>, vector<4x256xf32> -> vector<4x256xf32>
    %209 = arith.addf %204, %208 : vector<4x256xf32>
    %210 = vector.extract_strided_slice %12 {offsets = [0, 114], sizes = [8, 256], strides = [1, 1]} : vector<8x512xbf16> to vector<8x256xbf16>
    %211 = vector.extract_strided_slice %13 {offsets = [39, 0, 0], sizes = [1, 4, 8], strides = [1, 1, 1]} : vector<49x4x8xbf16> to vector<1x4x8xbf16>
    %212 = vector.shape_cast %211 : vector<1x4x8xbf16> to vector<4x8xbf16>
    %cst_50 = arith.constant dense<0.000000e+00> : vector<4x256xf32>
    %213 = tpu.matmul %212, %210, %cst_50 {dimension_numbers = #tpu.dot_dimension_numbers<[1], [0], [0], [1], [0, 0, 1, 1], [], []>} : vector<4x8xbf16>, vector<8x256xbf16>, vector<4x256xf32> -> vector<4x256xf32>
    %214 = arith.addf %209, %213 : vector<4x256xf32>
    %215 = vector.extract_strided_slice %12 {offsets = [0, 115], sizes = [8, 256], strides = [1, 1]} : vector<8x512xbf16> to vector<8x256xbf16>
    %216 = vector.extract_strided_slice %13 {offsets = [40, 0, 0], sizes = [1, 4, 8], strides = [1, 1, 1]} : vector<49x4x8xbf16> to vector<1x4x8xbf16>
    %217 = vector.shape_cast %216 : vector<1x4x8xbf16> to vector<4x8xbf16>
    %cst_51 = arith.constant dense<0.000000e+00> : vector<4x256xf32>
    %218 = tpu.matmul %217, %215, %cst_51 {dimension_numbers = #tpu.dot_dimension_numbers<[1], [0], [0], [1], [0, 0, 1, 1], [], []>} : vector<4x8xbf16>, vector<8x256xbf16>, vector<4x256xf32> -> vector<4x256xf32>
    %219 = arith.addf %214, %218 : vector<4x256xf32>
    %220 = vector.extract_strided_slice %12 {offsets = [0, 116], sizes = [8, 256], strides = [1, 1]} : vector<8x512xbf16> to vector<8x256xbf16>
    %221 = vector.extract_strided_slice %13 {offsets = [41, 0, 0], sizes = [1, 4, 8], strides = [1, 1, 1]} : vector<49x4x8xbf16> to vector<1x4x8xbf16>
    %222 = vector.shape_cast %221 : vector<1x4x8xbf16> to vector<4x8xbf16>
    %cst_52 = arith.constant dense<0.000000e+00> : vector<4x256xf32>
    %223 = tpu.matmul %222, %220, %cst_52 {dimension_numbers = #tpu.dot_dimension_numbers<[1], [0], [0], [1], [0, 0, 1, 1], [], []>} : vector<4x8xbf16>, vector<8x256xbf16>, vector<4x256xf32> -> vector<4x256xf32>
    %224 = arith.addf %219, %223 : vector<4x256xf32>
    %225 = vector.extract_strided_slice %12 {offsets = [0, 132], sizes = [8, 256], strides = [1, 1]} : vector<8x512xbf16> to vector<8x256xbf16>
    %226 = vector.extract_strided_slice %13 {offsets = [42, 0, 0], sizes = [1, 4, 8], strides = [1, 1, 1]} : vector<49x4x8xbf16> to vector<1x4x8xbf16>
    %227 = vector.shape_cast %226 : vector<1x4x8xbf16> to vector<4x8xbf16>
    %cst_53 = arith.constant dense<0.000000e+00> : vector<4x256xf32>
    %228 = tpu.matmul %227, %225, %cst_53 {dimension_numbers = #tpu.dot_dimension_numbers<[1], [0], [0], [1], [0, 0, 1, 1], [], []>} : vector<4x8xbf16>, vector<8x256xbf16>, vector<4x256xf32> -> vector<4x256xf32>
    %229 = arith.addf %224, %228 : vector<4x256xf32>
    %230 = vector.extract_strided_slice %12 {offsets = [0, 133], sizes = [8, 256], strides = [1, 1]} : vector<8x512xbf16> to vector<8x256xbf16>
    %231 = vector.extract_strided_slice %13 {offsets = [43, 0, 0], sizes = [1, 4, 8], strides = [1, 1, 1]} : vector<49x4x8xbf16> to vector<1x4x8xbf16>
    %232 = vector.shape_cast %231 : vector<1x4x8xbf16> to vector<4x8xbf16>
    %cst_54 = arith.constant dense<0.000000e+00> : vector<4x256xf32>
    %233 = tpu.matmul %232, %230, %cst_54 {dimension_numbers = #tpu.dot_dimension_numbers<[1], [0], [0], [1], [0, 0, 1, 1], [], []>} : vector<4x8xbf16>, vector<8x256xbf16>, vector<4x256xf32> -> vector<4x256xf32>
    %234 = arith.addf %229, %233 : vector<4x256xf32>
    %235 = vector.extract_strided_slice %12 {offsets = [0, 134], sizes = [8, 256], strides = [1, 1]} : vector<8x512xbf16> to vector<8x256xbf16>
    %236 = vector.extract_strided_slice %13 {offsets = [44, 0, 0], sizes = [1, 4, 8], strides = [1, 1, 1]} : vector<49x4x8xbf16> to vector<1x4x8xbf16>
    %237 = vector.shape_cast %236 : vector<1x4x8xbf16> to vector<4x8xbf16>
    %cst_55 = arith.constant dense<0.000000e+00> : vector<4x256xf32>
    %238 = tpu.matmul %237, %235, %cst_55 {dimension_numbers = #tpu.dot_dimension_numbers<[1], [0], [0], [1], [0, 0, 1, 1], [], []>} : vector<4x8xbf16>, vector<8x256xbf16>, vector<4x256xf32> -> vector<4x256xf32>
    %239 = arith.addf %234, %238 : vector<4x256xf32>
    %240 = vector.extract_strided_slice %12 {offsets = [0, 135], sizes = [8, 256], strides = [1, 1]} : vector<8x512xbf16> to vector<8x256xbf16>
    %241 = vector.extract_strided_slice %13 {offsets = [45, 0, 0], sizes = [1, 4, 8], strides = [1, 1, 1]} : vector<49x4x8xbf16> to vector<1x4x8xbf16>
    %242 = vector.shape_cast %241 : vector<1x4x8xbf16> to vector<4x8xbf16>
    %cst_56 = arith.constant dense<0.000000e+00> : vector<4x256xf32>
    %243 = tpu.matmul %242, %240, %cst_56 {dimension_numbers = #tpu.dot_dimension_numbers<[1], [0], [0], [1], [0, 0, 1, 1], [], []>} : vector<4x8xbf16>, vector<8x256xbf16>, vector<4x256xf32> -> vector<4x256xf32>
    %244 = arith.addf %239, %243 : vector<4x256xf32>
    %245 = vector.extract_strided_slice %12 {offsets = [0, 136], sizes = [8, 256], strides = [1, 1]} : vector<8x512xbf16> to vector<8x256xbf16>
    %246 = vector.extract_strided_slice %13 {offsets = [46, 0, 0], sizes = [1, 4, 8], strides = [1, 1, 1]} : vector<49x4x8xbf16> to vector<1x4x8xbf16>
    %247 = vector.shape_cast %246 : vector<1x4x8xbf16> to vector<4x8xbf16>
    %cst_57 = arith.constant dense<0.000000e+00> : vector<4x256xf32>
    %248 = tpu.matmul %247, %245, %cst_57 {dimension_numbers = #tpu.dot_dimension_numbers<[1], [0], [0], [1], [0, 0, 1, 1], [], []>} : vector<4x8xbf16>, vector<8x256xbf16>, vector<4x256xf32> -> vector<4x256xf32>
    %249 = arith.addf %244, %248 : vector<4x256xf32>
    %250 = vector.extract_strided_slice %12 {offsets = [0, 137], sizes = [8, 256], strides = [1, 1]} : vector<8x512xbf16> to vector<8x256xbf16>
    %251 = vector.extract_strided_slice %13 {offsets = [47, 0, 0], sizes = [1, 4, 8], strides = [1, 1, 1]} : vector<49x4x8xbf16> to vector<1x4x8xbf16>
    %252 = vector.shape_cast %251 : vector<1x4x8xbf16> to vector<4x8xbf16>
    %cst_58 = arith.constant dense<0.000000e+00> : vector<4x256xf32>
    %253 = tpu.matmul %252, %250, %cst_58 {dimension_numbers = #tpu.dot_dimension_numbers<[1], [0], [0], [1], [0, 0, 1, 1], [], []>} : vector<4x8xbf16>, vector<8x256xbf16>, vector<4x256xf32> -> vector<4x256xf32>
    %254 = arith.addf %249, %253 : vector<4x256xf32>
    %255 = vector.extract_strided_slice %12 {offsets = [0, 138], sizes = [8, 256], strides = [1, 1]} : vector<8x512xbf16> to vector<8x256xbf16>
    %256 = vector.extract_strided_slice %13 {offsets = [48, 0, 0], sizes = [1, 4, 8], strides = [1, 1, 1]} : vector<49x4x8xbf16> to vector<1x4x8xbf16>
    %257 = vector.shape_cast %256 : vector<1x4x8xbf16> to vector<4x8xbf16>
    %cst_59 = arith.constant dense<0.000000e+00> : vector<4x256xf32>
    %258 = tpu.matmul %257, %255, %cst_59 {dimension_numbers = #tpu.dot_dimension_numbers<[1], [0], [0], [1], [0, 0, 1, 1], [], []>} : vector<4x8xbf16>, vector<8x256xbf16>, vector<4x256xf32> -> vector<4x256xf32>
    %259 = arith.addf %254, %258 : vector<4x256xf32>
    %c0_60 = arith.constant 0 : index
    %c0_61 = arith.constant 0 : index
    %260 = vector.load %arg6[%c0_60, %c0_61] : memref<4x1xf32, #tpu.memory_space<vmem>>, vector<4x1xf32>
    %261 = vector.broadcast %260 : vector<4x1xf32> to vector<4x256xf32>
    %262 = arith.addf %259, %261 : vector<4x256xf32>
    %263 = math.tanh %262 : vector<4x256xf32>
    %c0_62 = arith.constant 0 : index
    %c0_63 = arith.constant 0 : index
    %264 = vector.load %arg7[%c0_62, %c0_63] : memref<4x256xf32, #tpu.memory_space<vmem>>, vector<4x256xf32>
    tpu.vector_store %arg7[%c0_62, %c0_63], %263 {strides = array<i32>} : memref<4x256xf32, #tpu.memory_space<vmem>>, vector<4x256xf32>,
    return
  }
  func.func @transform_0(%arg0: i32) -> (i32, i32) {
    %c0_i32 = arith.constant 0 : i32
    %c0_i32_0 = arith.constant 0 : i32
    return %c0_i32, %arg0 : i32, i32
  }
  func.func @transform_1(%arg0: i32) -> (i32, i32) {
    %c1_i32 = arith.constant 1 : i32
    %0 = arith.addi %arg0, %c1_i32 : i32
    %c0_i32 = arith.constant 0 : i32
    %c0_i32_0 = arith.constant 0 : i32
    return %c0_i32, %0 : i32, i32
  }
  func.func @transform_2(%arg0: i32) -> (i32, i32) {
    %c0_i32 = arith.constant 0 : i32
    %c0_i32_0 = arith.constant 0 : i32
    %c0_i32_1 = arith.constant 0 : i32
    return %c0_i32, %c0_i32_0 : i32, i32
  }
  func.func @transform_3(%arg0: i32) -> (i32, i32) {
    %c0_i32 = arith.constant 0 : i32
    %c0_i32_0 = arith.constant 0 : i32
    %c0_i32_1 = arith.constant 0 : i32
    return %c0_i32, %c0_i32_0 : i32, i32
  }
  func.func @transform_4(%arg0: i32) -> (i32, i32, i32) {
    %c0_i32 = arith.constant 0 : i32
    %c0_i32_0 = arith.constant 0 : i32
    %c0_i32_1 = arith.constant 0 : i32
    %c0_i32_2 = arith.constant 0 : i32
    return %c0_i32, %c0_i32_0, %c0_i32_1 : i32, i32, i32
  }
  func.func @transform_5(%arg0: i32) -> (i32, i32) {
    %c0_i32 = arith.constant 0 : i32
    %c0_i32_0 = arith.constant 0 : i32
    %c0_i32_1 = arith.constant 0 : i32
    return %c0_i32, %c0_i32_0 : i32, i32
  }
  func.func @transform_6(%arg0: i32) -> (i32, i32) {
    %c0_i32 = arith.constant 0 : i32
    %c0_i32_0 = arith.constant 0 : i32
    return %c0_i32, %arg0 : i32, i32
  }
}

</mosaic_0001>

<bundles_post_ra>
// kernel: generator_forward.15
= control target key start
LH: loop header
LB: loop body
LE: loop exit
PB: predicated region body
PF: predicated region fallthrough
CT: control target
= control target key end

     0   :  { %s312_s12 = smov 0   ;;  %s335_s0 = inlined_call_operand.vmem [shape: bf16[8,512], index: 0, kind: input, shape index: {}]   ;;  %s336_s1 = inlined_call_operand.vmem [shape: f32[8,1], index: 1, kind: input, shape index: {}]   ;;  %s337_s2 = inlined_call_operand.vmem [shape: f32[8,1], index: 2, kind: input, shape index: {}]   ;;  %s338_s3 = inlined_call_operand.vmem [shape: bf16[8,512], index: 3, kind: output, shape index: {}]  }
   0x1 LB: > { %s260_s13 = sadd.s32 4294967295, %s289_s12   ;;  %p264_p0 = scmp.ge.s32.totalorder %s289_s12, 1  ;;  %s289_s12 = sphi %s312_s12, %s13_s12  }
   0x2   : > { %p138_p1 = scmp.lt.s32.totalorder %s289_s12, 3 }
   0x4   : > { %p139_p2 = pnand %p264_p0, %p138_p1 }
   0x5   : > { %s265_s18 = sshll.u32 (!%p139_p2), %s260_s13, 1 }
   0x6   : > { %142 = sbr.rel (%p139_p2) target bundleno = 148 (0x94), region = 32  ;;  %p163_p3 = scmp.lt.s32.totalorder (!%p139_p2), %s265_s18, 3 }
   0xb   : > { %v177_v0 = vld [vmem:[%s336_s1] sm:$0xff]  ;;  %v291_v1 = vmov 0   ;;  %s340_s18 = smov (!%p163_p3, %s265_s18), 3 }
   0xc   : > { %282 = vset.pattern.permute.xlu0 %v291_v1  ;;  %v185_v2 = vld [vmem:[%s337_s2] sm:$0xff]  ;;  %s266_s19 = sshll.u32 %s340_s18, 2 }
   0xd   : > { %180 = vperm.xlu0 %282, %v177_v0   ;;  %s166_s22 = scalar_lea.vmem %s335_s0, %s266_s19  ;;  %s172_s25 = scalar_lea.vmem %s338_s3, %s266_s19 }
   0xe   : > { %v174_v3 = vld [vmem:[%s166_s22] sm:$0xff] }
   0xf   : > { %v175_v4 = vunpack.c.l.bf16 %v174_v3  ;;  %v176_v5 = vunpack.c.h.bf16 %v174_v3 }
  0x11   : > { %188 = vperm.xlu0 %282, %v185_v2  }
  0x88   : > { %v181_v6 = vpop.permute.xlu0 %180 }
  0x89   : > { %v183_v7 = vmul.f32 %v181_v6, %v175_v4  ;;  %v184_v8 = vmul.f32 %v181_v6, %v176_v5 }
  0x8c   : > { %v189_v9 = vpop.permute.xlu0 %188 }
  0x8d   : > { %v191_v10 = vadd.f32 %v189_v9, %v183_v7  ;;  %v192_v11 = vadd.f32 %v189_v9, %v184_v8 }
  0x8f   : > { %v193_v12 = vmax.f32 %v191_v10, 0.0  ;;  %v194_v13 = vmax.f32 %v192_v11, 0.0 }
  0x91   : > { %v272_v14 = vpack.c.bf16 %v194_v13, %v193_v12 }
  0x93   : > { %203 = vst [vmem:[%s172_s25] sm:$0xff] %v272_v14 }
  0x94 PF: > { %s13_s12 = sadd.s32 1, %s289_s12  }
  0x95   : > { %p10_p4 = scmp.ge.s32.totalorder %s13_s12, 4  }
  0x97   :  { %12 = sbr.rel (!%p10_p4) target bundleno = 1 (0x1), region = 62 }

// kernel: generator_forward.14
= control target key start
LH: loop header
LB: loop body
LE: loop exit
PB: predicated region body
PF: predicated region fallthrough
CT: control target
= control target key end

     0   :  { %s3781_s21 = smov 0   ;;  %s4374_s0 = inlined_call_operand.vmem [shape: bf16[4,1280], index: 0, kind: input, shape index: {}, may-alias: {0,1}]   ;;  %s4375_s1 = inlined_call_operand.vmem [shape: bf16[4,1280], index: 1, kind: input, shape index: {}, may-alias: {0,1}]   ;;  %s4376_s2 = inlined_call_operand.vmem [shape: bf16[49,8,4], index: 2, kind: input, shape index: {}]   ;;  %s4377_s3 = inlined_call_operand.vmem [shape: f32[1,1024], index: 3, kind: input, shape index: {}]   ;;  %s4378_s4 = inlined_call_operand.vmem [shape: bf16[8,1024], index: 4, kind: output, shape index: {0}]   ;;  %s4379_s5 = inlined_call_operand.vmem [shape: f32[4,8,1], index: 5, kind: output, shape index: {1}]   ;;  %s4380_s6 = inlined_call_operand.vmem [shape: f32[4,8,1], index: 6, kind: output, shape index: {2}]  }
   0x1 LB: > { %s3787_s22 = sadd.s32 4294967295, %s3698_s21   ;;  %p3522_p0 = scmp.ge.s32.totalorder %s3698_s21, 1  ;;  %s3698_s21 = sphi %s3781_s21, %s17_s21  }
   0x2   : > { %p243_p1 = scmp.lt.s32.totalorder %s3698_s21, 5 }
   0x4   : > { %p244_p2 = pnand %p3522_p0, %p243_p1 }
   0x5   : > { %s3792_s23 = sshll.u32 (!%p244_p2), %s3787_s22, 1  ;;  %s3701_s10 = smov (!%p244_p2), 126  }
   0x6   : > { %247 = sbr.rel (%p244_p2) target bundleno = 750 (0x2ee), region = 36  ;;  %p292_p3 = scmp.lt.s32.totalorder (!%p244_p2), %s3792_s23, 9 }
   0x7   : > { %s3636_s24 = sadd.s32 (!%p244_p2), 2, %s3792_s23  ;;  %s3702_s11 = smov (!%p244_p2), 127  }
   0x8   : > { %p299_p4 = scmp.lt.s32.totalorder (!%p244_p2), %s3636_s24, 9  ;;  %s3703_s14 = smov (!%p244_p2), 125  }
   0x9   : > { %s3704_s15 = smov (!%p244_p2), 124   ;;  %s3705_s16 = smov (!%p244_p2), 123  }
   0xa   : > { %s3706_s17 = smov (!%p244_p2), 122   ;;  %s3707_s18 = smov (!%p244_p2), 106  }
   0xb   : > { %s293_s25 = scalar_select %p292_p3, %s3792_s23, 9  ;;  %v3700_v0 = vmov 0   ;;  %vm407_vm0 = vcmask 1041408   ;;  %vm403_vm1 = vcmask 31744   ;;  %v345_v5 = vld [vmem:[%s4376_s2] sm:$0xf] }
   0xc   : > { %s4382_s24 = smov (!%p299_p4, %s3636_s24), 9  ;;  %446 = vmatprep.mubr.bf16.mxu0 %v3700_v0  ;;  %496 = vmatprep.mubr.bf16.mxu1 %v3700_v0  ;;  %s3708_s19 = smov 105   ;;  %vm400_vm2 = vcmask 1039360   ;;  %vm511_vm3 = vcmask 1031168   ;;  %v346_v15 = vld [vmem:[%s4376_s2 + $0x4] sm:$0xf] }
   0xd   : > { %s3524_s26 = sshll.u32 %s293_s25, 1  ;;  %s3526_s30 = sshll.u32 %s4382_s24, 1  ;;  %vm572_vm4 = vcmask 1022976   ;;  %v347_v24 = vld [vmem:[%s4376_s2 + $0x8] sm:$0xf]  ;;  %vm633_vm5 = vcmask 1014784  }
   0xe   : > { %s295_s29 = scalar_lea.vmem %s4374_s0, %s3524_s26  ;;  %s302_s9 = scalar_lea.vmem %s4375_s1, %s3526_s30  ;;  %v348_v29 = vld [vmem:[%s4376_s2 + $0xc] sm:$0xf]  ;;  %v349_v35 = vld [vmem:[%s4376_s2 + $0x10] sm:$0xf]  ;;  %vm694_vm6 = vcmask 1006592   ;;  %vm755_vm7 = vcmask 998400  }
   0xf   : > { %v3805_v1 = vld.sshfl [vmem:[%s295_s29] sm:$0x33 pattern:$0x76325410]  ;;  %s3709_s20 = smov 104   ;;  %s3710_s24 = smov 103  }
  0x10   : > { %505 = vrot.lane.b32.xlu1 %v3805_v1, %s3701_s10  ;;  %394 = vrot.lane.b32.xlu0 %v3805_v1, %s3702_s11  ;;  %v3811_v2 = vcombine.high %v3805_v1, %v3805_v1  ;;  %v3813_v3 = vld.sshfl [vmem:[%s302_s9] sm:$0x33 pattern:$0x76325410]  ;;  %v459_v4 = vsel %vm407_vm0, %v3805_v1, 0  ;;  %s3711_s25 = smov 102  }
  0x11   : > { %s3712_s26 = smov 101   ;;  %s3713_s27 = smov 100   ;;  %v350_v43 = vld [vmem:[%s4376_s2 + $0x14] sm:$0xf]  ;;  %v351_v49 = vld [vmem:[%s4376_s2 + $0x18] sm:$0xf] }
  0x12   : > { %3536 = vmatprep.subr.msk.bf16.mxu1 %vm407_vm0, %v3811_v2  ;;  %s3714_s28 = smov 84   ;;  %s3715_s29 = smov 83   ;;  %vm816_vm8 = vcmask 867328   ;;  %vm877_vm9 = vcmask 859136   ;;  %v352_v57 = vld [vmem:[%s4376_s2 + $0x1c] sm:$0xf] }
  0x13   : > { %479 = vmatpush1.bf16.msra.mxu1 %v459_v4  ;;  %s3716_s30 = smov 82   ;;  %s3717_s7 = smov 81   ;;  %v353_v63 = vld [vmem:[%s4376_s2 + $0x20] sm:$0xf]  ;;  %vm938_vm10 = vcmask 850944   ;;  %vm999_vm11 = vcmask 842752  }
  0x14   : > { %398 = vrot.lane.b32.xlu1 %v3813_v3, %s3702_s11  ;;  %396 = vrot.lane.b32.xlu0 %v3811_v2, %s3702_s11  ;;  %s3718_s8 = smov 80   ;;  %s3719_s9 = smov 79   ;;  %vm1060_vm12 = vcmask 834560   ;;  %vm1121_vm13 = vcmask 826368   ;;  %vm1182_vm14 = vcmask 818176   ;;  %vm1243_vm15 = vcmask 687104  }
  0x15   : > { %s3721_s11 = smov 62   ;;  %p306_p5 = scmp.lt.s32.totalorder %s3792_s23, 7 }
  0x16   : > { %3537 = vmatmul.mubr.msk.bf16.vlgmr.msra.gmra.mxu1 %vm403_vm1, %v345_v5  ;;  %p316_p6 = scmp.lt.s32.totalorder %s3787_s22, 3 }
  0x17   : > { %616 = vmatprep.mubr.bf16.mxu1 %v3700_v0  ;;  %s4384_s23 = smov (!%p306_p5, %s3792_s23), 7 }
  0x18   : > { %509 = vrot.lane.b32.xlu1 %v3813_v3, %s3701_s10  ;;  %507 = vrot.lane.b32.xlu0 %v3811_v2, %s3701_s10  ;;  %s3720_s10 = smov 78   ;;  %s4386_s22 = smov (!%p316_p6, %s3787_s22), 3 }
  0x1c   : > { %568 = vrot.lane.b32.xlu1 %v3811_v2, %s3703_s14  ;;  %566 = vrot.lane.b32.xlu0 %v3805_v1, %s3703_s14 }
  0x20   : > { %627 = vrot.lane.b32.xlu1 %v3805_v1, %s3704_s15  ;;  %570 = vrot.lane.b32.xlu0 %v3813_v3, %s3703_s14  ;;  %s3722_s14 = smov 61  }
  0x24   : > { %631 = vrot.lane.b32.xlu1 %v3813_v3, %s3704_s15  ;;  %629 = vrot.lane.b32.xlu0 %v3811_v2, %s3704_s15 }
  0x28   : > { %690 = vrot.lane.b32.xlu1 %v3811_v2, %s3705_s16  ;;  %688 = vrot.lane.b32.xlu0 %v3805_v1, %s3705_s16 }
  0x2c   : > { %749 = vrot.lane.b32.xlu1 %v3805_v1, %s3706_s17  ;;  %692 = vrot.lane.b32.xlu0 %v3813_v3, %s3705_s16 }
  0x30   : > { %753 = vrot.lane.b32.xlu1 %v3813_v3, %s3706_s17  ;;  %751 = vrot.lane.b32.xlu0 %v3811_v2, %s3706_s17 }
  0x34   : > { %812 = vrot.lane.b32.xlu1 %v3811_v2, %s3707_s18  ;;  %810 = vrot.lane.b32.xlu0 %v3805_v1, %s3707_s18 }
  0x38   : > { %871 = vrot.lane.b32.xlu1 %v3805_v1, %s3708_s19  ;;  %814 = vrot.lane.b32.xlu0 %v3813_v3, %s3707_s18 }
  0x3c   : > { %875 = vrot.lane.b32.xlu1 %v3813_v3, %s3708_s19  ;;  %873 = vrot.lane.b32.xlu0 %v3811_v2, %s3708_s19 }
  0x40   : > { %934 = vrot.lane.b32.xlu1 %v3811_v2, %s3709_s20  ;;  %932 = vrot.lane.b32.xlu0 %v3805_v1, %s3709_s20 }
  0x44   : > { %993 = vrot.lane.b32.xlu1 %v3805_v1, %s3710_s24  ;;  %936 = vrot.lane.b32.xlu0 %v3813_v3, %s3709_s20  ;;  %s3723_s20 = smov 60  }
  0x48   : > { %997 = vrot.lane.b32.xlu1 %v3813_v3, %s3710_s24  ;;  %995 = vrot.lane.b32.xlu0 %v3811_v2, %s3710_s24  ;;  %s3529_s24 = sshll.u32 %s4384_s23, 2 }
  0x4c   : > { %1056 = vrot.lane.b32.xlu1 %v3811_v2, %s3711_s25  ;;  %1054 = vrot.lane.b32.xlu0 %v3805_v1, %s3711_s25 }
  0x50   : > { %1115 = vrot.lane.b32.xlu1 %v3805_v1, %s3712_s26  ;;  %1058 = vrot.lane.b32.xlu0 %v3813_v3, %s3711_s25 }
  0x54   : > { %1119 = vrot.lane.b32.xlu1 %v3813_v3, %s3712_s26  ;;  %1117 = vrot.lane.b32.xlu0 %v3811_v2, %s3712_s26  ;;  %s3724_s26 = smov 59  }
  0x58   : > { %1178 = vrot.lane.b32.xlu1 %v3811_v2, %s3713_s27  ;;  %1176 = vrot.lane.b32.xlu0 %v3805_v1, %s3713_s27 }
  0x5c   : > { %1237 = vrot.lane.b32.xlu1 %v3805_v1, %s3714_s28  ;;  %1180 = vrot.lane.b32.xlu0 %v3813_v3, %s3713_s27  ;;  %s314_s27 = scalar_lea.vmem %s4378_s4, %s3529_s24 }
  0x60   : > { %1241 = vrot.lane.b32.xlu1 %v3813_v3, %s3714_s28  ;;  %1239 = vrot.lane.b32.xlu0 %v3811_v2, %s3714_s28  ;;  %s3743_s28 = smov 120  }
  0x64   : > { %1300 = vrot.lane.b32.xlu1 %v3811_v2, %s3715_s29  ;;  %1298 = vrot.lane.b32.xlu0 %v3805_v1, %s3715_s29 }
  0x68   : > { %1359 = vrot.lane.b32.xlu1 %v3805_v1, %s3716_s30  ;;  %1302 = vrot.lane.b32.xlu0 %v3813_v3, %s3715_s29  ;;  %s3725_s29 = smov 58  }
  0x6c   : > { %1363 = vrot.lane.b32.xlu1 %v3813_v3, %s3716_s30  ;;  %1361 = vrot.lane.b32.xlu0 %v3811_v2, %s3716_s30 }
  0x70   : > { %1422 = vrot.lane.b32.xlu1 %v3811_v2, %s3717_s7  ;;  %1420 = vrot.lane.b32.xlu0 %v3805_v1, %s3717_s7 }
  0x74   : > { %1481 = vrot.lane.b32.xlu1 %v3805_v1, %s3718_s8  ;;  %1424 = vrot.lane.b32.xlu0 %v3813_v3, %s3717_s7  ;;  %s3744_s7 = smov 119  }
  0x78   : > { %1485 = vrot.lane.b32.xlu1 %v3813_v3, %s3718_s8  ;;  %1483 = vrot.lane.b32.xlu0 %v3811_v2, %s3718_s8  ;;  %s3726_s8 = smov 57  }
  0x7c   : > { %1544 = vrot.lane.b32.xlu1 %v3811_v2, %s3719_s9  ;;  %1542 = vrot.lane.b32.xlu0 %v3805_v1, %s3719_s9 }
  0x80   : > { %1603 = vrot.lane.b32.xlu1 %v3805_v1, %s3720_s10  ;;  %1546 = vrot.lane.b32.xlu0 %v3813_v3, %s3719_s9 }
  0x82   : > { %v506_v6 = vpop.permute.xlu1 %505  ;;  %v395_v7 = vpop.permute.xlu0 %394 }
  0x84   : > { %1607 = vrot.lane.b32.xlu1 %v3813_v3, %s3720_s10  ;;  %1605 = vrot.lane.b32.xlu0 %v3811_v2, %s3720_s10  ;;  %s3745_s10 = smov 118  }
  0x86   : > { %v399_v8 = vpop.permute.xlu1 %398  ;;  %v397_v9 = vpop.permute.xlu0 %396 }
  0x87   : > { %v402_v10 = vsel %vm400_vm2, %v397_v9, %v399_v8  ;;  %v401_v11 = vsel %vm400_vm2, %v395_v7, %v397_v9  ;;  %vm1304_vm2 = vcmask 678912  }
  0x88   : > { %1666 = vrot.lane.b32.xlu1 %v3811_v2, %s3721_s11  ;;  %1664 = vrot.lane.b32.xlu0 %v3805_v1, %s3721_s11  ;;  %v409_v12 = vsel %vm407_vm0, %v401_v11, 0  ;;  %v354_v11 = vld [vmem:[%s4376_s2 + $0x24] sm:$0xf] }
  0x89   : > { %3534 = vmatprep.subr.msk.bf16.mxu0 %vm407_vm0, %v402_v10 }
  0x8a   : > { %429 = vmatpush1.bf16.msra.mxu0 %v409_v12  ;;  %v510_v13 = vpop.permute.xlu1 %509  ;;  %v508_v14 = vpop.permute.xlu0 %507 }
  0x8b   : > { %v512_v16 = vsel %vm511_vm3, %v506_v6, %v508_v14  ;;  %v513_v17 = vsel %vm511_vm3, %v508_v14, %v510_v13  ;;  %vm1365_vm3 = vcmask 670720  }
  0x8c   : > { %1725 = vrot.lane.b32.xlu1 %v3805_v1, %s3722_s14  ;;  %1668 = vrot.lane.b32.xlu0 %v3813_v3, %s3721_s11  ;;  %v518_v18 = vsel %vm407_vm0, %v512_v16, 0  ;;  %s3727_s11 = smov 56  }
  0x8d   : > { %3538 = vmatprep.subr.msk.bf16.mxu0 %vm407_vm0, %v513_v17  ;;  %3535 = vmatmul.mubr.msk.bf16.vlgmr.msra.gmra.mxu0 %vm403_vm1, %v346_v15  ;;  %v355_v17 = vld [vmem:[%s4376_s2 + $0x28] sm:$0xf] }
  0x8e   : > { %538 = vmatpush1.bf16.msra.mxu0 %v518_v18  ;;  %v569_v19 = vpop.permute.xlu1 %568  ;;  %v567_v20 = vpop.permute.xlu0 %566  ;;  %555 = vmatprep.mubr.bf16.mxu0 %v3700_v0 }
  0x8f   : > { %v573_v21 = vsel %vm572_vm4, %v567_v20, %v569_v19 }
  0x90   : > { %1729 = vrot.lane.b32.xlu1 %v3813_v3, %s3722_s14  ;;  %1727 = vrot.lane.b32.xlu0 %v3811_v2, %s3722_s14  ;;  %v579_v26 = vsel %vm407_vm0, %v573_v21, 0  ;;  %s3728_s14 = smov 40  }
  0x92   : > { %v628_v22 = vpop.permute.xlu1 %627  ;;  %v571_v23 = vpop.permute.xlu0 %570 }
  0x93   : > { %v574_v25 = vsel %vm572_vm4, %v569_v19, %v571_v23  ;;  %vm1426_vm4 = vcmask 662528  }
  0x94   : > { %1788 = vrot.lane.b32.xlu1 %v3811_v2, %s3723_s20  ;;  %1786 = vrot.lane.b32.xlu0 %v3805_v1, %s3723_s20 }
  0x95   : > { %3540 = vmatprep.subr.msk.bf16.mxu1 %vm407_vm0, %v574_v25  ;;  %3539 = vmatmul.mubr.msk.bf16.vlgmr.msra.gmra.mxu0 %vm403_vm1, %v347_v24  ;;  %v356_v25 = vld [vmem:[%s4376_s2 + $0x2c] sm:$0xf] }
  0x96   : > { %599 = vmatpush1.bf16.msra.mxu1 %v579_v26  ;;  %v3914_v27 = vpop.permute.xlu1 %631  ;;  %v630_v28 = vpop.permute.xlu0 %629  ;;  %677 = vmatprep.mubr.bf16.mxu0 %v3700_v0 }
  0x97   : > { %v634_v30 = vsel %vm633_vm5, %v628_v22, %v630_v28  ;;  %v3923_v31 = vsel %vm633_vm5, %v630_v28, %v3914_v27 }
  0x98   : > { %1847 = vrot.lane.b32.xlu1 %v3805_v1, %s3724_s26  ;;  %1790 = vrot.lane.b32.xlu0 %v3813_v3, %s3723_s20  ;;  %v640_v32 = vsel %vm407_vm0, %v634_v30, 0  ;;  %s3729_s20 = smov 39  }
  0x99   : > { %3542 = vmatprep.subr.msk.bf16.mxu0 %vm407_vm0, %v3923_v31  ;;  %3541 = vmatmul.mubr.msk.bf16.vlgmr.msra.gmra.mxu1 %vm403_vm1, %v348_v29 }
  0x9a   : > { %660 = vmatpush1.bf16.msra.mxu0 %v640_v32  ;;  %v691_v33 = vpop.permute.xlu1 %690  ;;  %v689_v34 = vpop.permute.xlu0 %688  ;;  %738 = vmatprep.mubr.bf16.mxu1 %v3700_v0 }
  0x9b   : > { %v695_v36 = vsel %vm694_vm6, %v689_v34, %v691_v33 }
  0x9c   : > { %1851 = vrot.lane.b32.xlu1 %v3813_v3, %s3724_s26  ;;  %1849 = vrot.lane.b32.xlu0 %v3811_v2, %s3724_s26  ;;  %v701_v40 = vsel %vm407_vm0, %v695_v36, 0  ;;  %s3730_s26 = smov 38  }
  0x9d   : > { %3543 = vmatmul.mubr.msk.bf16.vlgmr.msra.gmra.mxu0 %vm403_vm1, %v349_v35 }
  0x9e   : > { %v750_v37 = vpop.permute.xlu1 %749  ;;  %v3939_v38 = vpop.permute.xlu0 %692  ;;  %799 = vmatprep.mubr.bf16.mxu0 %v3700_v0 }
  0x9f   : > { %v3944_v39 = vsel %vm694_vm6, %v691_v33, %v3939_v38  ;;  %v357_v33 = vld [vmem:[%s4376_s2 + $0x30] sm:$0xf] }
  0xa0   : > { %1910 = vrot.lane.b32.xlu1 %v3811_v2, %s3725_s29  ;;  %1908 = vrot.lane.b32.xlu0 %v3805_v1, %s3725_s29 }
  0xa1   : > { %3544 = vmatprep.subr.msk.bf16.mxu1 %vm407_vm0, %v3944_v39 }
  0xa2   : > { %721 = vmatpush1.bf16.msra.mxu1 %v701_v40  ;;  %v3951_v41 = vpop.permute.xlu1 %753  ;;  %v752_v42 = vpop.permute.xlu0 %751 }
  0xa3   : > { %v756_v44 = vsel %vm755_vm7, %v750_v37, %v752_v42  ;;  %v3959_v45 = vsel %vm755_vm7, %v752_v42, %v3951_v41 }
  0xa4   : > { %1969 = vrot.lane.b32.xlu1 %v3805_v1, %s3726_s8  ;;  %1912 = vrot.lane.b32.xlu0 %v3813_v3, %s3725_s29  ;;  %v762_v46 = vsel %vm407_vm0, %v756_v44, 0  ;;  %s3731_s29 = smov 37   ;;  %v358_v44 = vld [vmem:[%s4376_s2 + $0x34] sm:$0xf] }
  0xa5   : > { %3546 = vmatprep.subr.msk.bf16.mxu0 %vm407_vm0, %v3959_v45  ;;  %3545 = vmatmul.mubr.msk.bf16.vlgmr.msra.gmra.mxu1 %vm403_vm1, %v350_v43 }
  0xa6   : > { %782 = vmatpush1.bf16.msra.mxu0 %v762_v46  ;;  %v813_v47 = vpop.permute.xlu1 %812  ;;  %v811_v48 = vpop.permute.xlu0 %810  ;;  %860 = vmatprep.mubr.bf16.mxu1 %v3700_v0 }
  0xa7   : > { %v817_v50 = vsel %vm816_vm8, %v811_v48, %v813_v47 }
  0xa8   : > { %1973 = vrot.lane.b32.xlu1 %v3813_v3, %s3726_s8  ;;  %1971 = vrot.lane.b32.xlu0 %v3811_v2, %s3726_s8  ;;  %v823_v54 = vsel %vm407_vm0, %v817_v50, 0  ;;  %s3732_s8 = smov 36  }
  0xa9   : > { %3547 = vmatmul.mubr.msk.bf16.vlgmr.msra.gmra.mxu0 %vm403_vm1, %v351_v49 }
  0xaa   : > { %v872_v51 = vpop.permute.xlu1 %871  ;;  %v815_v52 = vpop.permute.xlu0 %814  ;;  %921 = vmatprep.mubr.bf16.mxu0 %v3700_v0 }
  0xab   : > { %v818_v53 = vsel %vm816_vm8, %v813_v47, %v815_v52  ;;  %vm1487_vm8 = vcmask 654336  }
  0xac   : > { %2032 = vrot.lane.b32.xlu1 %v3811_v2, %s3727_s11  ;;  %2030 = vrot.lane.b32.xlu0 %v3805_v1, %s3727_s11 }
  0xad   : > { %3548 = vmatprep.subr.msk.bf16.mxu1 %vm407_vm0, %v818_v53 }
  0xae   : > { %843 = vmatpush1.bf16.msra.mxu1 %v823_v54  ;;  %v876_v55 = vpop.permute.xlu1 %875  ;;  %v874_v56 = vpop.permute.xlu0 %873 }
  0xaf   : > { %v878_v58 = vsel %vm877_vm9, %v872_v51, %v874_v56  ;;  %v879_v59 = vsel %vm877_vm9, %v874_v56, %v876_v55  ;;  %v359_v51 = vld [vmem:[%s4376_s2 + $0x38] sm:$0xf]  ;;  %vm1548_vm9 = vcmask 646144  }
  0xb0   : > { %2091 = vrot.lane.b32.xlu1 %v3805_v1, %s3728_s14  ;;  %2034 = vrot.lane.b32.xlu0 %v3813_v3, %s3727_s11  ;;  %v884_v60 = vsel %vm407_vm0, %v878_v58, 0  ;;  %s3733_s11 = smov 35  }
  0xb1   : > { %3550 = vmatprep.subr.msk.bf16.mxu0 %vm407_vm0, %v879_v59  ;;  %3549 = vmatmul.mubr.msk.bf16.vlgmr.msra.gmra.mxu1 %vm403_vm1, %v352_v57  ;;  %v360_v59 = vld [vmem:[%s4376_s2 + $0x3c] sm:$0xf] }
  0xb2   : > { %904 = vmatpush1.bf16.msra.mxu0 %v884_v60  ;;  %v935_v61 = vpop.permute.xlu1 %934  ;;  %v933_v62 = vpop.permute.xlu0 %932  ;;  %982 = vmatprep.mubr.bf16.mxu1 %v3700_v0 }
  0xb3   : > { %v939_v4 = vsel %vm938_vm10, %v933_v62, %v935_v61 }
  0xb4   : > { %2095 = vrot.lane.b32.xlu1 %v3813_v3, %s3728_s14  ;;  %2093 = vrot.lane.b32.xlu0 %v3811_v2, %s3728_s14  ;;  %v945_v8 = vsel %vm407_vm0, %v939_v4, 0  ;;  %s3734_s14 = smov 34  }
  0xb5   : > { %3551 = vmatmul.mubr.msk.bf16.vlgmr.msra.gmra.mxu0 %vm403_vm1, %v353_v63 }
  0xb6   : > { %v994_v5 = vpop.permute.xlu1 %993  ;;  %v937_v6 = vpop.permute.xlu0 %936  ;;  %1043 = vmatprep.mubr.bf16.mxu0 %v3700_v0 }
  0xb7   : > { %v940_v7 = vsel %vm938_vm10, %v935_v61, %v937_v6  ;;  %vm1609_vm10 = vcmask 637952  }
  0xb8   : > { %2154 = vrot.lane.b32.xlu1 %v3811_v2, %s3729_s20  ;;  %2152 = vrot.lane.b32.xlu0 %v3805_v1, %s3729_s20 }
  0xb9   : > { %3552 = vmatprep.subr.msk.bf16.mxu1 %vm407_vm0, %v940_v7 }
  0xba   : > { %965 = vmatpush1.bf16.msra.mxu1 %v945_v8  ;;  %v998_v9 = vpop.permute.xlu1 %997  ;;  %v996_v10 = vpop.permute.xlu0 %995 }
  0xbb   : > { %v1000_v12 = vsel %vm999_vm11, %v994_v5, %v996_v10  ;;  %v1001_v13 = vsel %vm999_vm11, %v996_v10, %v998_v9  ;;  %v361_v5 = vld [vmem:[%s4376_s2 + $0x40] sm:$0xf]  ;;  %vm1670_vm11 = vcmask 506880  }
  0xbc   : > { %2213 = vrot.lane.b32.xlu1 %v3805_v1, %s3730_s26  ;;  %2156 = vrot.lane.b32.xlu0 %v3813_v3, %s3729_s20  ;;  %v1006_v14 = vsel %vm407_vm0, %v1000_v12, 0  ;;  %s3735_s20 = smov 18  }
  0xbd   : > { %3554 = vmatprep.subr.msk.bf16.mxu0 %vm407_vm0, %v1001_v13  ;;  %3553 = vmatmul.mubr.msk.bf16.vlgmr.msra.gmra.mxu1 %vm403_vm1, %v354_v11  ;;  %v362_v13 = vld [vmem:[%s4376_s2 + $0x44] sm:$0xf] }
  0xbe   : > { %1026 = vmatpush1.bf16.msra.mxu0 %v1006_v14  ;;  %v1057_v15 = vpop.permute.xlu1 %1056  ;;  %v1055_v16 = vpop.permute.xlu0 %1054  ;;  %1104 = vmatprep.mubr.bf16.mxu1 %v3700_v0 }
  0xbf   : > { %v1061_v18 = vsel %vm1060_vm12, %v1055_v16, %v1057_v15 }
  0xc0   : > { %2217 = vrot.lane.b32.xlu1 %v3813_v3, %s3730_s26  ;;  %2215 = vrot.lane.b32.xlu0 %v3811_v2, %s3730_s26  ;;  %v1067_v22 = vsel %vm407_vm0, %v1061_v18, 0  ;;  %s3736_s26 = smov 17  }
  0xc1   : > { %3555 = vmatmul.mubr.msk.bf16.vlgmr.msra.gmra.mxu0 %vm403_vm1, %v355_v17 }
  0xc2   : > { %v1116_v19 = vpop.permute.xlu1 %1115  ;;  %v1059_v20 = vpop.permute.xlu0 %1058  ;;  %1165 = vmatprep.mubr.bf16.mxu0 %v3700_v0 }
  0xc3   : > { %v1062_v21 = vsel %vm1060_vm12, %v1057_v15, %v1059_v20  ;;  %vm1731_vm12 = vcmask 498688  }
  0xc4   : > { %2276 = vrot.lane.b32.xlu1 %v3811_v2, %s3731_s29  ;;  %2274 = vrot.lane.b32.xlu0 %v3805_v1, %s3731_s29 }
  0xc5   : > { %3556 = vmatprep.subr.msk.bf16.mxu1 %vm407_vm0, %v1062_v21 }
  0xc6   : > { %1087 = vmatpush1.bf16.msra.mxu1 %v1067_v22  ;;  %v1120_v23 = vpop.permute.xlu1 %1119  ;;  %v1118_v24 = vpop.permute.xlu0 %1117 }
  0xc7   : > { %v1122_v26 = vsel %vm1121_vm13, %v1116_v19, %v1118_v24  ;;  %v1123_v28 = vsel %vm1121_vm13, %v1118_v24, %v1120_v23  ;;  %v363_v19 = vld [vmem:[%s4376_s2 + $0x48] sm:$0xf]  ;;  %vm1792_vm13 = vcmask 490496  }
  0xc8   : > { %2335 = vrot.lane.b32.xlu1 %v3805_v1, %s3732_s8  ;;  %2278 = vrot.lane.b32.xlu0 %v3813_v3, %s3731_s29  ;;  %v1128_v29 = vsel %vm407_vm0, %v1122_v26, 0  ;;  %s3737_s29 = smov 16  }
  0xc9   : > { %3558 = vmatprep.subr.msk.bf16.mxu0 %vm407_vm0, %v1123_v28  ;;  %3557 = vmatmul.mubr.msk.bf16.vlgmr.msra.gmra.mxu1 %vm403_vm1, %v356_v25 }
  0xca   : > { %1148 = vmatpush1.bf16.msra.mxu0 %v1128_v29  ;;  %v1179_v30 = vpop.permute.xlu1 %1178  ;;  %v1177_v32 = vpop.permute.xlu0 %1176  ;;  %1226 = vmatprep.mubr.bf16.mxu1 %v3700_v0 }
  0xcb   : > { %v1183_v34 = vsel %vm1182_vm14, %v1177_v32, %v1179_v30 }
  0xcc   : > { %2339 = vrot.lane.b32.xlu1 %v3813_v3, %s3732_s8  ;;  %2337 = vrot.lane.b32.xlu0 %v3811_v2, %s3732_s8  ;;  %v1189_v40 = vsel %vm407_vm0, %v1183_v34, 0  ;;  %s3738_s8 = smov 15  }
  0xcd   : > { %3559 = vmatmul.mubr.msk.bf16.vlgmr.msra.gmra.mxu0 %vm403_vm1, %v357_v33 }
  0xce   : > { %v1238_v35 = vpop.permute.xlu1 %1237  ;;  %v1181_v36 = vpop.permute.xlu0 %1180  ;;  %1287 = vmatprep.mubr.bf16.mxu0 %v3700_v0 }
  0xcf   : > { %v1184_v37 = vsel %vm1182_vm14, %v1179_v30, %v1181_v36  ;;  %v364_v30 = vld [vmem:[%s4376_s2 + $0x4c] sm:$0xf]  ;;  %vm1853_vm14 = vcmask 482304  }
  0xd0   : > { %2398 = vrot.lane.b32.xlu1 %v3811_v2, %s3733_s11  ;;  %2396 = vrot.lane.b32.xlu0 %v3805_v1, %s3733_s11 }
  0xd1   : > { %3560 = vmatprep.subr.msk.bf16.mxu1 %vm407_vm0, %v1184_v37 }
  0xd2   : > { %1209 = vmatpush1.bf16.msra.mxu1 %v1189_v40  ;;  %v1242_v42 = vpop.permute.xlu1 %1241  ;;  %v1240_v43 = vpop.permute.xlu0 %1239 }
  0xd3   : > { %v1244_v46 = vsel %vm1243_vm15, %v1238_v35, %v1240_v43  ;;  %v1245_v47 = vsel %vm1243_vm15, %v1240_v43, %v1242_v42  ;;  %v365_v42 = vld [vmem:[%s4376_s2 + $0x50] sm:$0xf]  ;;  %vm1914_vm15 = vcmask 474112  }
  0xd4   : > { %2457 = vrot.lane.b32.xlu1 %v3805_v1, %s3734_s14  ;;  %2400 = vrot.lane.b32.xlu0 %v3813_v3, %s3733_s11  ;;  %v1250_v48 = vsel %vm407_vm0, %v1244_v46, 0  ;;  %s3739_s11 = smov 14  }
  0xd5   : > { %3562 = vmatprep.subr.msk.bf16.mxu0 %vm407_vm0, %v1245_v47  ;;  %3561 = vmatmul.mubr.msk.bf16.vlgmr.msra.gmra.mxu1 %vm403_vm1, %v358_v44 }
  0xd6   : > { %1270 = vmatpush1.bf16.msra.mxu0 %v1250_v48  ;;  %v1301_v49 = vpop.permute.xlu1 %1300  ;;  %v1299_v50 = vpop.permute.xlu0 %1298  ;;  %1348 = vmatprep.mubr.bf16.mxu1 %v3700_v0  ;;  %v4123_v48 = vcombine.high %v3813_v3, %v3813_v3 }
  0xd7   : > { %v1305_v52 = vsel %vm1304_vm2, %v1299_v50, %v1301_v49  ;;  %v4095_v24 = vpop.f32.mrf.mxu1 }
  0xd8   : > { %2461 = vrot.lane.b32.xlu1 %v3813_v3, %s3734_s14  ;;  %2459 = vrot.lane.b32.xlu0 %v3811_v2, %s3734_s14  ;;  %v1311_v56 = vsel %vm407_vm0, %v1305_v52, 0  ;;  %s3740_s14 = smov 13   ;;  %v366_v52 = vld [vmem:[%s4376_s2 + $0x54] sm:$0xf] }
  0xd9   : > { %3563 = vmatmul.mubr.msk.bf16.vlgmr.msra.gmra.mxu0 %vm403_vm1, %v359_v51  ;;  %v4101_v26 = vpop.f32.mrf.mxu1 }
  0xda   : > { %v1360_v53 = vpop.permute.xlu1 %1359  ;;  %v1303_v54 = vpop.permute.xlu0 %1302  ;;  %1409 = vmatprep.mubr.bf16.mxu0 %v3700_v0 }
  0xdb   : > { %v1306_v55 = vsel %vm1304_vm2, %v1301_v49, %v1303_v54  ;;  %v502_v34 = vpop.f32.mrf.mxu1  ;;  %vm1975_vm2 = vcmask 465920  }
  0xdc   : > { %2520 = vrot.lane.b32.xlu1 %v3811_v2, %s3735_s20  ;;  %2518 = vrot.lane.b32.xlu0 %v3805_v1, %s3735_s20  ;;  %v372_v34 = vld [vmem:[%s4376_s2 + $0x6c] sm:$0xf] }
  0xdd   : > { %3564 = vmatprep.subr.msk.bf16.mxu1 %vm407_vm0, %v1306_v55  ;;  %v503_v36 = vpop.f32.mrf.mxu1 }
  0xde   : > { %1331 = vmatpush1.bf16.msra.mxu1 %v1311_v56  ;;  %v1364_v57 = vpop.permute.xlu1 %1363  ;;  %v1362_v58 = vpop.permute.xlu0 %1361 }
  0xdf   : > { %v1366_v60 = vsel %vm1365_vm3, %v1360_v53, %v1362_v58  ;;  %v1367_v61 = vsel %vm1365_vm3, %v1362_v58, %v1364_v57  ;;  %v367_v57 = vld [vmem:[%s4376_s2 + $0x58] sm:$0xf]  ;;  %vm2036_vm3 = vcmask 457728  }
  0xe0   : > { %v1372_v62 = vsel %vm407_vm0, %v1366_v60, 0  ;;  %2579 = vrot.lane.b32.xlu1 %v3805_v1, %s3736_s26  ;;  %2522 = vrot.lane.b32.xlu0 %v3813_v3, %s3735_s20  ;;  %s3741_s20 = smov 12  }
  0xe1   : > { %3566 = vmatprep.subr.msk.bf16.mxu0 %vm407_vm0, %v1367_v61  ;;  %3565 = vmatmul.mubr.msk.bf16.vlgmr.msra.gmra.mxu1 %vm403_vm1, %v360_v59 }
  0xe2   : > { %1392 = vmatpush1.bf16.msra.mxu0 %v1372_v62  ;;  %v1423_v63 = vpop.permute.xlu1 %1422  ;;  %v1421_v4 = vpop.permute.xlu0 %1420  ;;  %1470 = vmatprep.mubr.bf16.mxu1 %v3700_v0 }
  0xe3   : > { %v1427_v6 = vsel %vm1426_vm4, %v1421_v4, %v1423_v63 }
  0xe4   : > { %2583 = vrot.lane.b32.xlu1 %v3813_v3, %s3736_s26  ;;  %2581 = vrot.lane.b32.xlu0 %v3811_v2, %s3736_s26  ;;  %v1433_v10 = vsel %vm407_vm0, %v1427_v6, 0 }
  0xe5   : > { %3567 = vmatmul.mubr.msk.bf16.vlgmr.msra.gmra.mxu0 %vm403_vm1, %v361_v5  ;;  %v368_v5 = vld [vmem:[%s4376_s2 + $0x5c] sm:$0xf] }
  0xe6   : > { %v1482_v7 = vpop.permute.xlu1 %1481  ;;  %v1425_v8 = vpop.permute.xlu0 %1424  ;;  %1531 = vmatprep.mubr.bf16.mxu0 %v3700_v0 }
  0xe7   : > { %v1428_v9 = vsel %vm1426_vm4, %v1423_v63, %v1425_v8  ;;  %vm2097_vm4 = vcmask 326656  }
  0xe8   : > { %2642 = vrot.lane.b32.xlu1 %v3811_v2, %s3737_s29  ;;  %2640 = vrot.lane.b32.xlu0 %v3805_v1, %s3737_s29 }
  0xe9   : > { %3568 = vmatprep.subr.msk.bf16.mxu1 %vm407_vm0, %v1428_v9 }
  0xea   : > { %1453 = vmatpush1.bf16.msra.mxu1 %v1433_v10  ;;  %v1486_v11 = vpop.permute.xlu1 %1485  ;;  %v1484_v12 = vpop.permute.xlu0 %1483 }
  0xeb   : > { %v1488_v14 = vsel %vm1487_vm8, %v1482_v7, %v1484_v12  ;;  %v1489_v15 = vsel %vm1487_vm8, %v1484_v12, %v1486_v11  ;;  %v369_v11 = vld [vmem:[%s4376_s2 + $0x60] sm:$0xf]  ;;  %vm2158_vm8 = vcmask 318464  }
  0xec   : > { %v1494_v16 = vsel %vm407_vm0, %v1488_v14, 0  ;;  %2701 = vrot.lane.b32.xlu1 %v3805_v1, %s3738_s8  ;;  %2644 = vrot.lane.b32.xlu0 %v3813_v3, %s3737_s29 }
  0xed   : > { %3570 = vmatprep.subr.msk.bf16.mxu0 %vm407_vm0, %v1489_v15  ;;  %3569 = vmatmul.mubr.msk.bf16.vlgmr.msra.gmra.mxu1 %vm403_vm1, %v362_v13 }
  0xee   : > { %1514 = vmatpush1.bf16.msra.mxu0 %v1494_v16  ;;  %v1545_v17 = vpop.permute.xlu1 %1544  ;;  %v1543_v18 = vpop.permute.xlu0 %1542  ;;  %1592 = vmatprep.mubr.bf16.mxu1 %v3700_v0 }
  0xef   : > { %v1549_v20 = vsel %vm1548_vm9, %v1543_v18, %v1545_v17 }
  0xf0   : > { %2705 = vrot.lane.b32.xlu1 %v3813_v3, %s3738_s8  ;;  %2703 = vrot.lane.b32.xlu0 %v3811_v2, %s3738_s8  ;;  %v1555_v25 = vsel %vm407_vm0, %v1549_v20, 0 }
  0xf1   : > { %3571 = vmatmul.mubr.msk.bf16.vlgmr.msra.gmra.mxu0 %vm403_vm1, %v363_v19  ;;  %v370_v19 = vld [vmem:[%s4376_s2 + $0x64] sm:$0xf] }
  0xf2   : > { %v1604_v21 = vpop.permute.xlu1 %1603  ;;  %v1547_v22 = vpop.permute.xlu0 %1546  ;;  %1653 = vmatprep.mubr.bf16.mxu0 %v3700_v0 }
  0xf3   : > { %v1550_v23 = vsel %vm1548_vm9, %v1545_v17, %v1547_v22  ;;  %vm2219_vm9 = vcmask 310272  }
  0xf4   : > { %2764 = vrot.lane.b32.xlu1 %v3811_v2, %s3739_s11  ;;  %2762 = vrot.lane.b32.xlu0 %v3805_v1, %s3739_s11 }
  0xf5   : > { %3572 = vmatprep.subr.msk.bf16.mxu1 %vm407_vm0, %v1550_v23 }
  0xf6   : > { %1575 = vmatpush1.bf16.msra.mxu1 %v1555_v25  ;;  %v1608_v28 = vpop.permute.xlu1 %1607  ;;  %v1606_v29 = vpop.permute.xlu0 %1605 }
  0xf7   : > { %v1610_v32 = vsel %vm1609_vm10, %v1604_v21, %v1606_v29  ;;  %v1611_v33 = vsel %vm1609_vm10, %v1606_v29, %v1608_v28  ;;  %v371_v28 = vld [vmem:[%s4376_s2 + $0x68] sm:$0xf]  ;;  %vm2280_vm10 = vcmask 302080  }
  0xf8   : > { %v1616_v35 = vsel %vm407_vm0, %v1610_v32, 0  ;;  %2823 = vrot.lane.b32.xlu1 %v3805_v1, %s3740_s14  ;;  %2766 = vrot.lane.b32.xlu0 %v3813_v3, %s3739_s11 }
  0xf9   : > { %3574 = vmatprep.subr.msk.bf16.mxu0 %vm407_vm0, %v1611_v33  ;;  %3573 = vmatmul.mubr.msk.bf16.vlgmr.msra.gmra.mxu1 %vm403_vm1, %v364_v30 }
  0xfa   : > { %1636 = vmatpush1.bf16.msra.mxu0 %v1616_v35  ;;  %v1667_v37 = vpop.permute.xlu1 %1666  ;;  %v1665_v40 = vpop.permute.xlu0 %1664  ;;  %1714 = vmatprep.mubr.bf16.mxu1 %v3700_v0 }
  0xfb   : > { %v1671_v43 = vsel %vm1670_vm11, %v1665_v40, %v1667_v37 }
  0xfc   : > { %2827 = vrot.lane.b32.xlu1 %v3813_v3, %s3740_s14  ;;  %2825 = vrot.lane.b32.xlu0 %v3811_v2, %s3740_s14  ;;  %v1677_v49 = vsel %vm407_vm0, %v1671_v43, 0 }
  0xfd   : > { %3575 = vmatmul.mubr.msk.bf16.vlgmr.msra.gmra.mxu0 %vm403_vm1, %v365_v42  ;;  %v373_v42 = vld [vmem:[%s4376_s2 + $0x70] sm:$0xf] }
  0xfe   : > { %v1726_v44 = vpop.permute.xlu1 %1725  ;;  %v1669_v46 = vpop.permute.xlu0 %1668  ;;  %1775 = vmatprep.mubr.bf16.mxu0 %v3700_v0 }
  0xff   : > { %v1672_v47 = vsel %vm1670_vm11, %v1667_v37, %v1669_v46  ;;  %vm2341_vm11 = vcmask 293888  }
 0x100   : > { %2886 = vrot.lane.b32.xlu1 %v3811_v2, %s3741_s20  ;;  %2884 = vrot.lane.b32.xlu0 %v3805_v1, %s3741_s20 }
 0x101   : > { %3576 = vmatprep.subr.msk.bf16.mxu1 %vm407_vm0, %v1672_v47 }
 0x102   : > { %1697 = vmatpush1.bf16.msra.mxu1 %v1677_v49  ;;  %v1730_v50 = vpop.permute.xlu1 %1729  ;;  %v1728_v51 = vpop.permute.xlu0 %1727 }
 0x103   : > { %v1732_v53 = vsel %vm1731_vm12, %v1726_v44, %v1728_v51  ;;  %v1733_v54 = vsel %vm1731_vm12, %v1728_v51, %v1730_v50  ;;  %v374_v51 = vld [vmem:[%s4376_s2 + $0x74] sm:$0xf]  ;;  %vm2402_vm12 = vcmask 285696  }
 0x104   : > { %v1738_v1 = vsel %vm407_vm0, %v1732_v53, 0  ;;  %2945 = vrot.lane.b32.xlu1 %v4123_v48, %s3704_s15  ;;  %2888 = vrot.lane.b32.xlu0 %v3813_v3, %s3741_s20  ;;  %s3742_s15 = smov 121   ;;  %s308_s20 = scalar_lea.vmem %s4377_s3, %s4384_s23 }
 0x105   : > { %3577 = vmatmul.mubr.msk.bf16.vlgmr.msra.gmra.mxu1 %vm403_vm1, %v366_v52  ;;  %3578 = vmatprep.subr.msk.bf16.mxu0 %vm407_vm0, %v1733_v54  ;;  %s3530_s23 = sshll.u32 %s4386_s22, 3 }
 0x106   : > { %1758 = vmatpush1.bf16.msra.mxu0 %v1738_v1  ;;  %v1789_v55 = vpop.permute.xlu1 %1788  ;;  %v1787_v56 = vpop.permute.xlu0 %1786  ;;  %1836 = vmatprep.mubr.bf16.mxu1 %v3700_v0  ;;  %s323_s30 = scalar_lea.vmem %s4380_s6, %s3530_s23 }
 0x107   : > { %v1793_v58 = vsel %vm1792_vm13, %v1787_v56, %v1789_v55  ;;  %v375_v56 = vld [vmem:[%s4376_s2 + $0x78] sm:$0xf] }
 0x108   : > { %3049 = vrot.lane.b32.xlu1 %v4123_v48, %s3706_s17  ;;  %2997 = vrot.lane.b32.xlu0 %v4123_v48, %s3705_s16  ;;  %v1799_v62 = vsel %vm407_vm0, %v1793_v58, 0  ;;  %s319_s17 = scalar_lea.vmem %s4379_s5, %s3530_s23 }
 0x109   : > { %3579 = vmatmul.mubr.msk.bf16.vlgmr.msra.gmra.mxu0 %vm403_vm1, %v367_v57 }
 0x10a   : > { %v1848_v59 = vpop.permute.xlu1 %1847  ;;  %v1791_v60 = vpop.permute.xlu0 %1790  ;;  %1897 = vmatprep.mubr.bf16.mxu0 %v3700_v0 }
 0x10b   : > { %v1794_v61 = vsel %vm1792_vm13, %v1789_v55, %v1791_v60  ;;  %vm2463_vm13 = vcmask 277504  }
 0x10c   : > { %3103 = vrot.lane.b32.xlu1 %v3813_v3, %s3742_s15  ;;  %3101 = vrot.lane.b32.xlu0 %v3811_v2, %s3742_s15 }
 0x10d   : > { %3580 = vmatprep.subr.msk.bf16.mxu1 %vm407_vm0, %v1794_v61 }
 0x10e   : > { %1819 = vmatpush1.bf16.msra.mxu1 %v1799_v62  ;;  %v1852_v63 = vpop.permute.xlu1 %1851  ;;  %v1850_v4 = vpop.permute.xlu0 %1849 }
 0x10f   : > { %v1854_v6 = vsel %vm1853_vm14, %v1848_v59, %v1850_v4  ;;  %v1855_v7 = vsel %vm1853_vm14, %v1850_v4, %v1852_v63  ;;  %v376_v4 = vld [vmem:[%s4376_s2 + $0x7c] sm:$0xf]  ;;  %vm2524_vm14 = vcmask 146432  }
 0x110   : > { %v1860_v8 = vsel %vm407_vm0, %v1854_v6, 0  ;;  %3162 = vrot.lane.b32.xlu1 %v3811_v2, %s3743_s28  ;;  %3105 = vrot.lane.b32.xlu0 %v4123_v48, %s3742_s15 }
 0x111   : > { %3581 = vmatmul.mubr.msk.bf16.vlgmr.msra.gmra.mxu1 %vm403_vm1, %v368_v5  ;;  %3582 = vmatprep.subr.msk.bf16.mxu0 %vm407_vm0, %v1855_v7 }
 0x112   : > { %1880 = vmatpush1.bf16.msra.mxu0 %v1860_v8  ;;  %v1911_v9 = vpop.permute.xlu1 %1910  ;;  %v1909_v10 = vpop.permute.xlu0 %1908  ;;  %1958 = vmatprep.mubr.bf16.mxu1 %v3700_v0 }
 0x113   : > { %v1915_v12 = vsel %vm1914_vm15, %v1909_v10, %v1911_v9  ;;  %v377_v10 = vld [vmem:[%s4376_s2 + $0x80] sm:$0xf] }
 0x114   : > { %3166 = vrot.lane.b32.xlu1 %v4123_v48, %s3743_s28  ;;  %3164 = vrot.lane.b32.xlu0 %v3813_v3, %s3743_s28  ;;  %v1921_v16 = vsel %vm407_vm0, %v1915_v12, 0 }
 0x115   : > { %3583 = vmatmul.mubr.msk.bf16.vlgmr.msra.gmra.mxu0 %vm403_vm1, %v369_v11 }
 0x116   : > { %v1970_v13 = vpop.permute.xlu1 %1969  ;;  %v1913_v14 = vpop.permute.xlu0 %1912  ;;  %2019 = vmatprep.mubr.bf16.mxu0 %v3700_v0 }
 0x117   : > { %v1916_v15 = vsel %vm1914_vm15, %v1911_v9, %v1913_v14  ;;  %vm2585_vm15 = vcmask 138240  }
 0x118   : > { %3225 = vrot.lane.b32.xlu1 %v3813_v3, %s3744_s7  ;;  %3223 = vrot.lane.b32.xlu0 %v3811_v2, %s3744_s7 }
 0x119   : > { %3584 = vmatprep.subr.msk.bf16.mxu1 %vm407_vm0, %v1916_v15 }
 0x11a   : > { %1941 = vmatpush1.bf16.msra.mxu1 %v1921_v16  ;;  %v1974_v17 = vpop.permute.xlu1 %1973  ;;  %v1972_v18 = vpop.permute.xlu0 %1971 }
 0x11b   : > { %v1976_v20 = vsel %vm1975_vm2, %v1970_v13, %v1972_v18  ;;  %v1977_v21 = vsel %vm1975_vm2, %v1972_v18, %v1974_v17  ;;  %v378_v18 = vld [vmem:[%s4376_s2 + $0x84] sm:$0xf]  ;;  %vm2646_vm2 = vcmask 130048  }
 0x11c   : > { %v1982_v22 = vsel %vm407_vm0, %v1976_v20, 0  ;;  %3284 = vrot.lane.b32.xlu1 %v3811_v2, %s3745_s10  ;;  %3227 = vrot.lane.b32.xlu0 %v4123_v48, %s3744_s7 }
 0x11d   : > { %3585 = vmatmul.mubr.msk.bf16.vlgmr.msra.gmra.mxu1 %vm403_vm1, %v370_v19  ;;  %3586 = vmatprep.subr.msk.bf16.mxu0 %vm407_vm0, %v1977_v21 }
 0x11e   : > { %2002 = vmatpush1.bf16.msra.mxu0 %v1982_v22  ;;  %v2033_v23 = vpop.permute.xlu1 %2032  ;;  %v2031_v25 = vpop.permute.xlu0 %2030  ;;  %2080 = vmatprep.mubr.bf16.mxu1 %v3700_v0 }
 0x11f   : > { %v2037_v2 = vsel %vm2036_vm3, %v2031_v25, %v2033_v23  ;;  %v379_v25 = vld [vmem:[%s4376_s2 + $0x88] sm:$0xf] }
 0x120   : > { %3288 = vrot.lane.b32.xlu1 %v4123_v48, %s3745_s10  ;;  %3286 = vrot.lane.b32.xlu0 %v3813_v3, %s3745_s10  ;;  %v2043_v33 = vsel %vm407_vm0, %v2037_v2, 0 }
 0x121   : > { %3587 = vmatmul.mubr.msk.bf16.vlgmr.msra.gmra.mxu0 %vm403_vm1, %v371_v28 }
 0x122   : > { %v2092_v29 = vpop.permute.xlu1 %2091  ;;  %v2035_v30 = vpop.permute.xlu0 %2034  ;;  %2141 = vmatprep.mubr.bf16.mxu0 %v3700_v0 }
 0x123   : > { %v2038_v32 = vsel %vm2036_vm3, %v2033_v23, %v2035_v30  ;;  %vm2707_vm3 = vcmask 121856  }
 0x124   : > { %3588 = vmatprep.subr.msk.bf16.mxu1 %vm407_vm0, %v2038_v32 }
 0x125   : > { %2063 = vmatpush1.bf16.msra.mxu1 %v2043_v33 }
 0x126   : > { %v2096_v35 = vpop.permute.xlu1 %2095  ;;  %v2094_v3 = vpop.permute.xlu0 %2093 }
 0x127   : > { %v2098_v36 = vsel %vm2097_vm4, %v2092_v29, %v2094_v3  ;;  %v2099_v37 = vsel %vm2097_vm4, %v2094_v3, %v2096_v35  ;;  %vm2768_vm4 = vcmask 113664  }
 0x128   : > { %v2104_v40 = vsel %vm407_vm0, %v2098_v36, 0  ;;  %3589 = vmatmul.mubr.msk.bf16.vlgmr.msra.gmra.mxu1 %vm403_vm1, %v372_v34  ;;  %3590 = vmatprep.subr.msk.bf16.mxu0 %vm407_vm0, %v2099_v37 }
 0x129   : > { %2124 = vmatpush1.bf16.msra.mxu0 %v2104_v40  ;;  %2202 = vmatprep.mubr.bf16.mxu1 %v3700_v0 }
 0x12a   : > { %v2155_v43 = vpop.permute.xlu1 %2154  ;;  %v2153_v44 = vpop.permute.xlu0 %2152 }
 0x12b   : > { %v2159_v46 = vsel %vm2158_vm8, %v2153_v44, %v2155_v43 }
 0x12c   : > { %3591 = vmatmul.mubr.msk.bf16.vlgmr.msra.gmra.mxu0 %vm403_vm1, %v373_v42  ;;  %v2165_v50 = vsel %vm407_vm0, %v2159_v46, 0 }
 0x12d   : > { %2263 = vmatprep.mubr.bf16.mxu0 %v3700_v0 }
 0x12e   : > { %v2214_v47 = vpop.permute.xlu1 %2213  ;;  %v2157_v48 = vpop.permute.xlu0 %2156 }
 0x12f   : > { %v2160_v49 = vsel %vm2158_vm8, %v2155_v43, %v2157_v48  ;;  %v380_v43 = vld [vmem:[%s4376_s2 + $0x8c] sm:$0xf]  ;;  %vm2829_vm8 = vcmask 105472  }
 0x130   : > { %3592 = vmatprep.subr.msk.bf16.mxu1 %vm407_vm0, %v2160_v49 }
 0x131   : > { %2185 = vmatpush1.bf16.msra.mxu1 %v2165_v50 }
 0x132   : > { %v2218_v52 = vpop.permute.xlu1 %2217  ;;  %v2216_v53 = vpop.permute.xlu0 %2215 }
 0x133   : > { %v2220_v54 = vsel %vm2219_vm9, %v2214_v47, %v2216_v53  ;;  %v2221_v1 = vsel %vm2219_vm9, %v2216_v53, %v2218_v52  ;;  %vm2890_vm9 = vcmask 97280  }
 0x134   : > { %v2226_v55 = vsel %vm407_vm0, %v2220_v54, 0  ;;  %3593 = vmatmul.mubr.msk.bf16.vlgmr.msra.gmra.mxu1 %vm403_vm1, %v374_v51  ;;  %3594 = vmatprep.subr.msk.bf16.mxu0 %vm407_vm0, %v2221_v1 }
 0x135   : > { %2246 = vmatpush1.bf16.msra.mxu0 %v2226_v55  ;;  %2324 = vmatprep.mubr.bf16.mxu1 %v3700_v0 }
 0x136   : > { %v2277_v57 = vpop.permute.xlu1 %2276  ;;  %v2275_v58 = vpop.permute.xlu0 %2274 }
 0x137   : > { %v2281_v59 = vsel %vm2280_vm10, %v2275_v58, %v2277_v57 }
 0x138   : > { %3595 = vmatmul.mubr.msk.bf16.vlgmr.msra.gmra.mxu0 %vm403_vm1, %v375_v56  ;;  %v2287_v63 = vsel %vm407_vm0, %v2281_v59, 0 }
 0x139   : > { %2385 = vmatprep.mubr.bf16.mxu0 %v3700_v0 }
 0x13a   : > { %v2336_v60 = vpop.permute.xlu1 %2335  ;;  %v2279_v61 = vpop.permute.xlu0 %2278 }
 0x13b   : > { %v2282_v62 = vsel %vm2280_vm10, %v2277_v57, %v2279_v61  ;;  %vm3290_vm10 = vcmask 965632  }
 0x13c   : > { %3596 = vmatprep.subr.msk.bf16.mxu1 %vm407_vm0, %v2282_v62 }
 0x13d   : > { %2307 = vmatpush1.bf16.msra.mxu1 %v2287_v63 }
 0x13e   : > { %v2340_v5 = vpop.permute.xlu1 %2339  ;;  %v2338_v6 = vpop.permute.xlu0 %2337 }
 0x13f   : > { %v2342_v7 = vsel %vm2341_vm11, %v2336_v60, %v2338_v6  ;;  %v2343_v8 = vsel %vm2341_vm11, %v2338_v6, %v2340_v5 }
 0x140   : > { %v2348_v9 = vsel %vm407_vm0, %v2342_v7, 0  ;;  %3597 = vmatmul.mubr.msk.bf16.vlgmr.msra.gmra.mxu1 %vm403_vm1, %v376_v4  ;;  %3598 = vmatprep.subr.msk.bf16.mxu0 %vm407_vm0, %v2343_v8 }
 0x141   : > { %2368 = vmatpush1.bf16.msra.mxu0 %v2348_v9  ;;  %2446 = vmatprep.mubr.bf16.mxu1 %v3700_v0 }
 0x142   : > { %v2399_v11 = vpop.permute.xlu1 %2398  ;;  %v2397_v12 = vpop.permute.xlu0 %2396 }
 0x143   : > { %v2403_v13 = vsel %vm2402_vm12, %v2397_v12, %v2399_v11 }
 0x144   : > { %3599 = vmatmul.mubr.msk.bf16.vlgmr.msra.gmra.mxu0 %vm403_vm1, %v377_v10  ;;  %v2409_v17 = vsel %vm407_vm0, %v2403_v13, 0 }
 0x145   : > { %2507 = vmatprep.mubr.bf16.mxu0 %v3700_v0 }
 0x146   : > { %v2458_v14 = vpop.permute.xlu1 %2457  ;;  %v2401_v15 = vpop.permute.xlu0 %2400 }
 0x147   : > { %v2404_v16 = vsel %vm2402_vm12, %v2399_v11, %v2401_v15  ;;  %v382_v11 = vld [vmem:[%s4376_s2 + $0x94] sm:$0xf] }
 0x148   : > { %3600 = vmatprep.subr.msk.bf16.mxu1 %vm407_vm0, %v2404_v16 }
 0x149   : > { %2429 = vmatpush1.bf16.msra.mxu1 %v2409_v17 }
 0x14a   : > { %v2462_v19 = vpop.permute.xlu1 %2461  ;;  %v2460_v20 = vpop.permute.xlu0 %2459 }
 0x14b   : > { %v2464_v21 = vsel %vm2463_vm13, %v2458_v14, %v2460_v20  ;;  %v2465_v22 = vsel %vm2463_vm13, %v2460_v20, %v2462_v19  ;;  %v383_v19 = vld [vmem:[%s4376_s2 + $0x98] sm:$0xf] }
 0x14c   : > { %v2470_v23 = vsel %vm407_vm0, %v2464_v21, 0  ;;  %3601 = vmatmul.mubr.msk.bf16.vlgmr.msra.gmra.mxu1 %vm403_vm1, %v378_v18  ;;  %3602 = vmatprep.subr.msk.bf16.mxu0 %vm407_vm0, %v2465_v22 }
 0x14d   : > { %2490 = vmatpush1.bf16.msra.mxu0 %v2470_v23  ;;  %2568 = vmatprep.mubr.bf16.mxu1 %v3700_v0  ;;  %v448_v28 = vpop.f32.mrf.mxu0 }
 0x14e   : > { %v2521_v2 = vpop.permute.xlu1 %2520  ;;  %v2519_v29 = vpop.permute.xlu0 %2518  ;;  %v499_v3 = vadd.f32 %v4095_v24, %v448_v28 }
 0x14f   : > { %v450_v30 = vpop.f32.mrf.mxu0  ;;  %v2525_v32 = vsel %vm2524_vm14, %v2519_v29, %v2521_v2 }
 0x150   : > { %3603 = vmatmul.mubr.msk.bf16.vlgmr.msra.gmra.mxu0 %vm403_vm1, %v379_v25  ;;  %v2531_v40 = vsel %vm407_vm0, %v2525_v32, 0  ;;  %v501_v42 = vadd.f32 %v4101_v26, %v450_v30  ;;  %v381_v26 = vld [vmem:[%s4376_s2 + $0x90] sm:$0xf] }
 0x151   : > { %2629 = vmatprep.mubr.bf16.mxu0 %v3700_v0  ;;  %v452_v33 = vpop.f32.mrf.mxu0 }
 0x152   : > { %v2580_v34 = vpop.permute.xlu1 %2579  ;;  %v2523_v35 = vpop.permute.xlu0 %2522 }
 0x153   : > { %v2526_v36 = vsel %vm2524_vm14, %v2521_v2, %v2523_v35  ;;  %v453_v37 = vpop.f32.mrf.mxu0 }
 0x154   : > { %3604 = vmatprep.subr.msk.bf16.mxu1 %vm407_vm0, %v2526_v36 }
 0x155   : > { %2551 = vmatpush1.bf16.msra.mxu1 %v2531_v40  ;;  %v557_v44 = vpop.f32.mrf.mxu0 }
 0x156   : > { %v2584_v46 = vpop.permute.xlu1 %2583  ;;  %v2582_v47 = vpop.permute.xlu0 %2581  ;;  %v564_v48 = vadd.f32 %v557_v44, %v499_v3 }
 0x157   : > { %v2586_v49 = vsel %vm2585_vm15, %v2580_v34, %v2582_v47  ;;  %v2587_v24 = vsel %vm2585_vm15, %v2582_v47, %v2584_v46  ;;  %v559_v50 = vpop.f32.mrf.mxu0 }
 0x158   : > { %v2592_v51 = vsel %vm407_vm0, %v2586_v49, 0  ;;  %3605 = vmatmul.mubr.msk.bf16.vlgmr.msra.gmra.mxu1 %vm403_vm1, %v380_v43  ;;  %3606 = vmatprep.subr.msk.bf16.mxu0 %vm407_vm0, %v2587_v24  ;;  %v565_v52 = vadd.f32 %v559_v50, %v501_v42  ;;  %v384_v42 = vld [vmem:[%s4376_s2 + $0x9c] sm:$0xf]  ;;  %v385_v50 = vld [vmem:[%s4376_s2 + $0xa0] sm:$0xf] }
 0x159   : > { %2612 = vmatpush1.bf16.msra.mxu0 %v2592_v51  ;;  %2690 = vmatprep.mubr.bf16.mxu1 %v3700_v0  ;;  %v561_v53 = vpop.f32.mrf.mxu0  ;;  %v618_v54 = vpop.f32.mrf.mxu1 }
 0x15a   : > { %v2643_v1 = vpop.permute.xlu1 %2642  ;;  %v2641_v55 = vpop.permute.xlu0 %2640  ;;  %v625_v56 = vadd.f32 %v618_v54, %v564_v48 }
 0x15b   : > { %v562_v57 = vpop.f32.mrf.mxu0  ;;  %v620_v58 = vpop.f32.mrf.mxu1  ;;  %v2647_v60 = vsel %vm2646_vm2, %v2641_v55, %v2643_v1 }
 0x15c   : > { %3607 = vmatmul.mubr.msk.bf16.vlgmr.msra.gmra.mxu0 %vm403_vm1, %v381_v26  ;;  %v626_v59 = vadd.f32 %v620_v58, %v565_v52  ;;  %v2653_v9 = vsel %vm407_vm0, %v2647_v60, 0 }
 0x15d   : > { %2751 = vmatprep.mubr.bf16.mxu0 %v3700_v0  ;;  %v622_v61 = vpop.f32.mrf.mxu1  ;;  %v679_v62 = vpop.f32.mrf.mxu0 }
 0x15e   : > { %v2702_v63 = vpop.permute.xlu1 %2701  ;;  %v2645_v4 = vpop.permute.xlu0 %2644  ;;  %v686_v5 = vadd.f32 %v679_v62, %v625_v56 }
 0x15f   : > { %v2648_v6 = vsel %vm2646_vm2, %v2643_v1, %v2645_v4  ;;  %v681_v7 = vpop.f32.mrf.mxu0  ;;  %v623_v8 = vpop.f32.mrf.mxu1 }
 0x160   : > { %3608 = vmatprep.subr.msk.bf16.mxu1 %vm407_vm0, %v2648_v6  ;;  %v687_v10 = vadd.f32 %v681_v7, %v626_v59  ;;  %v643_v6 = vsel %vm407_vm0, %v3923_v31, 0  ;;  %v386_v8 = vld [vmem:[%s4376_s2 + $0xa4] sm:$0xf] }
 0x161   : > { %2673 = vmatpush1.bf16.msra.mxu1 %v2653_v9  ;;  %v683_v12 = vpop.f32.mrf.mxu0 }
 0x162   : > { %v2706_v13 = vpop.permute.xlu1 %2705  ;;  %v2704_v14 = vpop.permute.xlu0 %2703 }
 0x163   : > { %v2708_v15 = vsel %vm2707_vm3, %v2702_v63, %v2704_v14  ;;  %v2709_v16 = vsel %vm2707_vm3, %v2704_v14, %v2706_v13  ;;  %v684_v17 = vpop.f32.mrf.mxu0  ;;  %v704_v14 = vsel %vm407_vm0, %v3944_v39, 0  ;;  %v388_v39 = vld [vmem:[%s4376_s2 + $0xac] sm:$0xf] }
 0x164   : > { %v2714_v18 = vsel %vm407_vm0, %v2708_v15, 0  ;;  %3609 = vmatmul.mubr.msk.bf16.vlgmr.msra.gmra.mxu1 %vm403_vm1, %v382_v11  ;;  %3610 = vmatprep.subr.msk.bf16.mxu0 %vm407_vm0, %v2709_v16  ;;  %v387_v11 = vld [vmem:[%s4376_s2 + $0xa8] sm:$0xf]  ;;  %v765_v15 = vsel %vm407_vm0, %v3959_v45, 0 }
 0x165   : > { %2734 = vmatpush1.bf16.msra.mxu0 %v2714_v18  ;;  %2812 = vmatprep.mubr.bf16.mxu1 %v3700_v0  ;;  %v740_v20 = vpop.f32.mrf.mxu1 }
 0x166   : > { %v2765_v21 = vpop.permute.xlu1 %2764  ;;  %v2763_v22 = vpop.permute.xlu0 %2762  ;;  %v747_v23 = vadd.f32 %v740_v20, %v686_v5 }
 0x167   : > { %v742_v25 = vpop.f32.mrf.mxu1  ;;  %v2769_v2 = vsel %vm2768_vm4, %v2763_v22, %v2765_v21 }
 0x168   : > { %3611 = vmatmul.mubr.msk.bf16.vlgmr.msra.gmra.mxu0 %vm403_vm1, %v383_v19  ;;  %v748_v28 = vadd.f32 %v742_v25, %v687_v10  ;;  %v2775_v37 = vsel %vm407_vm0, %v2769_v2, 0  ;;  %v389_v25 = vld [vmem:[%s4376_s2 + $0xb0] sm:$0xf] }
 0x169   : > { %2873 = vmatprep.mubr.bf16.mxu0 %v3700_v0  ;;  %v744_v29 = vpop.f32.mrf.mxu1  ;;  %v801_v30 = vpop.f32.mrf.mxu0 }
 0x16a   : > { %v2824_v32 = vpop.permute.xlu1 %2823  ;;  %v2767_v33 = vpop.permute.xlu0 %2766  ;;  %v808_v34 = vadd.f32 %v801_v30, %v747_v23 }
 0x16b   : > { %v2770_v35 = vsel %vm2768_vm4, %v2765_v21, %v2767_v33  ;;  %v803_v3 = vpop.f32.mrf.mxu0  ;;  %v745_v36 = vpop.f32.mrf.mxu1 }
 0x16c   : > { %3612 = vmatprep.subr.msk.bf16.mxu1 %vm407_vm0, %v2770_v35  ;;  %v809_v40 = vadd.f32 %v803_v3, %v748_v28 }
 0x16d   : > { %2795 = vmatpush1.bf16.msra.mxu1 %v2775_v37  ;;  %v805_v43 = vpop.f32.mrf.mxu0 }
 0x16e   : > { %v2828_v44 = vpop.permute.xlu1 %2827  ;;  %v2826_v46 = vpop.permute.xlu0 %2825  ;;  %v390_v43 = vld [vmem:[%s4376_s2 + $0xb4] sm:$0xf] }
 0x16f   : > { %v2830_v47 = vsel %vm2829_vm8, %v2824_v32, %v2826_v46  ;;  %v2831_v48 = vsel %vm2829_vm8, %v2826_v46, %v2828_v44  ;;  %v806_v49 = vpop.f32.mrf.mxu0 }
 0x170   : > { %v2836_v24 = vsel %vm407_vm0, %v2830_v47, 0  ;;  %3613 = vmatmul.mubr.msk.bf16.vlgmr.msra.gmra.mxu1 %vm403_vm1, %v384_v42  ;;  %3614 = vmatprep.subr.msk.bf16.mxu0 %vm407_vm0, %v2831_v48  ;;  %v391_v48 = vld [vmem:[%s4376_s2 + $0xb8] sm:$0xf] }
 0x171   : > { %2856 = vmatpush1.bf16.msra.mxu0 %v2836_v24  ;;  %2934 = vmatprep.mubr.bf16.mxu1 %v3700_v0  ;;  %v862_v51 = vpop.f32.mrf.mxu1 }
 0x172   : > { %v2887_v52 = vpop.permute.xlu1 %2886  ;;  %v2885_v26 = vpop.permute.xlu0 %2884  ;;  %v869_v53 = vadd.f32 %v862_v51, %v808_v34 }
 0x173   : > { %v864_v54 = vpop.f32.mrf.mxu1  ;;  %v2891_v55 = vsel %vm2890_vm9, %v2885_v26, %v2887_v52 }
 0x174   : > { %3615 = vmatmul.mubr.msk.bf16.vlgmr.msra.gmra.mxu0 %vm403_vm1, %v385_v50  ;;  %v870_v1 = vadd.f32 %v864_v54, %v809_v40  ;;  %v2897_v5 = vsel %vm407_vm0, %v2891_v55, 0 }
 0x175   : > { %2986 = vmatprep.mubr.bf16.mxu0 %v3700_v0  ;;  %v866_v56 = vpop.f32.mrf.mxu1  ;;  %v923_v57 = vpop.f32.mrf.mxu0 }
 0x176   : > { %v2946_v58 = vpop.permute.xlu1 %2945  ;;  %v2889_v59 = vpop.permute.xlu0 %2888  ;;  %v930_v60 = vadd.f32 %v923_v57, %v869_v53 }
 0x177   : > { %v2947_v61 = vsel %vm633_vm5, %v3914_v27, %v2946_v58  ;;  %v2892_v62 = vsel %vm2890_vm9, %v2887_v52, %v2889_v59  ;;  %v925_v63 = vpop.f32.mrf.mxu0  ;;  %v867_v4 = vpop.f32.mrf.mxu1  ;;  %vm3107_vm5 = vcmask 990208  }
 0x178   : > { %3616 = vmatprep.subr.msk.bf16.mxu1 %vm407_vm0, %v2892_v62  ;;  %3618 = vmatprep.subr.msk.bf16.mxu0 %vm407_vm0, %v2947_v61  ;;  %v931_v7 = vadd.f32 %v925_v63, %v870_v1 }
 0x179   : > { %2917 = vmatpush1.bf16.msra.mxu1 %v2897_v5  ;;  %2969 = vmatpush1.bf16.msra.mxu0 %v643_v6  ;;  %v927_v27 = vpop.f32.mrf.mxu0 }
 0x17a   : > { %v3050_v9 = vpop.permute.xlu1 %3049  ;;  %v2998_v10 = vpop.permute.xlu0 %2997 }
 0x17b   : > { %v3051_v12 = vsel %vm755_vm7, %v3951_v41, %v3050_v9  ;;  %v2999_v31 = vsel %vm694_vm6, %v3939_v38, %v2998_v10  ;;  %v928_v13 = vpop.f32.mrf.mxu0  ;;  %vm3168_vm6 = vcmask 982016   ;;  %vm3229_vm7 = vcmask 973824  }
 0x17c   : > { %3617 = vmatmul.mubr.msk.bf16.vlgmr.msra.gmra.mxu1 %vm403_vm1, %v386_v8  ;;  %3620 = vmatprep.subr.msk.bf16.mxu1 %vm407_vm0, %v2999_v31 }
 0x17d   : > { %3622 = vmatprep.subr.msk.bf16.mxu0 %vm407_vm0, %v3051_v12  ;;  %3619 = vmatmul.mubr.msk.bf16.vlgmr.msra.gmra.mxu0 %vm403_vm1, %v387_v11  ;;  %v984_v16 = vpop.f32.mrf.mxu1 }
 0x17e   : > { %3021 = vmatpush1.bf16.msra.mxu1 %v704_v14  ;;  %3073 = vmatpush1.bf16.msra.mxu0 %v765_v15  ;;  %v3104_v41 = vpop.permute.xlu1 %3103  ;;  %v3102_v38 = vpop.permute.xlu0 %3101  ;;  %v991_v17 = vadd.f32 %v984_v16, %v930_v60  ;;  %v392_v60 = vld [vmem:[%s4376_s2 + $0xbc] sm:$0xf] }
 0x17f   : > { %3038 = vmatprep.mubr.bf16.mxu1 %v3700_v0  ;;  %3090 = vmatprep.mubr.bf16.mxu0 %v3700_v0  ;;  %v986_v18 = vpop.f32.mrf.mxu1  ;;  %v3108_v20 = vsel %vm3107_vm5, %v3102_v38, %v3104_v41 }
 0x180   : > { %v992_v19 = vadd.f32 %v986_v18, %v931_v7  ;;  %v3114_v32 = vsel %vm407_vm0, %v3108_v20, 0  ;;  %v393_v7 = vld [vmem:[%s4376_s2 + $0xc0] sm:$0xf] }
 0x181   : > { %v988_v21 = vpop.f32.mrf.mxu1  ;;  %v1045_v45 = vpop.f32.mrf.mxu0 }
 0x182   : > { %v3163_v22 = vpop.permute.xlu1 %3162  ;;  %v3106_v23 = vpop.permute.xlu0 %3105  ;;  %v1052_v28 = vadd.f32 %v1045_v45, %v991_v17 }
 0x183   : > { %v3109_v2 = vsel %vm3107_vm5, %v3104_v41, %v3106_v23  ;;  %v989_v29 = vpop.f32.mrf.mxu1  ;;  %v1047_v30 = vpop.f32.mrf.mxu0 }
 0x184   : > { %3621 = vmatmul.mubr.msk.bf16.vlgmr.msra.gmra.mxu1 %vm403_vm1, %v388_v39  ;;  %3624 = vmatprep.subr.msk.bf16.mxu1 %vm407_vm0, %v3109_v2  ;;  %v1053_v33 = vadd.f32 %v1047_v30, %v992_v19 }
 0x185   : > { %3134 = vmatpush1.bf16.msra.mxu1 %v3114_v32  ;;  %3623 = vmatmul.mubr.msk.bf16.vlgmr.msra.gmra.mxu0 %vm403_vm1, %v389_v25  ;;  %v1049_v34 = vpop.f32.mrf.mxu0 }
 0x186   : > { %v3167_v35 = vpop.permute.xlu1 %3166  ;;  %v3165_v3 = vpop.permute.xlu0 %3164  ;;  %3151 = vmatprep.mubr.bf16.mxu1 %v3700_v0  ;;  %3212 = vmatprep.mubr.bf16.mxu0 %v3700_v0 }
 0x187   : > { %v3169_v36 = vsel %vm3168_vm6, %v3163_v22, %v3165_v3  ;;  %v3170_v37 = vsel %vm3168_vm6, %v3165_v3, %v3167_v35  ;;  %v1050_v40 = vpop.f32.mrf.mxu0 }
 0x188   : > { %v3175_v42 = vsel %vm407_vm0, %v3169_v36, 0  ;;  %3626 = vmatprep.subr.msk.bf16.mxu0 %vm407_vm0, %v3170_v37 }
 0x189   : > { %3195 = vmatpush1.bf16.msra.mxu0 %v3175_v42  ;;  %v1106_v44 = vpop.f32.mrf.mxu1 }
 0x18a   : > { %v3226_v46 = vpop.permute.xlu1 %3225  ;;  %v3224_v47 = vpop.permute.xlu0 %3223  ;;  %v1113_v49 = vadd.f32 %v1106_v44, %v1052_v28 }
 0x18b   : > { %v1108_v24 = vpop.f32.mrf.mxu1  ;;  %v3230_v51 = vsel %vm3229_vm7, %v3224_v47, %v3226_v46 }
 0x18c   : > { %3625 = vmatmul.mubr.msk.bf16.vlgmr.msra.gmra.mxu1 %vm403_vm1, %v390_v43  ;;  %v1114_v50 = vadd.f32 %v1108_v24, %v1053_v33  ;;  %v3236_v58 = vsel %vm407_vm0, %v3230_v51, 0 }
 0x18d   : > { %3627 = vmatmul.mubr.msk.bf16.vlgmr.msra.gmra.mxu0 %vm403_vm1, %v391_v48  ;;  %3273 = vmatprep.mubr.bf16.mxu1 %v3700_v0  ;;  %v1110_v52 = vpop.f32.mrf.mxu1  ;;  %v1167_v26 = vpop.f32.mrf.mxu0 }
 0x18e   : > { %v3285_v53 = vpop.permute.xlu1 %3284  ;;  %v3228_v54 = vpop.permute.xlu0 %3227  ;;  %3334 = vmatprep.mubr.bf16.mxu0 %v3700_v0  ;;  %v1174_v1 = vadd.f32 %v1167_v26, %v1113_v49 }
 0x18f   : > { %v3231_v55 = vsel %vm3229_vm7, %v3226_v46, %v3228_v54  ;;  %v1111_v56 = vpop.f32.mrf.mxu1  ;;  %v1169_v57 = vpop.f32.mrf.mxu0 }
 0x190   : > { %3628 = vmatprep.subr.msk.bf16.mxu1 %vm407_vm0, %v3231_v55  ;;  %v1175_v59 = vadd.f32 %v1169_v57, %v1114_v50 }
 0x191   : > { %3256 = vmatpush1.bf16.msra.mxu1 %v3236_v58  ;;  %v1171_v61 = vpop.f32.mrf.mxu0 }
 0x192   : > { %v3289_v62 = vpop.permute.xlu1 %3288  ;;  %v3287_v63 = vpop.permute.xlu0 %3286 }
 0x193   : > { %v3291_v0 = vsel %vm3290_vm10, %v3285_v53, %v3287_v63  ;;  %v3292_v4 = vsel %vm3290_vm10, %v3287_v63, %v3289_v62  ;;  %v1172_v5 = vpop.f32.mrf.mxu0 }
 0x194   : > { %v3297_v6 = vsel %vm407_vm0, %v3291_v0, 0  ;;  %3629 = vmatmul.mubr.msk.bf16.vlgmr.msra.gmra.mxu1 %vm403_vm1, %v392_v60  ;;  %3630 = vmatprep.subr.msk.bf16.mxu0 %vm407_vm0, %v3292_v4  ;;  %vm3371_vm0 = vcmask 7168  }
 0x195   : > { %3317 = vmatpush1.bf16.msra.mxu0 %v3297_v6  ;;  %v1228_v8 = vpop.f32.mrf.mxu1 }
 0x196   : > { %v1235_v27 = vadd.f32 %v1228_v8, %v1174_v1 }
 0x197   : > { %v1230_v9 = vpop.f32.mrf.mxu1 }
 0x198   : > { %3631 = vmatmul.mubr.msk.bf16.vlgmr.msra.gmra.mxu0 %vm403_vm1, %v393_v7  ;;  %v1236_v10 = vadd.f32 %v1230_v9, %v1175_v59 }
 0x199   : > { %v1232_v11 = vpop.f32.mrf.mxu1  ;;  %v1289_v12 = vpop.f32.mrf.mxu0 }
 0x19a   : > { %v1296_v31 = vadd.f32 %v1289_v12, %v1235_v27 }
 0x19b   : > { %v1233_v13 = vpop.f32.mrf.mxu1  ;;  %v1291_v14 = vpop.f32.mrf.mxu0 }
 0x19c   : > { %v1297_v15 = vadd.f32 %v1291_v14, %v1236_v10 }
 0x19d   : > { %v1293_v16 = vpop.f32.mrf.mxu0 }
 0x19f   : > { %v1294_v41 = vpop.f32.mrf.mxu0 }
 0x1a1   : > { %v1350_v38 = vpop.f32.mrf.mxu1 }
 0x1a2   : > { %v1357_v17 = vadd.f32 %v1350_v38, %v1296_v31 }
 0x1a3   : > { %v1352_v18 = vpop.f32.mrf.mxu1 }
 0x1a4   : > { %v1358_v19 = vadd.f32 %v1352_v18, %v1297_v15 }
 0x1a5   : > { %v1354_v20 = vpop.f32.mrf.mxu1  ;;  %v1411_v39 = vpop.f32.mrf.mxu0 }
 0x1a6   : > { %v1418_v21 = vadd.f32 %v1411_v39, %v1357_v17 }
 0x1a7   : > { %v1355_v45 = vpop.f32.mrf.mxu1  ;;  %v1413_v22 = vpop.f32.mrf.mxu0 }
 0x1a8   : > { %v1419_v23 = vadd.f32 %v1413_v22, %v1358_v19 }
 0x1a9   : > { %v1415_v25 = vpop.f32.mrf.mxu0 }
 0x1ab   : > { %v1416_v28 = vpop.f32.mrf.mxu0 }
 0x1ad   : > { %v1472_v2 = vpop.f32.mrf.mxu1 }
 0x1ae   : > { %v1479_v29 = vadd.f32 %v1472_v2, %v1418_v21 }
 0x1af   : > { %v1474_v30 = vpop.f32.mrf.mxu1 }
 0x1b0   : > { %v1480_v32 = vadd.f32 %v1474_v30, %v1419_v23 }
 0x1b1   : > { %v1476_v33 = vpop.f32.mrf.mxu1  ;;  %v1533_v34 = vpop.f32.mrf.mxu0 }
 0x1b2   : > { %v1540_v35 = vadd.f32 %v1533_v34, %v1479_v29 }
 0x1b3   : > { %v1477_v3 = vpop.f32.mrf.mxu1  ;;  %v1535_v36 = vpop.f32.mrf.mxu0 }
 0x1b4   : > { %v1541_v37 = vadd.f32 %v1535_v36, %v1480_v32 }
 0x1b5   : > { %v1537_v40 = vpop.f32.mrf.mxu0 }
 0x1b7   : > { %v1538_v42 = vpop.f32.mrf.mxu0 }
 0x1b9   : > { %v1594_v43 = vpop.f32.mrf.mxu1 }
 0x1ba   : > { %v1601_v44 = vadd.f32 %v1594_v43, %v1540_v35 }
 0x1bb   : > { %v1596_v46 = vpop.f32.mrf.mxu1 }
 0x1bc   : > { %v1602_v47 = vadd.f32 %v1596_v46, %v1541_v37 }
 0x1bd   : > { %v1598_v48 = vpop.f32.mrf.mxu1  ;;  %v1655_v49 = vpop.f32.mrf.mxu0 }
 0x1be   : > { %v1662_v24 = vadd.f32 %v1655_v49, %v1601_v44 }
 0x1bf   : > { %v1599_v50 = vpop.f32.mrf.mxu1  ;;  %v1657_v51 = vpop.f32.mrf.mxu0 }
 0x1c0   : > { %v1663_v52 = vadd.f32 %v1657_v51, %v1602_v47 }
 0x1c1   : > { %v1659_v26 = vpop.f32.mrf.mxu0 }
 0x1c3   : > { %v1660_v53 = vpop.f32.mrf.mxu0 }
 0x1c5   : > { %v1716_v54 = vpop.f32.mrf.mxu1 }
 0x1c6   : > { %v1723_v1 = vadd.f32 %v1716_v54, %v1662_v24 }
 0x1c7   : > { %v1718_v55 = vpop.f32.mrf.mxu1 }
 0x1c8   : > { %v1724_v56 = vadd.f32 %v1718_v55, %v1663_v52 }
 0x1c9   : > { %v1777_v57 = vpop.f32.mrf.mxu0  ;;  %v1720_v58 = vpop.f32.mrf.mxu1 }
 0x1ca   : > { %v1784_v59 = vadd.f32 %v1777_v57, %v1723_v1 }
 0x1cb   : > { %v1779_v60 = vpop.f32.mrf.mxu0  ;;  %v1721_v61 = vpop.f32.mrf.mxu1 }
 0x1cc   : > { %v1785_v62 = vadd.f32 %v1779_v60, %v1724_v56 }
 0x1cd   : > { %v1781_v63 = vpop.f32.mrf.mxu0 }
 0x1cf   : > { %v1782_v0 = vpop.f32.mrf.mxu0 }
 0x1d1   : > { %v1838_v4 = vpop.f32.mrf.mxu1 }
 0x1d2   : > { %v1845_v5 = vadd.f32 %v1838_v4, %v1784_v59 }
 0x1d3   : > { %v1840_v6 = vpop.f32.mrf.mxu1 }
 0x1d4   : > { %v1846_v7 = vadd.f32 %v1840_v6, %v1785_v62 }
 0x1d5   : > { %v1899_v8 = vpop.f32.mrf.mxu0  ;;  %v1842_v27 = vpop.f32.mrf.mxu1 }
 0x1d6   : > { %v1906_v9 = vadd.f32 %v1899_v8, %v1845_v5 }
 0x1d7   : > { %v1901_v10 = vpop.f32.mrf.mxu0  ;;  %v1843_v11 = vpop.f32.mrf.mxu1 }
 0x1d8   : > { %v1907_v12 = vadd.f32 %v1901_v10, %v1846_v7 }
 0x1d9   : > { %v1903_v31 = vpop.f32.mrf.mxu0 }
 0x1db   : > { %v1904_v13 = vpop.f32.mrf.mxu0 }
 0x1dd   : > { %v1960_v14 = vpop.f32.mrf.mxu1 }
 0x1de   : > { %v1967_v15 = vadd.f32 %v1960_v14, %v1906_v9 }
 0x1df   : > { %v1962_v16 = vpop.f32.mrf.mxu1 }
 0x1e0   : > { %v1968_v41 = vadd.f32 %v1962_v16, %v1907_v12 }
 0x1e1   : > { %v2021_v38 = vpop.f32.mrf.mxu0  ;;  %v1964_v17 = vpop.f32.mrf.mxu1 }
 0x1e2   : > { %v2028_v18 = vadd.f32 %v2021_v38, %v1967_v15 }
 0x1e3   : > { %v2023_v19 = vpop.f32.mrf.mxu0  ;;  %v1965_v20 = vpop.f32.mrf.mxu1 }
 0x1e4   : > { %v2029_v39 = vadd.f32 %v2023_v19, %v1968_v41 }
 0x1e5   : > { %v2025_v21 = vpop.f32.mrf.mxu0 }
 0x1e7   : > { %v2026_v45 = vpop.f32.mrf.mxu0 }
 0x1e8   : > { %v2082_v22 = vpop.f32.mrf.mxu1 }
 0x1e9   : > { %v2089_v23 = vadd.f32 %v2082_v22, %v2028_v18 }
 0x1ea   : > { %v2084_v25 = vpop.f32.mrf.mxu1 }
 0x1eb   : > { %v2090_v28 = vadd.f32 %v2084_v25, %v2029_v39 }
 0x1ec   : > { %v2143_v2 = vpop.f32.mrf.mxu0  ;;  %v2086_v29 = vpop.f32.mrf.mxu1 }
 0x1ed   : > { %v2150_v30 = vadd.f32 %v2143_v2, %v2089_v23 }
 0x1ee   : > { %v2145_v32 = vpop.f32.mrf.mxu0  ;;  %v2087_v33 = vpop.f32.mrf.mxu1 }
 0x1ef   : > { %v2151_v34 = vadd.f32 %v2145_v32, %v2090_v28 }
 0x1f0   : > { %v2147_v35 = vpop.f32.mrf.mxu0 }
 0x1f2   : > { %v2148_v3 = vpop.f32.mrf.mxu0 }
 0x1f4   : > { %v2204_v36 = vpop.f32.mrf.mxu1 }
 0x1f5   : > { %v2211_v37 = vadd.f32 %v2204_v36, %v2150_v30 }
 0x1f6   : > { %v2206_v40 = vpop.f32.mrf.mxu1 }
 0x1f7   : > { %v2212_v15 = vadd.f32 %v2206_v40, %v2151_v34 }
 0x1f8   : > { %v2265_v42 = vpop.f32.mrf.mxu0  ;;  %v2208_v43 = vpop.f32.mrf.mxu1 }
 0x1f9   : > { %v2272_v16 = vadd.f32 %v2265_v42, %v2211_v37 }
 0x1fa   : > { %v2267_v44 = vpop.f32.mrf.mxu0  ;;  %v2209_v46 = vpop.f32.mrf.mxu1 }
 0x1fb   : > { %v2273_v38 = vadd.f32 %v2267_v44, %v2212_v15 }
 0x1fc   : > { %v2269_v47 = vpop.f32.mrf.mxu0 }
 0x1fe   : > { %v2270_v48 = vpop.f32.mrf.mxu0 }
 0x200   : > { %v2326_v49 = vpop.f32.mrf.mxu1 }
 0x201   : > { %v2333_v17 = vadd.f32 %v2326_v49, %v2272_v16 }
 0x202   : > { %v2328_v24 = vpop.f32.mrf.mxu1 }
 0x203   : > { %v2334_v19 = vadd.f32 %v2328_v24, %v2273_v38 }
 0x204   : > { %v2387_v50 = vpop.f32.mrf.mxu0  ;;  %v2330_v51 = vpop.f32.mrf.mxu1 }
 0x205   : > { %v2394_v20 = vadd.f32 %v2387_v50, %v2333_v17 }
 0x206   : > { %v2389_v52 = vpop.f32.mrf.mxu0  ;;  %v2331_v26 = vpop.f32.mrf.mxu1 }
 0x207   : > { %v2395_v45 = vadd.f32 %v2389_v52, %v2334_v19 }
 0x208   : > { %v2391_v53 = vpop.f32.mrf.mxu0 }
 0x20a   : > { %v2392_v54 = vpop.f32.mrf.mxu0 }
 0x20c   : > { %v2448_v1 = vpop.f32.mrf.mxu1 }
 0x20d   : > { %v2455_v22 = vadd.f32 %v2448_v1, %v2394_v20 }
 0x20e   : > { %v2450_v55 = vpop.f32.mrf.mxu1 }
 0x20f   : > { %v2456_v28 = vadd.f32 %v2450_v55, %v2395_v45 }
 0x210   : > { %v2509_v56 = vpop.f32.mrf.mxu0  ;;  %v2452_v57 = vpop.f32.mrf.mxu1 }
 0x211   : > { %v2516_v2 = vadd.f32 %v2509_v56, %v2455_v22 }
 0x212   : > { %v2511_v58 = vpop.f32.mrf.mxu0  ;;  %v2453_v59 = vpop.f32.mrf.mxu1 }
 0x213   : > { %v2517_v30 = vadd.f32 %v2511_v58, %v2456_v28 }
 0x214   : > { %v2513_v60 = vpop.f32.mrf.mxu0 }
 0x216   : > { %v2514_v61 = vpop.f32.mrf.mxu0 }
 0x218   : > { %v2570_v62 = vpop.f32.mrf.mxu1 }
 0x219   : > { %v2577_v32 = vadd.f32 %v2570_v62, %v2516_v2 }
 0x21a   : > { %v2572_v63 = vpop.f32.mrf.mxu1 }
 0x21b   : > { %v2578_v34 = vadd.f32 %v2572_v63, %v2517_v30 }
 0x21c   : > { %v2631_v0 = vpop.f32.mrf.mxu0  ;;  %v2574_v4 = vpop.f32.mrf.mxu1 }
 0x21d   : > { %v2638_v35 = vadd.f32 %v2631_v0, %v2577_v32 }
 0x21e   : > { %v2633_v5 = vpop.f32.mrf.mxu0  ;;  %v2575_v6 = vpop.f32.mrf.mxu1 }
 0x21f   : > { %v2639_v36 = vadd.f32 %v2633_v5, %v2578_v34  ;;  %v3356_v5 = vlaneseq }
 0x220   : > { %v2635_v7 = vpop.f32.mrf.mxu0 }
 0x222   : > { %v2636_v8 = vpop.f32.mrf.mxu0 }
 0x224   : > { %v2692_v27 = vpop.f32.mrf.mxu1 }
 0x225   : > { %v2699_v37 = vadd.f32 %v2692_v27, %v2638_v35 }
 0x226   : > { %v2694_v9 = vpop.f32.mrf.mxu1 }
 0x227   : > { %v2700_v43 = vadd.f32 %v2694_v9, %v2639_v36 }
 0x228   : > { %v2753_v10 = vpop.f32.mrf.mxu0  ;;  %v2696_v11 = vpop.f32.mrf.mxu1 }
 0x229   : > { %v2760_v44 = vadd.f32 %v2753_v10, %v2699_v37  ;;  %v3357_v11 = vshrl.u32 %v3356_v5, 7 }
 0x22a   : > { %v2755_v12 = vpop.f32.mrf.mxu0  ;;  %v2697_v31 = vpop.f32.mrf.mxu1 }
 0x22b   : > { %v2761_v48 = vadd.f32 %v2755_v12, %v2700_v43  ;;  %v3358_v38 = vsub.s32 0, %v3357_v11  ;;  %v3362_v20 = vsub.s32 1, %v3357_v11 }
 0x22c   : > { %v2757_v13 = vpop.f32.mrf.mxu0 }
 0x22e   : > { %v2758_v14 = vpop.f32.mrf.mxu0 }
 0x230   : > { %v2814_v41 = vpop.f32.mrf.mxu1 }
 0x231   : > { %v2821_v49 = vadd.f32 %v2814_v41, %v2760_v44 }
 0x232   : > { %v2816_v18 = vpop.f32.mrf.mxu1 }
 0x233   : > { %v2822_v51 = vadd.f32 %v2816_v18, %v2761_v48  ;;  %v3354_v18 = vld [vmem:[%s308_s20] sm:$0x3] }
 0x234   : > { %v2875_v39 = vpop.f32.mrf.mxu0  ;;  %v2818_v21 = vpop.f32.mrf.mxu1  ;;  %v3359_v22 = vrot.slane %v3354_v18, %v3358_v38 }
 0x235   : > { %v2882_v52 = vadd.f32 %v2875_v39, %v2821_v49 }
 0x236   : > { %v2877_v23 = vpop.f32.mrf.mxu0  ;;  %v2819_v25 = vpop.f32.mrf.mxu1 }
 0x237   : > { %v2883_v54 = vadd.f32 %v2877_v23, %v2822_v51 }
 0x238   : > { %v2879_v29 = vpop.f32.mrf.mxu0 }
 0x239   : > { %v3363_v29 = vrot.slane %v3354_v18, %v3362_v20 }
 0x23a   : > { %v2880_v33 = vpop.f32.mrf.mxu0 }
 0x23c   : > { %v2936_v3 = vpop.f32.mrf.mxu1 }
 0x23d   : > { %v2988_v40 = vpop.f32.mrf.mxu0  ;;  %v2943_v1 = vadd.f32 %v2936_v3, %v2882_v52 }
 0x23e   : > { %v2938_v42 = vpop.f32.mrf.mxu1 }
 0x23f   : > { %v2990_v46 = vpop.f32.mrf.mxu0  ;;  %v2944_v57 = vadd.f32 %v2938_v42, %v2883_v54  ;;  %v2995_v60 = vadd.f32 %v2988_v40, %v2943_v1 }
 0x240   : > { %v2940_v47 = vpop.f32.mrf.mxu1 }
 0x241   : > { %v2992_v24 = vpop.f32.mrf.mxu0  ;;  %v2996_v63 = vadd.f32 %v2990_v46, %v2944_v57 }
 0x242   : > { %v2941_v50 = vpop.f32.mrf.mxu1 }
 0x243   : > { %v2993_v26 = vpop.f32.mrf.mxu0 }
 0x244   : > { %v3040_v53 = vpop.f32.mrf.mxu1 }
 0x245   : > { %v3092_v55 = vpop.f32.mrf.mxu0  ;;  %v3047_v0 = vadd.f32 %v3040_v53, %v2995_v60 }
 0x246   : > { %v3042_v56 = vpop.f32.mrf.mxu1 }
 0x247   : > { %v3094_v58 = vpop.f32.mrf.mxu0  ;;  %v3048_v7 = vadd.f32 %v3042_v56, %v2996_v63  ;;  %v3099_v9 = vadd.f32 %v3092_v55, %v3047_v0 }
 0x248   : > { %v3044_v59 = vpop.f32.mrf.mxu1 }
 0x249   : > { %v3096_v61 = vpop.f32.mrf.mxu0  ;;  %v3100_v31 = vadd.f32 %v3094_v58, %v3048_v7 }
 0x24a   : > { %v3045_v62 = vpop.f32.mrf.mxu1 }
 0x24b   : > { %v3097_v4 = vpop.f32.mrf.mxu0 }
 0x24c   : > { %v3153_v6 = vpop.f32.mrf.mxu1 }
 0x24d   : > { %v3214_v8 = vpop.f32.mrf.mxu0  ;;  %v3160_v13 = vadd.f32 %v3153_v6, %v3099_v9 }
 0x24e   : > { %v3155_v27 = vpop.f32.mrf.mxu1 }
 0x24f   : > { %v3216_v10 = vpop.f32.mrf.mxu0  ;;  %v3161_v16 = vadd.f32 %v3155_v27, %v3100_v31  ;;  %v3221_v19 = vadd.f32 %v3214_v8, %v3160_v13 }
 0x250   : > { %v3157_v12 = vpop.f32.mrf.mxu1 }
 0x251   : > { %v3218_v14 = vpop.f32.mrf.mxu0  ;;  %v3222_v21 = vadd.f32 %v3216_v10, %v3161_v16 }
 0x252   : > { %v3158_v15 = vpop.f32.mrf.mxu1 }
 0x253   : > { %v3219_v41 = vpop.f32.mrf.mxu0 }
 0x254   : > { %v3275_v17 = vpop.f32.mrf.mxu1 }
 0x255   : > { %v3282_v45 = vadd.f32 %v3275_v17, %v3221_v19 }
 0x256   : > { %v3277_v39 = vpop.f32.mrf.mxu1 }
 0x257   : > { %v3283_v28 = vadd.f32 %v3277_v39, %v3222_v21 }
 0x258   : > { %v3336_v23 = vpop.f32.mrf.mxu0  ;;  %v3279_v25 = vpop.f32.mrf.mxu1 }
 0x259   : > { %v3343_v2 = vadd.f32 %v3336_v23, %v3282_v45 }
 0x25a   : > { %v3338_v30 = vpop.f32.mrf.mxu0  ;;  %v3280_v32 = vpop.f32.mrf.mxu1 }
 0x25b   : > { %v3366_v33 = vmul.f32 %v3359_v22, %v3343_v2  ;;  %v3344_v34 = vadd.f32 %v3338_v30, %v3283_v28 }
 0x25c   : > { %v3340_v35 = vpop.f32.mrf.mxu0 }
 0x25d   : > { %v3637_v3 = vpack.c.bf16 %v3344_v34, %v3343_v2  ;;  %v3367_v36 = vmul.f32 %v3363_v29, %v3344_v34  ;;  %v3373_v40 = vmul.f32 %v3366_v33, %v3343_v2 }
 0x25e   : > { %v3341_v37 = vpop.f32.mrf.mxu0 }
 0x25f   : > { %3353 = vst [vmem:[%s314_s27] sm:$0xff] %v3637_v3  ;;  %v3374_v42 = vmul.f32 %v3367_v36, %v3344_v34  ;;  %v3368_v43 = vadd.f32 %v3367_v36, %v3366_v33 }
 0x261   : > { %3369 = vadd.xlane.f32.xlu0 %v3368_v43  ;;  %v3375_v44 = vadd.f32 %v3374_v42, %v3373_v40 }
 0x263   : > { %3376 = vadd.xlane.f32.xlu1 %v3375_v44 }
 0x2ea   : > { %v3370_v46 = vpop.xlane.xlu0 %3369 }
 0x2eb   : > { %3372 = vst.msk [vmem:[%s319_s17] sm:$0xff] %vm3371_vm0, %v3370_v46 }
 0x2ec   : > { %v3377_v47 = vpop.xlane.xlu1 %3376 }
 0x2ed   : > { %3378 = vst.msk [vmem:[%s323_s30] sm:$0xff] %vm3371_vm0, %v3377_v47 }
 0x2ee PF: > { %s17_s21 = sadd.s32 1, %s3698_s21  }
 0x2ef   : > { %p14_p7 = scmp.ge.s32.totalorder %s17_s21, 6  }
 0x2f1   :  { %16 = sbr.rel (!%p14_p7) target bundleno = 1 (0x1), region = 96 }

// kernel: generator_forward.16
= control target key start
LH: loop header
LB: loop body
LE: loop exit
PB: predicated region body
PF: predicated region fallthrough
CT: control target
= control target key end

     0   :  { %s1161_s21 = smov 0   ;;  %s1163_s22 = smov 0   ;;  %s1300_s0 = inlined_call_operand.vmem [shape: bf16[32,384], index: 0, kind: input, shape index: {}, may-alias: {0,1}]   ;;  %s1301_s1 = inlined_call_operand.vmem [shape: bf16[32,384], index: 1, kind: input, shape index: {}, may-alias: {0,1}]   ;;  %s1302_s2 = inlined_call_operand.vmem [shape: bf16[4,16,32], index: 2, kind: input, shape index: {}]   ;;  %s1303_s3 = inlined_call_operand.vmem [shape: f32[1,256], index: 3, kind: input, shape index: {}]   ;;  %s1304_s4 = inlined_call_operand.vmem [shape: bf16[16,256], index: 4, kind: output, shape index: {0}]   ;;  %s1305_s5 = inlined_call_operand.vmem [shape: f32[2,16,1], index: 5, kind: output, shape index: {1}]   ;;  %s1306_s6 = inlined_call_operand.vmem [shape: f32[2,16,1], index: 6, kind: output, shape index: {2}]  }
   0x1   :  { %s1165_s23 = smov 0   ;;  %s1167_s24 = smov 0  }
   0x2   :  { %s1169_s25 = smov 0  }
   0x3 LB: > { %s1187_s26 = sadd.s32 4294967295, %s1119_s25   ;;  %s1190_s27 = sadd.s32 1, %s1119_s25   ;;  %s1119_s25 = sphi %s1169_s25, %s1313_s25   ;;  %s1115_s24 = sphi %s1167_s24, %s1312_s24   ;;  %s1111_s23 = sphi %s1165_s23, %s1311_s23   ;;  %s1107_s22 = sphi %s1163_s22, %s1310_s22   ;;  %s1103_s21 = sphi %s1161_s21, %s1309_s21  }
   0x4   : > { %s21_s28 = ssub.s32 %s1119_s25, %s1190_s27  ;;  %s24_s29 = sadd.s32 1, %s1115_s24 }
   0x5   : > { %p22_p0 = scmp.eq.s32.totalorder %s21_s28, 0  ;;  %p31_p1 = scmp.ne.s32.totalorder %s1115_s24, %s1111_s23 }
   0x6   : > { %p32_p2 = scmp.eq.s32.totalorder %s1119_s25, 0  ;;  %s48_s30 = sadd.s32 1, %s1190_s27 }
   0x7   : > { %s1200_s7 = scalar_select %p22_p0, %s1115_s24, %s24_s29  }
   0x8   : > { %p33_p3 = por %p32_p2, %p31_p1  ;;  %s49_s8 = ssub.s32 %s1190_s27, %s48_s30 }
   0x9   : > { %p50_p4 = scmp.eq.s32.totalorder %s49_s8, 0  ;;  %s52_s9 = sadd.s32 1, %s1107_s22 }
   0xa   : > { %p59_p5 = scmp.ne.s32.totalorder %s1107_s22, %s1103_s21  ;;  %p136_p6 = scmp.eq.s32.totalorder %s1187_s26, 1 }
   0xb   : > { %s1208_s10 = scalar_select %p50_p4, %s1107_s22, %s52_s9  }
   0xc   : > { %p1210_p7 = por %p59_p5, %p32_p2  ;;  %p1214_p8 = por %p136_p6, %p31_p1 }
   0xd   : > { %p939_p9 = scmp.ge.s32.totalorder %s1119_s25, 2 }
   0xf   : > { %213 = sbr.rel (%p939_p9) target bundleno = 32 (0x20), region = 20 }
  0x14   : > { %216 = sbr.rel (!%p33_p3) target bundleno = 26 (0x1a), region = 24  ;;  %s218_s13 = sand.u32 (%p33_p3), 1, %s1115_s24  }
  0x15   : > { %s941_s14 = sshll.u32 (%p33_p3), %s1119_s25, 2  ;;  %s940_s15 = sshll.u32 (%p33_p3), %s218_s13, 4 }
  0x16   : > { %s222_s18 = scalar_lea.vmem (%p33_p3), %s1300_s0, %s941_s14  ;;  %s220_s19 = scalar_lea.vmem (%p33_p3), [#allocation2], %s940_s15 }
  0x17   : > { %v239_v0 = vld [vmem:[%s222_s18] sm:$0xf] (%p33_p3)  ;;  %v241_v1 = vld [vmem:[%s222_s18 + $0xc] sm:$0xf] (%p33_p3)  ;;  %v243_v2 = vld [vmem:[%s222_s18 + $0x18] sm:$0xf] (%p33_p3) }
  0x18   : > { %240 = vst [vmem:[%s220_s19] sm:$0xf] (%p33_p3), %v239_v0  ;;  %242 = vst [vmem:[%s220_s19 + $0x4] sm:$0xf] (%p33_p3), %v241_v1  ;;  %v245_v3 = vld [vmem:[%s222_s18 + $0x24] sm:$0xf] (%p33_p3) }
  0x19   : > { %244 = vst [vmem:[%s220_s19 + $0x8] sm:$0xf] %v243_v2  ;;  %246 = vst [vmem:[%s220_s19 + $0xc] sm:$0xf] %v245_v3 }
  0x1a PF: > { %278 = sbr.rel (!%p1210_p7) target bundleno = 32 (0x20), region = 65  ;;  %s280_s20 = sand.u32 (%p1210_p7), 1, %s1107_s22  }
  0x1b   : > { %s943_s28 = sshll.u32 (%p1210_p7), %s1119_s25, 2  ;;  %s942_s29 = sshll.u32 (%p1210_p7), %s280_s20, 4 }
  0x1c   : > { %s837_s9 = scalar_lea.vmem (%p1210_p7), %s1301_s1, %s943_s28  ;;  %s282_s13 = scalar_lea.vmem (%p1210_p7), [#allocation3], %s942_s29 }
  0x1d   : > { %v944_v4 = vld [vmem:[%s837_s9 + $0x4] sm:$0xf] (%p1210_p7)  ;;  %v945_v5 = vld [vmem:[%s837_s9 + $0x10] sm:$0xf] (%p1210_p7)  ;;  %v946_v6 = vld [vmem:[%s837_s9 + $0x1c] sm:$0xf] (%p1210_p7) }
  0x1e   : > { %303 = vst [vmem:[%s282_s13] sm:$0xf] (%p1210_p7), %v944_v4  ;;  %305 = vst [vmem:[%s282_s13 + $0x4] sm:$0xf] (%p1210_p7), %v945_v5  ;;  %v947_v7 = vld [vmem:[%s837_s9 + $0x28] sm:$0xf] (%p1210_p7) }
  0x1f   : > { %307 = vst [vmem:[%s282_s13 + $0x8] sm:$0xf] %v946_v6  ;;  %309 = vst [vmem:[%s282_s13 + $0xc] sm:$0xf] %v947_v7 }
  0x20 PF: > { %p948_p10 = scmp.ge.s32.totalorder %s1119_s25, 1  ;;  %p346_p11 = scmp.lt.s32.totalorder %s1119_s25, 3 }
  0x22   : > { %p347_p12 = pnand %p948_p10, %p346_p11 }
  0x23   : > { %s353_s11 = sand.u32 (!%p347_p12), 1, %s1111_s23   ;;  %s360_s15 = sand.u32 (!%p347_p12), 1, %s1103_s21  }
  0x24   : > { %350 = sbr.rel (%p347_p12) target bundleno = 528 (0x210), region = 110  ;;  %s949_s14 = sshll.u32 (!%p347_p12), %s353_s11, 4 }
  0x25   : > { %s950_s16 = sshll.u32 (!%p347_p12), %s360_s15, 4  ;;  %s355_s17 = scalar_lea.vmem (!%p347_p12), [#allocation2], %s949_s14 }
  0x26   : > { %s1123_s25 = smov (!%p347_p12), 127   ;;  %s362_s18 = scalar_lea.vmem (!%p347_p12), [#allocation3], %s950_s16 }
  0x27   : > { %s1124_s20 = smov (!%p347_p12), 119   ;;  %s1125_s28 = smov (!%p347_p12), 118  }
  0x28   : > { %p406_p13 = scmp.lt.s32.totalorder (!%p347_p12), %s1187_s26, 1 }
  0x29   : > { %v1121_v8 = vmov 0.0   ;;  %vm1122_vm0 = vmmov 0   ;;  %v1073_v9 = vld [vmem:[%s355_s17 + $0x8] sm:$0xff]   ;;  %v1074_v10 = vld [vmem:[%s355_s17] sm:$0xff]   ;;  %vm476_vm1 = vcmask 261120   ;;  %vm471_vm2 = vcmask 1039360  }
  0x2a   : > { %1004 = vmatprep.subr.bf16.mxu1 %v1121_v8  ;;  %996 = vmatprep.subr.bf16.mxu0 %v1121_v8  ;;  %v1075_v11 = vld [vmem:[%s362_s18 + $0x8] sm:$0xff]   ;;  %v1076_v12 = vld [vmem:[%s362_s18] sm:$0xff]   ;;  %vm583_vm3 = vcmask 973824   ;;  %vm647_vm4 = vcmask 965632   ;;  %s1263_s15 = scalar_select %p406_p13, %s1187_s26, 1  ;;  %vm721_vm5 = vcmask 7168  }
  0x2b   : > { %1008 = vmatprep.mubr.msk.bf16.mxu1 %vm1122_vm0, %v1121_v8  ;;  %1000 = vmatprep.mubr.msk.bf16.mxu0 %vm1122_vm0, %v1121_v8  ;;  %v1077_v13 = vld [vmem:[%s1302_s2] sm:$0xff]   ;;  %v1078_v22 = vld [vmem:[%s1302_s2 + $0x8] sm:$0xff]   ;;  %v1079_v30 = vld [vmem:[%s1302_s2 + $0x10] sm:$0xff]   ;;  %s951_s18 = sshll.u32 %s353_s11, 3  ;;  %s972_s8 = sshll.u32 (%p1214_p8), %s1187_s26, 2 }
  0x2c   : > { %467 = vrot.lane.b32.xlu0 %v1073_v9, %s1123_s25  ;;  %1005 = vmatpush3.bf16.msra.mxu1 %v1073_v9  ;;  %v1080_v34 = vld [vmem:[%s1302_s2 + $0x18] sm:$0xff]   ;;  %s390_s21 = scalar_lea.vmem [#allocation4], %s951_s18  ;;  %s975_s19 = sshll.u32 %s1263_s15, 4 }
  0x2d   : > { %463 = vrot.lane.b32.xlu1 %v1074_v10, %s1123_s25  ;;  %1006 = vmatprep.subr.bf16.mxu1 %v1121_v8  ;;  %s413_s23 = scalar_lea.vmem %s1305_s5, %s975_s19  ;;  %s418_s30 = scalar_lea.vmem %s1306_s6, %s975_s19 }
  0x2e   : > { %s750_s14 = scalar_lea.vmem (%p1214_p8), %s1304_s4, %s972_s8 }
  0x30   : > { %469 = vrot.lane.b32.xlu0 %v1075_v11, %s1123_s25  ;;  %1007 = vmatpush3.bf16.msra.mxu1 %v1074_v10 }
  0x31   : > { %465 = vrot.lane.b32.xlu1 %v1076_v12, %s1123_s25  ;;  %1020 = vmatprep.subr.bf16.mxu1 %v1121_v8  ;;  %s408_s25 = scalar_lea.vmem %s1303_s3, %s1263_s15 }
  0x32   : > { %v970_v49 = vld [vmem:[%s408_s25] ss:$0 sm:$0xff] }
  0x33   : > { %1009 = vmatmul.mubr.msk.bf16.vlgmr.msra.gmra.mxu1 %vm476_vm1, %v1077_v13 }
  0x34   : > { %579 = vrot.lane.b32.xlu0 %v1073_v9, %s1124_s20  ;;  %1024 = vmatprep.mubr.msk.bf16.mxu1 %vm1122_vm0, %v1121_v8 }
  0x35   : > { %581 = vrot.lane.b32.xlu1 %v1075_v11, %s1124_s20 }
  0x38   : > { %643 = vrot.lane.b32.xlu0 %v1073_v9, %s1125_s28 }
  0x39   : > { %645 = vrot.lane.b32.xlu1 %v1075_v11, %s1125_s28 }
  0x3c   : > { %575 = vrot.lane.b32.xlu0 %v1074_v10, %s1124_s20 }
  0x3d   : > { %577 = vrot.lane.b32.xlu1 %v1076_v12, %s1124_s20 }
  0x40   : > { %639 = vrot.lane.b32.xlu0 %v1074_v10, %s1125_s28 }
  0x41   : > { %641 = vrot.lane.b32.xlu1 %v1076_v12, %s1125_s28 }
  0x9e   : > { %v468_v14 = vpop.permute.xlu0 %467 }
  0x9f   : > { %v464_v15 = vpop.permute.xlu1 %463 }
  0xa2   : > { %v470_v16 = vpop.permute.xlu0 %469 }
  0xa3   : > { %v466_v17 = vpop.permute.xlu1 %465  ;;  %v473_v18 = vsel %vm471_vm2, %v468_v14, %v470_v16 }
  0xa4   : > { %997 = vmatpush3.bf16.msra.mxu0 %v473_v18  ;;  %v472_v21 = vsel %vm471_vm2, %v464_v15, %v466_v17 }
  0xa5   : > { %998 = vmatprep.subr.bf16.mxu0 %v1121_v8 }
  0xa6   : > { %v580_v19 = vpop.permute.xlu0 %579 }
  0xa7   : > { %v582_v20 = vpop.permute.xlu1 %581 }
  0xa8   : > { %999 = vmatpush3.bf16.msra.mxu0 %v472_v21  ;;  %v585_v24 = vsel %vm583_vm3, %v580_v19, %v582_v20 }
  0xa9   : > { %1012 = vmatprep.subr.bf16.mxu0 %v1121_v8 }
  0xaa   : > { %v644_v23 = vpop.permute.xlu0 %643 }
  0xab   : > { %v646_v25 = vpop.permute.xlu1 %645  ;;  %1001 = vmatmul.mubr.msk.bf16.vlgmr.msra.gmra.mxu0 %vm476_vm1, %v1078_v22 }
  0xac   : > { %v649_v26 = vsel %vm647_vm4, %v644_v23, %v646_v25  ;;  %1013 = vmatpush3.bf16.msra.mxu0 %v585_v24  ;;  %1016 = vmatprep.mubr.msk.bf16.mxu0 %vm1122_vm0, %v1121_v8 }
  0xad   : > { %1021 = vmatpush3.bf16.msra.mxu1 %v649_v26  ;;  %1014 = vmatprep.subr.bf16.mxu0 %v1121_v8 }
  0xae   : > { %v576_v27 = vpop.permute.xlu0 %575  ;;  %1022 = vmatprep.subr.bf16.mxu1 %v1121_v8 }
  0xaf   : > { %v578_v28 = vpop.permute.xlu1 %577 }
  0xb0   : > { %v584_v29 = vsel %vm583_vm3, %v576_v27, %v578_v28 }
  0xb1   : > { %1015 = vmatpush3.bf16.msra.mxu0 %v584_v29 }
  0xb2   : > { %v640_v31 = vpop.permute.xlu0 %639 }
  0xb3   : > { %v642_v32 = vpop.permute.xlu1 %641 }
  0xb4   : > { %v648_v33 = vsel %vm647_vm4, %v640_v31, %v642_v32  ;;  %1017 = vmatmul.mubr.msk.bf16.vlgmr.msra.gmra.mxu0 %vm476_vm1, %v1079_v30 }
  0xb5   : > { %1023 = vmatpush3.bf16.msra.mxu1 %v648_v33 }
  0xb8   : > { %1025 = vmatmul.mubr.msk.bf16.vlgmr.msra.gmra.mxu1 %vm476_vm1, %v1080_v34 }
  0xf3   : > { %v563_v35 = vpop.f32.mrf.mxu1 }
  0xf5   : > { %v1010_v36 = vpop.f32.mrf.mxu1 }
  0xf7   : > { %v566_v37 = vpop.f32.mrf.mxu1 }
  0xf9   : > { %v1011_v38 = vpop.f32.mrf.mxu1 }
 0x16b   : > { %v514_v39 = vpop.f32.mrf.mxu0 }
 0x16c   : > { %v564_v44 = vadd.f32 %v563_v35, %v514_v39 }
 0x16d   : > { %v1002_v40 = vpop.f32.mrf.mxu0 }
 0x16f   : > { %v517_v41 = vpop.f32.mrf.mxu0 }
 0x170   : > { %v567_v50 = vadd.f32 %v566_v37, %v517_v41 }
 0x171   : > { %v1003_v42 = vpop.f32.mrf.mxu0 }
 0x174   : > { %v625_v43 = vpop.f32.mrf.mxu0 }
 0x175   : > { %v632_v46 = vadd.f32 %v625_v43, %v564_v44 }
 0x176   : > { %v1018_v45 = vpop.f32.mrf.mxu0 }
 0x178   : > { %v628_v47 = vpop.f32.mrf.mxu0  ;;  %v689_v48 = vpop.f32.mrf.mxu1 }
 0x179   : > { %v696_v51 = vadd.f32 %v689_v48, %v632_v46  ;;  %v633_v54 = vadd.f32 %v628_v47, %v567_v50 }
 0x17a   : > { %v1019_v52 = vpop.f32.mrf.mxu0  ;;  %v1026_v53 = vpop.f32.mrf.mxu1 }
 0x17b   : > { %v715_v55 = vmul.f32 %v970_v49, %v696_v51 }
 0x17c   : > { %v692_v56 = vpop.f32.mrf.mxu1 }
 0x17d   : > { %v697_v57 = vadd.f32 %v692_v56, %v633_v54  ;;  %717 = vadd.xlane.f32.xlu0 %v715_v55  ;;  %v724_v60 = vmul.f32 %v715_v55, %v696_v51 }
 0x17e   : > { %v1027_v58 = vpop.f32.mrf.mxu1 }
 0x17f   : > { %v982_v59 = vpack.c.bf16 %v697_v57, %v696_v51  ;;  %v716_v61 = vmul.f32 %v970_v49, %v697_v57 }
 0x181   : > { %983 = vst [vmem:[%s390_s21] sm:$0xff] %v982_v59   ;;  %726 = vadd.xlane.f32.xlu0 %v724_v60  ;;  %719 = vadd.xlane.f32.xlu1 %v716_v61  ;;  %v725_v62 = vmul.f32 %v716_v61, %v697_v57 }
 0x185   : > { %728 = vadd.xlane.f32.xlu0 %v725_v62 }
 0x188   : > { %v767_v3 = vld [vmem:[%s390_s21] sm:$0xf] (%p1214_p8)  ;;  %v769_v4 = vld [vmem:[%s390_s21 + $0x4] sm:$0xf] (%p1214_p8) }
 0x189   : > { %768 = vst [vmem:[%s750_s14] sm:$0xf] (%p1214_p8), %v767_v3  ;;  %770 = vst [vmem:[%s750_s14 + $0x8] sm:$0xf] (%p1214_p8), %v769_v4 }
 0x206   : > { %v718_v63 = vpop.xlane.xlu0 %717 }
 0x207   : > { %722 = vst.msk [vmem:[%s413_s23] sm:$0xff] %vm721_vm5, %v718_v63 }
 0x20a   : > { %v727_v0 = vpop.xlane.xlu0 %726  ;;  %v720_v1 = vpop.xlane.xlu1 %719 }
 0x20b   : > { %730 = vst.msk [vmem:[%s418_s30] sm:$0xff] %vm721_vm5, %v727_v0  ;;  %723 = vst.msk [vmem:[%s413_s23 + $0x8] sm:$0xff] %vm721_vm5, %v720_v1  ;;  %748 = sbr.rel (!%p1214_p8) target bundleno = 528 (0x210), region = 122 }
 0x20e   : > { %v729_v2 = vpop.xlane.xlu0 %728 }
 0x20f   : > { %731 = vst.msk [vmem:[%s418_s30 + $0x8] sm:$0xff] %vm721_vm5, %v729_v2 }
 0x210 PF: > { %p14_p0 = scmp.ge.s32.totalorder %s1190_s27, 4   ;;  %s1309_s21 = smov %s1107_s22 }
 0x211   : > { %s1310_s22 = smov %s1208_s10  ;;  %s1311_s23 = smov %s1115_s24 }
 0x212   : > { %s1312_s24 = smov %s1200_s7  ;;  %s1313_s25 = smov %s1190_s27 }
 0x213   :  { %16 = sbr.rel (!%p14_p0) target bundleno = 3 (0x3), region = 229 }

// kernel: generator_forward.17
= control target key start
LH: loop header
LB: loop body
LE: loop exit
PB: predicated region body
PF: predicated region fallthrough
CT: control target
= control target key end

     0   :  { %v78_v0 = vmov 0   ;;  %s117_s2 = inlined_call_operand.vmem [shape: f32[16,1], index: 2, kind: input, shape index: {}]   ;;  %s118_s1 = inlined_call_operand.vmem [shape: f32[16,1], index: 1, kind: input, shape index: {}]   ;;  %s119_s0 = inlined_call_operand.vmem [shape: bf16[16,128], index: 0, kind: input, shape index: {}]   ;;  %s120_s3 = inlined_call_operand.vmem [shape: bf16[16,128], index: 3, kind: output, shape index: {}]  }
   0x1   :  { %77 = vset.pattern.permute.xlu1 %v78_v0  ;;  %76 = vset.pattern.permute.xlu0 %v78_v0  ;;  %v32_v1 = vld [vmem:[%s117_s2] sm:$0xff]  ;;  %v33_v3 = vld [vmem:[%s117_s2 + $0x8] sm:$0xff] }
   0x2   :  { %v18_v2 = vld [vmem:[%s118_s1] sm:$0xff]  ;;  %36 = vperm.xlu1 %77, %v32_v1   ;;  %v19_v4 = vld [vmem:[%s118_s1 + $0x8] sm:$0xff] }
   0x3   :  { %22 = vperm.xlu0 %76, %v18_v2   ;;  %v67_v5 = vld [vmem:[%s119_s0] sm:$0xff]  }
   0x4   :  { %v68_v6 = vunpack.c.l.bf16 %v67_v5  ;;  %v69_v10 = vunpack.c.h.bf16 %v67_v5 }
   0x6   :  { %41 = vperm.xlu1 %77, %v33_v3  }
   0x7   :  { %27 = vperm.xlu0 %76, %v19_v4  }
  0x7d   :  { %v37_v7 = vpop.permute.xlu1 %36 }
  0x7e   :  { %v23_v8 = vpop.permute.xlu0 %22 }
  0x7f   :  { %v30_v9 = vmul.f32 %v68_v6, %v23_v8 }
  0x81   :  { %v44_v12 = vadd.f32 %v37_v7, %v30_v9  ;;  %v42_v14 = vpop.permute.xlu1 %41 }
  0x82   :  { %v28_v11 = vpop.permute.xlu0 %27 }
  0x83   :  { %v31_v13 = vmul.f32 %v69_v10, %v28_v11  ;;  %v46_v16 = vmax.f32 %v44_v12, 0.0 }
  0x85   :  { %v45_v15 = vadd.f32 %v42_v14, %v31_v13 }
  0x87   :  { %v47_v17 = vmax.f32 %v45_v15, 0.0 }
  0x89   :  { %v73_v18 = vpack.c.bf16 %v47_v17, %v46_v16 }
  0x8b   :  { %74 = vst [vmem:[%s120_s3] sm:$0xff] %v73_v18  }

// kernel: generator_forward.19
= control target key start
LH: loop header
LB: loop body
LE: loop exit
PB: predicated region body
PF: predicated region fallthrough
CT: control target
= control target key end

     0   :  { %v192_v0 = vmov 0   ;;  %vm127_vm0 = vcmask 7168   ;;  %s299_s1 = inlined_call_operand.vmem [shape: f32[32,1], index: 1, kind: input, shape index: {}]   ;;  %s300_s2 = inlined_call_operand.vmem [shape: f32[32,1], index: 2, kind: input, shape index: {}]   ;;  %s301_s0 = inlined_call_operand.vmem [shape: bf16[32,128], index: 0, kind: input, shape index: {}]   ;;  %s302_s3 = inlined_call_operand.vmem [shape: f32[1,128], index: 3, kind: input, shape index: {}]   ;;  %s303_s4 = inlined_call_operand.vmem [shape: bf16[32,128], index: 4, kind: output, shape index: {0}]   ;;  %s304_s5 = inlined_call_operand.vmem [shape: f32[1,32,1], index: 5, kind: output, shape index: {1}]   ;;  %s305_s6 = inlined_call_operand.vmem [shape: f32[1,32,1], index: 6, kind: output, shape index: {2}]  }
   0x1   :  { %191 = vset.pattern.permute.xlu1 %v192_v0  ;;  %190 = vset.pattern.permute.xlu0 %v192_v0  ;;  %v30_v1 = vld [vmem:[%s299_s1 + $0x10] sm:$0xff]  ;;  %v28_v2 = vld [vmem:[%s299_s1] sm:$0xff]  ;;  %v31_v3 = vld [vmem:[%s299_s1 + $0x18] sm:$0xff] }
   0x2   :  { %44 = vperm.xlu1 %191, %v30_v1   ;;  %34 = vperm.xlu0 %190, %v28_v2   ;;  %v29_v4 = vld [vmem:[%s299_s1 + $0x8] sm:$0xff]  ;;  %v56_v6 = vld [vmem:[%s300_s2] sm:$0xff]  ;;  %v59_v7 = vld [vmem:[%s300_s2 + $0x18] sm:$0xff] }
   0x3   :  { %v57_v5 = vld [vmem:[%s300_s2 + $0x8] sm:$0xff]  ;;  %v58_v8 = vld [vmem:[%s300_s2 + $0x10] sm:$0xff]  ;;  %v170_v11 = vld [vmem:[%s301_s0] sm:$0xff]  }
   0x4   :  { %v171_v12 = vunpack.c.l.bf16 %v170_v11  ;;  %v172_v13 = vunpack.c.h.bf16 %v170_v11  ;;  %v187_v14 = vld [vmem:[%s301_s0 + $0x8] sm:$0xff]   ;;  %v164_v25 = vld [vmem:[%s302_s3] ss:$0 sm:$0xff] }
   0x5   :  { %v175_v17 = vunpack.c.l.bf16 %v187_v14  ;;  %v176_v19 = vunpack.c.h.bf16 %v187_v14 }
   0x6   :  { %49 = vperm.xlu1 %191, %v31_v3   ;;  %39 = vperm.xlu0 %190, %v29_v4  }
   0xa   :  { %67 = vperm.xlu1 %191, %v57_v5   ;;  %62 = vperm.xlu0 %190, %v56_v6  }
   0xe   :  { %77 = vperm.xlu1 %191, %v59_v7   ;;  %72 = vperm.xlu0 %190, %v58_v8  }
  0x7d   :  { %v45_v9 = vpop.permute.xlu1 %44  ;;  %v35_v10 = vpop.permute.xlu0 %34 }
  0x7e   :  { %v52_v18 = vmul.f32 %v171_v12, %v35_v10  ;;  %v54_v26 = vmul.f32 %v175_v17, %v45_v9 }
  0x81   :  { %v50_v15 = vpop.permute.xlu1 %49  ;;  %v40_v16 = vpop.permute.xlu0 %39 }
  0x82   :  { %v53_v20 = vmul.f32 %v172_v13, %v40_v16  ;;  %v55_v27 = vmul.f32 %v176_v19, %v50_v15 }
  0x85   :  { %v68_v21 = vpop.permute.xlu1 %67  ;;  %v63_v22 = vpop.permute.xlu0 %62 }
  0x86   :  { %v81_v23 = vadd.f32 %v68_v21, %v53_v20  ;;  %v80_v24 = vadd.f32 %v63_v22, %v52_v18 }
  0x88   :  { %v85_v28 = vmax.f32 %v81_v23, 0.0  ;;  %v84_v29 = vmax.f32 %v80_v24, 0.0 }
  0x89   :  { %v78_v30 = vpop.permute.xlu1 %77  ;;  %v73_v31 = vpop.permute.xlu0 %72 }
  0x8a   :  { %v180_v32 = vpack.c.bf16 %v85_v28, %v84_v29  ;;  %v83_v33 = vadd.f32 %v78_v30, %v55_v27  ;;  %v82_v34 = vadd.f32 %v73_v31, %v54_v26  ;;  %v116_v35 = vmul.f32 %v164_v25, %v85_v28 }
  0x8b   :  { %v115_v36 = vmul.f32 %v164_v25, %v84_v29 }
  0x8c   :  { %181 = vst [vmem:[%s303_s4] sm:$0xff] %v180_v32   ;;  %v87_v37 = vmax.f32 %v83_v33, 0.0  ;;  %v86_v38 = vmax.f32 %v82_v34, 0.0  ;;  %121 = vadd.xlane.f32.xlu1 %v116_v35  ;;  %v133_v44 = vmul.f32 %v116_v35, %v85_v28 }
  0x8d   :  { %119 = vadd.xlane.f32.xlu0 %v115_v36  ;;  %v132_v41 = vmul.f32 %v115_v36, %v84_v29 }
  0x8e   :  { %v185_v39 = vpack.c.bf16 %v87_v37, %v86_v38  ;;  %v117_v40 = vmul.f32 %v164_v25, %v86_v38  ;;  %v118_v43 = vmul.f32 %v164_v25, %v87_v37 }
  0x90   :  { %188 = vst [vmem:[%s303_s4 + $0x8] sm:$0xff] %v185_v39   ;;  %136 = vadd.xlane.f32.xlu1 %v132_v41  ;;  %v134_v42 = vmul.f32 %v117_v40, %v86_v38  ;;  %v135_v45 = vmul.f32 %v118_v43, %v87_v37 }
  0x91   :  { %123 = vadd.xlane.f32.xlu0 %v117_v40 }
  0x94   :  { %140 = vadd.xlane.f32.xlu1 %v134_v42 }
  0x95   :  { %125 = vadd.xlane.f32.xlu0 %v118_v43 }
  0x99   :  { %138 = vadd.xlane.f32.xlu0 %v133_v44 }
  0x9d   :  { %142 = vadd.xlane.f32.xlu0 %v135_v45 }
 0x115   :  { %v122_v46 = vpop.xlane.xlu1 %121 }
 0x116   :  { %129 = vst.msk [vmem:[%s304_s5 + $0x8] sm:$0xff] %vm127_vm0, %v122_v46  ;;  %v120_v47 = vpop.xlane.xlu0 %119 }
 0x117   :  { %128 = vst.msk [vmem:[%s304_s5] sm:$0xff] %vm127_vm0, %v120_v47 }
 0x119   :  { %v137_v48 = vpop.xlane.xlu1 %136 }
 0x11a   :  { %v124_v49 = vpop.xlane.xlu0 %123  ;;  %144 = vst.msk [vmem:[%s305_s6] sm:$0xff] %vm127_vm0, %v137_v48 }
 0x11b   :  { %130 = vst.msk [vmem:[%s304_s5 + $0x10] sm:$0xff] %vm127_vm0, %v124_v49 }
 0x11d   :  { %v141_v50 = vpop.xlane.xlu1 %140 }
 0x11e   :  { %v126_v51 = vpop.xlane.xlu0 %125  ;;  %146 = vst.msk [vmem:[%s305_s6 + $0x10] sm:$0xff] %vm127_vm0, %v141_v50 }
 0x11f   :  { %131 = vst.msk [vmem:[%s304_s5 + $0x18] sm:$0xff] %vm127_vm0, %v126_v51 }
 0x122   :  { %v139_v52 = vpop.xlane.xlu0 %138 }
 0x123   :  { %145 = vst.msk [vmem:[%s305_s6 + $0x8] sm:$0xff] %vm127_vm0, %v139_v52 }
 0x126   :  { %v143_v53 = vpop.xlane.xlu0 %142 }
 0x127   :  { %147 = vst.msk [vmem:[%s305_s6 + $0x18] sm:$0xff] %vm127_vm0, %v143_v53 }

// kernel: generator_forward.18
= control target key start
LH: loop header
LB: loop body
LE: loop exit
PB: predicated region body
PF: predicated region fallthrough
CT: control target
= control target key end

     0   :  { %s811_s29 = smov 127   ;;  %vm278_vm0 = vcmask 523264   ;;  %s812_s10 = smov 123   ;;  %vm269_vm1 = vcmask 1039360   ;;  %vm425_vm2 = vcmask 1006592   ;;  %vm519_vm3 = vcmask 998400   ;;  %s982_s0 = inlined_call_operand.vmem [shape: bf16[64,256], index: 0, kind: input, shape index: {}, may-alias: {0,1}]   ;;  %s983_s1 = inlined_call_operand.vmem [shape: bf16[64,256], index: 1, kind: input, shape index: {}, may-alias: {0,1}]   ;;  %s984_s2 = inlined_call_operand.vmem [shape: bf16[4,32,64], index: 2, kind: input, shape index: {}]   ;;  %s985_s3 = inlined_call_operand.vmem [shape: f32[1,128], index: 3, kind: input, shape index: {}]   ;;  %s986_s4 = inlined_call_operand.vmem [shape: bf16[32,128], index: 4, kind: output, shape index: {0}]   ;;  %s987_s5 = inlined_call_operand.vmem [shape: f32[1,32,1], index: 5, kind: output, shape index: {1}]   ;;  %s988_s6 = inlined_call_operand.vmem [shape: f32[1,32,1], index: 6, kind: output, shape index: {2}]  }
   0x1   :  { %v42_v0 = vld [vmem:[%s982_s0 + $0x30] sm:$0xf]  ;;  %v44_v1 = vld [vmem:[%s982_s0 + $0x38] sm:$0xf]  ;;  %v38_v2 = vld [vmem:[%s982_s0 + $0x20] sm:$0xf] }
   0x2   :  { %43 = vst [vmem:[#allocation2 + $0x18] sm:$0xf] %v42_v0  ;;  %45 = vst [vmem:[#allocation2 + $0x1c] sm:$0xf] %v44_v1  ;;  %v40_v3 = vld [vmem:[%s982_s0 + $0x28] sm:$0xf] }
   0x3   :  { %v674_v4 = vld [vmem:[%s983_s1 + $0x34] sm:$0xf]  ;;  %39 = vst [vmem:[#allocation2 + $0x10] sm:$0xf] %v38_v2  ;;  %41 = vst [vmem:[#allocation2 + $0x14] sm:$0xf] %v40_v3 }
   0x4   :  { %117 = vst [vmem:[#allocation3 + $0x18] sm:$0xf] %v674_v4  ;;  %v675_v5 = vld [vmem:[%s983_s1 + $0x3c] sm:$0xf]  ;;  %v672_v6 = vld [vmem:[%s983_s1 + $0x24] sm:$0xf] }
   0x5   :  { %v673_v7 = vld [vmem:[%s983_s1 + $0x2c] sm:$0xf]  ;;  %119 = vst [vmem:[#allocation3 + $0x1c] sm:$0xf] %v675_v5  ;;  %113 = vst [vmem:[#allocation3 + $0x10] sm:$0xf] %v672_v6 }
   0x6   :  { %115 = vst [vmem:[#allocation3 + $0x14] sm:$0xf] %v673_v7  ;;  %v670_v8 = vld [vmem:[%s983_s1 + $0x14] sm:$0xf]  ;;  %v671_v9 = vld [vmem:[%s983_s1 + $0x1c] sm:$0xf] }
   0x7   :  { %v34_v10 = vld [vmem:[%s982_s0 + $0x10] sm:$0xf]  ;;  %109 = vst [vmem:[#allocation3 + $0x8] sm:$0xf] %v670_v8  ;;  %111 = vst [vmem:[#allocation3 + $0xc] sm:$0xf] %v671_v9 }
   0x8   :  { %35 = vst [vmem:[#allocation2 + $0x8] sm:$0xf] %v34_v10  ;;  %v36_v11 = vld [vmem:[%s982_s0 + $0x18] sm:$0xf]  ;;  %v668_v12 = vld [vmem:[%s983_s1 + $0x4] sm:$0xf] }
   0x9   :  { %v669_v13 = vld [vmem:[%s983_s1 + $0xc] sm:$0xf]  ;;  %37 = vst [vmem:[#allocation2 + $0xc] sm:$0xf] %v36_v11  ;;  %105 = vst [vmem:[#allocation3] sm:$0xf] %v668_v12 }
   0xa   :  { %107 = vst [vmem:[#allocation3 + $0x4] sm:$0xf] %v669_v13  ;;  %v30_v14 = vld [vmem:[%s982_s0] sm:$0xf]  ;;  %v32_v15 = vld [vmem:[%s982_s0 + $0x8] sm:$0xf] }
   0xb   :  { %31 = vst [vmem:[#allocation2] sm:$0xf] %v30_v14  ;;  %33 = vst [vmem:[#allocation2 + $0x4] sm:$0xf] %v32_v15  ;;  %v795_v16 = vld [vmem:[#allocation2 + $0x18] sm:$0xff]   ;;  %v796_v17 = vld [vmem:[#allocation2 + $0x10] sm:$0xff]  }
   0xc   :  { %265 = vrot.lane.b32.xlu0 %v795_v16, %s811_s29  ;;  %v797_v18 = vld [vmem:[#allocation3 + $0x18] sm:$0xff]   ;;  %756 = vmatprep.subr.bf16.mxu1 %v795_v16  ;;  %v803_v22 = vld [vmem:[%s984_s2 + $0x10] sm:$0xff]   ;;  %v804_v23 = vld [vmem:[%s984_s2] sm:$0xff]   ;;  %s813_s11 = smov 122   ;;  %vm626_vm4 = vcmask 7168  }
   0xd   :  { %261 = vrot.lane.b32.xlu1 %v796_v17, %s811_s29  ;;  %v798_v19 = vld [vmem:[#allocation3 + $0x10] sm:$0xff]   ;;  %757 = vmatpush3.bf16.msra.mxu1 %v795_v16  ;;  %v806_v26 = vld [vmem:[%s984_s2 + $0x8] sm:$0xff]   ;;  %v805_v42 = vld [vmem:[%s984_s2 + $0x18] sm:$0xff]  }
   0xe   :  { %758 = vmatprep.subr.bf16.mxu1 %v796_v17  ;;  %v799_v21 = vld [vmem:[#allocation3 + $0x8] sm:$0xff]   ;;  %752 = vmatprep.mubr.msk.bf16.mxu0 %vm278_vm0, %v803_v22  ;;  %v809_v27 = vld [vmem:[%s984_s2 + $0x30] sm:$0xff]   ;;  %v807_v45 = vld [vmem:[%s984_s2 + $0x20] sm:$0xff]  }
   0xf   :  { %764 = vmatprep.mubr.msk.bf16.mxu1 %vm278_vm0, %v804_v23  ;;  %v808_v63 = vld [vmem:[%s984_s2 + $0x28] sm:$0xff]   ;;  %v810_v3 = vld [vmem:[%s984_s2 + $0x38] sm:$0xff]  }
  0x10   :  { %267 = vrot.lane.b32.xlu0 %v797_v18, %s811_s29  ;;  %v800_v20 = vld [vmem:[#allocation2 + $0x8] sm:$0xff]  }
  0x11   :  { %263 = vrot.lane.b32.xlu1 %v798_v19, %s811_s29  ;;  %759 = vmatpush3.bf16.msra.mxu1 %v796_v17  ;;  %v801_v24 = vld [vmem:[#allocation3] sm:$0xff]  }
  0x12   :  { %760 = vmatprep.subr.bf16.mxu1 %v800_v20  ;;  %v802_v25 = vld [vmem:[#allocation2] sm:$0xff]  }
  0x14   :  { %257 = vrot.lane.b32.xlu0 %v800_v20, %s811_s29 }
  0x15   :  { %259 = vrot.lane.b32.xlu1 %v799_v21, %s811_s29  ;;  %761 = vmatpush3.bf16.msra.mxu1 %v800_v20 }
  0x16   :  { %762 = vmatprep.subr.bf16.mxu1 %v802_v25 }
  0x18   :  { %253 = vrot.lane.b32.xlu0 %v802_v25, %s811_s29 }
  0x19   :  { %255 = vrot.lane.b32.xlu1 %v801_v24, %s811_s29  ;;  %763 = vmatpush3.bf16.msra.mxu1 %v802_v25 }
  0x1c   :  { %421 = vrot.lane.b32.xlu0 %v795_v16, %s812_s10  ;;  %765 = vmatmul.mubr.msk.bf16.vlgmr.msra.gmra.mxu1 %vm278_vm0, %v806_v26 }
  0x1d   :  { %423 = vrot.lane.b32.xlu1 %v797_v18, %s812_s10  ;;  %788 = vmatprep.mubr.msk.bf16.mxu1 %vm278_vm0, %v809_v27 }
  0x20   :  { %515 = vrot.lane.b32.xlu0 %v795_v16, %s813_s11 }
  0x21   :  { %517 = vrot.lane.b32.xlu1 %v797_v18, %s813_s11 }
  0x24   :  { %417 = vrot.lane.b32.xlu0 %v796_v17, %s812_s10 }
  0x25   :  { %419 = vrot.lane.b32.xlu1 %v798_v19, %s812_s10 }
  0x28   :  { %511 = vrot.lane.b32.xlu0 %v796_v17, %s813_s11 }
  0x29   :  { %513 = vrot.lane.b32.xlu1 %v798_v19, %s813_s11  ;;  %v704_v19 = vld [vmem:[%s985_s3] ss:$0 sm:$0xff] }
  0x2c   :  { %413 = vrot.lane.b32.xlu0 %v800_v20, %s812_s10 }
  0x2d   :  { %415 = vrot.lane.b32.xlu1 %v799_v21, %s812_s10 }
  0x30   :  { %507 = vrot.lane.b32.xlu0 %v800_v20, %s813_s11 }
  0x31   :  { %509 = vrot.lane.b32.xlu1 %v799_v21, %s813_s11 }
  0x34   :  { %409 = vrot.lane.b32.xlu0 %v802_v25, %s812_s10 }
  0x35   :  { %411 = vrot.lane.b32.xlu1 %v801_v24, %s812_s10 }
  0x38   :  { %503 = vrot.lane.b32.xlu0 %v802_v25, %s813_s11 }
  0x39   :  { %505 = vrot.lane.b32.xlu1 %v801_v24, %s813_s11 }
  0x7e   :  { %v266_v28 = vpop.permute.xlu0 %265 }
  0x7f   :  { %v262_v29 = vpop.permute.xlu1 %261 }
  0x82   :  { %v268_v30 = vpop.permute.xlu0 %267 }
  0x83   :  { %v264_v31 = vpop.permute.xlu1 %263  ;;  %v273_v32 = vsel %vm269_vm1, %v266_v28, %v268_v30 }
  0x84   :  { %744 = vmatprep.subr.bf16.mxu0 %v273_v32  ;;  %v272_v33 = vsel %vm269_vm1, %v262_v29, %v264_v31 }
  0x85   :  { %745 = vmatpush3.bf16.msra.mxu0 %v273_v32 }
  0x86   :  { %746 = vmatprep.subr.bf16.mxu0 %v272_v33  ;;  %v258_v34 = vpop.permute.xlu0 %257 }
  0x87   :  { %v260_v35 = vpop.permute.xlu1 %259 }
  0x88   :  { %v271_v36 = vsel %vm269_vm1, %v258_v34, %v260_v35 }
  0x89   :  { %747 = vmatpush3.bf16.msra.mxu0 %v272_v33 }
  0x8a   :  { %748 = vmatprep.subr.bf16.mxu0 %v271_v36  ;;  %v254_v37 = vpop.permute.xlu0 %253 }
  0x8b   :  { %v256_v38 = vpop.permute.xlu1 %255 }
  0x8c   :  { %v270_v39 = vsel %vm269_vm1, %v254_v37, %v256_v38 }
  0x8d   :  { %749 = vmatpush3.bf16.msra.mxu0 %v271_v36 }
  0x8e   :  { %750 = vmatprep.subr.bf16.mxu0 %v270_v39  ;;  %v422_v40 = vpop.permute.xlu0 %421 }
  0x8f   :  { %v424_v41 = vpop.permute.xlu1 %423 }
  0x90   :  { %v429_v43 = vsel %vm425_vm2, %v422_v40, %v424_v41 }
  0x91   :  { %751 = vmatpush3.bf16.msra.mxu0 %v270_v39 }
  0x92   :  { %768 = vmatprep.subr.bf16.mxu0 %v429_v43  ;;  %v516_v44 = vpop.permute.xlu0 %515 }
  0x93   :  { %v518_v46 = vpop.permute.xlu1 %517 }
  0x94   :  { %v523_v47 = vsel %vm519_vm3, %v516_v44, %v518_v46  ;;  %753 = vmatmul.mubr.msk.bf16.vlgmr.msra.gmra.mxu0 %vm278_vm0, %v805_v42 }
  0x95   :  { %780 = vmatprep.subr.bf16.mxu1 %v523_v47  ;;  %769 = vmatpush3.bf16.msra.mxu0 %v429_v43 }
  0x96   :  { %781 = vmatpush3.bf16.msra.mxu1 %v523_v47  ;;  %v418_v48 = vpop.permute.xlu0 %417  ;;  %776 = vmatprep.mubr.msk.bf16.mxu0 %vm278_vm0, %v807_v45 }
  0x97   :  { %v420_v49 = vpop.permute.xlu1 %419 }
  0x98   :  { %v428_v50 = vsel %vm425_vm2, %v418_v48, %v420_v49 }
  0x99   :  { %770 = vmatprep.subr.bf16.mxu0 %v428_v50 }
  0x9a   :  { %771 = vmatpush3.bf16.msra.mxu0 %v428_v50  ;;  %v512_v51 = vpop.permute.xlu0 %511 }
  0x9b   :  { %v514_v52 = vpop.permute.xlu1 %513 }
  0x9c   :  { %v522_v53 = vsel %vm519_vm3, %v512_v51, %v514_v52 }
  0x9d   :  { %782 = vmatprep.subr.bf16.mxu1 %v522_v53 }
  0x9e   :  { %783 = vmatpush3.bf16.msra.mxu1 %v522_v53  ;;  %v414_v54 = vpop.permute.xlu0 %413 }
  0x9f   :  { %v416_v55 = vpop.permute.xlu1 %415 }
  0xa0   :  { %v427_v56 = vsel %vm425_vm2, %v414_v54, %v416_v55 }
  0xa1   :  { %772 = vmatprep.subr.bf16.mxu0 %v427_v56 }
  0xa2   :  { %773 = vmatpush3.bf16.msra.mxu0 %v427_v56  ;;  %v508_v57 = vpop.permute.xlu0 %507 }
  0xa3   :  { %v510_v58 = vpop.permute.xlu1 %509 }
  0xa4   :  { %v521_v59 = vsel %vm519_vm3, %v508_v57, %v510_v58 }
  0xa5   :  { %784 = vmatprep.subr.bf16.mxu1 %v521_v59 }
  0xa6   :  { %785 = vmatpush3.bf16.msra.mxu1 %v521_v59  ;;  %v410_v60 = vpop.permute.xlu0 %409 }
  0xa7   :  { %v412_v61 = vpop.permute.xlu1 %411 }
  0xa8   :  { %v426_v62 = vsel %vm425_vm2, %v410_v60, %v412_v61 }
  0xa9   :  { %774 = vmatprep.subr.bf16.mxu0 %v426_v62 }
  0xaa   :  { %775 = vmatpush3.bf16.msra.mxu0 %v426_v62  ;;  %v504_v0 = vpop.permute.xlu0 %503 }
  0xab   :  { %v506_v1 = vpop.permute.xlu1 %505 }
  0xac   :  { %v520_v2 = vsel %vm519_vm3, %v504_v0, %v506_v1 }
  0xad   :  { %777 = vmatmul.mubr.msk.bf16.vlgmr.msra.gmra.mxu0 %vm278_vm0, %v808_v63  ;;  %786 = vmatprep.subr.bf16.mxu1 %v520_v2 }
  0xae   :  { %787 = vmatpush3.bf16.msra.mxu1 %v520_v2 }
  0xb1   :  { %789 = vmatmul.mubr.msk.bf16.vlgmr.msra.gmra.mxu1 %vm278_vm0, %v810_v3 }
  0xdc   :  { %v766_v5 = vpop.f32.mrf.mxu1 }
  0xde   :  { %v384_v7 = vpop.f32.mrf.mxu1 }
  0xe0   :  { %v767_v9 = vpop.f32.mrf.mxu1 }
  0xe2   :  { %v387_v13 = vpop.f32.mrf.mxu1 }
 0x154   :  { %v754_v4 = vpop.f32.mrf.mxu0 }
 0x155   :  { %v393_v12 = vadd.f32 %v766_v5, %v754_v4 }
 0x156   :  { %v319_v6 = vpop.f32.mrf.mxu0 }
 0x157   :  { %v385_v15 = vadd.f32 %v384_v7, %v319_v6 }
 0x158   :  { %v755_v8 = vpop.f32.mrf.mxu0 }
 0x159   :  { %v396_v20 = vadd.f32 %v767_v9, %v755_v8 }
 0x15a   :  { %v322_v10 = vpop.f32.mrf.mxu0 }
 0x15b   :  { %v388_v25 = vadd.f32 %v387_v13, %v322_v10 }
 0x16d   :  { %v778_v11 = vpop.f32.mrf.mxu0 }
 0x16e   :  { %v491_v16 = vadd.f32 %v778_v11, %v393_v12 }
 0x16f   :  { %v474_v14 = vpop.f32.mrf.mxu0 }
 0x170   :  { %v489_v21 = vadd.f32 %v474_v14, %v385_v15 }
 0x171   :  { %v779_v17 = vpop.f32.mrf.mxu0  ;;  %v790_v18 = vpop.f32.mrf.mxu1 }
 0x172   :  { %v585_v22 = vadd.f32 %v790_v18, %v491_v16  ;;  %v492_v26 = vadd.f32 %v779_v17, %v396_v20 }
 0x173   :  { %v477_v23 = vpop.f32.mrf.mxu0  ;;  %v568_v24 = vpop.f32.mrf.mxu1 }
 0x174   :  { %v583_v27 = vadd.f32 %v568_v24, %v489_v21  ;;  %v616_v28 = vmul.f32 %v704_v19, %v585_v22  ;;  %v490_v30 = vadd.f32 %v477_v23, %v388_v25 }
 0x175   :  { %v791_v29 = vpop.f32.mrf.mxu1 }
 0x176   :  { %v586_v31 = vadd.f32 %v791_v29, %v492_v26  ;;  %622 = vadd.xlane.f32.xlu0 %v616_v28  ;;  %v614_v32 = vmul.f32 %v704_v19, %v583_v27  ;;  %v633_v41 = vmul.f32 %v616_v28, %v585_v22 }
 0x177   :  { %v571_v33 = vpop.f32.mrf.mxu1 }
 0x178   :  { %v717_v34 = vpack.c.bf16 %v586_v31, %v585_v22  ;;  %v584_v35 = vadd.f32 %v571_v33, %v490_v30  ;;  %v631_v36 = vmul.f32 %v614_v32, %v583_v27  ;;  %v617_v38 = vmul.f32 %v704_v19, %v586_v31 }
 0x17a   :  { %719 = vst [vmem:[%s986_s4 + $0x8] sm:$0xff] %v717_v34   ;;  %v712_v37 = vpack.c.bf16 %v584_v35, %v583_v27  ;;  %618 = vadd.xlane.f32.xlu0 %v614_v32  ;;  %635 = vadd.xlane.f32.xlu1 %v631_v36  ;;  %v615_v39 = vmul.f32 %v704_v19, %v584_v35 }
 0x17b   :  { %v634_v42 = vmul.f32 %v617_v38, %v586_v31 }
 0x17c   :  { %713 = vst [vmem:[%s986_s4] sm:$0xff] %v712_v37   ;;  %v632_v40 = vmul.f32 %v615_v39, %v584_v35 }
 0x17e   :  { %624 = vadd.xlane.f32.xlu0 %v617_v38  ;;  %620 = vadd.xlane.f32.xlu1 %v615_v39 }
 0x182   :  { %637 = vadd.xlane.f32.xlu0 %v632_v40  ;;  %639 = vadd.xlane.f32.xlu1 %v633_v41 }
 0x186   :  { %641 = vadd.xlane.f32.xlu0 %v634_v42 }
 0x1ff   :  { %v623_v43 = vpop.xlane.xlu0 %622 }
 0x200   :  { %629 = vst.msk [vmem:[%s987_s5 + $0x10] sm:$0xff] %vm626_vm4, %v623_v43 }
 0x203   :  { %v619_v44 = vpop.xlane.xlu0 %618  ;;  %v636_v45 = vpop.xlane.xlu1 %635 }
 0x204   :  { %627 = vst.msk [vmem:[%s987_s5] sm:$0xff] %vm626_vm4, %v619_v44  ;;  %643 = vst.msk [vmem:[%s988_s6] sm:$0xff] %vm626_vm4, %v636_v45 }
 0x207   :  { %v625_v46 = vpop.xlane.xlu0 %624  ;;  %v621_v47 = vpop.xlane.xlu1 %620 }
 0x208   :  { %630 = vst.msk [vmem:[%s987_s5 + $0x18] sm:$0xff] %vm626_vm4, %v625_v46  ;;  %628 = vst.msk [vmem:[%s987_s5 + $0x8] sm:$0xff] %vm626_vm4, %v621_v47 }
 0x20b   :  { %v638_v48 = vpop.xlane.xlu0 %637  ;;  %v640_v49 = vpop.xlane.xlu1 %639 }
 0x20c   :  { %644 = vst.msk [vmem:[%s988_s6 + $0x8] sm:$0xff] %vm626_vm4, %v638_v48  ;;  %645 = vst.msk [vmem:[%s988_s6 + $0x10] sm:$0xff] %vm626_vm4, %v640_v49 }
 0x20f   :  { %v642_v50 = vpop.xlane.xlu0 %641 }
 0x210   :  { %646 = vst.msk [vmem:[%s988_s6 + $0x18] sm:$0xff] %vm626_vm4, %v642_v50 }

// kernel: generator_forward.23
= control target key start
LH: loop header
LB: loop body
LE: loop exit
PB: predicated region body
PF: predicated region fallthrough
CT: control target
= control target key end

     0   :  { %18 = vsyncpa [#allocation5], 0  ;;  %v1474_v2 = vmov 0   ;;  %s1731_s0 = inlined_call_operand.vmem [shape: bf16[32,256], index: 0, kind: input, shape index: {}, may-alias: {0,1}]   ;;  %s1732_s1 = inlined_call_operand.vmem [shape: bf16[32,256], index: 1, kind: input, shape index: {}, may-alias: {0,1}]   ;;  %s1733_s2 = inlined_call_operand.vmem [shape: f32[32,1], index: 2, kind: input, shape index: {}]   ;;  %s1734_s3 = inlined_call_operand.vmem [shape: f32[32,1], index: 3, kind: input, shape index: {}]   ;;  %s1735_s4 = inlined_call_operand.vmem [shape: f32[1,256], index: 4, kind: input, shape index: {}, may-alias: {4,5}]   ;;  %s1736_s5 = inlined_call_operand.vmem [shape: f32[1,256], index: 5, kind: input, shape index: {}, may-alias: {4,5}]   ;;  %s1737_s6 = inlined_call_operand.vmem [shape: bf16[9,32,32], index: 6, kind: input, shape index: {}]   ;;  %s1738_s7 = inlined_call_operand.vmem [shape: f32[32,1], index: 7, kind: input, shape index: {}]   ;;  %s1739_s8 = inlined_call_operand.vmem [shape: bf16[32,128], index: 8, kind: input, shape index: {}]   ;;  %s1740_s9 = inlined_call_operand.vmem [shape: f32[1,128], index: 9, kind: input, shape index: {}]   ;;  %s1741_s10 = inlined_call_operand.vmem [shape: bf16[32,128], index: 10, kind: output, shape index: {0}]   ;;  %s1742_s11 = inlined_call_operand.hbm [shape: f32[1,32,1], index: 11, kind: output, shape index: {1}]   ;;  %s1743_s12 = inlined_call_operand.hbm [shape: f32[1,32,1], index: 12, kind: output, shape index: {2}]  }
   0x1   :  { %v243_v0 = vld [vmem:[%s1734_s3 + $0x10] sm:$0xff]  ;;  %1407 = vset.pattern.permute.xlu1 %v1474_v2  ;;  %1406 = vset.pattern.permute.xlu0 %v1474_v2  ;;  %v244_v3 = vld [vmem:[%s1734_s3 + $0x18] sm:$0xff]  ;;  %v38_v9 = vld [vmem:[%s1731_s0] sm:$0xf] }
   0x2   :  { %v211_v1 = vld [vmem:[%s1733_s2 + $0x10] sm:$0xff]  ;;  %257 = vperm.xlu1 %1407, %v243_v0   ;;  %v212_v4 = vld [vmem:[%s1733_s2 + $0x18] sm:$0xff]  ;;  %v210_v10 = vld [vmem:[%s1733_s2 + $0x8] sm:$0xff]  ;;  %39 = vst [vmem:[#allocation2] sm:$0xf] %v38_v9 }
   0x3   :  { %225 = vperm.xlu0 %1406, %v211_v1   ;;  %v42_v5 = vld [vmem:[%s1731_s0 + $0x10] sm:$0xf]  ;;  %v44_v6 = vld [vmem:[%s1731_s0 + $0x18] sm:$0xf]  ;;  %v1211_v7 = vld [vmem:[%s1732_s1 + $0x14] sm:$0xf] }
   0x4   :  { %43 = vst [vmem:[#allocation2 + $0x8] sm:$0xf] %v42_v5  ;;  %45 = vst [vmem:[#allocation2 + $0xc] sm:$0xf] %v44_v6  ;;  %v1212_v8 = vld [vmem:[%s1732_s1 + $0x1c] sm:$0xf] }
   0x5   :  { %v209_v11 = vld [vmem:[%s1733_s2] sm:$0xff]  ;;  %101 = vst [vmem:[#allocation3 + $0x8] sm:$0xf] %v1211_v7  ;;  %103 = vst [vmem:[#allocation3 + $0xc] sm:$0xf] %v1212_v8  ;;  %v242_v15 = vld [vmem:[%s1734_s3 + $0x8] sm:$0xff] }
   0x6   :  { %v40_v12 = vld [vmem:[%s1731_s0 + $0x8] sm:$0xf]  ;;  %v1209_v13 = vld [vmem:[%s1732_s1 + $0x4] sm:$0xf]  ;;  %v1210_v14 = vld [vmem:[%s1732_s1 + $0xc] sm:$0xf]  ;;  %262 = vperm.xlu1 %1407, %v244_v3  }
   0x7   :  { %230 = vperm.xlu0 %1406, %v212_v4   ;;  %41 = vst [vmem:[#allocation2 + $0x4] sm:$0xf] %v40_v12  ;;  %97 = vst [vmem:[#allocation3] sm:$0xf] %v1209_v13  ;;  %v241_v16 = vld [vmem:[%s1734_s3] sm:$0xff] }
   0x8   :  { %99 = vst [vmem:[#allocation3 + $0x4] sm:$0xf] %v1210_v14 }
   0xa   :  { %220 = vperm.xlu1 %1407, %v210_v10  }
   0xb   :  { %215 = vperm.xlu0 %1406, %v209_v11  }
   0xe   :  { %252 = vperm.xlu1 %1407, %v242_v15  }
   0xf   :  { %247 = vperm.xlu0 %1406, %v241_v16  }
  0x10   :  { %19 = vsyncpa [#allocation7], 0  ;;  %v1408_v17 = vld [vmem:[#allocation2 + $0x8] sm:$0xff]   ;;  %v1409_v18 = vld [vmem:[#allocation3 + $0x8] sm:$0xff]   ;;  %vm366_vm0 = vcmask 261120   ;;  %s1475_s17 = smov 127  }
  0x11   :  { %v205_v19 = vunpack.c.l.bf16 %v1408_v17  ;;  %v206_v20 = vunpack.c.l.bf16 %v1409_v18  ;;  %v207_v25 = vunpack.c.h.bf16 %v1408_v17  ;;  %v208_v26 = vunpack.c.h.bf16 %v1409_v18  ;;  %v1410_v29 = vld [vmem:[#allocation2] sm:$0xff]   ;;  %v1411_v30 = vld [vmem:[#allocation3] sm:$0xff]   ;;  %v1415_v13 = vld [vmem:[%s1737_s6 + $0x8] sm:$0xff]   ;;  %s1476_s22 = smov 126   ;;  %s1477_s23 = smov 122  }
  0x12   :  { %v1218_v37 = vld [vmem:[%s1735_s4] ss:$0 sm:$0xff]  ;;  %v1219_v38 = vld [vmem:[%s1736_s5 + $0x1] ss:$0 sm:$0xff]  ;;  %v203_v41 = vunpack.c.h.bf16 %v1410_v29  ;;  %v204_v42 = vunpack.c.h.bf16 %v1411_v30  ;;  %v201_v45 = vunpack.c.l.bf16 %v1410_v29  ;;  %v202_v46 = vunpack.c.l.bf16 %v1411_v30  ;;  %v1412_v59 = vld [vmem:[%s1737_s6 + $0x10] sm:$0xff]   ;;  %s1478_s26 = smov 121  }
  0x13   :  { %1325 = vmatprep.mubr.msk.bf16.mxu0 %vm366_vm0, %v1412_v59  ;;  %v1414_v12 = vld [vmem:[%s1737_s6] sm:$0xff]   ;;  %v1418_v14 = vld [vmem:[%s1737_s6 + $0x30] sm:$0xff]   ;;  %s1479_s27 = smov 120   ;;  %s1480_s28 = smov 116   ;;  %v1062_v15 = vld [vmem:[%s1738_s7 + $0x8] sm:$0xff]  ;;  %vm361_vm1 = vcmask 1039360  }
  0x14   :  { %1333 = vmatprep.mubr.msk.bf16.mxu1 %vm366_vm0, %v1414_v12  ;;  %s1481_s29 = smov 115   ;;  %s1482_s30 = smov 114   ;;  %v1061_v16 = vld [vmem:[%s1738_s7] sm:$0xff]  ;;  %v1064_v17 = vld [vmem:[%s1738_s7 + $0x18] sm:$0xff]  ;;  %v1063_v18 = vld [vmem:[%s1738_s7 + $0x10] sm:$0xff]  ;;  %vm505_vm2 = vcmask 1031168  }
  0x15   :  { %vm587_vm3 = vcmask 998400   ;;  %vm669_vm4 = vcmask 990208   ;;  %vm751_vm5 = vcmask 982016   ;;  %vm833_vm6 = vcmask 949248   ;;  %v1427_v12 = vld [vmem:[%s1737_s6 + $0x78] sm:$0xff]   ;;  %s1483_s24 = smov [#allocation4]  }
  0x16   :  { %vm915_vm7 = vcmask 941056   ;;  %vm997_vm8 = vcmask 932864   ;;  %vm1140_vm9 = vcmask 7168   ;;  %s1168_s25 = sshll.u32 %s1483_s24, 4  ;;  %s1169_s25 = int_to_ptr.vmem [resolvable:$true] %s1168_s25 }
  0x17   :  { %p1435_p1 = scmp.lt.s32.totalorder %s1169_s25, %s1169_s25 }
  0x7d   :  { %v258_v21 = vpop.permute.xlu1 %257 }
  0x7e   :  { %v226_v22 = vpop.permute.xlu0 %225 }
  0x7f   :  { %v237_v23 = vmul.f32 %v226_v22, %v205_v19  ;;  %v238_v24 = vmul.f32 %v226_v22, %v206_v20 }
  0x81   :  { %v269_v27 = vadd.f32 %v258_v21, %v237_v23  ;;  %v270_v28 = vadd.f32 %v258_v21, %v238_v24  ;;  %v263_v31 = vpop.permute.xlu1 %262 }
  0x82   :  { %v231_v32 = vpop.permute.xlu0 %230 }
  0x83   :  { %v239_v33 = vmul.f32 %v231_v32, %v207_v25  ;;  %v240_v34 = vmul.f32 %v231_v32, %v208_v26  ;;  %v277_v35 = vmax.f32 %v269_v27, 0.0  ;;  %v278_v36 = vmax.f32 %v270_v28, 0.0  ;;  %v1413_v25 = vld [vmem:[%s1737_s6 + $0x18] sm:$0xff]   ;;  %v1416_v26 = vld [vmem:[%s1737_s6 + $0x20] sm:$0xff]  }
  0x85   :  { %v271_v39 = vadd.f32 %v263_v31, %v239_v33  ;;  %v272_v40 = vadd.f32 %v263_v31, %v240_v34  ;;  %v221_v43 = vpop.permute.xlu1 %220  ;;  %v295_v49 = vmul.f32 %v1218_v37, %v277_v35  ;;  %v296_v50 = vmul.f32 %v1219_v38, %v278_v36  ;;  %v1417_v33 = vld [vmem:[%s1737_s6 + $0x28] sm:$0xff]   ;;  %v1420_v34 = vld [vmem:[%s1737_s6 + $0x40] sm:$0xff]  }
  0x86   :  { %v216_v44 = vpop.permute.xlu0 %215  ;;  %v235_v53 = vmul.f32 %v221_v43, %v203_v41  ;;  %v236_v54 = vmul.f32 %v221_v43, %v204_v42 }
  0x87   :  { %v279_v47 = vmax.f32 %v271_v39, 0.0  ;;  %v280_v48 = vmax.f32 %v272_v40, 0.0  ;;  %v233_v55 = vmul.f32 %v216_v44, %v201_v45  ;;  %v234_v56 = vmul.f32 %v216_v44, %v202_v46  ;;  %v1419_v44 = vld [vmem:[%s1737_s6 + $0x38] sm:$0xff]   ;;  %v1422_v45 = vld [vmem:[%s1737_s6 + $0x50] sm:$0xff]  }
  0x89   :  { %v297_v51 = vmul.f32 %v1218_v37, %v279_v47  ;;  %v298_v52 = vmul.f32 %v1219_v38, %v280_v48  ;;  %v253_v57 = vpop.permute.xlu1 %252 }
  0x8a   :  { %v248_v58 = vpop.permute.xlu0 %247  ;;  %v267_v62 = vadd.f32 %v253_v57, %v235_v53  ;;  %v268_v63 = vadd.f32 %v253_v57, %v236_v54 }
  0x8b   :  { %v301_v60 = vpack.c.bf16 %v297_v51, %v295_v49  ;;  %v302_v61 = vpack.c.bf16 %v298_v52, %v296_v50  ;;  %v265_v0 = vadd.f32 %v248_v58, %v233_v55  ;;  %v266_v1 = vadd.f32 %v248_v58, %v234_v56  ;;  %v1421_v49 = vld [vmem:[%s1737_s6 + $0x48] sm:$0xff]   ;;  %v1424_v50 = vld [vmem:[%s1737_s6 + $0x60] sm:$0xff]  }
  0x8c   :  { %v275_v2 = vmax.f32 %v267_v62, 0.0  ;;  %v276_v3 = vmax.f32 %v268_v63, 0.0 }
  0x8d   :  { %359 = vrot.lane.b32.xlu1 %v302_v61, %s1475_s17  ;;  %357 = vrot.lane.b32.xlu0 %v301_v60, %s1475_s17  ;;  %v273_v4 = vmax.f32 %v265_v0, 0.0  ;;  %v274_v5 = vmax.f32 %v266_v1, 0.0  ;;  %v1425_v1 = vld [vmem:[%s1737_s6 + $0x68] sm:$0xff]  }
  0x8e   :  { %1329 = vmatprep.subr.bf16.mxu1 %v301_v60  ;;  %v293_v6 = vmul.f32 %v1218_v37, %v275_v2  ;;  %v294_v7 = vmul.f32 %v1219_v38, %v276_v3  ;;  %v1428_v2 = vld [vmem:[%s1737_s6 + $0x80] sm:$0xff]  }
  0x8f   :  { %1330 = vmatpush3.bf16.msra.mxu1 %v301_v60  ;;  %v291_v8 = vmul.f32 %v1218_v37, %v273_v4  ;;  %v292_v9 = vmul.f32 %v1219_v38, %v274_v5 }
  0x91   :  { %v299_v10 = vpack.c.bf16 %v293_v6, %v291_v8  ;;  %v300_v11 = vpack.c.bf16 %v294_v7, %v292_v9 }
  0x93   :  { %355 = vrot.lane.b32.xlu1 %v300_v11, %s1475_s17  ;;  %353 = vrot.lane.b32.xlu0 %v299_v10, %s1475_s17 }
  0x94   :  { %1331 = vmatprep.subr.bf16.mxu1 %v299_v10 }
  0x95   :  { %1332 = vmatpush3.bf16.msra.mxu1 %v299_v10 }
  0x97   :  { %503 = vrot.lane.b32.xlu1 %v302_v61, %s1476_s22  ;;  %501 = vrot.lane.b32.xlu0 %v301_v60, %s1476_s22 }
  0x98   :  { %1334 = vmatmul.mubr.msk.bf16.vlgmr.msra.gmra.mxu1 %vm366_vm0, %v1415_v13 }
  0x99   :  { %1349 = vmatprep.mubr.msk.bf16.mxu1 %vm366_vm0, %v1418_v14 }
  0x9b   :  { %499 = vrot.lane.b32.xlu1 %v300_v11, %s1476_s22  ;;  %497 = vrot.lane.b32.xlu0 %v299_v10, %s1476_s22 }
  0x9f   :  { %585 = vrot.lane.b32.xlu1 %v302_v61, %s1477_s23  ;;  %583 = vrot.lane.b32.xlu0 %v301_v60, %s1477_s23 }
  0xa3   :  { %667 = vrot.lane.b32.xlu1 %v302_v61, %s1478_s26  ;;  %665 = vrot.lane.b32.xlu0 %v301_v60, %s1478_s26 }
  0xa7   :  { %581 = vrot.lane.b32.xlu1 %v300_v11, %s1477_s23  ;;  %579 = vrot.lane.b32.xlu0 %v299_v10, %s1477_s23 }
  0xab   :  { %663 = vrot.lane.b32.xlu1 %v300_v11, %s1478_s26  ;;  %661 = vrot.lane.b32.xlu0 %v299_v10, %s1478_s26 }
  0xaf   :  { %749 = vrot.lane.b32.xlu1 %v302_v61, %s1479_s27  ;;  %747 = vrot.lane.b32.xlu0 %v301_v60, %s1479_s27 }
  0xb3   :  { %831 = vrot.lane.b32.xlu1 %v302_v61, %s1480_s28  ;;  %829 = vrot.lane.b32.xlu0 %v301_v60, %s1480_s28 }
  0xb7   :  { %745 = vrot.lane.b32.xlu1 %v300_v11, %s1479_s27  ;;  %743 = vrot.lane.b32.xlu0 %v299_v10, %s1479_s27 }
  0xbb   :  { %827 = vrot.lane.b32.xlu1 %v300_v11, %s1480_s28  ;;  %825 = vrot.lane.b32.xlu0 %v299_v10, %s1480_s28 }
  0xbf   :  { %913 = vrot.lane.b32.xlu1 %v302_v61, %s1481_s29  ;;  %911 = vrot.lane.b32.xlu0 %v301_v60, %s1481_s29 }
  0xc3   :  { %995 = vrot.lane.b32.xlu1 %v302_v61, %s1482_s30  ;;  %993 = vrot.lane.b32.xlu0 %v301_v60, %s1482_s30  ;;  %v1423_v60 = vld [vmem:[%s1737_s6 + $0x58] sm:$0xff]   ;;  %v1426_v61 = vld [vmem:[%s1737_s6 + $0x70] sm:$0xff]  }
  0xc7   :  { %909 = vrot.lane.b32.xlu1 %v300_v11, %s1481_s29  ;;  %907 = vrot.lane.b32.xlu0 %v299_v10, %s1481_s29 }
  0xcb   :  { %991 = vrot.lane.b32.xlu1 %v300_v11, %s1482_s30  ;;  %989 = vrot.lane.b32.xlu0 %v299_v10, %s1482_s30 }
  0xcf   :  { %1072 = vperm.xlu1 %1407, %v1062_v15   ;;  %1067 = vperm.xlu0 %1406, %v1061_v16   ;;  %v1429_v16 = vld [vmem:[%s1737_s6 + $0x88] sm:$0xff]  }
  0xd3   :  { %1082 = vperm.xlu1 %1407, %v1064_v17   ;;  %1077 = vperm.xlu0 %1406, %v1063_v18  }
  0xff   :  { %v360_v19 = vpop.permute.xlu1 %359  ;;  %v358_v20 = vpop.permute.xlu0 %357 }
 0x100   :  { %v363_v21 = vsel %vm361_vm1, %v358_v20, %v360_v19 }
 0x101   :  { %1321 = vmatprep.subr.bf16.mxu0 %v363_v21 }
 0x102   :  { %1322 = vmatpush3.bf16.msra.mxu0 %v363_v21 }
 0x105   :  { %v356_v22 = vpop.permute.xlu1 %355  ;;  %v354_v23 = vpop.permute.xlu0 %353 }
 0x106   :  { %v362_v24 = vsel %vm361_vm1, %v354_v23, %v356_v22 }
 0x107   :  { %1323 = vmatprep.subr.bf16.mxu0 %v362_v24 }
 0x108   :  { %1324 = vmatpush3.bf16.msra.mxu0 %v362_v24 }
 0x109   :  { %v504_v27 = vpop.permute.xlu1 %503  ;;  %v502_v28 = vpop.permute.xlu0 %501 }
 0x10a   :  { %v507_v29 = vsel %vm505_vm2, %v502_v28, %v504_v27 }
 0x10b   :  { %1337 = vmatprep.subr.bf16.mxu0 %v507_v29  ;;  %1326 = vmatmul.mubr.msk.bf16.vlgmr.msra.gmra.mxu0 %vm366_vm0, %v1413_v25 }
 0x10c   :  { %1338 = vmatpush3.bf16.msra.mxu0 %v507_v29  ;;  %1341 = vmatprep.mubr.msk.bf16.mxu0 %vm366_vm0, %v1416_v26 }
 0x10d   :  { %v500_v30 = vpop.permute.xlu1 %499  ;;  %v498_v31 = vpop.permute.xlu0 %497 }
 0x10e   :  { %v506_v32 = vsel %vm505_vm2, %v498_v31, %v500_v30 }
 0x10f   :  { %1339 = vmatprep.subr.bf16.mxu0 %v506_v32 }
 0x110   :  { %1340 = vmatpush3.bf16.msra.mxu0 %v506_v32 }
 0x111   :  { %v586_v35 = vpop.permute.xlu1 %585  ;;  %v584_v36 = vpop.permute.xlu0 %583 }
 0x112   :  { %v589_v37 = vsel %vm587_vm3, %v584_v36, %v586_v35 }
 0x113   :  { %1345 = vmatprep.subr.bf16.mxu1 %v589_v37  ;;  %1342 = vmatmul.mubr.msk.bf16.vlgmr.msra.gmra.mxu0 %vm366_vm0, %v1417_v33 }
 0x114   :  { %1346 = vmatpush3.bf16.msra.mxu1 %v589_v37  ;;  %1357 = vmatprep.mubr.msk.bf16.mxu0 %vm366_vm0, %v1420_v34 }
 0x115   :  { %v668_v38 = vpop.permute.xlu1 %667  ;;  %v666_v39 = vpop.permute.xlu0 %665 }
 0x116   :  { %v671_v40 = vsel %vm669_vm4, %v666_v39, %v668_v38 }
 0x117   :  { %1353 = vmatprep.subr.bf16.mxu0 %v671_v40 }
 0x118   :  { %1354 = vmatpush3.bf16.msra.mxu0 %v671_v40 }
 0x119   :  { %v582_v41 = vpop.permute.xlu1 %581  ;;  %v580_v42 = vpop.permute.xlu0 %579 }
 0x11a   :  { %v588_v43 = vsel %vm587_vm3, %v580_v42, %v582_v41 }
 0x11b   :  { %1347 = vmatprep.subr.bf16.mxu1 %v588_v43 }
 0x11c   :  { %1348 = vmatpush3.bf16.msra.mxu1 %v588_v43 }
 0x11d   :  { %v664_v46 = vpop.permute.xlu1 %663  ;;  %v662_v47 = vpop.permute.xlu0 %661 }
 0x11e   :  { %v670_v48 = vsel %vm669_vm4, %v662_v47, %v664_v46 }
 0x11f   :  { %1355 = vmatprep.subr.bf16.mxu0 %v670_v48  ;;  %1350 = vmatmul.mubr.msk.bf16.vlgmr.msra.gmra.mxu1 %vm366_vm0, %v1419_v44 }
 0x120   :  { %1356 = vmatpush3.bf16.msra.mxu0 %v670_v48  ;;  %1365 = vmatprep.mubr.msk.bf16.mxu1 %vm366_vm0, %v1422_v45 }
 0x121   :  { %v750_v51 = vpop.permute.xlu1 %749  ;;  %v748_v52 = vpop.permute.xlu0 %747 }
 0x122   :  { %v753_v53 = vsel %vm751_vm5, %v748_v52, %v750_v51 }
 0x123   :  { %1361 = vmatprep.subr.bf16.mxu1 %v753_v53  ;;  %1358 = vmatmul.mubr.msk.bf16.vlgmr.msra.gmra.mxu0 %vm366_vm0, %v1421_v49 }
 0x124   :  { %1362 = vmatpush3.bf16.msra.mxu1 %v753_v53  ;;  %1373 = vmatprep.mubr.msk.bf16.mxu0 %vm366_vm0, %v1424_v50 }
 0x125   :  { %v832_v54 = vpop.permute.xlu1 %831  ;;  %v830_v55 = vpop.permute.xlu0 %829 }
 0x126   :  { %v835_v56 = vsel %vm833_vm6, %v830_v55, %v832_v54 }
 0x127   :  { %1369 = vmatprep.subr.bf16.mxu0 %v835_v56 }
 0x128   :  { %1370 = vmatpush3.bf16.msra.mxu0 %v835_v56 }
 0x129   :  { %v746_v57 = vpop.permute.xlu1 %745  ;;  %v744_v58 = vpop.permute.xlu0 %743 }
 0x12a   :  { %v752_v59 = vsel %vm751_vm5, %v744_v58, %v746_v57 }
 0x12b   :  { %1363 = vmatprep.subr.bf16.mxu1 %v752_v59 }
 0x12c   :  { %1364 = vmatpush3.bf16.msra.mxu1 %v752_v59 }
 0x12d   :  { %v828_v62 = vpop.permute.xlu1 %827  ;;  %v826_v63 = vpop.permute.xlu0 %825 }
 0x12e   :  { %v834_v0 = vsel %vm833_vm6, %v826_v63, %v828_v62 }
 0x12f   :  { %1366 = vmatmul.mubr.msk.bf16.vlgmr.msra.gmra.mxu1 %vm366_vm0, %v1423_v60  ;;  %1371 = vmatprep.subr.bf16.mxu0 %v834_v0 }
 0x130   :  { %1372 = vmatpush3.bf16.msra.mxu0 %v834_v0  ;;  %1381 = vmatprep.mubr.msk.bf16.mxu1 %vm366_vm0, %v1426_v61  ;;  %v1283_v0 = vld [vmem:[%s1739_s8 + $0x8] sm:$0xff]  }
 0x131   :  { %v914_v3 = vpop.permute.xlu1 %913  ;;  %v912_v4 = vpop.permute.xlu0 %911 }
 0x132   :  { %v917_v5 = vsel %vm915_vm7, %v912_v4, %v914_v3 }
 0x133   :  { %1374 = vmatmul.mubr.msk.bf16.vlgmr.msra.gmra.mxu0 %vm366_vm0, %v1425_v1  ;;  %1377 = vmatprep.subr.bf16.mxu1 %v917_v5 }
 0x134   :  { %1378 = vmatpush3.bf16.msra.mxu1 %v917_v5  ;;  %1389 = vmatprep.mubr.msk.bf16.mxu0 %vm366_vm0, %v1428_v2 }
 0x135   :  { %v996_v6 = vpop.permute.xlu1 %995  ;;  %v994_v7 = vpop.permute.xlu0 %993 }
 0x136   :  { %v999_v8 = vsel %vm997_vm8, %v994_v7, %v996_v6 }
 0x137   :  { %1385 = vmatprep.subr.bf16.mxu0 %v999_v8 }
 0x138   :  { %1386 = vmatpush3.bf16.msra.mxu0 %v999_v8  ;;  %v1266_v8 = vld [vmem:[%s1739_s8] sm:$0xff]  }
 0x139   :  { %v910_v9 = vpop.permute.xlu1 %909  ;;  %v908_v10 = vpop.permute.xlu0 %907 }
 0x13a   :  { %v916_v11 = vsel %vm915_vm7, %v908_v10, %v910_v9 }
 0x13b   :  { %1379 = vmatprep.subr.bf16.mxu1 %v916_v11 }
 0x13c   :  { %1380 = vmatpush3.bf16.msra.mxu1 %v916_v11  ;;  %v1271_v11 = vunpack.c.l.bf16 %v1283_v0 }
 0x13d   :  { %v992_v13 = vpop.permute.xlu1 %991  ;;  %v990_v14 = vpop.permute.xlu0 %989 }
 0x13e   :  { %v998_v15 = vsel %vm997_vm8, %v990_v14, %v992_v13 }
 0x13f   :  { %1382 = vmatmul.mubr.msk.bf16.vlgmr.msra.gmra.mxu1 %vm366_vm0, %v1427_v12  ;;  %1387 = vmatprep.subr.bf16.mxu0 %v998_v15 }
 0x140   :  { %1388 = vmatpush3.bf16.msra.mxu0 %v998_v15 }
 0x143   :  { %1390 = vmatmul.mubr.msk.bf16.vlgmr.msra.gmra.mxu0 %vm366_vm0, %v1429_v16 }
 0x14a   :  { %v1068_v56 = vpop.permute.xlu0 %1067  ;;  %v1073_v3 = vpop.permute.xlu1 %1072 }
 0x14e   :  { %v1078_v12 = vpop.permute.xlu0 %1077 }
 0x158   :  { %v1335_v21 = vpop.f32.mrf.mxu1 }
 0x15a   :  { %v472_v22 = vpop.f32.mrf.mxu1 }
 0x15c   :  { %v1336_v24 = vpop.f32.mrf.mxu1 }
 0x15e   :  { %v475_v26 = vpop.f32.mrf.mxu1 }
 0x1cb   :  { %v1327_v17 = vpop.f32.mrf.mxu0 }
 0x1cc   :  { %v481_v36 = vadd.f32 %v1335_v21, %v1327_v17 }
 0x1cd   :  { %v407_v18 = vpop.f32.mrf.mxu0 }
 0x1ce   :  { %v473_v38 = vadd.f32 %v472_v22, %v407_v18 }
 0x1cf   :  { %v1328_v19 = vpop.f32.mrf.mxu0 }
 0x1d0   :  { %v484_v41 = vadd.f32 %v1336_v24, %v1328_v19  ;;  %v1267_v19 = vunpack.c.l.bf16 %v1266_v8 }
 0x1d1   :  { %v410_v20 = vpop.f32.mrf.mxu0 }
 0x1d2   :  { %v476_v45 = vadd.f32 %v475_v26, %v410_v20  ;;  %v1260_v26 = vld [vmem:[%s1740_s9] ss:$0 sm:$0xff] }
 0x1d3   :  { %v1343_v23 = vpop.f32.mrf.mxu0 }
 0x1d4   :  { %v567_v40 = vadd.f32 %v1343_v23, %v481_v36 }
 0x1d5   :  { %v550_v25 = vpop.f32.mrf.mxu0 }
 0x1d6   :  { %v565_v44 = vadd.f32 %v550_v25, %v473_v38  ;;  %v1272_v25 = vunpack.c.h.bf16 %v1283_v0 }
 0x1d7   :  { %v1344_v27 = vpop.f32.mrf.mxu0 }
 0x1d8   :  { %v568_v46 = vadd.f32 %v1344_v27, %v484_v41 }
 0x1d9   :  { %v553_v28 = vpop.f32.mrf.mxu0 }
 0x1da   :  { %v566_v50 = vadd.f32 %v553_v28, %v476_v45 }
 0x1df   :  { %v1351_v29 = vpop.f32.mrf.mxu1 }
 0x1e0   :  { %v649_v47 = vadd.f32 %v1351_v29, %v567_v40 }
 0x1e1   :  { %v632_v30 = vpop.f32.mrf.mxu1 }
 0x1e2   :  { %v647_v51 = vadd.f32 %v632_v30, %v565_v44 }
 0x1e3   :  { %v1359_v31 = vpop.f32.mrf.mxu0  ;;  %v1352_v32 = vpop.f32.mrf.mxu1 }
 0x1e4   :  { %v731_v52 = vadd.f32 %v1359_v31, %v649_v47  ;;  %v650_v53 = vadd.f32 %v1352_v32, %v568_v46  ;;  %v1083_v31 = vpop.permute.xlu1 %1082 }
 0x1e5   :  { %v714_v33 = vpop.f32.mrf.mxu0  ;;  %v635_v34 = vpop.f32.mrf.mxu1 }
 0x1e6   :  { %v729_v57 = vadd.f32 %v714_v33, %v647_v51  ;;  %v648_v58 = vadd.f32 %v635_v34, %v566_v50  ;;  %v1268_v33 = vunpack.c.h.bf16 %v1266_v8 }
 0x1e7   :  { %v1360_v35 = vpop.f32.mrf.mxu0 }
 0x1e8   :  { %v732_v61 = vadd.f32 %v1360_v35, %v650_v53 }
 0x1e9   :  { %v717_v39 = vpop.f32.mrf.mxu0 }
 0x1ea   :  { %v730_v4 = vadd.f32 %v717_v39, %v648_v58 }
 0x1ef   :  { %v1367_v37 = vpop.f32.mrf.mxu1 }
 0x1f0   :  { %v813_v59 = vadd.f32 %v1367_v37, %v731_v52 }
 0x1f1   :  { %v796_v42 = vpop.f32.mrf.mxu1 }
 0x1f2   :  { %v811_v62 = vadd.f32 %v796_v42, %v729_v57 }
 0x1f3   :  { %v1375_v43 = vpop.f32.mrf.mxu0  ;;  %v1368_v48 = vpop.f32.mrf.mxu1 }
 0x1f4   :  { %v895_v63 = vadd.f32 %v1375_v43, %v813_v59  ;;  %v814_v5 = vadd.f32 %v1368_v48, %v732_v61 }
 0x1f5   :  { %v878_v49 = vpop.f32.mrf.mxu0  ;;  %v799_v54 = vpop.f32.mrf.mxu1 }
 0x1f6   :  { %v893_v6 = vadd.f32 %v878_v49, %v811_v62  ;;  %v812_v13 = vadd.f32 %v799_v54, %v730_v4 }
 0x1f7   :  { %v1376_v55 = vpop.f32.mrf.mxu0 }
 0x1f8   :  { %v896_v14 = vadd.f32 %v1376_v55, %v814_v5 }
 0x1f9   :  { %v881_v1 = vpop.f32.mrf.mxu0 }
 0x1fa   :  { %v894_v20 = vadd.f32 %v881_v1, %v812_v13 }
 0x1ff   :  { %v1383_v60 = vpop.f32.mrf.mxu1 }
 0x200   :  { %v977_v7 = vadd.f32 %v1383_v60, %v895_v63 }
 0x201   :  { %v960_v2 = vpop.f32.mrf.mxu1 }
 0x202   :  { %v975_v15 = vadd.f32 %v960_v2, %v893_v6 }
 0x203   :  { %v1384_v9 = vpop.f32.mrf.mxu1  ;;  %v1391_v10 = vpop.f32.mrf.mxu0 }
 0x204   :  { %v1059_v16 = vadd.f32 %v1391_v10, %v977_v7  ;;  %v978_v21 = vadd.f32 %v1384_v9, %v896_v14 }
 0x205   :  { %v963_v17 = vpop.f32.mrf.mxu1  ;;  %v1042_v18 = vpop.f32.mrf.mxu0 }
 0x206   :  { %v1087_v22 = vadd.f32 %v1078_v12, %v1059_v16  ;;  %v1057_v23 = vadd.f32 %v1042_v18, %v975_v15  ;;  %v976_v28 = vadd.f32 %v963_v17, %v894_v20 }
 0x207   :  { %v1392_v24 = vpop.f32.mrf.mxu0 }
 0x208   :  { %v1099_v27 = vadd.f32 %v1271_v11, %v1087_v22  ;;  %v1085_v29 = vadd.f32 %v1068_v56, %v1057_v23  ;;  %v1060_v30 = vadd.f32 %v1392_v24, %v978_v21 }
 0x209   :  { %v1045_v32 = vpop.f32.mrf.mxu0 }
 0x20a   :  { %v1097_v34 = vadd.f32 %v1267_v19, %v1085_v29  ;;  %v1088_v35 = vadd.f32 %v1083_v31, %v1060_v30  ;;  %v1058_v36 = vadd.f32 %v1045_v32, %v976_v28  ;;  %v1130_v37 = vmul.f32 %v1260_v26, %v1099_v27 }
 0x20c   :  { %v1100_v38 = vadd.f32 %v1272_v25, %v1088_v35  ;;  %v1086_v39 = vadd.f32 %v1073_v3, %v1058_v36  ;;  %1136 = vadd.xlane.f32.xlu0 %v1130_v37  ;;  %v1128_v40 = vmul.f32 %v1260_v26, %v1097_v34  ;;  %v1147_v48 = vmul.f32 %v1130_v37, %v1099_v27 }
 0x20e   :  { %v1281_v41 = vpack.c.bf16 %v1100_v38, %v1099_v27  ;;  %v1098_v42 = vadd.f32 %v1268_v33, %v1086_v39  ;;  %v1145_v43 = vmul.f32 %v1128_v40, %v1097_v34  ;;  %v1131_v45 = vmul.f32 %v1260_v26, %v1100_v38 }
 0x210   :  { %1284 = vst [vmem:[%s1741_s10 + $0x8] sm:$0xff] %v1281_v41   ;;  %v1276_v44 = vpack.c.bf16 %v1098_v42, %v1097_v34  ;;  %1132 = vadd.xlane.f32.xlu0 %v1128_v40  ;;  %1149 = vadd.xlane.f32.xlu1 %v1145_v43  ;;  %v1129_v46 = vmul.f32 %v1260_v26, %v1098_v42 }
 0x211   :  { %v1148_v49 = vmul.f32 %v1131_v45, %v1100_v38 }
 0x212   :  { %1277 = vst [vmem:[%s1741_s10] sm:$0xff] %v1276_v44   ;;  %v1146_v47 = vmul.f32 %v1129_v46, %v1098_v42  ;;  %s1430_s10 = scalar_lea.vmem %s1169_s25, 512 }
 0x213   :  { %p1431_p0 = scmp.ne.s32.totalorder %s1169_s25, %s1430_s10  ;;  %p1436_p2 = scmp.lt.s32.totalorder %s1430_s10, %s1430_s10 }
 0x214   :  { %1138 = vadd.xlane.f32.xlu0 %v1131_v45  ;;  %1134 = vadd.xlane.f32.xlu1 %v1129_v46 }
 0x215   :  { %p1437_p3 = por %p1436_p2, %p1435_p1 }
 0x217   :  { %p1438_p4 = pnand %p1437_p3, %p1431_p0 }
 0x218   :  { %1151 = vadd.xlane.f32.xlu0 %v1146_v47  ;;  %1153 = vadd.xlane.f32.xlu1 %v1147_v48 }
 0x21c   :  { %1155 = vadd.xlane.f32.xlu0 %v1148_v49 }
 0x295   :  { %v1137_v50 = vpop.xlane.xlu0 %1136 }
 0x296   :  { %1143 = vst.msk [vmem:[#allocation4 + $0x10] sm:$0xff] %vm1140_vm9, %v1137_v50 }
 0x299   :  { %v1133_v51 = vpop.xlane.xlu0 %1132  ;;  %v1150_v52 = vpop.xlane.xlu1 %1149 }
 0x29a   :  { %1141 = vst.msk [vmem:[#allocation4] sm:$0xff] %vm1140_vm9, %v1133_v51  ;;  %1157 = vst.msk [vmem:[#allocation6] sm:$0xff] %vm1140_vm9, %v1150_v52 }
 0x29d   :  { %v1139_v53 = vpop.xlane.xlu0 %1138  ;;  %v1135_v54 = vpop.xlane.xlu1 %1134 }
 0x29e   :  { %1144 = vst.msk [vmem:[#allocation4 + $0x18] sm:$0xff] %vm1140_vm9, %v1139_v53  ;;  %1142 = vst.msk [vmem:[#allocation4 + $0x8] sm:$0xff] %vm1140_vm9, %v1135_v54 }
 0x29f   :  { %1441 = shalt.err (!%p1438_p4)
}
 0x2a0   :  { %s1484_s26 = smov 128   ;;  %s1485_s27 = smov 8  }
 0x2a1   :  { %1174 = dma.vmem_to_hbm [thread:$0]  %s1169_s25, 512, %s1742_s11, [#allocation5], %s1484_s26, %s1484_s26, %s1485_s27   ;;  %v1152_v55 = vpop.xlane.xlu0 %1151  ;;  %v1154_v56 = vpop.xlane.xlu1 %1153 }
 0x2a2   :  { %s1486_s30 = smov [#allocation6]   ;;  %1158 = vst.msk [vmem:[#allocation6 + $0x8] sm:$0xff] %vm1140_vm9, %v1152_v55  ;;  %1159 = vst.msk [vmem:[#allocation6 + $0x10] sm:$0xff] %vm1140_vm9, %v1154_v56 }
 0x2a3   :  { %s1180_s2 = sshll.u32 %s1486_s30, 4  ;;  %s1181_s2 = int_to_ptr.vmem [resolvable:$true] %s1180_s2 }
 0x2a4   :  { %s1450_s13 = scalar_lea.vmem %s1181_s2, 512  ;;  %p1455_p6 = scmp.lt.s32.totalorder %s1181_s2, %s1181_s2 }
 0x2a5   :  { %v1156_v57 = vpop.xlane.xlu0 %1155  ;;  %p1451_p5 = scmp.ne.s32.totalorder %s1181_s2, %s1450_s13  ;;  %p1456_p7 = scmp.lt.s32.totalorder %s1450_s13, %s1450_s13 }
 0x2a6   :  { %1160 = vst.msk [vmem:[#allocation6 + $0x18] sm:$0xff] %vm1140_vm9, %v1156_v57 }
 0x2a7   :  { %p1457_p8 = por %p1456_p7, %p1455_p6 }
 0x2a9   :  { %p1458_p9 = pnand %p1457_p8, %p1451_p5 }
 0x2ab   :  { %1461 = shalt.err (!%p1458_p9)
}
 0x2ac   :  { %1186 = dma.vmem_to_hbm [thread:$0]  %s1181_s2, 512, %s1743_s12, [#allocation7], %s1484_s26, %s1484_s26, %s1485_s27  }
 0x2ad   :  { %1470 = dma.done.wait [#allocation5], 512  }
 0x2ae   :  { %1471 = vsyncadd [#allocation5], 4294966784 }
 0x2af   :  { %1472 = dma.done.wait [#allocation7], 512  }
 0x2b0   :  { %1473 = vsyncadd [#allocation7], 4294966784 }
 0x2b1   :  { %1195 = vsyncpa [#allocation5], 1 }
 0x2b2   :  { %1196 = vsyncpa [#allocation7], 1 }

// kernel: generator_forward.20
= control target key start
LH: loop header
LB: loop body
LE: loop exit
PB: predicated region body
PF: predicated region fallthrough
CT: control target
= control target key end

     0   :  { %v1376_v2 = vmov 0   ;;  %vm361_vm0 = vcmask 261120   ;;  %s1377_s30 = smov 127   ;;  %s1378_s16 = smov 126   ;;  %vm356_vm1 = vcmask 1039360   ;;  %vm500_vm2 = vcmask 1031168   ;;  %s1636_s0 = inlined_call_operand.vmem [shape: bf16[32,256], index: 0, kind: input, shape index: {}, may-alias: {0,1}]   ;;  %s1637_s1 = inlined_call_operand.vmem [shape: bf16[32,256], index: 1, kind: input, shape index: {}, may-alias: {0,1}]   ;;  %s1638_s2 = inlined_call_operand.vmem [shape: f32[32,1], index: 2, kind: input, shape index: {}]   ;;  %s1639_s3 = inlined_call_operand.vmem [shape: f32[32,1], index: 3, kind: input, shape index: {}]   ;;  %s1640_s4 = inlined_call_operand.vmem [shape: f32[1,256], index: 4, kind: input, shape index: {}, may-alias: {4,5}]   ;;  %s1641_s5 = inlined_call_operand.vmem [shape: f32[1,256], index: 5, kind: input, shape index: {}, may-alias: {4,5}]   ;;  %s1642_s6 = inlined_call_operand.vmem [shape: bf16[9,32,32], index: 6, kind: input, shape index: {}]   ;;  %s1643_s7 = inlined_call_operand.vmem [shape: f32[32,1], index: 7, kind: input, shape index: {}]   ;;  %s1644_s8 = inlined_call_operand.vmem [shape: f32[1,128], index: 8, kind: input, shape index: {}]   ;;  %s1645_s9 = inlined_call_operand.vmem [shape: bf16[32,128], index: 9, kind: output, shape index: {0}]   ;;  %s1646_s10 = inlined_call_operand.vmem [shape: f32[1,32,1], index: 10, kind: output, shape index: {1}]   ;;  %s1647_s11 = inlined_call_operand.vmem [shape: f32[1,32,1], index: 11, kind: output, shape index: {2}]  }
   0x1   :  { %v238_v0 = vld [vmem:[%s1639_s3 + $0x10] sm:$0xff]  ;;  %1353 = vset.pattern.permute.xlu1 %v1376_v2  ;;  %1352 = vset.pattern.permute.xlu0 %v1376_v2  ;;  %v239_v3 = vld [vmem:[%s1639_s3 + $0x18] sm:$0xff]  ;;  %v35_v9 = vld [vmem:[%s1636_s0] sm:$0xf]  ;;  %s1379_s17 = smov 122   ;;  %s1380_s20 = smov 121  }
   0x2   :  { %v206_v1 = vld [vmem:[%s1638_s2 + $0x10] sm:$0xff]  ;;  %252 = vperm.xlu1 %1353, %v238_v0   ;;  %v207_v4 = vld [vmem:[%s1638_s2 + $0x18] sm:$0xff]  ;;  %v205_v10 = vld [vmem:[%s1638_s2 + $0x8] sm:$0xff]  ;;  %36 = vst [vmem:[#allocation2] sm:$0xf] %v35_v9  ;;  %s1381_s21 = smov 120  }
   0x3   :  { %220 = vperm.xlu0 %1352, %v206_v1   ;;  %v39_v5 = vld [vmem:[%s1636_s0 + $0x10] sm:$0xf]  ;;  %v41_v6 = vld [vmem:[%s1636_s0 + $0x18] sm:$0xf]  ;;  %v1170_v7 = vld [vmem:[%s1637_s1 + $0x14] sm:$0xf] }
   0x4   :  { %40 = vst [vmem:[#allocation2 + $0x8] sm:$0xf] %v39_v5  ;;  %42 = vst [vmem:[#allocation2 + $0xc] sm:$0xf] %v41_v6  ;;  %v1171_v8 = vld [vmem:[%s1637_s1 + $0x1c] sm:$0xf] }
   0x5   :  { %v204_v11 = vld [vmem:[%s1638_s2] sm:$0xff]  ;;  %98 = vst [vmem:[#allocation3 + $0x8] sm:$0xf] %v1170_v7  ;;  %100 = vst [vmem:[#allocation3 + $0xc] sm:$0xf] %v1171_v8  ;;  %v237_v15 = vld [vmem:[%s1639_s3 + $0x8] sm:$0xff] }
   0x6   :  { %v37_v12 = vld [vmem:[%s1636_s0 + $0x8] sm:$0xf]  ;;  %v1168_v13 = vld [vmem:[%s1637_s1 + $0x4] sm:$0xf]  ;;  %v1169_v14 = vld [vmem:[%s1637_s1 + $0xc] sm:$0xf]  ;;  %257 = vperm.xlu1 %1353, %v239_v3  }
   0x7   :  { %225 = vperm.xlu0 %1352, %v207_v4   ;;  %38 = vst [vmem:[#allocation2 + $0x4] sm:$0xf] %v37_v12  ;;  %94 = vst [vmem:[#allocation3] sm:$0xf] %v1168_v13  ;;  %v236_v16 = vld [vmem:[%s1639_s3] sm:$0xff]  ;;  %v1358_v59 = vld [vmem:[%s1642_s6 + $0x10] sm:$0xff]  }
   0x8   :  { %96 = vst [vmem:[#allocation3 + $0x4] sm:$0xf] %v1169_v14  ;;  %v1177_v37 = vld [vmem:[%s1640_s4] ss:$0 sm:$0xff]  ;;  %v1178_v38 = vld [vmem:[%s1641_s5 + $0x1] ss:$0 sm:$0xff]  ;;  %1275 = vmatprep.mubr.msk.bf16.mxu0 %vm361_vm0, %v1358_v59 }
   0x9   :  { %v1360_v12 = vld [vmem:[%s1642_s6] sm:$0xff]   ;;  %v1361_v13 = vld [vmem:[%s1642_s6 + $0x8] sm:$0xff]   ;;  %v1364_v14 = vld [vmem:[%s1642_s6 + $0x30] sm:$0xff]   ;;  %s1382_s22 = smov 116   ;;  %s1383_s23 = smov 115   ;;  %vm582_vm3 = vcmask 998400  }
   0xa   :  { %215 = vperm.xlu1 %1353, %v205_v10   ;;  %1283 = vmatprep.mubr.msk.bf16.mxu1 %vm361_vm0, %v1360_v12  ;;  %s1384_s24 = smov 114   ;;  %vm664_vm4 = vcmask 990208   ;;  %vm746_vm5 = vcmask 982016   ;;  %vm828_vm6 = vcmask 949248   ;;  %vm910_vm7 = vcmask 941056   ;;  %v1373_v12 = vld [vmem:[%s1642_s6 + $0x78] sm:$0xff]  }
   0xb   :  { %210 = vperm.xlu0 %1352, %v204_v11   ;;  %v1354_v17 = vld [vmem:[#allocation2 + $0x8] sm:$0xff]   ;;  %vm992_vm8 = vcmask 932864   ;;  %vm1123_vm9 = vcmask 7168  }
   0xc   :  { %v1355_v18 = vld [vmem:[#allocation3 + $0x8] sm:$0xff]   ;;  %v200_v19 = vunpack.c.l.bf16 %v1354_v17  ;;  %v202_v25 = vunpack.c.h.bf16 %v1354_v17 }
   0xd   :  { %v201_v20 = vunpack.c.l.bf16 %v1355_v18  ;;  %v203_v26 = vunpack.c.h.bf16 %v1355_v18  ;;  %v1059_v17 = vld [vmem:[%s1643_s7 + $0x18] sm:$0xff]  ;;  %v1058_v18 = vld [vmem:[%s1643_s7 + $0x10] sm:$0xff] }
   0xe   :  { %247 = vperm.xlu1 %1353, %v237_v15   ;;  %v1356_v29 = vld [vmem:[#allocation2] sm:$0xff]   ;;  %v1057_v15 = vld [vmem:[%s1643_s7 + $0x8] sm:$0xff] }
   0xf   :  { %242 = vperm.xlu0 %1352, %v236_v16   ;;  %v1357_v30 = vld [vmem:[#allocation3] sm:$0xff]   ;;  %v198_v41 = vunpack.c.h.bf16 %v1356_v29  ;;  %v196_v45 = vunpack.c.l.bf16 %v1356_v29  ;;  %v1056_v16 = vld [vmem:[%s1643_s7] sm:$0xff] }
  0x10   :  { %v199_v42 = vunpack.c.h.bf16 %v1357_v30  ;;  %v197_v46 = vunpack.c.l.bf16 %v1357_v30 }
  0x7d   :  { %v253_v21 = vpop.permute.xlu1 %252 }
  0x7e   :  { %v221_v22 = vpop.permute.xlu0 %220 }
  0x7f   :  { %v232_v23 = vmul.f32 %v221_v22, %v200_v19  ;;  %v233_v24 = vmul.f32 %v221_v22, %v201_v20 }
  0x81   :  { %v264_v27 = vadd.f32 %v253_v21, %v232_v23  ;;  %v265_v28 = vadd.f32 %v253_v21, %v233_v24  ;;  %v258_v31 = vpop.permute.xlu1 %257 }
  0x82   :  { %v226_v32 = vpop.permute.xlu0 %225 }
  0x83   :  { %v234_v33 = vmul.f32 %v226_v32, %v202_v25  ;;  %v235_v34 = vmul.f32 %v226_v32, %v203_v26  ;;  %v272_v35 = vmax.f32 %v264_v27, 0.0  ;;  %v273_v36 = vmax.f32 %v265_v28, 0.0  ;;  %v1359_v25 = vld [vmem:[%s1642_s6 + $0x18] sm:$0xff]   ;;  %v1362_v26 = vld [vmem:[%s1642_s6 + $0x20] sm:$0xff]  }
  0x85   :  { %v266_v39 = vadd.f32 %v258_v31, %v234_v33  ;;  %v267_v40 = vadd.f32 %v258_v31, %v235_v34  ;;  %v216_v43 = vpop.permute.xlu1 %215  ;;  %v290_v49 = vmul.f32 %v1177_v37, %v272_v35  ;;  %v291_v50 = vmul.f32 %v1178_v38, %v273_v36  ;;  %v1363_v33 = vld [vmem:[%s1642_s6 + $0x28] sm:$0xff]   ;;  %v1366_v34 = vld [vmem:[%s1642_s6 + $0x40] sm:$0xff]  }
  0x86   :  { %v211_v44 = vpop.permute.xlu0 %210  ;;  %v230_v53 = vmul.f32 %v216_v43, %v198_v41  ;;  %v231_v54 = vmul.f32 %v216_v43, %v199_v42 }
  0x87   :  { %v274_v47 = vmax.f32 %v266_v39, 0.0  ;;  %v275_v48 = vmax.f32 %v267_v40, 0.0  ;;  %v228_v55 = vmul.f32 %v211_v44, %v196_v45  ;;  %v229_v56 = vmul.f32 %v211_v44, %v197_v46  ;;  %v1365_v44 = vld [vmem:[%s1642_s6 + $0x38] sm:$0xff]   ;;  %v1368_v45 = vld [vmem:[%s1642_s6 + $0x50] sm:$0xff]  }
  0x89   :  { %v292_v51 = vmul.f32 %v1177_v37, %v274_v47  ;;  %v293_v52 = vmul.f32 %v1178_v38, %v275_v48  ;;  %v248_v57 = vpop.permute.xlu1 %247 }
  0x8a   :  { %v243_v58 = vpop.permute.xlu0 %242  ;;  %v262_v62 = vadd.f32 %v248_v57, %v230_v53  ;;  %v263_v63 = vadd.f32 %v248_v57, %v231_v54 }
  0x8b   :  { %v296_v60 = vpack.c.bf16 %v292_v51, %v290_v49  ;;  %v297_v61 = vpack.c.bf16 %v293_v52, %v291_v50  ;;  %v260_v0 = vadd.f32 %v243_v58, %v228_v55  ;;  %v261_v1 = vadd.f32 %v243_v58, %v229_v56  ;;  %v1367_v49 = vld [vmem:[%s1642_s6 + $0x48] sm:$0xff]   ;;  %v1370_v50 = vld [vmem:[%s1642_s6 + $0x60] sm:$0xff]  }
  0x8c   :  { %v270_v2 = vmax.f32 %v262_v62, 0.0  ;;  %v271_v3 = vmax.f32 %v263_v63, 0.0 }
  0x8d   :  { %354 = vrot.lane.b32.xlu1 %v297_v61, %s1377_s30  ;;  %352 = vrot.lane.b32.xlu0 %v296_v60, %s1377_s30  ;;  %v268_v4 = vmax.f32 %v260_v0, 0.0  ;;  %v269_v5 = vmax.f32 %v261_v1, 0.0  ;;  %v1371_v1 = vld [vmem:[%s1642_s6 + $0x68] sm:$0xff]  }
  0x8e   :  { %1279 = vmatprep.subr.bf16.mxu1 %v296_v60  ;;  %v288_v6 = vmul.f32 %v1177_v37, %v270_v2  ;;  %v289_v7 = vmul.f32 %v1178_v38, %v271_v3  ;;  %v1374_v2 = vld [vmem:[%s1642_s6 + $0x80] sm:$0xff]  }
  0x8f   :  { %1280 = vmatpush3.bf16.msra.mxu1 %v296_v60  ;;  %v286_v8 = vmul.f32 %v1177_v37, %v268_v4  ;;  %v287_v9 = vmul.f32 %v1178_v38, %v269_v5 }
  0x91   :  { %v294_v10 = vpack.c.bf16 %v288_v6, %v286_v8  ;;  %v295_v11 = vpack.c.bf16 %v289_v7, %v287_v9 }
  0x93   :  { %350 = vrot.lane.b32.xlu1 %v295_v11, %s1377_s30  ;;  %348 = vrot.lane.b32.xlu0 %v294_v10, %s1377_s30 }
  0x94   :  { %1281 = vmatprep.subr.bf16.mxu1 %v294_v10 }
  0x95   :  { %1282 = vmatpush3.bf16.msra.mxu1 %v294_v10 }
  0x97   :  { %498 = vrot.lane.b32.xlu1 %v297_v61, %s1378_s16  ;;  %496 = vrot.lane.b32.xlu0 %v296_v60, %s1378_s16 }
  0x98   :  { %1284 = vmatmul.mubr.msk.bf16.vlgmr.msra.gmra.mxu1 %vm361_vm0, %v1361_v13 }
  0x99   :  { %1299 = vmatprep.mubr.msk.bf16.mxu1 %vm361_vm0, %v1364_v14 }
  0x9b   :  { %494 = vrot.lane.b32.xlu1 %v295_v11, %s1378_s16  ;;  %492 = vrot.lane.b32.xlu0 %v294_v10, %s1378_s16 }
  0x9f   :  { %580 = vrot.lane.b32.xlu1 %v297_v61, %s1379_s17  ;;  %578 = vrot.lane.b32.xlu0 %v296_v60, %s1379_s17 }
  0xa3   :  { %662 = vrot.lane.b32.xlu1 %v297_v61, %s1380_s20  ;;  %660 = vrot.lane.b32.xlu0 %v296_v60, %s1380_s20 }
  0xa7   :  { %576 = vrot.lane.b32.xlu1 %v295_v11, %s1379_s17  ;;  %574 = vrot.lane.b32.xlu0 %v294_v10, %s1379_s17 }
  0xab   :  { %658 = vrot.lane.b32.xlu1 %v295_v11, %s1380_s20  ;;  %656 = vrot.lane.b32.xlu0 %v294_v10, %s1380_s20 }
  0xaf   :  { %744 = vrot.lane.b32.xlu1 %v297_v61, %s1381_s21  ;;  %742 = vrot.lane.b32.xlu0 %v296_v60, %s1381_s21 }
  0xb3   :  { %826 = vrot.lane.b32.xlu1 %v297_v61, %s1382_s22  ;;  %824 = vrot.lane.b32.xlu0 %v296_v60, %s1382_s22 }
  0xb7   :  { %740 = vrot.lane.b32.xlu1 %v295_v11, %s1381_s21  ;;  %738 = vrot.lane.b32.xlu0 %v294_v10, %s1381_s21 }
  0xbb   :  { %822 = vrot.lane.b32.xlu1 %v295_v11, %s1382_s22  ;;  %820 = vrot.lane.b32.xlu0 %v294_v10, %s1382_s22 }
  0xbf   :  { %908 = vrot.lane.b32.xlu1 %v297_v61, %s1383_s23  ;;  %906 = vrot.lane.b32.xlu0 %v296_v60, %s1383_s23 }
  0xc3   :  { %990 = vrot.lane.b32.xlu1 %v297_v61, %s1384_s24  ;;  %988 = vrot.lane.b32.xlu0 %v296_v60, %s1384_s24  ;;  %v1369_v60 = vld [vmem:[%s1642_s6 + $0x58] sm:$0xff]   ;;  %v1372_v61 = vld [vmem:[%s1642_s6 + $0x70] sm:$0xff]  }
  0xc7   :  { %904 = vrot.lane.b32.xlu1 %v295_v11, %s1383_s23  ;;  %902 = vrot.lane.b32.xlu0 %v294_v10, %s1383_s23 }
  0xcb   :  { %986 = vrot.lane.b32.xlu1 %v295_v11, %s1384_s24  ;;  %984 = vrot.lane.b32.xlu0 %v294_v10, %s1384_s24 }
  0xcf   :  { %1067 = vperm.xlu1 %1353, %v1057_v15   ;;  %1062 = vperm.xlu0 %1352, %v1056_v16   ;;  %v1375_v16 = vld [vmem:[%s1642_s6 + $0x88] sm:$0xff]  }
  0xd3   :  { %1077 = vperm.xlu1 %1353, %v1059_v17   ;;  %1072 = vperm.xlu0 %1352, %v1058_v18  }
  0xff   :  { %v355_v19 = vpop.permute.xlu1 %354  ;;  %v353_v20 = vpop.permute.xlu0 %352 }
 0x100   :  { %v358_v21 = vsel %vm356_vm1, %v353_v20, %v355_v19 }
 0x101   :  { %1271 = vmatprep.subr.bf16.mxu0 %v358_v21 }
 0x102   :  { %1272 = vmatpush3.bf16.msra.mxu0 %v358_v21 }
 0x105   :  { %v351_v22 = vpop.permute.xlu1 %350  ;;  %v349_v23 = vpop.permute.xlu0 %348 }
 0x106   :  { %v357_v24 = vsel %vm356_vm1, %v349_v23, %v351_v22 }
 0x107   :  { %1273 = vmatprep.subr.bf16.mxu0 %v357_v24 }
 0x108   :  { %1274 = vmatpush3.bf16.msra.mxu0 %v357_v24 }
 0x109   :  { %v499_v27 = vpop.permute.xlu1 %498  ;;  %v497_v28 = vpop.permute.xlu0 %496 }
 0x10a   :  { %v502_v29 = vsel %vm500_vm2, %v497_v28, %v499_v27 }
 0x10b   :  { %1287 = vmatprep.subr.bf16.mxu0 %v502_v29  ;;  %1276 = vmatmul.mubr.msk.bf16.vlgmr.msra.gmra.mxu0 %vm361_vm0, %v1359_v25 }
 0x10c   :  { %1288 = vmatpush3.bf16.msra.mxu0 %v502_v29  ;;  %1291 = vmatprep.mubr.msk.bf16.mxu0 %vm361_vm0, %v1362_v26 }
 0x10d   :  { %v495_v30 = vpop.permute.xlu1 %494  ;;  %v493_v31 = vpop.permute.xlu0 %492 }
 0x10e   :  { %v501_v32 = vsel %vm500_vm2, %v493_v31, %v495_v30 }
 0x10f   :  { %1289 = vmatprep.subr.bf16.mxu0 %v501_v32 }
 0x110   :  { %1290 = vmatpush3.bf16.msra.mxu0 %v501_v32 }
 0x111   :  { %v581_v35 = vpop.permute.xlu1 %580  ;;  %v579_v36 = vpop.permute.xlu0 %578 }
 0x112   :  { %v584_v37 = vsel %vm582_vm3, %v579_v36, %v581_v35 }
 0x113   :  { %1295 = vmatprep.subr.bf16.mxu1 %v584_v37  ;;  %1292 = vmatmul.mubr.msk.bf16.vlgmr.msra.gmra.mxu0 %vm361_vm0, %v1363_v33 }
 0x114   :  { %1296 = vmatpush3.bf16.msra.mxu1 %v584_v37  ;;  %1307 = vmatprep.mubr.msk.bf16.mxu0 %vm361_vm0, %v1366_v34 }
 0x115   :  { %v663_v38 = vpop.permute.xlu1 %662  ;;  %v661_v39 = vpop.permute.xlu0 %660 }
 0x116   :  { %v666_v40 = vsel %vm664_vm4, %v661_v39, %v663_v38 }
 0x117   :  { %1303 = vmatprep.subr.bf16.mxu0 %v666_v40 }
 0x118   :  { %1304 = vmatpush3.bf16.msra.mxu0 %v666_v40 }
 0x119   :  { %v577_v41 = vpop.permute.xlu1 %576  ;;  %v575_v42 = vpop.permute.xlu0 %574 }
 0x11a   :  { %v583_v43 = vsel %vm582_vm3, %v575_v42, %v577_v41 }
 0x11b   :  { %1297 = vmatprep.subr.bf16.mxu1 %v583_v43 }
 0x11c   :  { %1298 = vmatpush3.bf16.msra.mxu1 %v583_v43 }
 0x11d   :  { %v659_v46 = vpop.permute.xlu1 %658  ;;  %v657_v47 = vpop.permute.xlu0 %656 }
 0x11e   :  { %v665_v48 = vsel %vm664_vm4, %v657_v47, %v659_v46 }
 0x11f   :  { %1305 = vmatprep.subr.bf16.mxu0 %v665_v48  ;;  %1300 = vmatmul.mubr.msk.bf16.vlgmr.msra.gmra.mxu1 %vm361_vm0, %v1365_v44 }
 0x120   :  { %1306 = vmatpush3.bf16.msra.mxu0 %v665_v48  ;;  %1315 = vmatprep.mubr.msk.bf16.mxu1 %vm361_vm0, %v1368_v45 }
 0x121   :  { %v745_v51 = vpop.permute.xlu1 %744  ;;  %v743_v52 = vpop.permute.xlu0 %742 }
 0x122   :  { %v748_v53 = vsel %vm746_vm5, %v743_v52, %v745_v51 }
 0x123   :  { %1311 = vmatprep.subr.bf16.mxu1 %v748_v53  ;;  %1308 = vmatmul.mubr.msk.bf16.vlgmr.msra.gmra.mxu0 %vm361_vm0, %v1367_v49 }
 0x124   :  { %1312 = vmatpush3.bf16.msra.mxu1 %v748_v53  ;;  %1323 = vmatprep.mubr.msk.bf16.mxu0 %vm361_vm0, %v1370_v50 }
 0x125   :  { %v827_v54 = vpop.permute.xlu1 %826  ;;  %v825_v55 = vpop.permute.xlu0 %824 }
 0x126   :  { %v830_v56 = vsel %vm828_vm6, %v825_v55, %v827_v54 }
 0x127   :  { %1319 = vmatprep.subr.bf16.mxu0 %v830_v56 }
 0x128   :  { %1320 = vmatpush3.bf16.msra.mxu0 %v830_v56 }
 0x129   :  { %v741_v57 = vpop.permute.xlu1 %740  ;;  %v739_v58 = vpop.permute.xlu0 %738 }
 0x12a   :  { %v747_v59 = vsel %vm746_vm5, %v739_v58, %v741_v57 }
 0x12b   :  { %1313 = vmatprep.subr.bf16.mxu1 %v747_v59 }
 0x12c   :  { %1314 = vmatpush3.bf16.msra.mxu1 %v747_v59 }
 0x12d   :  { %v823_v62 = vpop.permute.xlu1 %822  ;;  %v821_v63 = vpop.permute.xlu0 %820 }
 0x12e   :  { %v829_v0 = vsel %vm828_vm6, %v821_v63, %v823_v62 }
 0x12f   :  { %1316 = vmatmul.mubr.msk.bf16.vlgmr.msra.gmra.mxu1 %vm361_vm0, %v1369_v60  ;;  %1321 = vmatprep.subr.bf16.mxu0 %v829_v0 }
 0x130   :  { %1322 = vmatpush3.bf16.msra.mxu0 %v829_v0  ;;  %1331 = vmatprep.mubr.msk.bf16.mxu1 %vm361_vm0, %v1372_v61 }
 0x131   :  { %v909_v3 = vpop.permute.xlu1 %908  ;;  %v907_v4 = vpop.permute.xlu0 %906 }
 0x132   :  { %v912_v5 = vsel %vm910_vm7, %v907_v4, %v909_v3 }
 0x133   :  { %1324 = vmatmul.mubr.msk.bf16.vlgmr.msra.gmra.mxu0 %vm361_vm0, %v1371_v1  ;;  %1327 = vmatprep.subr.bf16.mxu1 %v912_v5 }
 0x134   :  { %1328 = vmatpush3.bf16.msra.mxu1 %v912_v5  ;;  %1339 = vmatprep.mubr.msk.bf16.mxu0 %vm361_vm0, %v1374_v2 }
 0x135   :  { %v991_v6 = vpop.permute.xlu1 %990  ;;  %v989_v7 = vpop.permute.xlu0 %988 }
 0x136   :  { %v994_v8 = vsel %vm992_vm8, %v989_v7, %v991_v6 }
 0x137   :  { %1335 = vmatprep.subr.bf16.mxu0 %v994_v8 }
 0x138   :  { %1336 = vmatpush3.bf16.msra.mxu0 %v994_v8 }
 0x139   :  { %v905_v9 = vpop.permute.xlu1 %904  ;;  %v903_v10 = vpop.permute.xlu0 %902 }
 0x13a   :  { %v911_v11 = vsel %vm910_vm7, %v903_v10, %v905_v9 }
 0x13b   :  { %1329 = vmatprep.subr.bf16.mxu1 %v911_v11 }
 0x13c   :  { %1330 = vmatpush3.bf16.msra.mxu1 %v911_v11 }
 0x13d   :  { %v987_v13 = vpop.permute.xlu1 %986  ;;  %v985_v14 = vpop.permute.xlu0 %984 }
 0x13e   :  { %v993_v15 = vsel %vm992_vm8, %v985_v14, %v987_v13 }
 0x13f   :  { %1332 = vmatmul.mubr.msk.bf16.vlgmr.msra.gmra.mxu1 %vm361_vm0, %v1373_v12  ;;  %1337 = vmatprep.subr.bf16.mxu0 %v993_v15 }
 0x140   :  { %1338 = vmatpush3.bf16.msra.mxu0 %v993_v15 }
 0x143   :  { %1340 = vmatmul.mubr.msk.bf16.vlgmr.msra.gmra.mxu0 %vm361_vm0, %v1375_v16  ;;  %v1219_v16 = vld [vmem:[%s1644_s8] ss:$0 sm:$0xff] }
 0x14a   :  { %v1063_v56 = vpop.permute.xlu0 %1062  ;;  %v1068_v2 = vpop.permute.xlu1 %1067 }
 0x14e   :  { %v1073_v9 = vpop.permute.xlu0 %1072 }
 0x158   :  { %v1285_v21 = vpop.f32.mrf.mxu1 }
 0x15a   :  { %v467_v22 = vpop.f32.mrf.mxu1 }
 0x15c   :  { %v1286_v24 = vpop.f32.mrf.mxu1 }
 0x15e   :  { %v470_v26 = vpop.f32.mrf.mxu1 }
 0x1cb   :  { %v1277_v17 = vpop.f32.mrf.mxu0 }
 0x1cc   :  { %v476_v36 = vadd.f32 %v1285_v21, %v1277_v17 }
 0x1cd   :  { %v402_v18 = vpop.f32.mrf.mxu0 }
 0x1ce   :  { %v468_v38 = vadd.f32 %v467_v22, %v402_v18 }
 0x1cf   :  { %v1278_v19 = vpop.f32.mrf.mxu0 }
 0x1d0   :  { %v479_v41 = vadd.f32 %v1286_v24, %v1278_v19 }
 0x1d1   :  { %v405_v20 = vpop.f32.mrf.mxu0 }
 0x1d2   :  { %v471_v45 = vadd.f32 %v470_v26, %v405_v20  ;;  %v1078_v26 = vpop.permute.xlu1 %1077 }
 0x1d3   :  { %v1293_v23 = vpop.f32.mrf.mxu0 }
 0x1d4   :  { %v562_v40 = vadd.f32 %v1293_v23, %v476_v36 }
 0x1d5   :  { %v545_v25 = vpop.f32.mrf.mxu0 }
 0x1d6   :  { %v560_v44 = vadd.f32 %v545_v25, %v468_v38 }
 0x1d7   :  { %v1294_v27 = vpop.f32.mrf.mxu0 }
 0x1d8   :  { %v563_v46 = vadd.f32 %v1294_v27, %v479_v41 }
 0x1d9   :  { %v548_v28 = vpop.f32.mrf.mxu0 }
 0x1da   :  { %v561_v50 = vadd.f32 %v548_v28, %v471_v45 }
 0x1df   :  { %v1301_v29 = vpop.f32.mrf.mxu1 }
 0x1e0   :  { %v644_v47 = vadd.f32 %v1301_v29, %v562_v40 }
 0x1e1   :  { %v627_v30 = vpop.f32.mrf.mxu1 }
 0x1e2   :  { %v642_v51 = vadd.f32 %v627_v30, %v560_v44 }
 0x1e3   :  { %v1309_v31 = vpop.f32.mrf.mxu0  ;;  %v1302_v32 = vpop.f32.mrf.mxu1 }
 0x1e4   :  { %v726_v52 = vadd.f32 %v1309_v31, %v644_v47  ;;  %v645_v53 = vadd.f32 %v1302_v32, %v563_v46 }
 0x1e5   :  { %v709_v33 = vpop.f32.mrf.mxu0  ;;  %v630_v34 = vpop.f32.mrf.mxu1 }
 0x1e6   :  { %v724_v57 = vadd.f32 %v709_v33, %v642_v51  ;;  %v643_v58 = vadd.f32 %v630_v34, %v561_v50 }
 0x1e7   :  { %v1310_v35 = vpop.f32.mrf.mxu0 }
 0x1e8   :  { %v727_v61 = vadd.f32 %v1310_v35, %v645_v53 }
 0x1e9   :  { %v712_v39 = vpop.f32.mrf.mxu0 }
 0x1ea   :  { %v725_v3 = vadd.f32 %v712_v39, %v643_v58 }
 0x1ef   :  { %v1317_v37 = vpop.f32.mrf.mxu1 }
 0x1f0   :  { %v808_v59 = vadd.f32 %v1317_v37, %v726_v52 }
 0x1f1   :  { %v791_v42 = vpop.f32.mrf.mxu1 }
 0x1f2   :  { %v806_v62 = vadd.f32 %v791_v42, %v724_v57 }
 0x1f3   :  { %v1325_v43 = vpop.f32.mrf.mxu0  ;;  %v1318_v48 = vpop.f32.mrf.mxu1 }
 0x1f4   :  { %v890_v63 = vadd.f32 %v1325_v43, %v808_v59  ;;  %v809_v4 = vadd.f32 %v1318_v48, %v727_v61 }
 0x1f5   :  { %v873_v49 = vpop.f32.mrf.mxu0  ;;  %v794_v54 = vpop.f32.mrf.mxu1 }
 0x1f6   :  { %v888_v5 = vadd.f32 %v873_v49, %v806_v62  ;;  %v807_v10 = vadd.f32 %v794_v54, %v725_v3 }
 0x1f7   :  { %v1326_v55 = vpop.f32.mrf.mxu0 }
 0x1f8   :  { %v891_v11 = vadd.f32 %v1326_v55, %v809_v4 }
 0x1f9   :  { %v876_v0 = vpop.f32.mrf.mxu0 }
 0x1fa   :  { %v889_v17 = vadd.f32 %v876_v0, %v807_v10 }
 0x1ff   :  { %v1333_v60 = vpop.f32.mrf.mxu1 }
 0x200   :  { %v972_v6 = vadd.f32 %v1333_v60, %v890_v63 }
 0x201   :  { %v955_v1 = vpop.f32.mrf.mxu1 }
 0x202   :  { %v970_v12 = vadd.f32 %v955_v1, %v888_v5 }
 0x203   :  { %v1334_v7 = vpop.f32.mrf.mxu1  ;;  %v1341_v8 = vpop.f32.mrf.mxu0 }
 0x204   :  { %v1054_v13 = vadd.f32 %v1341_v8, %v972_v6  ;;  %v973_v18 = vadd.f32 %v1334_v7, %v891_v11 }
 0x205   :  { %v958_v14 = vpop.f32.mrf.mxu1  ;;  %v1037_v15 = vpop.f32.mrf.mxu0 }
 0x206   :  { %v1082_v19 = vadd.f32 %v1073_v9, %v1054_v13  ;;  %v1052_v20 = vadd.f32 %v1037_v15, %v970_v12  ;;  %v971_v22 = vadd.f32 %v958_v14, %v889_v17 }
 0x207   :  { %v1342_v21 = vpop.f32.mrf.mxu0 }
 0x208   :  { %v1080_v23 = vadd.f32 %v1063_v56, %v1052_v20  ;;  %v1055_v24 = vadd.f32 %v1342_v21, %v973_v18  ;;  %v1113_v25 = vmul.f32 %v1219_v16, %v1082_v19 }
 0x209   :  { %v1040_v27 = vpop.f32.mrf.mxu0 }
 0x20a   :  { %v1083_v28 = vadd.f32 %v1078_v26, %v1055_v24  ;;  %v1053_v29 = vadd.f32 %v1040_v27, %v971_v22  ;;  %1119 = vadd.xlane.f32.xlu0 %v1113_v25  ;;  %v1111_v30 = vmul.f32 %v1219_v16, %v1080_v23  ;;  %v1130_v38 = vmul.f32 %v1113_v25, %v1082_v19 }
 0x20c   :  { %v1232_v31 = vpack.c.bf16 %v1083_v28, %v1082_v19  ;;  %v1081_v32 = vadd.f32 %v1068_v2, %v1053_v29  ;;  %v1128_v33 = vmul.f32 %v1111_v30, %v1080_v23  ;;  %v1114_v35 = vmul.f32 %v1219_v16, %v1083_v28 }
 0x20e   :  { %1234 = vst [vmem:[%s1645_s9 + $0x8] sm:$0xff] %v1232_v31   ;;  %v1227_v34 = vpack.c.bf16 %v1081_v32, %v1080_v23  ;;  %1115 = vadd.xlane.f32.xlu0 %v1111_v30  ;;  %1132 = vadd.xlane.f32.xlu1 %v1128_v33  ;;  %v1112_v36 = vmul.f32 %v1219_v16, %v1081_v32 }
 0x20f   :  { %v1131_v39 = vmul.f32 %v1114_v35, %v1083_v28 }
 0x210   :  { %1228 = vst [vmem:[%s1645_s9] sm:$0xff] %v1227_v34   ;;  %v1129_v37 = vmul.f32 %v1112_v36, %v1081_v32 }
 0x212   :  { %1121 = vadd.xlane.f32.xlu0 %v1114_v35  ;;  %1117 = vadd.xlane.f32.xlu1 %v1112_v36 }
 0x216   :  { %1134 = vadd.xlane.f32.xlu0 %v1129_v37  ;;  %1136 = vadd.xlane.f32.xlu1 %v1130_v38 }
 0x21a   :  { %1138 = vadd.xlane.f32.xlu0 %v1131_v39 }
 0x293   :  { %v1120_v40 = vpop.xlane.xlu0 %1119 }
 0x294   :  { %1126 = vst.msk [vmem:[%s1646_s10 + $0x10] sm:$0xff] %vm1123_vm9, %v1120_v40 }
 0x297   :  { %v1116_v41 = vpop.xlane.xlu0 %1115  ;;  %v1133_v42 = vpop.xlane.xlu1 %1132 }
 0x298   :  { %1124 = vst.msk [vmem:[%s1646_s10] sm:$0xff] %vm1123_vm9, %v1116_v41  ;;  %1140 = vst.msk [vmem:[%s1647_s11] sm:$0xff] %vm1123_vm9, %v1133_v42 }
 0x29b   :  { %v1122_v43 = vpop.xlane.xlu0 %1121  ;;  %v1118_v44 = vpop.xlane.xlu1 %1117 }
 0x29c   :  { %1127 = vst.msk [vmem:[%s1646_s10 + $0x18] sm:$0xff] %vm1123_vm9, %v1122_v43  ;;  %1125 = vst.msk [vmem:[%s1646_s10 + $0x8] sm:$0xff] %vm1123_vm9, %v1118_v44 }
 0x29f   :  { %v1135_v45 = vpop.xlane.xlu0 %1134  ;;  %v1137_v46 = vpop.xlane.xlu1 %1136 }
 0x2a0   :  { %1141 = vst.msk [vmem:[%s1647_s11 + $0x8] sm:$0xff] %vm1123_vm9, %v1135_v45  ;;  %1142 = vst.msk [vmem:[%s1647_s11 + $0x10] sm:$0xff] %vm1123_vm9, %v1137_v46 }
 0x2a3   :  { %v1139_v47 = vpop.xlane.xlu0 %1138 }
 0x2a4   :  { %1143 = vst.msk [vmem:[%s1647_s11 + $0x18] sm:$0xff] %vm1123_vm9, %v1139_v47 }

// kernel: generator_forward.21
= control target key start
LH: loop header
LB: loop body
LE: loop exit
PB: predicated region body
PF: predicated region fallthrough
CT: control target
= control target key end

     0   :  { %v1400_v2 = vmov 0   ;;  %vm364_vm0 = vcmask 261120   ;;  %s1401_s17 = smov 127   ;;  %s1402_s22 = smov 126   ;;  %vm359_vm1 = vcmask 1039360   ;;  %vm503_vm2 = vcmask 1031168   ;;  %s1671_s0 = inlined_call_operand.vmem [shape: bf16[32,256], index: 0, kind: input, shape index: {}, may-alias: {0,1}]   ;;  %s1672_s1 = inlined_call_operand.vmem [shape: bf16[32,256], index: 1, kind: input, shape index: {}, may-alias: {0,1}]   ;;  %s1673_s2 = inlined_call_operand.vmem [shape: f32[32,1], index: 2, kind: input, shape index: {}]   ;;  %s1674_s3 = inlined_call_operand.vmem [shape: f32[32,1], index: 3, kind: input, shape index: {}]   ;;  %s1675_s4 = inlined_call_operand.vmem [shape: f32[1,256], index: 4, kind: input, shape index: {}, may-alias: {4,5}]   ;;  %s1676_s5 = inlined_call_operand.vmem [shape: f32[1,256], index: 5, kind: input, shape index: {}, may-alias: {4,5}]   ;;  %s1677_s6 = inlined_call_operand.vmem [shape: bf16[9,32,32], index: 6, kind: input, shape index: {}]   ;;  %s1678_s7 = inlined_call_operand.vmem [shape: f32[32,1], index: 7, kind: input, shape index: {}]   ;;  %s1679_s8 = inlined_call_operand.vmem [shape: bf16[32,128], index: 8, kind: input, shape index: {}]   ;;  %s1680_s9 = inlined_call_operand.vmem [shape: f32[1,128], index: 9, kind: input, shape index: {}]   ;;  %s1681_s10 = inlined_call_operand.vmem [shape: bf16[32,128], index: 10, kind: output, shape index: {0}]   ;;  %s1682_s11 = inlined_call_operand.vmem [shape: f32[1,32,1], index: 11, kind: output, shape index: {1}]   ;;  %s1683_s12 = inlined_call_operand.vmem [shape: f32[1,32,1], index: 12, kind: output, shape index: {2}]  }
   0x1   :  { %v241_v0 = vld [vmem:[%s1674_s3 + $0x10] sm:$0xff]  ;;  %1377 = vset.pattern.permute.xlu1 %v1400_v2  ;;  %1376 = vset.pattern.permute.xlu0 %v1400_v2  ;;  %v242_v3 = vld [vmem:[%s1674_s3 + $0x18] sm:$0xff]  ;;  %v36_v9 = vld [vmem:[%s1671_s0] sm:$0xf]  ;;  %s1403_s23 = smov 122   ;;  %s1404_s26 = smov 121  }
   0x2   :  { %v209_v1 = vld [vmem:[%s1673_s2 + $0x10] sm:$0xff]  ;;  %255 = vperm.xlu1 %1377, %v241_v0   ;;  %v210_v4 = vld [vmem:[%s1673_s2 + $0x18] sm:$0xff]  ;;  %v208_v10 = vld [vmem:[%s1673_s2 + $0x8] sm:$0xff]  ;;  %37 = vst [vmem:[#allocation2] sm:$0xf] %v36_v9  ;;  %s1405_s27 = smov 120  }
   0x3   :  { %223 = vperm.xlu0 %1376, %v209_v1   ;;  %v40_v5 = vld [vmem:[%s1671_s0 + $0x10] sm:$0xf]  ;;  %v42_v6 = vld [vmem:[%s1671_s0 + $0x18] sm:$0xf]  ;;  %v1185_v7 = vld [vmem:[%s1672_s1 + $0x14] sm:$0xf] }
   0x4   :  { %41 = vst [vmem:[#allocation2 + $0x8] sm:$0xf] %v40_v5  ;;  %43 = vst [vmem:[#allocation2 + $0xc] sm:$0xf] %v42_v6  ;;  %v1186_v8 = vld [vmem:[%s1672_s1 + $0x1c] sm:$0xf] }
   0x5   :  { %v207_v11 = vld [vmem:[%s1673_s2] sm:$0xff]  ;;  %99 = vst [vmem:[#allocation3 + $0x8] sm:$0xf] %v1185_v7  ;;  %101 = vst [vmem:[#allocation3 + $0xc] sm:$0xf] %v1186_v8  ;;  %v240_v15 = vld [vmem:[%s1674_s3 + $0x8] sm:$0xff] }
   0x6   :  { %v38_v12 = vld [vmem:[%s1671_s0 + $0x8] sm:$0xf]  ;;  %v1183_v13 = vld [vmem:[%s1672_s1 + $0x4] sm:$0xf]  ;;  %v1184_v14 = vld [vmem:[%s1672_s1 + $0xc] sm:$0xf]  ;;  %260 = vperm.xlu1 %1377, %v242_v3  }
   0x7   :  { %228 = vperm.xlu0 %1376, %v210_v4   ;;  %39 = vst [vmem:[#allocation2 + $0x4] sm:$0xf] %v38_v12  ;;  %95 = vst [vmem:[#allocation3] sm:$0xf] %v1183_v13  ;;  %v239_v16 = vld [vmem:[%s1674_s3] sm:$0xff]  ;;  %v1382_v59 = vld [vmem:[%s1677_s6 + $0x10] sm:$0xff]  }
   0x8   :  { %97 = vst [vmem:[#allocation3 + $0x4] sm:$0xf] %v1184_v14  ;;  %v1192_v37 = vld [vmem:[%s1675_s4] ss:$0 sm:$0xff]  ;;  %v1193_v38 = vld [vmem:[%s1676_s5 + $0x1] ss:$0 sm:$0xff]  ;;  %1299 = vmatprep.mubr.msk.bf16.mxu0 %vm364_vm0, %v1382_v59 }
   0x9   :  { %v1384_v12 = vld [vmem:[%s1677_s6] sm:$0xff]   ;;  %v1385_v13 = vld [vmem:[%s1677_s6 + $0x8] sm:$0xff]   ;;  %v1388_v14 = vld [vmem:[%s1677_s6 + $0x30] sm:$0xff]   ;;  %s1406_s28 = smov 116   ;;  %s1407_s29 = smov 115   ;;  %vm585_vm3 = vcmask 998400  }
   0xa   :  { %218 = vperm.xlu1 %1377, %v208_v10   ;;  %1307 = vmatprep.mubr.msk.bf16.mxu1 %vm364_vm0, %v1384_v12  ;;  %s1408_s30 = smov 114   ;;  %vm667_vm4 = vcmask 990208   ;;  %vm749_vm5 = vcmask 982016   ;;  %vm831_vm6 = vcmask 949248   ;;  %vm913_vm7 = vcmask 941056   ;;  %v1397_v12 = vld [vmem:[%s1677_s6 + $0x78] sm:$0xff]  }
   0xb   :  { %213 = vperm.xlu0 %1376, %v207_v11   ;;  %v1378_v17 = vld [vmem:[#allocation2 + $0x8] sm:$0xff]   ;;  %vm995_vm8 = vcmask 932864   ;;  %vm1138_vm9 = vcmask 7168  }
   0xc   :  { %v1379_v18 = vld [vmem:[#allocation3 + $0x8] sm:$0xff]   ;;  %v203_v19 = vunpack.c.l.bf16 %v1378_v17  ;;  %v205_v25 = vunpack.c.h.bf16 %v1378_v17 }
   0xd   :  { %v204_v20 = vunpack.c.l.bf16 %v1379_v18  ;;  %v206_v26 = vunpack.c.h.bf16 %v1379_v18  ;;  %v1062_v17 = vld [vmem:[%s1678_s7 + $0x18] sm:$0xff]  ;;  %v1061_v18 = vld [vmem:[%s1678_s7 + $0x10] sm:$0xff] }
   0xe   :  { %250 = vperm.xlu1 %1377, %v240_v15   ;;  %v1380_v29 = vld [vmem:[#allocation2] sm:$0xff]   ;;  %v1060_v15 = vld [vmem:[%s1678_s7 + $0x8] sm:$0xff] }
   0xf   :  { %245 = vperm.xlu0 %1376, %v239_v16   ;;  %v1381_v30 = vld [vmem:[#allocation3] sm:$0xff]   ;;  %v201_v41 = vunpack.c.h.bf16 %v1380_v29  ;;  %v199_v45 = vunpack.c.l.bf16 %v1380_v29  ;;  %v1059_v16 = vld [vmem:[%s1678_s7] sm:$0xff] }
  0x10   :  { %v202_v42 = vunpack.c.h.bf16 %v1381_v30  ;;  %v200_v46 = vunpack.c.l.bf16 %v1381_v30 }
  0x7d   :  { %v256_v21 = vpop.permute.xlu1 %255 }
  0x7e   :  { %v224_v22 = vpop.permute.xlu0 %223 }
  0x7f   :  { %v235_v23 = vmul.f32 %v224_v22, %v203_v19  ;;  %v236_v24 = vmul.f32 %v224_v22, %v204_v20 }
  0x81   :  { %v267_v27 = vadd.f32 %v256_v21, %v235_v23  ;;  %v268_v28 = vadd.f32 %v256_v21, %v236_v24  ;;  %v261_v31 = vpop.permute.xlu1 %260 }
  0x82   :  { %v229_v32 = vpop.permute.xlu0 %228 }
  0x83   :  { %v237_v33 = vmul.f32 %v229_v32, %v205_v25  ;;  %v238_v34 = vmul.f32 %v229_v32, %v206_v26  ;;  %v275_v35 = vmax.f32 %v267_v27, 0.0  ;;  %v276_v36 = vmax.f32 %v268_v28, 0.0  ;;  %v1383_v25 = vld [vmem:[%s1677_s6 + $0x18] sm:$0xff]   ;;  %v1386_v26 = vld [vmem:[%s1677_s6 + $0x20] sm:$0xff]  }
  0x85   :  { %v269_v39 = vadd.f32 %v261_v31, %v237_v33  ;;  %v270_v40 = vadd.f32 %v261_v31, %v238_v34  ;;  %v219_v43 = vpop.permute.xlu1 %218  ;;  %v293_v49 = vmul.f32 %v1192_v37, %v275_v35  ;;  %v294_v50 = vmul.f32 %v1193_v38, %v276_v36  ;;  %v1387_v33 = vld [vmem:[%s1677_s6 + $0x28] sm:$0xff]   ;;  %v1390_v34 = vld [vmem:[%s1677_s6 + $0x40] sm:$0xff]  }
  0x86   :  { %v214_v44 = vpop.permute.xlu0 %213  ;;  %v233_v53 = vmul.f32 %v219_v43, %v201_v41  ;;  %v234_v54 = vmul.f32 %v219_v43, %v202_v42 }
  0x87   :  { %v277_v47 = vmax.f32 %v269_v39, 0.0  ;;  %v278_v48 = vmax.f32 %v270_v40, 0.0  ;;  %v231_v55 = vmul.f32 %v214_v44, %v199_v45  ;;  %v232_v56 = vmul.f32 %v214_v44, %v200_v46  ;;  %v1389_v44 = vld [vmem:[%s1677_s6 + $0x38] sm:$0xff]   ;;  %v1392_v45 = vld [vmem:[%s1677_s6 + $0x50] sm:$0xff]  }
  0x89   :  { %v295_v51 = vmul.f32 %v1192_v37, %v277_v47  ;;  %v296_v52 = vmul.f32 %v1193_v38, %v278_v48  ;;  %v251_v57 = vpop.permute.xlu1 %250 }
  0x8a   :  { %v246_v58 = vpop.permute.xlu0 %245  ;;  %v265_v62 = vadd.f32 %v251_v57, %v233_v53  ;;  %v266_v63 = vadd.f32 %v251_v57, %v234_v54 }
  0x8b   :  { %v299_v60 = vpack.c.bf16 %v295_v51, %v293_v49  ;;  %v300_v61 = vpack.c.bf16 %v296_v52, %v294_v50  ;;  %v263_v0 = vadd.f32 %v246_v58, %v231_v55  ;;  %v264_v1 = vadd.f32 %v246_v58, %v232_v56  ;;  %v1391_v49 = vld [vmem:[%s1677_s6 + $0x48] sm:$0xff]   ;;  %v1394_v50 = vld [vmem:[%s1677_s6 + $0x60] sm:$0xff]  }
  0x8c   :  { %v273_v2 = vmax.f32 %v265_v62, 0.0  ;;  %v274_v3 = vmax.f32 %v266_v63, 0.0 }
  0x8d   :  { %357 = vrot.lane.b32.xlu1 %v300_v61, %s1401_s17  ;;  %355 = vrot.lane.b32.xlu0 %v299_v60, %s1401_s17  ;;  %v271_v4 = vmax.f32 %v263_v0, 0.0  ;;  %v272_v5 = vmax.f32 %v264_v1, 0.0  ;;  %v1395_v1 = vld [vmem:[%s1677_s6 + $0x68] sm:$0xff]  }
  0x8e   :  { %1303 = vmatprep.subr.bf16.mxu1 %v299_v60  ;;  %v291_v6 = vmul.f32 %v1192_v37, %v273_v2  ;;  %v292_v7 = vmul.f32 %v1193_v38, %v274_v3  ;;  %v1398_v2 = vld [vmem:[%s1677_s6 + $0x80] sm:$0xff]  }
  0x8f   :  { %1304 = vmatpush3.bf16.msra.mxu1 %v299_v60  ;;  %v289_v8 = vmul.f32 %v1192_v37, %v271_v4  ;;  %v290_v9 = vmul.f32 %v1193_v38, %v272_v5 }
  0x91   :  { %v297_v10 = vpack.c.bf16 %v291_v6, %v289_v8  ;;  %v298_v11 = vpack.c.bf16 %v292_v7, %v290_v9 }
  0x93   :  { %353 = vrot.lane.b32.xlu1 %v298_v11, %s1401_s17  ;;  %351 = vrot.lane.b32.xlu0 %v297_v10, %s1401_s17 }
  0x94   :  { %1305 = vmatprep.subr.bf16.mxu1 %v297_v10 }
  0x95   :  { %1306 = vmatpush3.bf16.msra.mxu1 %v297_v10 }
  0x97   :  { %501 = vrot.lane.b32.xlu1 %v300_v61, %s1402_s22  ;;  %499 = vrot.lane.b32.xlu0 %v299_v60, %s1402_s22 }
  0x98   :  { %1308 = vmatmul.mubr.msk.bf16.vlgmr.msra.gmra.mxu1 %vm364_vm0, %v1385_v13 }
  0x99   :  { %1323 = vmatprep.mubr.msk.bf16.mxu1 %vm364_vm0, %v1388_v14 }
  0x9b   :  { %497 = vrot.lane.b32.xlu1 %v298_v11, %s1402_s22  ;;  %495 = vrot.lane.b32.xlu0 %v297_v10, %s1402_s22 }
  0x9f   :  { %583 = vrot.lane.b32.xlu1 %v300_v61, %s1403_s23  ;;  %581 = vrot.lane.b32.xlu0 %v299_v60, %s1403_s23 }
  0xa3   :  { %665 = vrot.lane.b32.xlu1 %v300_v61, %s1404_s26  ;;  %663 = vrot.lane.b32.xlu0 %v299_v60, %s1404_s26 }
  0xa7   :  { %579 = vrot.lane.b32.xlu1 %v298_v11, %s1403_s23  ;;  %577 = vrot.lane.b32.xlu0 %v297_v10, %s1403_s23 }
  0xab   :  { %661 = vrot.lane.b32.xlu1 %v298_v11, %s1404_s26  ;;  %659 = vrot.lane.b32.xlu0 %v297_v10, %s1404_s26 }
  0xaf   :  { %747 = vrot.lane.b32.xlu1 %v300_v61, %s1405_s27  ;;  %745 = vrot.lane.b32.xlu0 %v299_v60, %s1405_s27 }
  0xb3   :  { %829 = vrot.lane.b32.xlu1 %v300_v61, %s1406_s28  ;;  %827 = vrot.lane.b32.xlu0 %v299_v60, %s1406_s28 }
  0xb7   :  { %743 = vrot.lane.b32.xlu1 %v298_v11, %s1405_s27  ;;  %741 = vrot.lane.b32.xlu0 %v297_v10, %s1405_s27 }
  0xbb   :  { %825 = vrot.lane.b32.xlu1 %v298_v11, %s1406_s28  ;;  %823 = vrot.lane.b32.xlu0 %v297_v10, %s1406_s28 }
  0xbf   :  { %911 = vrot.lane.b32.xlu1 %v300_v61, %s1407_s29  ;;  %909 = vrot.lane.b32.xlu0 %v299_v60, %s1407_s29 }
  0xc3   :  { %993 = vrot.lane.b32.xlu1 %v300_v61, %s1408_s30  ;;  %991 = vrot.lane.b32.xlu0 %v299_v60, %s1408_s30  ;;  %v1393_v60 = vld [vmem:[%s1677_s6 + $0x58] sm:$0xff]   ;;  %v1396_v61 = vld [vmem:[%s1677_s6 + $0x70] sm:$0xff]  }
  0xc7   :  { %907 = vrot.lane.b32.xlu1 %v298_v11, %s1407_s29  ;;  %905 = vrot.lane.b32.xlu0 %v297_v10, %s1407_s29 }
  0xcb   :  { %989 = vrot.lane.b32.xlu1 %v298_v11, %s1408_s30  ;;  %987 = vrot.lane.b32.xlu0 %v297_v10, %s1408_s30 }
  0xcf   :  { %1070 = vperm.xlu1 %1377, %v1060_v15   ;;  %1065 = vperm.xlu0 %1376, %v1059_v16   ;;  %v1399_v16 = vld [vmem:[%s1677_s6 + $0x88] sm:$0xff]  }
  0xd3   :  { %1080 = vperm.xlu1 %1377, %v1062_v17   ;;  %1075 = vperm.xlu0 %1376, %v1061_v18  }
  0xff   :  { %v358_v19 = vpop.permute.xlu1 %357  ;;  %v356_v20 = vpop.permute.xlu0 %355 }
 0x100   :  { %v361_v21 = vsel %vm359_vm1, %v356_v20, %v358_v19 }
 0x101   :  { %1295 = vmatprep.subr.bf16.mxu0 %v361_v21 }
 0x102   :  { %1296 = vmatpush3.bf16.msra.mxu0 %v361_v21 }
 0x105   :  { %v354_v22 = vpop.permute.xlu1 %353  ;;  %v352_v23 = vpop.permute.xlu0 %351 }
 0x106   :  { %v360_v24 = vsel %vm359_vm1, %v352_v23, %v354_v22 }
 0x107   :  { %1297 = vmatprep.subr.bf16.mxu0 %v360_v24 }
 0x108   :  { %1298 = vmatpush3.bf16.msra.mxu0 %v360_v24 }
 0x109   :  { %v502_v27 = vpop.permute.xlu1 %501  ;;  %v500_v28 = vpop.permute.xlu0 %499 }
 0x10a   :  { %v505_v29 = vsel %vm503_vm2, %v500_v28, %v502_v27 }
 0x10b   :  { %1311 = vmatprep.subr.bf16.mxu0 %v505_v29  ;;  %1300 = vmatmul.mubr.msk.bf16.vlgmr.msra.gmra.mxu0 %vm364_vm0, %v1383_v25 }
 0x10c   :  { %1312 = vmatpush3.bf16.msra.mxu0 %v505_v29  ;;  %1315 = vmatprep.mubr.msk.bf16.mxu0 %vm364_vm0, %v1386_v26 }
 0x10d   :  { %v498_v30 = vpop.permute.xlu1 %497  ;;  %v496_v31 = vpop.permute.xlu0 %495 }
 0x10e   :  { %v504_v32 = vsel %vm503_vm2, %v496_v31, %v498_v30 }
 0x10f   :  { %1313 = vmatprep.subr.bf16.mxu0 %v504_v32 }
 0x110   :  { %1314 = vmatpush3.bf16.msra.mxu0 %v504_v32 }
 0x111   :  { %v584_v35 = vpop.permute.xlu1 %583  ;;  %v582_v36 = vpop.permute.xlu0 %581 }
 0x112   :  { %v587_v37 = vsel %vm585_vm3, %v582_v36, %v584_v35 }
 0x113   :  { %1319 = vmatprep.subr.bf16.mxu1 %v587_v37  ;;  %1316 = vmatmul.mubr.msk.bf16.vlgmr.msra.gmra.mxu0 %vm364_vm0, %v1387_v33 }
 0x114   :  { %1320 = vmatpush3.bf16.msra.mxu1 %v587_v37  ;;  %1331 = vmatprep.mubr.msk.bf16.mxu0 %vm364_vm0, %v1390_v34 }
 0x115   :  { %v666_v38 = vpop.permute.xlu1 %665  ;;  %v664_v39 = vpop.permute.xlu0 %663 }
 0x116   :  { %v669_v40 = vsel %vm667_vm4, %v664_v39, %v666_v38 }
 0x117   :  { %1327 = vmatprep.subr.bf16.mxu0 %v669_v40 }
 0x118   :  { %1328 = vmatpush3.bf16.msra.mxu0 %v669_v40 }
 0x119   :  { %v580_v41 = vpop.permute.xlu1 %579  ;;  %v578_v42 = vpop.permute.xlu0 %577 }
 0x11a   :  { %v586_v43 = vsel %vm585_vm3, %v578_v42, %v580_v41 }
 0x11b   :  { %1321 = vmatprep.subr.bf16.mxu1 %v586_v43 }
 0x11c   :  { %1322 = vmatpush3.bf16.msra.mxu1 %v586_v43 }
 0x11d   :  { %v662_v46 = vpop.permute.xlu1 %661  ;;  %v660_v47 = vpop.permute.xlu0 %659 }
 0x11e   :  { %v668_v48 = vsel %vm667_vm4, %v660_v47, %v662_v46 }
 0x11f   :  { %1329 = vmatprep.subr.bf16.mxu0 %v668_v48  ;;  %1324 = vmatmul.mubr.msk.bf16.vlgmr.msra.gmra.mxu1 %vm364_vm0, %v1389_v44 }
 0x120   :  { %1330 = vmatpush3.bf16.msra.mxu0 %v668_v48  ;;  %1339 = vmatprep.mubr.msk.bf16.mxu1 %vm364_vm0, %v1392_v45 }
 0x121   :  { %v748_v51 = vpop.permute.xlu1 %747  ;;  %v746_v52 = vpop.permute.xlu0 %745 }
 0x122   :  { %v751_v53 = vsel %vm749_vm5, %v746_v52, %v748_v51 }
 0x123   :  { %1335 = vmatprep.subr.bf16.mxu1 %v751_v53  ;;  %1332 = vmatmul.mubr.msk.bf16.vlgmr.msra.gmra.mxu0 %vm364_vm0, %v1391_v49 }
 0x124   :  { %1336 = vmatpush3.bf16.msra.mxu1 %v751_v53  ;;  %1347 = vmatprep.mubr.msk.bf16.mxu0 %vm364_vm0, %v1394_v50 }
 0x125   :  { %v830_v54 = vpop.permute.xlu1 %829  ;;  %v828_v55 = vpop.permute.xlu0 %827 }
 0x126   :  { %v833_v56 = vsel %vm831_vm6, %v828_v55, %v830_v54 }
 0x127   :  { %1343 = vmatprep.subr.bf16.mxu0 %v833_v56 }
 0x128   :  { %1344 = vmatpush3.bf16.msra.mxu0 %v833_v56 }
 0x129   :  { %v744_v57 = vpop.permute.xlu1 %743  ;;  %v742_v58 = vpop.permute.xlu0 %741 }
 0x12a   :  { %v750_v59 = vsel %vm749_vm5, %v742_v58, %v744_v57 }
 0x12b   :  { %1337 = vmatprep.subr.bf16.mxu1 %v750_v59 }
 0x12c   :  { %1338 = vmatpush3.bf16.msra.mxu1 %v750_v59 }
 0x12d   :  { %v826_v62 = vpop.permute.xlu1 %825  ;;  %v824_v63 = vpop.permute.xlu0 %823 }
 0x12e   :  { %v832_v0 = vsel %vm831_vm6, %v824_v63, %v826_v62 }
 0x12f   :  { %1340 = vmatmul.mubr.msk.bf16.vlgmr.msra.gmra.mxu1 %vm364_vm0, %v1393_v60  ;;  %1345 = vmatprep.subr.bf16.mxu0 %v832_v0 }
 0x130   :  { %1346 = vmatpush3.bf16.msra.mxu0 %v832_v0  ;;  %1355 = vmatprep.mubr.msk.bf16.mxu1 %vm364_vm0, %v1396_v61  ;;  %v1257_v0 = vld [vmem:[%s1679_s8 + $0x8] sm:$0xff]  }
 0x131   :  { %v912_v3 = vpop.permute.xlu1 %911  ;;  %v910_v4 = vpop.permute.xlu0 %909 }
 0x132   :  { %v915_v5 = vsel %vm913_vm7, %v910_v4, %v912_v3 }
 0x133   :  { %1348 = vmatmul.mubr.msk.bf16.vlgmr.msra.gmra.mxu0 %vm364_vm0, %v1395_v1  ;;  %1351 = vmatprep.subr.bf16.mxu1 %v915_v5 }
 0x134   :  { %1352 = vmatpush3.bf16.msra.mxu1 %v915_v5  ;;  %1363 = vmatprep.mubr.msk.bf16.mxu0 %vm364_vm0, %v1398_v2 }
 0x135   :  { %v994_v6 = vpop.permute.xlu1 %993  ;;  %v992_v7 = vpop.permute.xlu0 %991 }
 0x136   :  { %v997_v8 = vsel %vm995_vm8, %v992_v7, %v994_v6 }
 0x137   :  { %1359 = vmatprep.subr.bf16.mxu0 %v997_v8 }
 0x138   :  { %1360 = vmatpush3.bf16.msra.mxu0 %v997_v8  ;;  %v1240_v8 = vld [vmem:[%s1679_s8] sm:$0xff]  }
 0x139   :  { %v908_v9 = vpop.permute.xlu1 %907  ;;  %v906_v10 = vpop.permute.xlu0 %905 }
 0x13a   :  { %v914_v11 = vsel %vm913_vm7, %v906_v10, %v908_v9 }
 0x13b   :  { %1353 = vmatprep.subr.bf16.mxu1 %v914_v11 }
 0x13c   :  { %1354 = vmatpush3.bf16.msra.mxu1 %v914_v11  ;;  %v1245_v11 = vunpack.c.l.bf16 %v1257_v0 }
 0x13d   :  { %v990_v13 = vpop.permute.xlu1 %989  ;;  %v988_v14 = vpop.permute.xlu0 %987 }
 0x13e   :  { %v996_v15 = vsel %vm995_vm8, %v988_v14, %v990_v13 }
 0x13f   :  { %1356 = vmatmul.mubr.msk.bf16.vlgmr.msra.gmra.mxu1 %vm364_vm0, %v1397_v12  ;;  %1361 = vmatprep.subr.bf16.mxu0 %v996_v15 }
 0x140   :  { %1362 = vmatpush3.bf16.msra.mxu0 %v996_v15 }
 0x143   :  { %1364 = vmatmul.mubr.msk.bf16.vlgmr.msra.gmra.mxu0 %vm364_vm0, %v1399_v16 }
 0x14a   :  { %v1066_v56 = vpop.permute.xlu0 %1065  ;;  %v1071_v3 = vpop.permute.xlu1 %1070 }
 0x14e   :  { %v1076_v12 = vpop.permute.xlu0 %1075 }
 0x158   :  { %v1309_v21 = vpop.f32.mrf.mxu1 }
 0x15a   :  { %v470_v22 = vpop.f32.mrf.mxu1 }
 0x15c   :  { %v1310_v24 = vpop.f32.mrf.mxu1 }
 0x15e   :  { %v473_v26 = vpop.f32.mrf.mxu1 }
 0x1cb   :  { %v1301_v17 = vpop.f32.mrf.mxu0 }
 0x1cc   :  { %v479_v36 = vadd.f32 %v1309_v21, %v1301_v17 }
 0x1cd   :  { %v405_v18 = vpop.f32.mrf.mxu0 }
 0x1ce   :  { %v471_v38 = vadd.f32 %v470_v22, %v405_v18 }
 0x1cf   :  { %v1302_v19 = vpop.f32.mrf.mxu0 }
 0x1d0   :  { %v482_v41 = vadd.f32 %v1310_v24, %v1302_v19  ;;  %v1241_v19 = vunpack.c.l.bf16 %v1240_v8 }
 0x1d1   :  { %v408_v20 = vpop.f32.mrf.mxu0 }
 0x1d2   :  { %v474_v45 = vadd.f32 %v473_v26, %v408_v20  ;;  %v1234_v26 = vld [vmem:[%s1680_s9] ss:$0 sm:$0xff] }
 0x1d3   :  { %v1317_v23 = vpop.f32.mrf.mxu0 }
 0x1d4   :  { %v565_v40 = vadd.f32 %v1317_v23, %v479_v36 }
 0x1d5   :  { %v548_v25 = vpop.f32.mrf.mxu0 }
 0x1d6   :  { %v563_v44 = vadd.f32 %v548_v25, %v471_v38  ;;  %v1246_v25 = vunpack.c.h.bf16 %v1257_v0 }
 0x1d7   :  { %v1318_v27 = vpop.f32.mrf.mxu0 }
 0x1d8   :  { %v566_v46 = vadd.f32 %v1318_v27, %v482_v41 }
 0x1d9   :  { %v551_v28 = vpop.f32.mrf.mxu0 }
 0x1da   :  { %v564_v50 = vadd.f32 %v551_v28, %v474_v45 }
 0x1df   :  { %v1325_v29 = vpop.f32.mrf.mxu1 }
 0x1e0   :  { %v647_v47 = vadd.f32 %v1325_v29, %v565_v40 }
 0x1e1   :  { %v630_v30 = vpop.f32.mrf.mxu1 }
 0x1e2   :  { %v645_v51 = vadd.f32 %v630_v30, %v563_v44 }
 0x1e3   :  { %v1333_v31 = vpop.f32.mrf.mxu0  ;;  %v1326_v32 = vpop.f32.mrf.mxu1 }
 0x1e4   :  { %v729_v52 = vadd.f32 %v1333_v31, %v647_v47  ;;  %v648_v53 = vadd.f32 %v1326_v32, %v566_v46  ;;  %v1081_v31 = vpop.permute.xlu1 %1080 }
 0x1e5   :  { %v712_v33 = vpop.f32.mrf.mxu0  ;;  %v633_v34 = vpop.f32.mrf.mxu1 }
 0x1e6   :  { %v727_v57 = vadd.f32 %v712_v33, %v645_v51  ;;  %v646_v58 = vadd.f32 %v633_v34, %v564_v50  ;;  %v1242_v33 = vunpack.c.h.bf16 %v1240_v8 }
 0x1e7   :  { %v1334_v35 = vpop.f32.mrf.mxu0 }
 0x1e8   :  { %v730_v61 = vadd.f32 %v1334_v35, %v648_v53 }
 0x1e9   :  { %v715_v39 = vpop.f32.mrf.mxu0 }
 0x1ea   :  { %v728_v4 = vadd.f32 %v715_v39, %v646_v58 }
 0x1ef   :  { %v1341_v37 = vpop.f32.mrf.mxu1 }
 0x1f0   :  { %v811_v59 = vadd.f32 %v1341_v37, %v729_v52 }
 0x1f1   :  { %v794_v42 = vpop.f32.mrf.mxu1 }
 0x1f2   :  { %v809_v62 = vadd.f32 %v794_v42, %v727_v57 }
 0x1f3   :  { %v1349_v43 = vpop.f32.mrf.mxu0  ;;  %v1342_v48 = vpop.f32.mrf.mxu1 }
 0x1f4   :  { %v893_v63 = vadd.f32 %v1349_v43, %v811_v59  ;;  %v812_v5 = vadd.f32 %v1342_v48, %v730_v61 }
 0x1f5   :  { %v876_v49 = vpop.f32.mrf.mxu0  ;;  %v797_v54 = vpop.f32.mrf.mxu1 }
 0x1f6   :  { %v891_v6 = vadd.f32 %v876_v49, %v809_v62  ;;  %v810_v13 = vadd.f32 %v797_v54, %v728_v4 }
 0x1f7   :  { %v1350_v55 = vpop.f32.mrf.mxu0 }
 0x1f8   :  { %v894_v14 = vadd.f32 %v1350_v55, %v812_v5 }
 0x1f9   :  { %v879_v1 = vpop.f32.mrf.mxu0 }
 0x1fa   :  { %v892_v20 = vadd.f32 %v879_v1, %v810_v13 }
 0x1ff   :  { %v1357_v60 = vpop.f32.mrf.mxu1 }
 0x200   :  { %v975_v7 = vadd.f32 %v1357_v60, %v893_v63 }
 0x201   :  { %v958_v2 = vpop.f32.mrf.mxu1 }
 0x202   :  { %v973_v15 = vadd.f32 %v958_v2, %v891_v6 }
 0x203   :  { %v1358_v9 = vpop.f32.mrf.mxu1  ;;  %v1365_v10 = vpop.f32.mrf.mxu0 }
 0x204   :  { %v1057_v16 = vadd.f32 %v1365_v10, %v975_v7  ;;  %v976_v21 = vadd.f32 %v1358_v9, %v894_v14 }
 0x205   :  { %v961_v17 = vpop.f32.mrf.mxu1  ;;  %v1040_v18 = vpop.f32.mrf.mxu0 }
 0x206   :  { %v1085_v22 = vadd.f32 %v1076_v12, %v1057_v16  ;;  %v1055_v23 = vadd.f32 %v1040_v18, %v973_v15  ;;  %v974_v28 = vadd.f32 %v961_v17, %v892_v20 }
 0x207   :  { %v1366_v24 = vpop.f32.mrf.mxu0 }
 0x208   :  { %v1097_v27 = vadd.f32 %v1245_v11, %v1085_v22  ;;  %v1083_v29 = vadd.f32 %v1066_v56, %v1055_v23  ;;  %v1058_v30 = vadd.f32 %v1366_v24, %v976_v21 }
 0x209   :  { %v1043_v32 = vpop.f32.mrf.mxu0 }
 0x20a   :  { %v1095_v34 = vadd.f32 %v1241_v19, %v1083_v29  ;;  %v1086_v35 = vadd.f32 %v1081_v31, %v1058_v30  ;;  %v1056_v36 = vadd.f32 %v1043_v32, %v974_v28  ;;  %v1128_v37 = vmul.f32 %v1234_v26, %v1097_v27 }
 0x20c   :  { %v1098_v38 = vadd.f32 %v1246_v25, %v1086_v35  ;;  %v1084_v39 = vadd.f32 %v1071_v3, %v1056_v36  ;;  %1134 = vadd.xlane.f32.xlu0 %v1128_v37  ;;  %v1126_v40 = vmul.f32 %v1234_v26, %v1095_v34  ;;  %v1145_v48 = vmul.f32 %v1128_v37, %v1097_v27 }
 0x20e   :  { %v1255_v41 = vpack.c.bf16 %v1098_v38, %v1097_v27  ;;  %v1096_v42 = vadd.f32 %v1242_v33, %v1084_v39  ;;  %v1143_v43 = vmul.f32 %v1126_v40, %v1095_v34  ;;  %v1129_v45 = vmul.f32 %v1234_v26, %v1098_v38 }
 0x210   :  { %1258 = vst [vmem:[%s1681_s10 + $0x8] sm:$0xff] %v1255_v41   ;;  %v1250_v44 = vpack.c.bf16 %v1096_v42, %v1095_v34  ;;  %1130 = vadd.xlane.f32.xlu0 %v1126_v40  ;;  %1147 = vadd.xlane.f32.xlu1 %v1143_v43  ;;  %v1127_v46 = vmul.f32 %v1234_v26, %v1096_v42 }
 0x211   :  { %v1146_v49 = vmul.f32 %v1129_v45, %v1098_v38 }
 0x212   :  { %1251 = vst [vmem:[%s1681_s10] sm:$0xff] %v1250_v44   ;;  %v1144_v47 = vmul.f32 %v1127_v46, %v1096_v42 }
 0x214   :  { %1136 = vadd.xlane.f32.xlu0 %v1129_v45  ;;  %1132 = vadd.xlane.f32.xlu1 %v1127_v46 }
 0x218   :  { %1149 = vadd.xlane.f32.xlu0 %v1144_v47  ;;  %1151 = vadd.xlane.f32.xlu1 %v1145_v48 }
 0x21c   :  { %1153 = vadd.xlane.f32.xlu0 %v1146_v49 }
 0x295   :  { %v1135_v50 = vpop.xlane.xlu0 %1134 }
 0x296   :  { %1141 = vst.msk [vmem:[%s1682_s11 + $0x10] sm:$0xff] %vm1138_vm9, %v1135_v50 }
 0x299   :  { %v1131_v51 = vpop.xlane.xlu0 %1130  ;;  %v1148_v52 = vpop.xlane.xlu1 %1147 }
 0x29a   :  { %1139 = vst.msk [vmem:[%s1682_s11] sm:$0xff] %vm1138_vm9, %v1131_v51  ;;  %1155 = vst.msk [vmem:[%s1683_s12] sm:$0xff] %vm1138_vm9, %v1148_v52 }
 0x29d   :  { %v1137_v53 = vpop.xlane.xlu0 %1136  ;;  %v1133_v54 = vpop.xlane.xlu1 %1132 }
 0x29e   :  { %1142 = vst.msk [vmem:[%s1682_s11 + $0x18] sm:$0xff] %vm1138_vm9, %v1137_v53  ;;  %1140 = vst.msk [vmem:[%s1682_s11 + $0x8] sm:$0xff] %vm1138_vm9, %v1133_v54 }
 0x2a1   :  { %v1150_v55 = vpop.xlane.xlu0 %1149  ;;  %v1152_v56 = vpop.xlane.xlu1 %1151 }
 0x2a2   :  { %1156 = vst.msk [vmem:[%s1683_s12 + $0x8] sm:$0xff] %vm1138_vm9, %v1150_v55  ;;  %1157 = vst.msk [vmem:[%s1683_s12 + $0x10] sm:$0xff] %vm1138_vm9, %v1152_v56 }
 0x2a5   :  { %v1154_v57 = vpop.xlane.xlu0 %1153 }
 0x2a6   :  { %1158 = vst.msk [vmem:[%s1683_s12 + $0x18] sm:$0xff] %vm1138_vm9, %v1154_v57 }

// kernel: squeeze.95
= control target key start
LH: loop header
LB: loop body
LE: loop exit
PB: predicated region body
PF: predicated region fallthrough
CT: control target
= control target key end

     0   :  { %s40_s8 = smov 80   ;;  %vm8_vm0 = vcmask 130048   ;;  %s41_s9 = smov 96   ;;  %s58_s0 = inlined_call_operand.vmem [shape: f32[64], index: 0, kind: input, shape index: {}]   ;;  %s59_s1 = inlined_call_operand.vmem [shape: f32[4,16], index: 1, kind: output, shape index: {}]  }
   0x1   :  { %v5_v0 = vld [vmem:[%s58_s0] sm:$0x1]  ;;  %s39_s0 = smov 112  }
   0x2   :  { %6 = vst [vmem:[#allocation1] sm:$0x1] %v5_v0 }
   0x9   :  { %v10_v1 = vld [vmem:[#allocation1] sm:$0x1]  }
   0xa   :  { %v22_v2 = vld [vmem:[#allocation1] sm:$0x1]   ;;  %11 = vrot.lane.b32.xlu0 %v10_v1, %s39_s0 }
   0xb   :  { %23 = vrot.lane.b32.xlu1 %v22_v2, %s40_s8  ;;  %v7_v3 = vld [vmem:[#allocation1] sm:$0x1]  }
   0xc   :  { %v16_v4 = vld [vmem:[#allocation1] sm:$0x1]   ;;  %9 = vst.msk [vmem:[#allocation0] sm:$0x1] %vm8_vm0, %v7_v3  }
   0xe   :  { %17 = vrot.lane.b32.xlu0 %v16_v4, %s41_s9 }
  0x7c   :  { %v12_v5 = vpop.permute.xlu0 %11  }
  0x7d   :  { %v24_v6 = vpop.permute.xlu1 %23   ;;  %15 = vst.msk [vmem:[#allocation0 + $0x1] sm:$0x1] %vm8_vm0, %v12_v5  }
  0x7e   :  { %27 = vst.msk [vmem:[#allocation0 + $0x3] sm:$0x1] %vm8_vm0, %v24_v6  }
  0x80   :  { %v18_v7 = vpop.permute.xlu0 %17  }
  0x81   :  { %21 = vst.msk [vmem:[#allocation0 + $0x2] sm:$0x1] %vm8_vm0, %v18_v7  }
  0x88   :  { %v32_v8 = vld [vmem:[#allocation0] sm:$0xf] }
  0x89   :  { %35 = vst [vmem:[%s59_s1] sm:$0xf] %v32_v8 }

// kernel: squeeze.106
= control target key start
LH: loop header
LB: loop body
LE: loop exit
PB: predicated region body
PF: predicated region fallthrough
CT: control target
= control target key end

     0   :  { %s40_s8 = smov 104   ;;  %vm8_vm0 = vcmask 64512   ;;  %s41_s9 = smov 112   ;;  %s58_s0 = inlined_call_operand.vmem [shape: f32[32], index: 0, kind: input, shape index: {}]   ;;  %s59_s1 = inlined_call_operand.vmem [shape: f32[4,8], index: 1, kind: output, shape index: {}]  }
   0x1   :  { %v5_v0 = vld [vmem:[%s58_s0] sm:$0x1]  ;;  %s39_s0 = smov 120  }
   0x2   :  { %6 = vst [vmem:[#allocation1] sm:$0x1] %v5_v0 }
   0x9   :  { %v10_v1 = vld [vmem:[#allocation1] sm:$0x1]  }
   0xa   :  { %v22_v2 = vld [vmem:[#allocation1] sm:$0x1]   ;;  %11 = vrot.lane.b32.xlu0 %v10_v1, %s39_s0 }
   0xb   :  { %23 = vrot.lane.b32.xlu1 %v22_v2, %s40_s8  ;;  %v7_v3 = vld [vmem:[#allocation1] sm:$0x1]  }
   0xc   :  { %v16_v4 = vld [vmem:[#allocation1] sm:$0x1]   ;;  %9 = vst.msk [vmem:[#allocation0] sm:$0x1] %vm8_vm0, %v7_v3  }
   0xe   :  { %17 = vrot.lane.b32.xlu0 %v16_v4, %s41_s9 }
  0x7c   :  { %v12_v5 = vpop.permute.xlu0 %11  }
  0x7d   :  { %v24_v6 = vpop.permute.xlu1 %23   ;;  %15 = vst.msk [vmem:[#allocation0 + $0x1] sm:$0x1] %vm8_vm0, %v12_v5  }
  0x7e   :  { %27 = vst.msk [vmem:[#allocation0 + $0x3] sm:$0x1] %vm8_vm0, %v24_v6  }
  0x80   :  { %v18_v7 = vpop.permute.xlu0 %17  }
  0x81   :  { %21 = vst.msk [vmem:[#allocation0 + $0x2] sm:$0x1] %vm8_vm0, %v18_v7  }
  0x88   :  { %v32_v8 = vld [vmem:[#allocation0] sm:$0xf] }
  0x89   :  { %35 = vst [vmem:[%s59_s1] sm:$0xf] %v32_v8 }

// kernel: generator_forward.24
= control target key start
LH: loop header
LB: loop body
LE: loop exit
PB: predicated region body
PF: predicated region fallthrough
CT: control target
= control target key end

     0   :  { %vm230_vm0 = vcmask 261120   ;;  %s949_s14 = smov 127   ;;  %s950_s20 = smov 123   ;;  %vm225_vm1 = vcmask 1039360   ;;  %vm433_vm2 = vcmask 1006592   ;;  %vm551_vm3 = vcmask 998400   ;;  %s1168_s0 = inlined_call_operand.vmem [shape: bf16[32,256], index: 0, kind: input, shape index: {}, may-alias: {0,1}]   ;;  %s1169_s1 = inlined_call_operand.vmem [shape: bf16[32,256], index: 1, kind: input, shape index: {}, may-alias: {0,1}]   ;;  %s1170_s2 = inlined_call_operand.vmem [shape: bf16[4,64,32], index: 2, kind: input, shape index: {}]   ;;  %s1171_s3 = inlined_call_operand.vmem [shape: f32[1,128], index: 3, kind: input, shape index: {}]   ;;  %s1172_s4 = inlined_call_operand.vmem [shape: bf16[64,128], index: 4, kind: output, shape index: {0}]   ;;  %s1173_s5 = inlined_call_operand.vmem [shape: f32[1,64,1], index: 5, kind: output, shape index: {1}]   ;;  %s1174_s6 = inlined_call_operand.vmem [shape: f32[1,64,1], index: 6, kind: output, shape index: {2}]  }
   0x1   :  { %v34_v0 = vld [vmem:[%s1168_s0 + $0x10] sm:$0xf]  ;;  %v36_v1 = vld [vmem:[%s1168_s0 + $0x18] sm:$0xf]  ;;  %v30_v2 = vld [vmem:[%s1168_s0] sm:$0xf] }
   0x2   :  { %35 = vst [vmem:[#allocation2 + $0x8] sm:$0xf] %v34_v0  ;;  %37 = vst [vmem:[#allocation2 + $0xc] sm:$0xf] %v36_v1  ;;  %v32_v3 = vld [vmem:[%s1168_s0 + $0x8] sm:$0xf] }
   0x3   :  { %v776_v4 = vld [vmem:[%s1169_s1 + $0x14] sm:$0xf]  ;;  %31 = vst [vmem:[#allocation2] sm:$0xf] %v30_v2  ;;  %33 = vst [vmem:[#allocation2 + $0x4] sm:$0xf] %v32_v3 }
   0x4   :  { %93 = vst [vmem:[#allocation3 + $0x8] sm:$0xf] %v776_v4  ;;  %v777_v5 = vld [vmem:[%s1169_s1 + $0x1c] sm:$0xf]  ;;  %v774_v6 = vld [vmem:[%s1169_s1 + $0x4] sm:$0xf] }
   0x5   :  { %v775_v7 = vld [vmem:[%s1169_s1 + $0xc] sm:$0xf]  ;;  %95 = vst [vmem:[#allocation3 + $0xc] sm:$0xf] %v777_v5  ;;  %89 = vst [vmem:[#allocation3] sm:$0xf] %v774_v6 }
   0x6   :  { %91 = vst [vmem:[#allocation3 + $0x4] sm:$0xf] %v775_v7  ;;  %v933_v8 = vld [vmem:[%s1170_s2] sm:$0xff]   ;;  %v934_v13 = vld [vmem:[%s1170_s2 + $0x8] sm:$0xff]   ;;  %v937_v15 = vld [vmem:[%s1170_s2 + $0x10] sm:$0xff]   ;;  %s951_s21 = smov 122  }
   0x7   :  { %894 = vmatprep.mubr.msk.bf16.mxu1 %vm230_vm0, %v933_v8  ;;  %v935_v14 = vld [vmem:[%s1170_s2 + $0x20] sm:$0xff]   ;;  %v938_v16 = vld [vmem:[%s1170_s2 + $0x18] sm:$0xff]   ;;  %v936_v27 = vld [vmem:[%s1170_s2 + $0x28] sm:$0xff]   ;;  %vm712_vm4 = vcmask 7168  }
   0x8   :  { %882 = vmatprep.mubr.msk.bf16.mxu0 %vm230_vm0, %v935_v14  ;;  %v941_v17 = vld [vmem:[%s1170_s2 + $0x60] sm:$0xff]   ;;  %v939_v29 = vld [vmem:[%s1170_s2 + $0x30] sm:$0xff]   ;;  %v940_v35 = vld [vmem:[%s1170_s2 + $0x38] sm:$0xff]  }
   0x9   :  { %v929_v9 = vld [vmem:[#allocation2 + $0x8] sm:$0xff]   ;;  %v943_v36 = vld [vmem:[%s1170_s2 + $0x40] sm:$0xff]   ;;  %v947_v41 = vld [vmem:[%s1170_s2 + $0x70] sm:$0xff]  }
   0xa   :  { %v930_v10 = vld [vmem:[#allocation2] sm:$0xff]   ;;  %221 = vrot.lane.b32.xlu0 %v929_v9, %s949_s14  ;;  %890 = vmatprep.subr.bf16.mxu1 %v929_v9  ;;  %v942_v40 = vld [vmem:[%s1170_s2 + $0x68] sm:$0xff]   ;;  %v945_v43 = vld [vmem:[%s1170_s2 + $0x50] sm:$0xff]  }
   0xb   :  { %217 = vrot.lane.b32.xlu1 %v930_v10, %s949_s14  ;;  %891 = vmatpush3.bf16.msra.mxu1 %v929_v9  ;;  %v944_v42 = vld [vmem:[%s1170_s2 + $0x48] sm:$0xff]   ;;  %v948_v44 = vld [vmem:[%s1170_s2 + $0x78] sm:$0xff]   ;;  %v1082_v6 = vld [vmem:[%s1171_s3] ss:$0 sm:$0xff] }
   0xc   :  { %v931_v11 = vld [vmem:[#allocation3 + $0x8] sm:$0xff]   ;;  %892 = vmatprep.subr.bf16.mxu1 %v930_v10 }
   0xd   :  { %v932_v12 = vld [vmem:[#allocation3] sm:$0xff]   ;;  %v946_v45 = vld [vmem:[%s1170_s2 + $0x58] sm:$0xff]  }
   0xe   :  { %223 = vrot.lane.b32.xlu0 %v931_v11, %s949_s14 }
   0xf   :  { %219 = vrot.lane.b32.xlu1 %v932_v12, %s949_s14  ;;  %893 = vmatpush3.bf16.msra.mxu1 %v930_v10 }
  0x12   :  { %429 = vrot.lane.b32.xlu0 %v929_v9, %s950_s20  ;;  %895 = vmatmul.mubr.msk.bf16.vlgmr.msra.gmra.mxu1 %vm230_vm0, %v934_v13 }
  0x13   :  { %431 = vrot.lane.b32.xlu1 %v931_v11, %s950_s20  ;;  %898 = vmatprep.mubr.msk.bf16.mxu1 %vm230_vm0, %v937_v15 }
  0x16   :  { %547 = vrot.lane.b32.xlu0 %v929_v9, %s951_s21 }
  0x17   :  { %549 = vrot.lane.b32.xlu1 %v931_v11, %s951_s21 }
  0x1a   :  { %425 = vrot.lane.b32.xlu0 %v930_v10, %s950_s20  ;;  %899 = vmatmul.mubr.msk.bf16.gmra.mxu1 %vm230_vm0, %v938_v16 }
  0x1b   :  { %427 = vrot.lane.b32.xlu1 %v932_v12, %s950_s20  ;;  %918 = vmatprep.mubr.msk.bf16.mxu1 %vm230_vm0, %v941_v17 }
  0x1e   :  { %543 = vrot.lane.b32.xlu0 %v930_v10, %s951_s21 }
  0x1f   :  { %545 = vrot.lane.b32.xlu1 %v932_v12, %s951_s21 }
  0x7c   :  { %v222_v18 = vpop.permute.xlu0 %221 }
  0x7d   :  { %v218_v19 = vpop.permute.xlu1 %217 }
  0x80   :  { %v224_v20 = vpop.permute.xlu0 %223 }
  0x81   :  { %v220_v21 = vpop.permute.xlu1 %219  ;;  %v227_v22 = vsel %vm225_vm1, %v222_v18, %v224_v20 }
  0x82   :  { %878 = vmatprep.subr.bf16.mxu0 %v227_v22  ;;  %v226_v23 = vsel %vm225_vm1, %v218_v19, %v220_v21 }
  0x83   :  { %879 = vmatpush3.bf16.msra.mxu0 %v227_v22 }
  0x84   :  { %880 = vmatprep.subr.bf16.mxu0 %v226_v23  ;;  %v430_v24 = vpop.permute.xlu0 %429 }
  0x85   :  { %v432_v25 = vpop.permute.xlu1 %431 }
  0x86   :  { %v435_v26 = vsel %vm433_vm2, %v430_v24, %v432_v25 }
  0x87   :  { %881 = vmatpush3.bf16.msra.mxu0 %v226_v23 }
  0x88   :  { %902 = vmatprep.subr.bf16.mxu0 %v435_v26  ;;  %v548_v28 = vpop.permute.xlu0 %547 }
  0x89   :  { %v550_v30 = vpop.permute.xlu1 %549 }
  0x8a   :  { %883 = vmatmul.mubr.msk.bf16.vlgmr.msra.gmra.mxu0 %vm230_vm0, %v936_v27  ;;  %v553_v31 = vsel %vm551_vm3, %v548_v28, %v550_v30 }
  0x8b   :  { %903 = vmatpush3.bf16.msra.mxu0 %v435_v26  ;;  %914 = vmatprep.subr.bf16.mxu1 %v553_v31 }
  0x8c   :  { %915 = vmatpush3.bf16.msra.mxu1 %v553_v31  ;;  %v426_v32 = vpop.permute.xlu0 %425  ;;  %886 = vmatprep.mubr.msk.bf16.mxu0 %vm230_vm0, %v939_v29 }
  0x8d   :  { %v428_v33 = vpop.permute.xlu1 %427 }
  0x8e   :  { %v434_v34 = vsel %vm433_vm2, %v426_v32, %v428_v33 }
  0x8f   :  { %904 = vmatprep.subr.bf16.mxu0 %v434_v34 }
  0x90   :  { %905 = vmatpush3.bf16.msra.mxu0 %v434_v34  ;;  %v544_v37 = vpop.permute.xlu0 %543 }
  0x91   :  { %v546_v38 = vpop.permute.xlu1 %545 }
  0x92   :  { %887 = vmatmul.mubr.msk.bf16.gmra.mxu0 %vm230_vm0, %v940_v35  ;;  %v552_v39 = vsel %vm551_vm3, %v544_v37, %v546_v38 }
  0x93   :  { %916 = vmatprep.subr.bf16.mxu1 %v552_v39  ;;  %906 = vmatprep.mubr.msk.bf16.mxu0 %vm230_vm0, %v943_v36 }
  0x94   :  { %917 = vmatpush3.bf16.msra.mxu1 %v552_v39 }
  0x97   :  { %919 = vmatmul.mubr.msk.bf16.vlgmr.msra.gmra.mxu1 %vm230_vm0, %v942_v40 }
  0x98   :  { %922 = vmatprep.mubr.msk.bf16.mxu1 %vm230_vm0, %v947_v41 }
  0x9a   :  { %907 = vmatmul.mubr.msk.bf16.vlgmr.msra.gmra.mxu0 %vm230_vm0, %v944_v42 }
  0x9b   :  { %910 = vmatprep.mubr.msk.bf16.mxu0 %vm230_vm0, %v945_v43 }
  0x9f   :  { %923 = vmatmul.mubr.msk.bf16.gmra.mxu1 %vm230_vm0, %v948_v44 }
  0xa2   :  { %911 = vmatmul.mubr.msk.bf16.gmra.mxu0 %vm230_vm0, %v946_v45 }
  0xd2   :  { %v896_v46 = vpop.f32.mrf.mxu1 }
  0xd4   :  { %v374_v47 = vpop.f32.mrf.mxu1 }
  0xd6   :  { %v897_v48 = vpop.f32.mrf.mxu1 }
  0xd8   :  { %v377_v49 = vpop.f32.mrf.mxu1 }
  0xda   :  { %v900_v50 = vpop.f32.mrf.mxu1 }
  0xdc   :  { %v390_v52 = vpop.f32.mrf.mxu1 }
  0xde   :  { %v901_v55 = vpop.f32.mrf.mxu1 }
  0xe0   :  { %v393_v58 = vpop.f32.mrf.mxu1 }
 0x14a   :  { %v884_v51 = vpop.f32.mrf.mxu0 }
 0x14b   :  { %v383_v63 = vadd.f32 %v896_v46, %v884_v51 }
 0x14c   :  { %v277_v53 = vpop.f32.mrf.mxu0 }
 0x14d   :  { %v375_v2 = vadd.f32 %v374_v47, %v277_v53 }
 0x14e   :  { %v885_v54 = vpop.f32.mrf.mxu0 }
 0x14f   :  { %v386_v7 = vadd.f32 %v897_v48, %v885_v54 }
 0x150   :  { %v280_v56 = vpop.f32.mrf.mxu0 }
 0x151   :  { %v378_v12 = vadd.f32 %v377_v49, %v280_v56 }
 0x152   :  { %v888_v57 = vpop.f32.mrf.mxu0 }
 0x153   :  { %v399_v24 = vadd.f32 %v900_v50, %v888_v57 }
 0x154   :  { %v293_v59 = vpop.f32.mrf.mxu0 }
 0x155   :  { %v391_v27 = vadd.f32 %v390_v52, %v293_v59 }
 0x156   :  { %v889_v60 = vpop.f32.mrf.mxu0 }
 0x157   :  { %v920_v61 = vpop.f32.mrf.mxu1  ;;  %v402_v30 = vadd.f32 %v901_v55, %v889_v60 }
 0x158   :  { %v296_v62 = vpop.f32.mrf.mxu0 }
 0x159   :  { %v602_v0 = vpop.f32.mrf.mxu1  ;;  %v394_v35 = vadd.f32 %v393_v58, %v296_v62 }
 0x15a   :  { %v908_v1 = vpop.f32.mrf.mxu0 }
 0x15b   :  { %v517_v3 = vadd.f32 %v908_v1, %v383_v63  ;;  %v921_v4 = vpop.f32.mrf.mxu1 }
 0x15c   :  { %v484_v5 = vpop.f32.mrf.mxu0 }
 0x15d   :  { %v635_v8 = vadd.f32 %v920_v61, %v517_v3  ;;  %v515_v9 = vadd.f32 %v484_v5, %v375_v2  ;;  %v605_v10 = vpop.f32.mrf.mxu1 }
 0x15e   :  { %v909_v11 = vpop.f32.mrf.mxu0 }
 0x15f   :  { %v633_v13 = vadd.f32 %v602_v0, %v515_v9  ;;  %v518_v14 = vadd.f32 %v909_v11, %v386_v7  ;;  %v690_v15 = vmul.f32 %v1082_v6, %v635_v8  ;;  %v924_v16 = vpop.f32.mrf.mxu1 }
 0x160   :  { %v487_v17 = vpop.f32.mrf.mxu0 }
 0x161   :  { %v636_v18 = vadd.f32 %v921_v4, %v518_v14  ;;  %v516_v19 = vadd.f32 %v487_v17, %v378_v12  ;;  %700 = vadd.xlane.f32.xlu0 %v690_v15  ;;  %v723_v20 = vmul.f32 %v690_v15, %v635_v8  ;;  %v688_v21 = vmul.f32 %v1082_v6, %v633_v13  ;;  %v618_v22 = vpop.f32.mrf.mxu1 }
 0x162   :  { %v912_v23 = vpop.f32.mrf.mxu0 }
 0x163   :  { %v839_v25 = vpack.c.bf16 %v636_v18, %v635_v8  ;;  %v634_v26 = vadd.f32 %v605_v10, %v516_v19  ;;  %733 = vadd.xlane.f32.xlu1 %v723_v20  ;;  %v925_v29 = vpop.f32.mrf.mxu1  ;;  %v521_v32 = vadd.f32 %v912_v23, %v399_v24  ;;  %v721_v33 = vmul.f32 %v688_v21, %v633_v13 }
 0x164   :  { %v500_v28 = vpop.f32.mrf.mxu0  ;;  %v691_v38 = vmul.f32 %v1082_v6, %v636_v18 }
 0x165   :  { %851 = vst [vmem:[%s1172_s4 + $0x8] sm:$0xff] %v839_v25   ;;  %v834_v31 = vpack.c.bf16 %v634_v26, %v633_v13  ;;  %696 = vadd.xlane.f32.xlu0 %v688_v21  ;;  %v519_v36 = vadd.f32 %v500_v28, %v391_v27  ;;  %v621_v40 = vpop.f32.mrf.mxu1  ;;  %v639_v41 = vadd.f32 %v924_v16, %v521_v32 }
 0x166   :  { %v913_v34 = vpop.f32.mrf.mxu0  ;;  %v689_v44 = vmul.f32 %v1082_v6, %v634_v26  ;;  %v724_v48 = vmul.f32 %v691_v38, %v636_v18 }
 0x167   :  { %835 = vst [vmem:[%s1172_s4] sm:$0xff] %v834_v31   ;;  %v522_v37 = vadd.f32 %v913_v34, %v402_v30  ;;  %729 = vadd.xlane.f32.xlu1 %v721_v33  ;;  %v637_v45 = vadd.f32 %v618_v22, %v519_v36  ;;  %v694_v50 = vmul.f32 %v1082_v6, %v639_v41 }
 0x168   :  { %v503_v39 = vpop.f32.mrf.mxu0  ;;  %v722_v51 = vmul.f32 %v689_v44, %v634_v26 }
 0x169   :  { %v520_v42 = vadd.f32 %v503_v39, %v394_v35  ;;  %v640_v43 = vadd.f32 %v925_v29, %v522_v37  ;;  %702 = vadd.xlane.f32.xlu0 %v691_v38  ;;  %v692_v52 = vmul.f32 %v1082_v6, %v637_v45  ;;  %v727_v56 = vmul.f32 %v694_v50, %v639_v41 }
 0x16b   :  { %v849_v46 = vpack.c.bf16 %v640_v43, %v639_v41  ;;  %v638_v47 = vadd.f32 %v621_v40, %v520_v42  ;;  %698 = vadd.xlane.f32.xlu1 %v689_v44  ;;  %v695_v53 = vmul.f32 %v1082_v6, %v640_v43  ;;  %v725_v54 = vmul.f32 %v692_v52, %v637_v45 }
 0x16d   :  { %853 = vst [vmem:[%s1172_s4 + $0x18] sm:$0xff] %v849_v46   ;;  %v844_v49 = vpack.c.bf16 %v638_v47, %v637_v45  ;;  %735 = vadd.xlane.f32.xlu0 %v724_v48  ;;  %v693_v55 = vmul.f32 %v1082_v6, %v638_v47  ;;  %v728_v58 = vmul.f32 %v695_v53, %v640_v43 }
 0x16f   :  { %852 = vst [vmem:[%s1172_s4 + $0x10] sm:$0xff] %v844_v49   ;;  %708 = vadd.xlane.f32.xlu1 %v694_v50  ;;  %v726_v57 = vmul.f32 %v693_v55, %v638_v47 }
 0x171   :  { %731 = vadd.xlane.f32.xlu0 %v722_v51 }
 0x173   :  { %704 = vadd.xlane.f32.xlu1 %v692_v52 }
 0x175   :  { %710 = vadd.xlane.f32.xlu0 %v695_v53 }
 0x177   :  { %737 = vadd.xlane.f32.xlu1 %v725_v54 }
 0x179   :  { %706 = vadd.xlane.f32.xlu0 %v693_v55 }
 0x17b   :  { %741 = vadd.xlane.f32.xlu1 %v727_v56 }
 0x17d   :  { %739 = vadd.xlane.f32.xlu0 %v726_v57 }
 0x181   :  { %743 = vadd.xlane.f32.xlu0 %v728_v58 }
 0x1ea   :  { %v701_v59 = vpop.xlane.xlu0 %700 }
 0x1eb   :  { %715 = vst.msk [vmem:[%s1173_s5 + $0x10] sm:$0xff] %vm712_vm4, %v701_v59 }
 0x1ec   :  { %v734_v60 = vpop.xlane.xlu1 %733 }
 0x1ed   :  { %747 = vst.msk [vmem:[%s1174_s6 + $0x10] sm:$0xff] %vm712_vm4, %v734_v60 }
 0x1ee   :  { %v697_v61 = vpop.xlane.xlu0 %696 }
 0x1ef   :  { %713 = vst.msk [vmem:[%s1173_s5] sm:$0xff] %vm712_vm4, %v697_v61 }
 0x1f0   :  { %v730_v62 = vpop.xlane.xlu1 %729 }
 0x1f1   :  { %745 = vst.msk [vmem:[%s1174_s6] sm:$0xff] %vm712_vm4, %v730_v62 }
 0x1f2   :  { %v703_v63 = vpop.xlane.xlu0 %702 }
 0x1f3   :  { %716 = vst.msk [vmem:[%s1173_s5 + $0x18] sm:$0xff] %vm712_vm4, %v703_v63 }
 0x1f4   :  { %v699_v0 = vpop.xlane.xlu1 %698 }
 0x1f5   :  { %714 = vst.msk [vmem:[%s1173_s5 + $0x8] sm:$0xff] %vm712_vm4, %v699_v0 }
 0x1f6   :  { %v736_v1 = vpop.xlane.xlu0 %735 }
 0x1f7   :  { %748 = vst.msk [vmem:[%s1174_s6 + $0x18] sm:$0xff] %vm712_vm4, %v736_v1 }
 0x1f8   :  { %v709_v2 = vpop.xlane.xlu1 %708 }
 0x1f9   :  { %719 = vst.msk [vmem:[%s1173_s5 + $0x30] sm:$0xff] %vm712_vm4, %v709_v2 }
 0x1fa   :  { %v732_v3 = vpop.xlane.xlu0 %731 }
 0x1fb   :  { %746 = vst.msk [vmem:[%s1174_s6 + $0x8] sm:$0xff] %vm712_vm4, %v732_v3 }
 0x1fc   :  { %v705_v4 = vpop.xlane.xlu1 %704 }
 0x1fd   :  { %717 = vst.msk [vmem:[%s1173_s5 + $0x20] sm:$0xff] %vm712_vm4, %v705_v4 }
 0x1fe   :  { %v711_v5 = vpop.xlane.xlu0 %710 }
 0x1ff   :  { %720 = vst.msk [vmem:[%s1173_s5 + $0x38] sm:$0xff] %vm712_vm4, %v711_v5 }
 0x200   :  { %v738_v6 = vpop.xlane.xlu1 %737 }
 0x201   :  { %749 = vst.msk [vmem:[%s1174_s6 + $0x20] sm:$0xff] %vm712_vm4, %v738_v6 }
 0x202   :  { %v707_v7 = vpop.xlane.xlu0 %706 }
 0x203   :  { %718 = vst.msk [vmem:[%s1173_s5 + $0x28] sm:$0xff] %vm712_vm4, %v707_v7 }
 0x204   :  { %v742_v8 = vpop.xlane.xlu1 %741 }
 0x205   :  { %751 = vst.msk [vmem:[%s1174_s6 + $0x30] sm:$0xff] %vm712_vm4, %v742_v8 }
 0x206   :  { %v740_v9 = vpop.xlane.xlu0 %739 }
 0x207   :  { %750 = vst.msk [vmem:[%s1174_s6 + $0x28] sm:$0xff] %vm712_vm4, %v740_v9 }
 0x20a   :  { %v744_v10 = vpop.xlane.xlu0 %743 }
 0x20b   :  { %752 = vst.msk [vmem:[%s1174_s6 + $0x38] sm:$0xff] %vm712_vm4, %v744_v10 }

// kernel: generator_forward.26
= control target key start
LH: loop header
LB: loop body
LE: loop exit
PB: predicated region body
PF: predicated region fallthrough
CT: control target
= control target key end

     0   :  { %s1226_s21 = smov 0   ;;  %s1228_s22 = smov 0   ;;  %s1389_s0 = inlined_call_operand.vmem [shape: bf16[16,384], index: 0, kind: input, shape index: {}, may-alias: {0,1}]   ;;  %s1390_s1 = inlined_call_operand.vmem [shape: bf16[16,384], index: 1, kind: input, shape index: {}, may-alias: {0,1}]   ;;  %s1391_s2 = inlined_call_operand.vmem [shape: bf16[4,32,16], index: 2, kind: input, shape index: {}]   ;;  %s1392_s3 = inlined_call_operand.vmem [shape: f32[1,256], index: 3, kind: input, shape index: {}]   ;;  %s1393_s4 = inlined_call_operand.vmem [shape: bf16[32,256], index: 4, kind: output, shape index: {0}]   ;;  %s1394_s5 = inlined_call_operand.vmem [shape: f32[2,32,1], index: 5, kind: output, shape index: {1}]   ;;  %s1395_s6 = inlined_call_operand.vmem [shape: f32[2,32,1], index: 6, kind: output, shape index: {2}]  }
   0x1   :  { %s1230_s23 = smov 0   ;;  %s1232_s24 = smov 0  }
   0x2   :  { %s1234_s25 = smov 0  }
   0x3 LB: > { %s1252_s26 = sadd.s32 4294967295, %s1186_s25   ;;  %s1255_s27 = sadd.s32 1, %s1186_s25   ;;  %s1186_s25 = sphi %s1234_s25, %s1402_s25   ;;  %s1182_s24 = sphi %s1232_s24, %s1401_s24   ;;  %s1178_s23 = sphi %s1230_s23, %s1400_s23   ;;  %s1174_s22 = sphi %s1228_s22, %s1399_s22   ;;  %s1170_s21 = sphi %s1226_s21, %s1398_s21  }
   0x4   : > { %s21_s28 = ssub.s32 %s1186_s25, %s1255_s27  ;;  %s24_s29 = sadd.s32 1, %s1182_s24 }
   0x5   : > { %p22_p0 = scmp.eq.s32.totalorder %s21_s28, 0  ;;  %p31_p1 = scmp.ne.s32.totalorder %s1182_s24, %s1178_s23 }
   0x6   : > { %p32_p2 = scmp.eq.s32.totalorder %s1186_s25, 0  ;;  %s48_s30 = sadd.s32 1, %s1255_s27 }
   0x7   : > { %s1265_s7 = scalar_select %p22_p0, %s1182_s24, %s24_s29  }
   0x8   : > { %p33_p3 = por %p32_p2, %p31_p1  ;;  %s49_s8 = ssub.s32 %s1255_s27, %s48_s30 }
   0x9   : > { %p50_p4 = scmp.eq.s32.totalorder %s49_s8, 0  ;;  %s52_s9 = sadd.s32 1, %s1174_s22 }
   0xa   : > { %p59_p5 = scmp.ne.s32.totalorder %s1174_s22, %s1170_s21  ;;  %p136_p6 = scmp.eq.s32.totalorder %s1252_s26, 1 }
   0xb   : > { %s1273_s10 = scalar_select %p50_p4, %s1174_s22, %s52_s9  }
   0xc   : > { %p1275_p7 = por %p59_p5, %p32_p2  ;;  %p1279_p8 = por %p136_p6, %p31_p1 }
   0xd   : > { %p1000_p9 = scmp.ge.s32.totalorder %s1186_s25, 2 }
   0xf   : > { %213 = sbr.rel (%p1000_p9) target bundleno = 30 (0x1e), region = 20 }
  0x14   : > { %216 = sbr.rel (!%p33_p3) target bundleno = 25 (0x19), region = 24  ;;  %s218_s13 = sand.u32 (%p33_p3), 1, %s1182_s24  }
  0x15   : > { %s1002_s14 = sshll.u32 (%p33_p3), %s1186_s25, 2  ;;  %s1001_s15 = sshll.u32 (%p33_p3), %s218_s13, 3 }
  0x16   : > { %s222_s18 = scalar_lea.vmem (%p33_p3), %s1389_s0, %s1002_s14  ;;  %s220_s19 = scalar_lea.vmem (%p33_p3), [#allocation2], %s1001_s15 }
  0x17   : > { %v239_v0 = vld [vmem:[%s222_s18] sm:$0xf] (%p33_p3)  ;;  %v241_v1 = vld [vmem:[%s222_s18 + $0xc] sm:$0xf] (%p33_p3) }
  0x18   : > { %240 = vst [vmem:[%s220_s19] sm:$0xf] (%p33_p3), %v239_v0  ;;  %242 = vst [vmem:[%s220_s19 + $0x4] sm:$0xf] (%p33_p3), %v241_v1 }
  0x19 PF: > { %270 = sbr.rel (!%p1275_p7) target bundleno = 30 (0x1e), region = 65  ;;  %s272_s20 = sand.u32 (%p1275_p7), 1, %s1174_s22  }
  0x1a   : > { %s1004_s28 = sshll.u32 (%p1275_p7), %s1186_s25, 2  ;;  %s1003_s29 = sshll.u32 (%p1275_p7), %s272_s20, 3 }
  0x1b   : > { %s898_s9 = scalar_lea.vmem (%p1275_p7), %s1390_s1, %s1004_s28  ;;  %s274_s13 = scalar_lea.vmem (%p1275_p7), [#allocation3], %s1003_s29 }
  0x1c   : > { %v1005_v2 = vld [vmem:[%s898_s9 + $0x4] sm:$0xf] (%p1275_p7)  ;;  %v1006_v3 = vld [vmem:[%s898_s9 + $0x10] sm:$0xf] (%p1275_p7) }
  0x1d   : > { %295 = vst [vmem:[%s274_s13] sm:$0xf] (%p1275_p7), %v1005_v2  ;;  %297 = vst [vmem:[%s274_s13 + $0x4] sm:$0xf] (%p1275_p7), %v1006_v3 }
  0x1e PF: > { %p1007_p10 = scmp.ge.s32.totalorder %s1186_s25, 1  ;;  %p330_p11 = scmp.lt.s32.totalorder %s1186_s25, 3 }
  0x20   : > { %p331_p12 = pnand %p1007_p10, %p330_p11 }
  0x21   : > { %s337_s11 = sand.u32 (!%p331_p12), 1, %s1178_s23   ;;  %s344_s17 = sand.u32 (!%p331_p12), 1, %s1170_s21  }
  0x22   : > { %334 = sbr.rel (%p331_p12) target bundleno = 527 (0x20f), region = 110  ;;  %s1008_s14 = sshll.u32 (!%p331_p12), %s337_s11, 3 }
  0x23   : > { %s339_s18 = scalar_lea.vmem (!%p331_p12), [#allocation2], %s1008_s14  ;;  %s1009_s19 = sshll.u32 (!%p331_p12), %s344_s17, 3 }
  0x24   : > { %s1188_s30 = smov (!%p331_p12), 119   ;;  %s1189_s8 = smov (!%p331_p12), 127  }
  0x25   : > { %s346_s9 = scalar_lea.vmem (!%p331_p12), [#allocation3], %s1009_s19  ;;  %s1190_s14 = smov (!%p331_p12), 118  }
  0x26   : > { %p390_p13 = scmp.lt.s32.totalorder (!%p331_p12), %s1252_s26, 1  ;;  %s1010_s21 = sshll.u32 (!%p331_p12), %s337_s11, 4 }
  0x27   : > { %vm452_vm0 = vcmask 130048   ;;  %v1140_v4 = vld [vmem:[%s1391_s2] sm:$0xff]   ;;  %v1141_v6 = vld [vmem:[%s1391_s2 + $0x8] sm:$0xff]   ;;  %v1142_v7 = vld [vmem:[%s1391_s2 + $0x10] sm:$0xff]   ;;  %vm449_vm1 = vcmask 1039360   ;;  %vm587_vm2 = vcmask 973824  }
  0x28   : > { %v1138_v5 = vld [vmem:[%s339_s18] sm:$0xff]   ;;  %1079 = vmatprep.mubr.msk.bf16.mxu1 %vm452_vm0, %v1140_v4  ;;  %v1139_v8 = vld [vmem:[%s346_s9] sm:$0xff]   ;;  %1073 = vmatprep.mubr.msk.bf16.mxu0 %vm452_vm0, %v1142_v7  ;;  %vm663_vm3 = vcmask 965632   ;;  %s1336_s29 = scalar_select %p390_p13, %s1252_s26, 1  ;;  %vm764_vm4 = vcmask 7168  }
  0x29   : > { %583 = vrot.lane.b32.xlu1 %v1138_v5, %s1188_s30  ;;  %445 = vrot.lane.b32.xlu0 %v1138_v5, %s1189_s8  ;;  %v1144_v9 = vld [vmem:[%s1391_s2 + $0x30] sm:$0xff]   ;;  %v1143_v16 = vld [vmem:[%s1391_s2 + $0x18] sm:$0xff]   ;;  %s1344_s13 = scalar_lea.vmem [#allocation4], %s1010_s21  ;;  %s1039_s19 = sshll.u32 (%p1279_p8), %s1252_s26, 2 }
  0x2a   : > { %1077 = vmatprep.subr.bf16.mxu1 %v1138_v5  ;;  %v1146_v19 = vld [vmem:[%s1391_s2 + $0x20] sm:$0xff]   ;;  %v1145_v21 = vld [vmem:[%s1391_s2 + $0x38] sm:$0xff]   ;;  %v1147_v22 = vld [vmem:[%s1391_s2 + $0x28] sm:$0xff]   ;;  %s392_s9 = scalar_lea.vmem %s1392_s3, %s1336_s29  ;;  %s1042_s23 = sshll.u32 %s1336_s29, 5 }
  0x2b   : > { %1078 = vmatpush3.bf16.msra.mxu1 %v1138_v5  ;;  %v1037_v38 = vld [vmem:[%s392_s9] ss:$0 sm:$0xff]  ;;  %s397_s15 = scalar_lea.vmem %s1394_s5, %s1042_s23  ;;  %s402_s18 = scalar_lea.vmem %s1395_s6, %s1042_s23 }
  0x2c   : > { %s803_s28 = scalar_lea.vmem (%p1279_p8), %s1393_s4, %s1039_s19 }
  0x2d   : > { %585 = vrot.lane.b32.xlu1 %v1139_v8, %s1188_s30  ;;  %447 = vrot.lane.b32.xlu0 %v1139_v8, %s1189_s8 }
  0x2e   : > { %1080 = vmatmul.mubr.msk.bf16.vlgmr.msra.gmra.mxu1 %vm452_vm0, %v1141_v6 }
  0x2f   : > { %1091 = vmatprep.mubr.msk.bf16.mxu1 %vm452_vm0, %v1144_v9 }
  0x31   : > { %661 = vrot.lane.b32.xlu1 %v1139_v8, %s1190_s14  ;;  %659 = vrot.lane.b32.xlu0 %v1138_v5, %s1190_s14 }
  0x9b   : > { %v584_v10 = vpop.permute.xlu1 %583  ;;  %v446_v11 = vpop.permute.xlu0 %445 }
  0x9f   : > { %v586_v12 = vpop.permute.xlu1 %585  ;;  %v448_v13 = vpop.permute.xlu0 %447 }
  0xa0   : > { %v450_v14 = vsel %vm449_vm1, %v446_v11, %v448_v13  ;;  %v588_v15 = vsel %vm587_vm2, %v584_v10, %v586_v12 }
  0xa1   : > { %1071 = vmatprep.subr.bf16.mxu0 %v450_v14 }
  0xa2   : > { %1072 = vmatpush3.bf16.msra.mxu0 %v450_v14 }
  0xa3   : > { %1083 = vmatprep.subr.bf16.mxu0 %v588_v15  ;;  %v662_v17 = vpop.permute.xlu1 %661  ;;  %v660_v18 = vpop.permute.xlu0 %659 }
  0xa4   : > { %v664_v20 = vsel %vm663_vm3, %v660_v18, %v662_v17 }
  0xa5   : > { %1074 = vmatmul.mubr.msk.bf16.vlgmr.msra.gmra.mxu0 %vm452_vm0, %v1143_v16  ;;  %1089 = vmatprep.subr.bf16.mxu1 %v664_v20 }
  0xa6   : > { %1084 = vmatpush3.bf16.msra.mxu0 %v588_v15  ;;  %1090 = vmatpush3.bf16.msra.mxu1 %v664_v20 }
  0xa7   : > { %1085 = vmatprep.mubr.msk.bf16.mxu0 %vm452_vm0, %v1146_v19 }
  0xa9   : > { %1092 = vmatmul.mubr.msk.bf16.vlgmr.msra.gmra.mxu1 %vm452_vm0, %v1145_v21 }
  0xad   : > { %1086 = vmatmul.mubr.msk.bf16.vlgmr.msra.gmra.mxu0 %vm452_vm0, %v1147_v22 }
  0xee   : > { %v1081_v23 = vpop.f32.mrf.mxu1 }
  0xf0   : > { %v558_v24 = vpop.f32.mrf.mxu1 }
  0xf2   : > { %v1082_v25 = vpop.f32.mrf.mxu1 }
  0xf4   : > { %v561_v27 = vpop.f32.mrf.mxu1 }
 0x165   : > { %v1075_v26 = vpop.f32.mrf.mxu0 }
 0x166   : > { %v567_v32 = vadd.f32 %v1081_v23, %v1075_v26 }
 0x167   : > { %v493_v28 = vpop.f32.mrf.mxu0 }
 0x168   : > { %v559_v35 = vadd.f32 %v558_v24, %v493_v28 }
 0x169   : > { %v1076_v29 = vpop.f32.mrf.mxu0  ;;  %v1093_v30 = vpop.f32.mrf.mxu1 }
 0x16a   : > { %v570_v39 = vadd.f32 %v1082_v25, %v1076_v29 }
 0x16b   : > { %v496_v31 = vpop.f32.mrf.mxu0  ;;  %v706_v33 = vpop.f32.mrf.mxu1 }
 0x16c   : > { %v562_v44 = vadd.f32 %v561_v27, %v496_v31 }
 0x16d   : > { %v1087_v34 = vpop.f32.mrf.mxu0  ;;  %v1094_v42 = vpop.f32.mrf.mxu1 }
 0x16e   : > { %v647_v36 = vadd.f32 %v1087_v34, %v567_v32 }
 0x16f   : > { %v630_v37 = vpop.f32.mrf.mxu0  ;;  %v709_v52 = vpop.f32.mrf.mxu1 }
 0x170   : > { %v723_v40 = vadd.f32 %v1093_v30, %v647_v36  ;;  %v645_v41 = vadd.f32 %v630_v37, %v559_v35 }
 0x171   : > { %v1088_v43 = vpop.f32.mrf.mxu0 }
 0x172   : > { %v721_v45 = vadd.f32 %v706_v33, %v645_v41  ;;  %v648_v46 = vadd.f32 %v1088_v43, %v570_v39  ;;  %v754_v47 = vmul.f32 %v1037_v38, %v723_v40 }
 0x173   : > { %v633_v48 = vpop.f32.mrf.mxu0 }
 0x174   : > { %v724_v49 = vadd.f32 %v1094_v42, %v648_v46  ;;  %v646_v50 = vadd.f32 %v633_v48, %v562_v44  ;;  %760 = vadd.xlane.f32.xlu0 %v754_v47  ;;  %v752_v51 = vmul.f32 %v1037_v38, %v721_v45  ;;  %v771_v60 = vmul.f32 %v754_v47, %v723_v40 }
 0x176   : > { %v1056_v53 = vpack.c.bf16 %v724_v49, %v723_v40  ;;  %v722_v54 = vadd.f32 %v709_v52, %v646_v50  ;;  %v769_v55 = vmul.f32 %v752_v51, %v721_v45  ;;  %v755_v57 = vmul.f32 %v1037_v38, %v724_v49 }
 0x178   : > { %1058 = vst [vmem:[%s1344_s13 + $0x8] sm:$0xff] %v1056_v53   ;;  %v1051_v56 = vpack.c.bf16 %v722_v54, %v721_v45  ;;  %756 = vadd.xlane.f32.xlu0 %v752_v51  ;;  %773 = vadd.xlane.f32.xlu1 %v769_v55  ;;  %v753_v58 = vmul.f32 %v1037_v38, %v722_v54 }
 0x179   : > { %v772_v61 = vmul.f32 %v755_v57, %v724_v49 }
 0x17a   : > { %1052 = vst [vmem:[%s1344_s13] sm:$0xff] %v1051_v56   ;;  %v770_v59 = vmul.f32 %v753_v58, %v722_v54 }
 0x17c   : > { %762 = vadd.xlane.f32.xlu0 %v755_v57  ;;  %758 = vadd.xlane.f32.xlu1 %v753_v58 }
 0x17f   : > { %v824_v8 = vld [vmem:[%s1344_s13 + $0x8] sm:$0xf] (%p1279_p8)  ;;  %v826_v9 = vld [vmem:[%s1344_s13 + $0xc] sm:$0xf] (%p1279_p8) }
 0x180   : > { %775 = vadd.xlane.f32.xlu0 %v770_v59  ;;  %777 = vadd.xlane.f32.xlu1 %v771_v60  ;;  %825 = vst [vmem:[%s803_s28 + $0x10] sm:$0xf] (%p1279_p8), %v824_v8  ;;  %827 = vst [vmem:[%s803_s28 + $0x18] sm:$0xf] (%p1279_p8), %v826_v9 }
 0x181   : > { %v820_v6 = vld [vmem:[%s1344_s13] sm:$0xf] (%p1279_p8)  ;;  %v822_v7 = vld [vmem:[%s1344_s13 + $0x4] sm:$0xf] (%p1279_p8) }
 0x182   : > { %821 = vst [vmem:[%s803_s28] sm:$0xf] (%p1279_p8), %v820_v6  ;;  %823 = vst [vmem:[%s803_s28 + $0x8] sm:$0xf] (%p1279_p8), %v822_v7 }
 0x184   : > { %779 = vadd.xlane.f32.xlu0 %v772_v61 }
 0x1fd   : > { %v761_v62 = vpop.xlane.xlu0 %760 }
 0x1fe   : > { %767 = vst.msk [vmem:[%s397_s15 + $0x10] sm:$0xff] %vm764_vm4, %v761_v62 }
 0x201   : > { %v757_v63 = vpop.xlane.xlu0 %756  ;;  %v774_v0 = vpop.xlane.xlu1 %773 }
 0x202   : > { %765 = vst.msk [vmem:[%s397_s15] sm:$0xff] %vm764_vm4, %v757_v63  ;;  %781 = vst.msk [vmem:[%s402_s18] sm:$0xff] %vm764_vm4, %v774_v0 }
 0x205   : > { %v763_v1 = vpop.xlane.xlu0 %762  ;;  %v759_v2 = vpop.xlane.xlu1 %758 }
 0x206   : > { %768 = vst.msk [vmem:[%s397_s15 + $0x18] sm:$0xff] %vm764_vm4, %v763_v1  ;;  %766 = vst.msk [vmem:[%s397_s15 + $0x8] sm:$0xff] %vm764_vm4, %v759_v2 }
 0x209   : > { %v776_v3 = vpop.xlane.xlu0 %775  ;;  %v778_v4 = vpop.xlane.xlu1 %777 }
 0x20a   : > { %782 = vst.msk [vmem:[%s402_s18 + $0x8] sm:$0xff] %vm764_vm4, %v776_v3  ;;  %783 = vst.msk [vmem:[%s402_s18 + $0x10] sm:$0xff] %vm764_vm4, %v778_v4  ;;  %801 = sbr.rel (!%p1279_p8) target bundleno = 527 (0x20f), region = 122 }
 0x20d   : > { %v780_v5 = vpop.xlane.xlu0 %779 }
 0x20e   : > { %784 = vst.msk [vmem:[%s402_s18 + $0x18] sm:$0xff] %vm764_vm4, %v780_v5 }
 0x20f PF: > { %p14_p0 = scmp.ge.s32.totalorder %s1255_s27, 4   ;;  %s1398_s21 = smov %s1174_s22 }
 0x210   : > { %s1399_s22 = smov %s1273_s10  ;;  %s1400_s23 = smov %s1182_s24 }
 0x211   : > { %s1401_s24 = smov %s1265_s7  ;;  %s1402_s25 = smov %s1255_s27 }
 0x212   :  { %16 = sbr.rel (!%p14_p0) target bundleno = 3 (0x3), region = 229 }

// kernel: generator_forward.27
= control target key start
LH: loop header
LB: loop body
LE: loop exit
PB: predicated region body
PF: predicated region fallthrough
CT: control target
= control target key end

     0   :  { %s3689_s21 = smov 0   ;;  %s4286_s0 = inlined_call_operand.vmem [shape: bf16[8,1280], index: 0, kind: input, shape index: {}, may-alias: {0,1}]   ;;  %s4287_s1 = inlined_call_operand.vmem [shape: bf16[8,1280], index: 1, kind: input, shape index: {}, may-alias: {0,1}]   ;;  %s4288_s2 = inlined_call_operand.vmem [shape: f32[8,1], index: 2, kind: input, shape index: {}]   ;;  %s4289_s3 = inlined_call_operand.vmem [shape: f32[8,1], index: 3, kind: input, shape index: {}]   ;;  %s4290_s4 = inlined_call_operand.vmem [shape: bf16[49,4,8], index: 4, kind: input, shape index: {}]   ;;  %s4291_s5 = inlined_call_operand.vmem [shape: f32[4,1], index: 5, kind: input, shape index: {}]   ;;  %s4292_s6 = inlined_call_operand.vmem [shape: f32[4,1024], index: 6, kind: output, shape index: {}]  }
   0x1 LB: > { %s3420_s22 = sadd.s32 4294967295, %s3606_s21   ;;  %p3424_p0 = scmp.ge.s32.totalorder %s3606_s21, 1  ;;  %s3606_s21 = sphi %s3689_s21, %s16_s21  }
   0x2   : > { %p228_p1 = scmp.lt.s32.totalorder %s3606_s21, 5 }
   0x4   : > { %p229_p2 = pnand %p3424_p0, %p228_p1 }
   0x5   : > { %s3706_s27 = sshll.u32 (!%p229_p2), %s3420_s22, 1  ;;  %s3609_s14 = smov (!%p229_p2), 127  }
   0x6   : > { %232 = sbr.rel (%p229_p2) target bundleno = 760 (0x2f8), region = 44  ;;  %s3536_s28 = sadd.s32 (!%p229_p2), 2, %s3706_s27 }
   0x7   : > { %p265_p3 = scmp.lt.s32.totalorder (!%p229_p2), %s3706_s27, 9  ;;  %p272_p4 = scmp.lt.s32.totalorder (!%p229_p2), %s3536_s28, 9 }
   0x8   : > { %s3610_s15 = smov (!%p229_p2), 126   ;;  %s3611_s18 = smov (!%p229_p2), 125  }
   0x9   : > { %s3612_s19 = smov (!%p229_p2), 124   ;;  %s3613_s20 = smov (!%p229_p2), 123  }
   0xa   : > { %s3614_s22 = smov (!%p229_p2), 122   ;;  %s3615_s23 = smov (!%p229_p2), 106  }
   0xb   : > { %v305_v0 = vld [vmem:[%s4288_s2] sm:$0xff]  ;;  %v3608_v1 = vmov 0   ;;  %s266_s29 = scalar_select %p265_p3, %s3706_s27, 9  ;;  %vm398_vm0 = vcmask 1043456   ;;  %vm394_vm1 = vcmask 64512   ;;  %vm391_vm2 = vcmask 1039360  }
   0xc   : > { %3591 = vset.pattern.permute.xlu0 %v3608_v1  ;;  %437 = vmatprep.mubr.bf16.mxu0 %v3608_v1  ;;  %v315_v2 = vld [vmem:[%s4289_s3] sm:$0xff]  ;;  %s4294_s28 = smov (!%p272_p4, %s3536_s28), 9  ;;  %s3616_s24 = smov 105   ;;  %vm502_vm3 = vcmask 1031168   ;;  %vm563_vm4 = vcmask 1022976   ;;  %vm624_vm5 = vcmask 1014784  }
   0xd   : > { %308 = vperm.xlu0 %3591, %v305_v0   ;;  %487 = vmatprep.mubr.bf16.mxu1 %v3608_v1  ;;  %s3426_s30 = sshll.u32 %s266_s29, 2  ;;  %s3428_s7 = sshll.u32 %s4294_s28, 2  ;;  %v333_v26 = vld [vmem:[%s4290_s4] sm:$0x3]  ;;  %v334_v35 = vld [vmem:[%s4290_s4 + $0x2] sm:$0x3] }
   0xe   : > { %s268_s10 = scalar_lea.vmem %s4286_s0, %s3426_s30  ;;  %s275_s13 = scalar_lea.vmem %s4287_s1, %s3428_s7  ;;  %v335_v44 = vld [vmem:[%s4290_s4 + $0x4] sm:$0x3]  ;;  %v336_v49 = vld [vmem:[%s4290_s4 + $0x6] sm:$0x3]  ;;  %vm685_vm6 = vcmask 1006592   ;;  %vm746_vm7 = vcmask 998400  }
   0xf   : > { %v285_v3 = vld [vmem:[%s268_s10] sm:$0xff]  ;;  %s3617_s25 = smov 104   ;;  %s3618_s26 = smov 103   ;;  %v337_v58 = vld [vmem:[%s4290_s4 + $0x8] sm:$0x3]  ;;  %vm807_vm8 = vcmask 867328  }
  0x10   : > { %v3717_v4 = vld [vmem:[%s275_s13] sm:$0xff]  ;;  %v3431_v5 = vcombine.low %v285_v3, %v285_v3  ;;  %v3432_v6 = vcombine.high %v285_v3, %v285_v3  ;;  %s3619_s28 = smov 102   ;;  %s3620_s29 = smov 101   ;;  %v338_v63 = vld [vmem:[%s4290_s4 + $0xa] sm:$0x3]  ;;  %vm868_vm9 = vcmask 859136  }
  0x11   : > { %318 = vperm.xlu0 %3591, %v315_v2   ;;  %v3433_v7 = vcombine.low %v3717_v4, %v3717_v4  ;;  %s3621_s30 = smov 100   ;;  %s3622_s7 = smov 84   ;;  %vm929_vm10 = vcmask 850944   ;;  %vm990_vm11 = vcmask 842752   ;;  %vm1051_vm12 = vcmask 834560  }
  0x12   : > { %v301_v8 = vunpack.c.l.bf16 %v3431_v5  ;;  %v302_v9 = vunpack.c.l.bf16 %v3432_v6  ;;  %s3623_s8 = smov 83   ;;  %s3624_s9 = smov 82   ;;  %vm1112_vm13 = vcmask 826368   ;;  %vm1173_vm14 = vcmask 818176  }
  0x13   : > { %v303_v10 = vunpack.c.l.bf16 %v3433_v7  ;;  %s3625_s10 = smov 81   ;;  %s3626_s11 = smov 80   ;;  %vm1234_vm15 = vcmask 687104  }
  0x14   : > { %s3627_s12 = smov 79   ;;  %s3628_s13 = smov 78  }
  0x15   : > { %s3630_s17 = smov 61   ;;  %s3636_s16 = smov 40  }
  0x16   : > { %p279_p5 = scmp.lt.s32.totalorder %s3706_s27, 7 }
  0x18   : > { %s4296_s27 = smov (!%p279_p5, %s3706_s27), 7 }
  0x88   : > { %v3721_v11 = vpop.permute.xlu0 %308 }
  0x89   : > { %v311_v12 = vmul.f32 %v3721_v11, %v301_v8  ;;  %v312_v13 = vmul.f32 %v3721_v11, %v302_v9  ;;  %v313_v14 = vmul.f32 %v3721_v11, %v303_v10  ;;  %v339_v10 = vld [vmem:[%s4290_s4 + $0xc] sm:$0x3] }
  0x8c   : > { %v3726_v15 = vpop.permute.xlu0 %318 }
  0x8d   : > { %v321_v16 = vadd.f32 %v3726_v15, %v311_v12  ;;  %v322_v17 = vadd.f32 %v3726_v15, %v312_v13  ;;  %v323_v18 = vadd.f32 %v3726_v15, %v313_v14 }
  0x8f   : > { %v325_v19 = vmax.f32 %v321_v16, 0.0  ;;  %v326_v20 = vmax.f32 %v322_v17, 0.0  ;;  %v327_v21 = vmax.f32 %v323_v18, 0.0  ;;  %v340_v17 = vld [vmem:[%s4290_s4 + $0xe] sm:$0x3] }
  0x91   : > { %v3731_v22 = vpack.c.bf16 %v325_v19, %v325_v19  ;;  %v3733_v23 = vpack.c.bf16 %v326_v20, %v326_v20  ;;  %v3735_v24 = vpack.c.bf16 %v327_v21, %v327_v21 }
  0x93   : > { %389 = vrot.lane.b32.xlu0 %v3735_v24, %s3609_s14  ;;  %3437 = vmatprep.subr.msk.bf16.mxu1 %vm398_vm0, %v3733_v23  ;;  %v450_v25 = vsel %vm398_vm0, %v3731_v22, 0 }
  0x94   : > { %385 = vrot.lane.b32.xlu1 %v3731_v22, %s3609_s14  ;;  %470 = vmatpush1.bf16.msra.mxu1 %v450_v25 }
  0x97   : > { %498 = vrot.lane.b32.xlu0 %v3733_v23, %s3610_s15  ;;  %3438 = vmatmul.mubr.msk.bf16.vlgmr.msra.gmra.mxu1 %vm394_vm1, %v333_v26 }
  0x98   : > { %387 = vrot.lane.b32.xlu1 %v3733_v23, %s3609_s14  ;;  %607 = vmatprep.mubr.bf16.mxu1 %v3608_v1  ;;  %s3629_s14 = smov 62  }
  0x9b   : > { %557 = vrot.lane.b32.xlu0 %v3731_v22, %s3611_s18 }
  0x9c   : > { %496 = vrot.lane.b32.xlu1 %v3731_v22, %s3610_s15 }
  0x9f   : > { %561 = vrot.lane.b32.xlu0 %v3735_v24, %s3611_s18 }
  0xa0   : > { %500 = vrot.lane.b32.xlu1 %v3735_v24, %s3610_s15  ;;  %s3642_s15 = smov 34  }
  0xa3   : > { %620 = vrot.lane.b32.xlu0 %v3733_v23, %s3612_s19 }
  0xa4   : > { %559 = vrot.lane.b32.xlu1 %v3733_v23, %s3611_s18  ;;  %s3631_s18 = smov 60  }
  0xa7   : > { %679 = vrot.lane.b32.xlu0 %v3731_v22, %s3613_s20 }
  0xa8   : > { %618 = vrot.lane.b32.xlu1 %v3731_v22, %s3612_s19 }
  0xab   : > { %683 = vrot.lane.b32.xlu0 %v3735_v24, %s3613_s20 }
  0xac   : > { %622 = vrot.lane.b32.xlu1 %v3735_v24, %s3612_s19 }
  0xaf   : > { %742 = vrot.lane.b32.xlu0 %v3733_v23, %s3614_s22 }
  0xb0   : > { %681 = vrot.lane.b32.xlu1 %v3733_v23, %s3613_s20 }
  0xb3   : > { %801 = vrot.lane.b32.xlu0 %v3731_v22, %s3615_s23 }
  0xb4   : > { %740 = vrot.lane.b32.xlu1 %v3731_v22, %s3614_s22 }
  0xb7   : > { %805 = vrot.lane.b32.xlu0 %v3735_v24, %s3615_s23 }
  0xb8   : > { %744 = vrot.lane.b32.xlu1 %v3735_v24, %s3614_s22 }
  0xbb   : > { %864 = vrot.lane.b32.xlu0 %v3733_v23, %s3616_s24 }
  0xbc   : > { %803 = vrot.lane.b32.xlu1 %v3733_v23, %s3615_s23 }
  0xbf   : > { %923 = vrot.lane.b32.xlu0 %v3731_v22, %s3617_s25 }
  0xc0   : > { %862 = vrot.lane.b32.xlu1 %v3731_v22, %s3616_s24 }
  0xc3   : > { %927 = vrot.lane.b32.xlu0 %v3735_v24, %s3617_s25 }
  0xc4   : > { %866 = vrot.lane.b32.xlu1 %v3735_v24, %s3616_s24  ;;  %s3650_s24 = smov 121  }
  0xc7   : > { %986 = vrot.lane.b32.xlu0 %v3733_v23, %s3618_s26 }
  0xc8   : > { %925 = vrot.lane.b32.xlu1 %v3733_v23, %s3617_s25  ;;  %s3644_s25 = smov 17  }
  0xcb   : > { %1045 = vrot.lane.b32.xlu0 %v3731_v22, %s3619_s28 }
  0xcc   : > { %984 = vrot.lane.b32.xlu1 %v3731_v22, %s3618_s26 }
  0xcf   : > { %1049 = vrot.lane.b32.xlu0 %v3735_v24, %s3619_s28 }
  0xd0   : > { %988 = vrot.lane.b32.xlu1 %v3735_v24, %s3618_s26  ;;  %s3638_s26 = smov 38  }
  0xd3   : > { %1108 = vrot.lane.b32.xlu0 %v3733_v23, %s3620_s29 }
  0xd4   : > { %1047 = vrot.lane.b32.xlu1 %v3733_v23, %s3619_s28  ;;  %s3632_s28 = smov 59  }
  0xd7   : > { %1167 = vrot.lane.b32.xlu0 %v3731_v22, %s3621_s30 }
  0xd8   : > { %1106 = vrot.lane.b32.xlu1 %v3731_v22, %s3620_s29 }
  0xdb   : > { %1171 = vrot.lane.b32.xlu0 %v3735_v24, %s3621_s30 }
  0xdc   : > { %1110 = vrot.lane.b32.xlu1 %v3735_v24, %s3620_s29  ;;  %s3633_s29 = smov 58  }
  0xdf   : > { %1230 = vrot.lane.b32.xlu0 %v3733_v23, %s3622_s7 }
  0xe0   : > { %1169 = vrot.lane.b32.xlu1 %v3733_v23, %s3621_s30 }
  0xe3   : > { %1289 = vrot.lane.b32.xlu0 %v3731_v22, %s3623_s8 }
  0xe4   : > { %1228 = vrot.lane.b32.xlu1 %v3731_v22, %s3622_s7 }
  0xe7   : > { %1293 = vrot.lane.b32.xlu0 %v3735_v24, %s3623_s8 }
  0xe8   : > { %1232 = vrot.lane.b32.xlu1 %v3735_v24, %s3622_s7 }
  0xeb   : > { %1352 = vrot.lane.b32.xlu0 %v3733_v23, %s3624_s9 }
  0xec   : > { %1291 = vrot.lane.b32.xlu1 %v3733_v23, %s3623_s8  ;;  %s3646_s8 = smov 15  }
  0xef   : > { %1411 = vrot.lane.b32.xlu0 %v3731_v22, %s3625_s10 }
  0xf0   : > { %1350 = vrot.lane.b32.xlu1 %v3731_v22, %s3624_s9 }
  0xf3   : > { %1415 = vrot.lane.b32.xlu0 %v3735_v24, %s3625_s10 }
  0xf4   : > { %1354 = vrot.lane.b32.xlu1 %v3735_v24, %s3624_s9  ;;  %s3640_s9 = smov 36  }
  0xf7   : > { %1474 = vrot.lane.b32.xlu0 %v3733_v23, %s3626_s11 }
  0xf8   : > { %1413 = vrot.lane.b32.xlu1 %v3733_v23, %s3625_s10  ;;  %s3634_s10 = smov 57  }
  0xfb   : > { %1533 = vrot.lane.b32.xlu0 %v3731_v22, %s3627_s12 }
  0xfc   : > { %1472 = vrot.lane.b32.xlu1 %v3731_v22, %s3626_s11 }
  0xff   : > { %1537 = vrot.lane.b32.xlu0 %v3735_v24, %s3627_s12 }
 0x100   : > { %1476 = vrot.lane.b32.xlu1 %v3735_v24, %s3626_s11  ;;  %s3635_s11 = smov 56  }
 0x103   : > { %1596 = vrot.lane.b32.xlu0 %v3733_v23, %s3628_s13 }
 0x104   : > { %1535 = vrot.lane.b32.xlu1 %v3733_v23, %s3627_s12 }
 0x105   : > { %v390_v27 = vpop.permute.xlu0 %389 }
 0x106   : > { %v386_v28 = vpop.permute.xlu1 %385 }
 0x107   : > { %1655 = vrot.lane.b32.xlu0 %v3731_v22, %s3629_s14 }
 0x108   : > { %1594 = vrot.lane.b32.xlu1 %v3731_v22, %s3628_s13 }
 0x109   : > { %v499_v29 = vpop.permute.xlu0 %498 }
 0x10a   : > { %v388_v30 = vpop.permute.xlu1 %387 }
 0x10b   : > { %1659 = vrot.lane.b32.xlu0 %v3735_v24, %s3629_s14  ;;  %v393_v31 = vsel %vm391_vm2, %v388_v30, %v390_v27  ;;  %v392_v32 = vsel %vm391_vm2, %v386_v28, %v388_v30  ;;  %vm1295_vm2 = vcmask 678912  }
 0x10c   : > { %1598 = vrot.lane.b32.xlu1 %v3735_v24, %s3628_s13  ;;  %3435 = vmatprep.subr.msk.bf16.mxu0 %vm398_vm0, %v393_v31  ;;  %v400_v33 = vsel %vm398_vm0, %v392_v32, 0 }
 0x10d   : > { %420 = vmatpush1.bf16.msra.mxu0 %v400_v33  ;;  %v558_v34 = vpop.permute.xlu0 %557 }
 0x10e   : > { %v497_v36 = vpop.permute.xlu1 %496 }
 0x10f   : > { %1718 = vrot.lane.b32.xlu0 %v3733_v23, %s3630_s17  ;;  %v503_v37 = vsel %vm502_vm3, %v497_v36, %v499_v29 }
 0x110   : > { %1657 = vrot.lane.b32.xlu1 %v3733_v23, %s3629_s14  ;;  %3436 = vmatmul.mubr.msk.bf16.vlgmr.msra.gmra.mxu0 %vm394_vm1, %v334_v35  ;;  %v509_v41 = vsel %vm398_vm0, %v503_v37, 0  ;;  %s3648_s14 = smov 13  }
 0x111   : > { %v562_v38 = vpop.permute.xlu0 %561  ;;  %546 = vmatprep.mubr.bf16.mxu0 %v3608_v1 }
 0x112   : > { %v501_v39 = vpop.permute.xlu1 %500 }
 0x113   : > { %v504_v40 = vsel %vm502_vm3, %v499_v29, %v501_v39  ;;  %1777 = vrot.lane.b32.xlu0 %v3731_v22, %s3631_s18  ;;  %v341_v29 = vld [vmem:[%s4290_s4 + $0x10] sm:$0x3]  ;;  %vm1356_vm3 = vcmask 670720  }
 0x114   : > { %1716 = vrot.lane.b32.xlu1 %v3731_v22, %s3630_s17  ;;  %3439 = vmatprep.subr.msk.bf16.mxu0 %vm398_vm0, %v504_v40 }
 0x115   : > { %529 = vmatpush1.bf16.msra.mxu0 %v509_v41  ;;  %v621_v42 = vpop.permute.xlu0 %620 }
 0x116   : > { %v560_v43 = vpop.permute.xlu1 %559 }
 0x117   : > { %v564_v45 = vsel %vm563_vm4, %v558_v34, %v560_v43  ;;  %1781 = vrot.lane.b32.xlu0 %v3735_v24, %s3631_s18  ;;  %v565_v46 = vsel %vm563_vm4, %v560_v43, %v562_v38  ;;  %v342_v34 = vld [vmem:[%s4290_s4 + $0x12] sm:$0x3]  ;;  %v343_v43 = vld [vmem:[%s4290_s4 + $0x14] sm:$0x3]  ;;  %vm1417_vm4 = vcmask 662528  }
 0x118   : > { %1720 = vrot.lane.b32.xlu1 %v3735_v24, %s3630_s17  ;;  %3441 = vmatprep.subr.msk.bf16.mxu1 %vm398_vm0, %v565_v46  ;;  %v570_v47 = vsel %vm398_vm0, %v564_v45, 0  ;;  %s3637_s17 = smov 39  }
 0x119   : > { %590 = vmatpush1.bf16.msra.mxu1 %v570_v47  ;;  %v680_v48 = vpop.permute.xlu0 %679  ;;  %3440 = vmatmul.mubr.msk.bf16.vlgmr.msra.gmra.mxu0 %vm394_vm1, %v335_v44 }
 0x11a   : > { %v619_v50 = vpop.permute.xlu1 %618  ;;  %668 = vmatprep.mubr.bf16.mxu0 %v3608_v1 }
 0x11b   : > { %1840 = vrot.lane.b32.xlu0 %v3733_v23, %s3632_s28  ;;  %v625_v51 = vsel %vm624_vm5, %v619_v50, %v621_v42 }
 0x11c   : > { %1779 = vrot.lane.b32.xlu1 %v3733_v23, %s3631_s18  ;;  %3442 = vmatmul.mubr.msk.bf16.vlgmr.msra.gmra.mxu1 %vm394_vm1, %v336_v49  ;;  %v631_v55 = vsel %vm398_vm0, %v625_v51, 0 }
 0x11d   : > { %v3846_v52 = vpop.permute.xlu0 %683  ;;  %729 = vmatprep.mubr.bf16.mxu1 %v3608_v1 }
 0x11e   : > { %v3849_v53 = vpop.permute.xlu1 %622 }
 0x11f   : > { %1899 = vrot.lane.b32.xlu0 %v3731_v22, %s3633_s29  ;;  %v3854_v54 = vsel %vm624_vm5, %v621_v42, %v3849_v53 }
 0x120   : > { %1838 = vrot.lane.b32.xlu1 %v3731_v22, %s3632_s28  ;;  %3443 = vmatprep.subr.msk.bf16.mxu0 %vm398_vm0, %v3854_v54 }
 0x121   : > { %651 = vmatpush1.bf16.msra.mxu0 %v631_v55  ;;  %v743_v56 = vpop.permute.xlu0 %742 }
 0x122   : > { %v682_v57 = vpop.permute.xlu1 %681 }
 0x123   : > { %v686_v59 = vsel %vm685_vm6, %v680_v48, %v682_v57  ;;  %1903 = vrot.lane.b32.xlu0 %v3735_v24, %s3633_s29  ;;  %v3867_v60 = vsel %vm685_vm6, %v682_v57, %v3846_v52  ;;  %v344_v48 = vld [vmem:[%s4290_s4 + $0x16] sm:$0x3] }
 0x124   : > { %1842 = vrot.lane.b32.xlu1 %v3735_v24, %s3632_s28  ;;  %3445 = vmatprep.subr.msk.bf16.mxu1 %vm398_vm0, %v3867_v60  ;;  %v692_v61 = vsel %vm398_vm0, %v686_v59, 0  ;;  %s3639_s28 = smov 37  }
 0x125   : > { %712 = vmatpush1.bf16.msra.mxu1 %v692_v61  ;;  %v802_v62 = vpop.permute.xlu0 %801  ;;  %3444 = vmatmul.mubr.msk.bf16.vlgmr.msra.gmra.mxu0 %vm394_vm1, %v337_v58  ;;  %v345_v61 = vld [vmem:[%s4290_s4 + $0x18] sm:$0x3] }
 0x126   : > { %v741_v0 = vpop.permute.xlu1 %740  ;;  %790 = vmatprep.mubr.bf16.mxu0 %v3608_v1 }
 0x127   : > { %1962 = vrot.lane.b32.xlu0 %v3733_v23, %s3634_s10  ;;  %v747_v2 = vsel %vm746_vm7, %v741_v0, %v743_v56 }
 0x128   : > { %1901 = vrot.lane.b32.xlu1 %v3733_v23, %s3633_s29  ;;  %3446 = vmatmul.mubr.msk.bf16.vlgmr.msra.gmra.mxu1 %vm394_vm1, %v338_v63  ;;  %v753_v7 = vsel %vm398_vm0, %v747_v2, 0 }
 0x129   : > { %v806_v3 = vpop.permute.xlu0 %805  ;;  %851 = vmatprep.mubr.bf16.mxu1 %v3608_v1 }
 0x12a   : > { %v3883_v5 = vpop.permute.xlu1 %744 }
 0x12b   : > { %2021 = vrot.lane.b32.xlu0 %v3731_v22, %s3635_s11  ;;  %v3888_v6 = vsel %vm746_vm7, %v743_v56, %v3883_v5 }
 0x12c   : > { %1960 = vrot.lane.b32.xlu1 %v3731_v22, %s3634_s10  ;;  %3447 = vmatprep.subr.msk.bf16.mxu0 %vm398_vm0, %v3888_v6 }
 0x12d   : > { %773 = vmatpush1.bf16.msra.mxu0 %v753_v7  ;;  %v865_v8 = vpop.permute.xlu0 %864 }
 0x12e   : > { %v804_v9 = vpop.permute.xlu1 %803 }
 0x12f   : > { %v808_v12 = vsel %vm807_vm8, %v802_v62, %v804_v9  ;;  %2025 = vrot.lane.b32.xlu0 %v3735_v24, %s3635_s11  ;;  %v809_v13 = vsel %vm807_vm8, %v804_v9, %v806_v3  ;;  %v346_v3 = vld [vmem:[%s4290_s4 + $0x1a] sm:$0x3]  ;;  %vm1478_vm8 = vcmask 654336  }
 0x130   : > { %1964 = vrot.lane.b32.xlu1 %v3735_v24, %s3634_s10  ;;  %3449 = vmatprep.subr.msk.bf16.mxu1 %vm398_vm0, %v809_v13  ;;  %v814_v14 = vsel %vm398_vm0, %v808_v12, 0  ;;  %s3641_s10 = smov 35  }
 0x131   : > { %834 = vmatpush1.bf16.msra.mxu1 %v814_v14  ;;  %v924_v16 = vpop.permute.xlu0 %923  ;;  %3448 = vmatmul.mubr.msk.bf16.vlgmr.msra.gmra.mxu0 %vm394_vm1, %v339_v10 }
 0x132   : > { %v863_v18 = vpop.permute.xlu1 %862  ;;  %912 = vmatprep.mubr.bf16.mxu0 %v3608_v1 }
 0x133   : > { %2084 = vrot.lane.b32.xlu0 %v3733_v23, %s3636_s16  ;;  %v869_v19 = vsel %vm868_vm9, %v863_v18, %v865_v8 }
 0x134   : > { %2023 = vrot.lane.b32.xlu1 %v3733_v23, %s3635_s11  ;;  %3450 = vmatmul.mubr.msk.bf16.vlgmr.msra.gmra.mxu1 %vm394_vm1, %v340_v17  ;;  %v875_v26 = vsel %vm398_vm0, %v869_v19, 0  ;;  %v347_v17 = vld [vmem:[%s4290_s4 + $0x1c] sm:$0x3] }
 0x135   : > { %v928_v20 = vpop.permute.xlu0 %927  ;;  %973 = vmatprep.mubr.bf16.mxu1 %v3608_v1 }
 0x136   : > { %v867_v21 = vpop.permute.xlu1 %866 }
 0x137   : > { %v870_v25 = vsel %vm868_vm9, %v865_v8, %v867_v21  ;;  %2143 = vrot.lane.b32.xlu0 %v3731_v22, %s3637_s17  ;;  %vm1539_vm9 = vcmask 646144  }
 0x138   : > { %2082 = vrot.lane.b32.xlu1 %v3731_v22, %s3636_s16  ;;  %3451 = vmatprep.subr.msk.bf16.mxu0 %vm398_vm0, %v870_v25  ;;  %v348_v25 = vld [vmem:[%s4290_s4 + $0x1e] sm:$0x3] }
 0x139   : > { %895 = vmatpush1.bf16.msra.mxu0 %v875_v26  ;;  %v987_v27 = vpop.permute.xlu0 %986 }
 0x13a   : > { %v926_v28 = vpop.permute.xlu1 %925 }
 0x13b   : > { %v930_v30 = vsel %vm929_vm10, %v924_v16, %v926_v28  ;;  %2147 = vrot.lane.b32.xlu0 %v3735_v24, %s3637_s17  ;;  %v931_v31 = vsel %vm929_vm10, %v926_v28, %v928_v20  ;;  %vm1600_vm10 = vcmask 637952  }
 0x13c   : > { %2086 = vrot.lane.b32.xlu1 %v3735_v24, %s3636_s16  ;;  %3453 = vmatprep.subr.msk.bf16.mxu1 %vm398_vm0, %v931_v31  ;;  %v936_v32 = vsel %vm398_vm0, %v930_v30, 0  ;;  %s3643_s16 = smov 18  }
 0x13d   : > { %956 = vmatpush1.bf16.msra.mxu1 %v936_v32  ;;  %v1046_v33 = vpop.permute.xlu0 %1045  ;;  %3452 = vmatmul.mubr.msk.bf16.vlgmr.msra.gmra.mxu0 %vm394_vm1, %v341_v29 }
 0x13e   : > { %v985_v35 = vpop.permute.xlu1 %984  ;;  %1034 = vmatprep.mubr.bf16.mxu0 %v3608_v1 }
 0x13f   : > { %2206 = vrot.lane.b32.xlu0 %v3733_v23, %s3638_s26  ;;  %v991_v36 = vsel %vm990_vm11, %v985_v35, %v987_v27 }
 0x140   : > { %2145 = vrot.lane.b32.xlu1 %v3733_v23, %s3637_s17  ;;  %3454 = vmatmul.mubr.msk.bf16.vlgmr.msra.gmra.mxu1 %vm394_vm1, %v342_v34  ;;  %v997_v40 = vsel %vm398_vm0, %v991_v36, 0  ;;  %v349_v34 = vld [vmem:[%s4290_s4 + $0x20] sm:$0x3] }
 0x141   : > { %v1050_v37 = vpop.permute.xlu0 %1049  ;;  %1095 = vmatprep.mubr.bf16.mxu1 %v3608_v1 }
 0x142   : > { %v989_v38 = vpop.permute.xlu1 %988 }
 0x143   : > { %v992_v39 = vsel %vm990_vm11, %v987_v27, %v989_v38  ;;  %2265 = vrot.lane.b32.xlu0 %v3731_v22, %s3639_s28  ;;  %vm1661_vm11 = vcmask 506880  }
 0x144   : > { %2204 = vrot.lane.b32.xlu1 %v3731_v22, %s3638_s26  ;;  %3455 = vmatprep.subr.msk.bf16.mxu0 %vm398_vm0, %v992_v39  ;;  %v350_v39 = vld [vmem:[%s4290_s4 + $0x22] sm:$0x3] }
 0x145   : > { %1017 = vmatpush1.bf16.msra.mxu0 %v997_v40  ;;  %v1109_v41 = vpop.permute.xlu0 %1108 }
 0x146   : > { %v1048_v42 = vpop.permute.xlu1 %1047 }
 0x147   : > { %v1052_v44 = vsel %vm1051_vm12, %v1046_v33, %v1048_v42  ;;  %2269 = vrot.lane.b32.xlu0 %v3735_v24, %s3639_s28  ;;  %v1053_v45 = vsel %vm1051_vm12, %v1048_v42, %v1050_v37  ;;  %vm1722_vm12 = vcmask 498688  }
 0x148   : > { %2208 = vrot.lane.b32.xlu1 %v3735_v24, %s3638_s26  ;;  %3457 = vmatprep.subr.msk.bf16.mxu1 %vm398_vm0, %v1053_v45  ;;  %v1058_v46 = vsel %vm398_vm0, %v1052_v44, 0  ;;  %s3645_s26 = smov 16   ;;  %v3434_v44 = vcombine.high %v3717_v4, %v3717_v4 }
 0x149   : > { %1078 = vmatpush1.bf16.msra.mxu1 %v1058_v46  ;;  %v1168_v47 = vpop.permute.xlu0 %1167  ;;  %3456 = vmatmul.mubr.msk.bf16.vlgmr.msra.gmra.mxu0 %vm394_vm1, %v343_v43 }
 0x14a   : > { %v1107_v49 = vpop.permute.xlu1 %1106  ;;  %1156 = vmatprep.mubr.bf16.mxu0 %v3608_v1 }
 0x14b   : > { %2328 = vrot.lane.b32.xlu0 %v3733_v23, %s3640_s9  ;;  %v1113_v50 = vsel %vm1112_vm13, %v1107_v49, %v1109_v41  ;;  %v351_v49 = vld [vmem:[%s4290_s4 + $0x24] sm:$0x3] }
 0x14c   : > { %2267 = vrot.lane.b32.xlu1 %v3733_v23, %s3639_s28  ;;  %3458 = vmatmul.mubr.msk.bf16.vlgmr.msra.gmra.mxu1 %vm394_vm1, %v344_v48  ;;  %v1119_v57 = vsel %vm398_vm0, %v1113_v50, 0  ;;  %v304_v50 = vunpack.c.l.bf16 %v3434_v44  ;;  %s3651_s28 = smov 120   ;;  %v357_v44 = vld [vmem:[%s4290_s4 + $0x30] sm:$0x3] }
 0x14d   : > { %v1172_v51 = vpop.permute.xlu0 %1171  ;;  %1217 = vmatprep.mubr.bf16.mxu1 %v3608_v1 }
 0x14e   : > { %v1111_v55 = vpop.permute.xlu1 %1110 }
 0x14f   : > { %v1114_v56 = vsel %vm1112_vm13, %v1109_v41, %v1111_v55  ;;  %2387 = vrot.lane.b32.xlu0 %v3731_v22, %s3641_s10  ;;  %vm1783_vm13 = vcmask 490496  }
 0x150   : > { %2326 = vrot.lane.b32.xlu1 %v3731_v22, %s3640_s9  ;;  %3459 = vmatprep.subr.msk.bf16.mxu0 %vm398_vm0, %v1114_v56 }
 0x151   : > { %1139 = vmatpush1.bf16.msra.mxu0 %v1119_v57  ;;  %v1231_v58 = vpop.permute.xlu0 %1230  ;;  %v352_v57 = vld [vmem:[%s4290_s4 + $0x26] sm:$0x3] }
 0x152   : > { %v1170_v59 = vpop.permute.xlu1 %1169 }
 0x153   : > { %v1174_v62 = vsel %vm1173_vm14, %v1168_v47, %v1170_v59  ;;  %2391 = vrot.lane.b32.xlu0 %v3735_v24, %s3641_s10  ;;  %v1175_v63 = vsel %vm1173_vm14, %v1170_v59, %v1172_v51  ;;  %vm1844_vm14 = vcmask 482304  }
 0x154   : > { %2330 = vrot.lane.b32.xlu1 %v3735_v24, %s3640_s9  ;;  %3461 = vmatprep.subr.msk.bf16.mxu1 %vm398_vm0, %v1175_v63  ;;  %v1180_v0 = vsel %vm398_vm0, %v1174_v62, 0  ;;  %s3647_s9 = smov 14  }
 0x155   : > { %1200 = vmatpush1.bf16.msra.mxu1 %v1180_v0  ;;  %v1290_v2 = vpop.permute.xlu0 %1289  ;;  %3460 = vmatmul.mubr.msk.bf16.vlgmr.msra.gmra.mxu0 %vm394_vm1, %v345_v61  ;;  %v314_v61 = vmul.f32 %v3721_v11, %v304_v50 }
 0x156   : > { %v1229_v7 = vpop.permute.xlu1 %1228  ;;  %1278 = vmatprep.mubr.bf16.mxu0 %v3608_v1 }
 0x157   : > { %2450 = vrot.lane.b32.xlu0 %v3733_v23, %s3642_s15  ;;  %v1235_v8 = vsel %vm1234_vm15, %v1229_v7, %v1231_v58  ;;  %v324_v63 = vadd.f32 %v3726_v15, %v314_v61 }
 0x158   : > { %2389 = vrot.lane.b32.xlu1 %v3733_v23, %s3641_s10  ;;  %3462 = vmatmul.mubr.msk.bf16.vlgmr.msra.gmra.mxu1 %vm394_vm1, %v346_v3  ;;  %v1241_v13 = vsel %vm398_vm0, %v1235_v8, 0 }
 0x159   : > { %v1294_v9 = vpop.permute.xlu0 %1293  ;;  %1339 = vmatprep.mubr.bf16.mxu1 %v3608_v1 }
 0x15a   : > { %v1233_v10 = vpop.permute.xlu1 %1232 }
 0x15b   : > { %v1236_v12 = vsel %vm1234_vm15, %v1231_v58, %v1233_v10  ;;  %2509 = vrot.lane.b32.xlu0 %v3731_v22, %s3643_s16  ;;  %v4027_v58 = vpop.f32.mrf.mxu1  ;;  %v328_v10 = vmax.f32 %v324_v63, 0.0  ;;  %vm1905_vm15 = vcmask 474112   ;;  %v359_v63 = vld [vmem:[%s4290_s4 + $0x34] sm:$0x3] }
 0x15c   : > { %2448 = vrot.lane.b32.xlu1 %v3731_v22, %s3642_s15  ;;  %3463 = vmatprep.subr.msk.bf16.mxu0 %vm398_vm0, %v1236_v12 }
 0x15d   : > { %1261 = vmatpush1.bf16.msra.mxu0 %v1241_v13  ;;  %v1353_v14 = vpop.permute.xlu0 %1352  ;;  %v4032_v62 = vpop.f32.mrf.mxu1  ;;  %v353_v13 = vld [vmem:[%s4290_s4 + $0x28] sm:$0x3] }
 0x15e   : > { %v1292_v16 = vpop.permute.xlu1 %1291 }
 0x15f   : > { %v1296_v18 = vsel %vm1295_vm2, %v1290_v2, %v1292_v16  ;;  %v1297_v19 = vsel %vm1295_vm2, %v1292_v16, %v1294_v9  ;;  %2513 = vrot.lane.b32.xlu0 %v3735_v24, %s3643_s16  ;;  %v493_v3 = vpop.f32.mrf.mxu1  ;;  %vm1966_vm2 = vcmask 465920  }
 0x160   : > { %v1302_v20 = vsel %vm398_vm0, %v1296_v18, 0  ;;  %2452 = vrot.lane.b32.xlu1 %v3735_v24, %s3642_s15  ;;  %3465 = vmatprep.subr.msk.bf16.mxu1 %vm398_vm0, %v1297_v19  ;;  %s3649_s15 = smov 12   ;;  %v354_v19 = vld [vmem:[%s4290_s4 + $0x2a] sm:$0x3] }
 0x161   : > { %1322 = vmatpush1.bf16.msra.mxu1 %v1302_v20  ;;  %v1412_v21 = vpop.permute.xlu0 %1411  ;;  %3464 = vmatmul.mubr.msk.bf16.vlgmr.msra.gmra.mxu0 %vm394_vm1, %v347_v17  ;;  %v494_v11 = vpop.f32.mrf.mxu1 }
 0x162   : > { %v1351_v26 = vpop.permute.xlu1 %1350  ;;  %1400 = vmatprep.mubr.bf16.mxu0 %v3608_v1  ;;  %v360_v11 = vld [vmem:[%s4290_s4 + $0x36] sm:$0x3] }
 0x163   : > { %2572 = vrot.lane.b32.xlu0 %v3733_v23, %s3644_s25  ;;  %v1357_v27 = vsel %vm1356_vm3, %v1351_v26, %v1353_v14 }
 0x164   : > { %2511 = vrot.lane.b32.xlu1 %v3733_v23, %s3643_s16  ;;  %3466 = vmatmul.mubr.msk.bf16.vlgmr.msra.gmra.mxu1 %vm394_vm1, %v348_v25  ;;  %v1363_v31 = vsel %vm398_vm0, %v1357_v27, 0 }
 0x165   : > { %v1416_v28 = vpop.permute.xlu0 %1415  ;;  %1461 = vmatprep.mubr.bf16.mxu1 %v3608_v1 }
 0x166   : > { %v1355_v29 = vpop.permute.xlu1 %1354 }
 0x167   : > { %v1358_v30 = vsel %vm1356_vm3, %v1353_v14, %v1355_v29  ;;  %2631 = vrot.lane.b32.xlu0 %v3731_v22, %s3645_s26  ;;  %vm2027_vm3 = vcmask 457728  }
 0x168   : > { %2570 = vrot.lane.b32.xlu1 %v3731_v22, %s3644_s25  ;;  %3467 = vmatprep.subr.msk.bf16.mxu0 %vm398_vm0, %v1358_v30  ;;  %v355_v30 = vld [vmem:[%s4290_s4 + $0x2c] sm:$0x3] }
 0x169   : > { %1383 = vmatpush1.bf16.msra.mxu0 %v1363_v31  ;;  %v1475_v32 = vpop.permute.xlu0 %1474 }
 0x16a   : > { %v1414_v33 = vpop.permute.xlu1 %1413 }
 0x16b   : > { %v1418_v35 = vsel %vm1417_vm4, %v1412_v21, %v1414_v33  ;;  %v1419_v36 = vsel %vm1417_vm4, %v1414_v33, %v1416_v28  ;;  %2635 = vrot.lane.b32.xlu0 %v3735_v24, %s3645_s26  ;;  %vm2088_vm4 = vcmask 326656  }
 0x16c   : > { %v1424_v37 = vsel %vm398_vm0, %v1418_v35, 0  ;;  %2574 = vrot.lane.b32.xlu1 %v3735_v24, %s3644_s25  ;;  %3469 = vmatprep.subr.msk.bf16.mxu1 %vm398_vm0, %v1419_v36 }
 0x16d   : > { %1444 = vmatpush1.bf16.msra.mxu1 %v1424_v37  ;;  %v1534_v38 = vpop.permute.xlu0 %1533  ;;  %3468 = vmatmul.mubr.msk.bf16.vlgmr.msra.gmra.mxu0 %vm394_vm1, %v349_v34  ;;  %v356_v37 = vld [vmem:[%s4290_s4 + $0x2e] sm:$0x3] }
 0x16e   : > { %v1473_v40 = vpop.permute.xlu1 %1472  ;;  %1522 = vmatprep.mubr.bf16.mxu0 %v3608_v1 }
 0x16f   : > { %2694 = vrot.lane.b32.xlu0 %v3733_v23, %s3646_s8  ;;  %v1479_v41 = vsel %vm1478_vm8, %v1473_v40, %v1475_v32 }
 0x170   : > { %2633 = vrot.lane.b32.xlu1 %v3733_v23, %s3645_s26  ;;  %3470 = vmatmul.mubr.msk.bf16.vlgmr.msra.gmra.mxu1 %vm394_vm1, %v350_v39  ;;  %v1485_v46 = vsel %vm398_vm0, %v1479_v41, 0 }
 0x171   : > { %v1538_v42 = vpop.permute.xlu0 %1537  ;;  %1583 = vmatprep.mubr.bf16.mxu1 %v3608_v1 }
 0x172   : > { %v1477_v43 = vpop.permute.xlu1 %1476 }
 0x173   : > { %v1480_v45 = vsel %vm1478_vm8, %v1475_v32, %v1477_v43  ;;  %2753 = vrot.lane.b32.xlu0 %v3731_v22, %s3647_s9  ;;  %vm2149_vm8 = vcmask 318464  }
 0x174   : > { %2692 = vrot.lane.b32.xlu1 %v3731_v22, %s3646_s8  ;;  %3471 = vmatprep.subr.msk.bf16.mxu0 %vm398_vm0, %v1480_v45 }
 0x175   : > { %1505 = vmatpush1.bf16.msra.mxu0 %v1485_v46  ;;  %v1597_v47 = vpop.permute.xlu0 %1596 }
 0x176   : > { %v1536_v48 = vpop.permute.xlu1 %1535 }
 0x177   : > { %v1540_v4 = vsel %vm1539_vm9, %v1534_v38, %v1536_v48  ;;  %v1541_v51 = vsel %vm1539_vm9, %v1536_v48, %v1538_v42  ;;  %2757 = vrot.lane.b32.xlu0 %v3735_v24, %s3647_s9  ;;  %vm2210_vm9 = vcmask 310272  }
 0x178   : > { %v1546_v55 = vsel %vm398_vm0, %v1540_v4, 0  ;;  %2696 = vrot.lane.b32.xlu1 %v3735_v24, %s3646_s8  ;;  %3473 = vmatprep.subr.msk.bf16.mxu1 %vm398_vm0, %v1541_v51  ;;  %v358_v4 = vld [vmem:[%s4290_s4 + $0x32] sm:$0x3]  ;;  %v3337_v51 = vld [vmem:[%s4291_s5] sm:$0xf] }
 0x179   : > { %1566 = vmatpush1.bf16.msra.mxu1 %v1546_v55  ;;  %v1656_v56 = vpop.permute.xlu0 %1655  ;;  %3472 = vmatmul.mubr.msk.bf16.vlgmr.msra.gmra.mxu0 %vm394_vm1, %v351_v49 }
 0x17a   : > { %v1595_v59 = vpop.permute.xlu1 %1594  ;;  %1644 = vmatprep.mubr.bf16.mxu0 %v3608_v1 }
 0x17b   : > { %2816 = vrot.lane.b32.xlu0 %v3733_v23, %s3648_s14  ;;  %v1601_v0 = vsel %vm1600_vm10, %v1595_v59, %v1597_v47 }
 0x17c   : > { %2755 = vrot.lane.b32.xlu1 %v3733_v23, %s3647_s9  ;;  %3474 = vmatmul.mubr.msk.bf16.vlgmr.msra.gmra.mxu1 %vm394_vm1, %v352_v57  ;;  %v1607_v9 = vsel %vm398_vm0, %v1601_v0, 0  ;;  %s3653_s9 = smov 118  }
 0x17d   : > { %v1660_v2 = vpop.permute.xlu0 %1659  ;;  %1705 = vmatprep.mubr.bf16.mxu1 %v3608_v1 }
 0x17e   : > { %v1599_v7 = vpop.permute.xlu1 %1598 }
 0x17f   : > { %v1602_v8 = vsel %vm1600_vm10, %v1597_v47, %v1599_v7  ;;  %2875 = vrot.lane.b32.xlu0 %v3731_v22, %s3649_s15  ;;  %vm2271_vm10 = vcmask 302080  }
 0x180   : > { %2814 = vrot.lane.b32.xlu1 %v3731_v22, %s3648_s14  ;;  %3475 = vmatprep.subr.msk.bf16.mxu0 %vm398_vm0, %v1602_v8  ;;  %v4049_v22 = vpack.c.bf16 %v328_v10, %v328_v10 }
 0x181   : > { %1627 = vmatpush1.bf16.msra.mxu0 %v1607_v9  ;;  %v1719_v15 = vpop.permute.xlu0 %1718 }
 0x182   : > { %v1658_v12 = vpop.permute.xlu1 %1657 }
 0x183   : > { %v1662_v14 = vsel %vm1661_vm11, %v1656_v56, %v1658_v12  ;;  %v1663_v16 = vsel %vm1661_vm11, %v1658_v12, %v1660_v2  ;;  %2879 = vrot.lane.b32.xlu0 %v3735_v24, %s3649_s15  ;;  %vm2332_vm11 = vcmask 293888  }
 0x184   : > { %v1668_v17 = vsel %vm398_vm0, %v1662_v14, 0  ;;  %2818 = vrot.lane.b32.xlu1 %v3735_v24, %s3648_s14  ;;  %3477 = vmatprep.subr.msk.bf16.mxu1 %vm398_vm0, %v1663_v16  ;;  %v361_v16 = vld [vmem:[%s4290_s4 + $0x38] sm:$0x3]  ;;  %s3430_s14 = sshll.u32 %s4296_s27, 2 }
 0x185   : > { %1688 = vmatpush1.bf16.msra.mxu1 %v1668_v17  ;;  %v1778_v18 = vpop.permute.xlu0 %1777  ;;  %3476 = vmatmul.mubr.msk.bf16.vlgmr.msra.gmra.mxu0 %vm394_vm1, %v353_v13  ;;  %s282_s17 = scalar_lea.vmem %s4292_s6, %s3430_s14 }
 0x186   : > { %v1717_v20 = vpop.permute.xlu1 %1716  ;;  %1766 = vmatprep.mubr.bf16.mxu0 %v3608_v1 }
 0x187   : > { %2989 = vrot.lane.b32.xlu0 %v4049_v22, %s3613_s20  ;;  %v1723_v21 = vsel %vm1722_vm12, %v1717_v20, %v1719_v15 }
 0x188   : > { %2877 = vrot.lane.b32.xlu1 %v3733_v23, %s3649_s15  ;;  %3478 = vmatmul.mubr.msk.bf16.vlgmr.msra.gmra.mxu1 %vm394_vm1, %v354_v19  ;;  %v1729_v28 = vsel %vm398_vm0, %v1723_v21, 0  ;;  %v362_v21 = vld [vmem:[%s4290_s4 + $0x3a] sm:$0x3] }
 0x189   : > { %v1782_v25 = vpop.permute.xlu0 %1781  ;;  %1827 = vmatprep.mubr.bf16.mxu1 %v3608_v1 }
 0x18a   : > { %v1721_v26 = vpop.permute.xlu1 %1720 }
 0x18b   : > { %v1724_v27 = vsel %vm1722_vm12, %v1719_v15, %v1721_v26  ;;  %3093 = vrot.lane.b32.xlu0 %v3733_v23, %s3650_s24  ;;  %vm2393_vm12 = vcmask 285696  }
 0x18c   : > { %2937 = vrot.lane.b32.xlu1 %v4049_v22, %s3612_s19  ;;  %3479 = vmatprep.subr.msk.bf16.mxu0 %vm398_vm0, %v1724_v27 }
 0x18d   : > { %1749 = vmatpush1.bf16.msra.mxu0 %v1729_v28  ;;  %v1841_v29 = vpop.permute.xlu0 %1840 }
 0x18e   : > { %v1780_v31 = vpop.permute.xlu1 %1779 }
 0x18f   : > { %v1784_v32 = vsel %vm1783_vm13, %v1778_v18, %v1780_v31  ;;  %v1785_v33 = vsel %vm1783_vm13, %v1780_v31, %v1782_v25  ;;  %3097 = vrot.lane.b32.xlu0 %v4049_v22, %s3650_s24  ;;  %vm2454_vm13 = vcmask 277504  }
 0x190   : > { %v1790_v34 = vsel %vm398_vm0, %v1784_v32, 0  ;;  %3041 = vrot.lane.b32.xlu1 %v4049_v22, %s3614_s22  ;;  %3480 = vmatmul.mubr.msk.bf16.vlgmr.msra.gmra.mxu0 %vm394_vm1, %v355_v30  ;;  %s3652_s22 = smov 119   ;;  %v363_v32 = vld [vmem:[%s4290_s4 + $0x3c] sm:$0x3] }
 0x191   : > { %3481 = vmatprep.subr.msk.bf16.mxu1 %vm398_vm0, %v1785_v33  ;;  %v1900_v35 = vpop.permute.xlu0 %1899  ;;  %1888 = vmatprep.mubr.bf16.mxu0 %v3608_v1 }
 0x192   : > { %1810 = vmatpush1.bf16.msra.mxu1 %v1790_v34  ;;  %v1839_v36 = vpop.permute.xlu1 %1838 }
 0x193   : > { %3156 = vrot.lane.b32.xlu0 %v3735_v24, %s3651_s28  ;;  %v1845_v38 = vsel %vm1844_vm14, %v1839_v36, %v1841_v29 }
 0x194   : > { %3095 = vrot.lane.b32.xlu1 %v3735_v24, %s3650_s24  ;;  %v1851_v42 = vsel %vm398_vm0, %v1845_v38, 0  ;;  %v364_v38 = vld [vmem:[%s4290_s4 + $0x3e] sm:$0x3] }
 0x195   : > { %3482 = vmatmul.mubr.msk.bf16.vlgmr.msra.gmra.mxu1 %vm394_vm1, %v356_v37  ;;  %v1904_v39 = vpop.permute.xlu0 %1903 }
 0x196   : > { %v1843_v40 = vpop.permute.xlu1 %1842  ;;  %1949 = vmatprep.mubr.bf16.mxu1 %v3608_v1 }
 0x197   : > { %v1846_v41 = vsel %vm1844_vm14, %v1841_v29, %v1843_v40  ;;  %3215 = vrot.lane.b32.xlu0 %v3733_v23, %s3652_s22  ;;  %vm2515_vm14 = vcmask 146432  }
 0x198   : > { %3154 = vrot.lane.b32.xlu1 %v3733_v23, %s3651_s28  ;;  %3483 = vmatprep.subr.msk.bf16.mxu0 %vm398_vm0, %v1846_v41 }
 0x199   : > { %1871 = vmatpush1.bf16.msra.mxu0 %v1851_v42  ;;  %v1963_v43 = vpop.permute.xlu0 %1962 }
 0x19a   : > { %v1902_v45 = vpop.permute.xlu1 %1901 }
 0x19b   : > { %v1906_v46 = vsel %vm1905_vm15, %v1900_v35, %v1902_v45  ;;  %v1907_v47 = vsel %vm1905_vm15, %v1902_v45, %v1904_v39  ;;  %3219 = vrot.lane.b32.xlu0 %v4049_v22, %s3652_s22  ;;  %vm2576_vm15 = vcmask 138240  }
 0x19c   : > { %v1912_v48 = vsel %vm398_vm0, %v1906_v46, 0  ;;  %3158 = vrot.lane.b32.xlu1 %v4049_v22, %s3651_s28  ;;  %3484 = vmatmul.mubr.msk.bf16.vlgmr.msra.gmra.mxu0 %vm394_vm1, %v357_v44  ;;  %v365_v46 = vld [vmem:[%s4290_s4 + $0x40] sm:$0x3] }
 0x19d   : > { %3485 = vmatprep.subr.msk.bf16.mxu1 %vm398_vm0, %v1907_v47  ;;  %v2022_v49 = vpop.permute.xlu0 %2021  ;;  %2010 = vmatprep.mubr.bf16.mxu0 %v3608_v1 }
 0x19e   : > { %1932 = vmatpush1.bf16.msra.mxu1 %v1912_v48  ;;  %v1961_v50 = vpop.permute.xlu1 %1960 }
 0x19f   : > { %3278 = vrot.lane.b32.xlu0 %v3735_v24, %s3653_s9  ;;  %v1967_v55 = vsel %vm1966_vm2, %v1961_v50, %v1963_v43 }
 0x1a0   : > { %3217 = vrot.lane.b32.xlu1 %v3735_v24, %s3652_s22  ;;  %v1973_v61 = vsel %vm398_vm0, %v1967_v55, 0 }
 0x1a1   : > { %3486 = vmatmul.mubr.msk.bf16.vlgmr.msra.gmra.mxu1 %vm394_vm1, %v358_v4  ;;  %v2026_v56 = vpop.permute.xlu0 %2025 }
 0x1a2   : > { %v1965_v57 = vpop.permute.xlu1 %1964  ;;  %2071 = vmatprep.mubr.bf16.mxu1 %v3608_v1 }
 0x1a3   : > { %v1968_v59 = vsel %vm1966_vm2, %v1963_v43, %v1965_v57  ;;  %3340 = vperm.xlu0 %3591, %v3337_v51   ;;  %v366_v51 = vld [vmem:[%s4290_s4 + $0x42] sm:$0x3]  ;;  %vm2637_vm2 = vcmask 130048  }
 0x1a4   : > { %3276 = vrot.lane.b32.xlu1 %v3733_v23, %s3653_s9  ;;  %3487 = vmatprep.subr.msk.bf16.mxu0 %vm398_vm0, %v1968_v59 }
 0x1a5   : > { %1993 = vmatpush1.bf16.msra.mxu0 %v1973_v61  ;;  %v2085_v24 = vpop.permute.xlu0 %2084 }
 0x1a6   : > { %v2024_v0 = vpop.permute.xlu1 %2023 }
 0x1a7   : > { %v2028_v2 = vsel %vm2027_vm3, %v2022_v49, %v2024_v0  ;;  %v2029_v3 = vsel %vm2027_vm3, %v2024_v0, %v2026_v56  ;;  %vm2698_vm3 = vcmask 121856  }
 0x1a8   : > { %v2034_v7 = vsel %vm398_vm0, %v2028_v2, 0  ;;  %3280 = vrot.lane.b32.xlu1 %v4049_v22, %s3653_s9  ;;  %3488 = vmatmul.mubr.msk.bf16.vlgmr.msra.gmra.mxu0 %vm394_vm1, %v359_v63 }
 0x1a9   : > { %3489 = vmatprep.subr.msk.bf16.mxu1 %vm398_vm0, %v2029_v3  ;;  %v2144_v23 = vpop.permute.xlu0 %2143  ;;  %2132 = vmatprep.mubr.bf16.mxu0 %v3608_v1 }
 0x1aa   : > { %2054 = vmatpush1.bf16.msra.mxu1 %v2034_v7  ;;  %v2083_v8 = vpop.permute.xlu1 %2082  ;;  %v367_v7 = vld [vmem:[%s4290_s4 + $0x44] sm:$0x3] }
 0x1ab   : > { %v2089_v9 = vsel %vm2088_vm4, %v2083_v8, %v2085_v24 }
 0x1ac   : > { %v2095_v13 = vsel %vm398_vm0, %v2089_v9, 0 }
 0x1ad   : > { %3490 = vmatmul.mubr.msk.bf16.vlgmr.msra.gmra.mxu1 %vm394_vm1, %v360_v11  ;;  %v2148_v10 = vpop.permute.xlu0 %2147 }
 0x1ae   : > { %v2087_v15 = vpop.permute.xlu1 %2086  ;;  %2193 = vmatprep.mubr.bf16.mxu1 %v3608_v1 }
 0x1af   : > { %v2090_v12 = vsel %vm2088_vm4, %v2085_v24, %v2087_v15  ;;  %vm2759_vm4 = vcmask 113664  }
 0x1b0   : > { %3491 = vmatprep.subr.msk.bf16.mxu0 %vm398_vm0, %v2090_v12 }
 0x1b1   : > { %2115 = vmatpush1.bf16.msra.mxu0 %v2095_v13  ;;  %v2207_v14 = vpop.permute.xlu0 %2206 }
 0x1b2   : > { %v2146_v17 = vpop.permute.xlu1 %2145 }
 0x1b3   : > { %v2150_v22 = vsel %vm2149_vm8, %v2144_v23, %v2146_v17  ;;  %v2151_v18 = vsel %vm2149_vm8, %v2146_v17, %v2148_v10  ;;  %vm2820_vm8 = vcmask 105472  }
 0x1b4   : > { %v2156_v19 = vsel %vm398_vm0, %v2150_v22, 0  ;;  %3492 = vmatmul.mubr.msk.bf16.vlgmr.msra.gmra.mxu0 %vm394_vm1, %v361_v16  ;;  %3493 = vmatprep.subr.msk.bf16.mxu1 %vm398_vm0, %v2151_v18 }
 0x1b5   : > { %2176 = vmatpush1.bf16.msra.mxu1 %v2156_v19  ;;  %v2266_v20 = vpop.permute.xlu0 %2265  ;;  %2254 = vmatprep.mubr.bf16.mxu0 %v3608_v1 }
 0x1b6   : > { %v2205_v25 = vpop.permute.xlu1 %2204 }
 0x1b7   : > { %v2211_v26 = vsel %vm2210_vm9, %v2205_v25, %v2207_v14 }
 0x1b8   : > { %3494 = vmatmul.mubr.msk.bf16.vlgmr.msra.gmra.mxu1 %vm394_vm1, %v362_v21  ;;  %v2217_v30 = vsel %vm398_vm0, %v2211_v26, 0 }
 0x1b9   : > { %v2270_v27 = vpop.permute.xlu0 %2269  ;;  %2315 = vmatprep.mubr.bf16.mxu1 %v3608_v1 }
 0x1ba   : > { %v2209_v28 = vpop.permute.xlu1 %2208 }
 0x1bb   : > { %v2212_v29 = vsel %vm2210_vm9, %v2207_v14, %v2209_v28  ;;  %v368_v14 = vld [vmem:[%s4290_s4 + $0x46] sm:$0x3]  ;;  %vm2881_vm9 = vcmask 97280  }
 0x1bc   : > { %3495 = vmatprep.subr.msk.bf16.mxu0 %vm398_vm0, %v2212_v29 }
 0x1bd   : > { %2237 = vmatpush1.bf16.msra.mxu0 %v2217_v30  ;;  %v2329_v31 = vpop.permute.xlu0 %2328 }
 0x1be   : > { %v2268_v33 = vpop.permute.xlu1 %2267 }
 0x1bf   : > { %v2272_v34 = vsel %vm2271_vm10, %v2266_v20, %v2268_v33  ;;  %v2273_v35 = vsel %vm2271_vm10, %v2268_v33, %v2270_v27  ;;  %vm3282_vm10 = vcmask 965632  }
 0x1c0   : > { %v2278_v36 = vsel %vm398_vm0, %v2272_v34, 0  ;;  %3496 = vmatmul.mubr.msk.bf16.vlgmr.msra.gmra.mxu0 %vm394_vm1, %v363_v32  ;;  %3497 = vmatprep.subr.msk.bf16.mxu1 %vm398_vm0, %v2273_v35  ;;  %v369_v34 = vld [vmem:[%s4290_s4 + $0x48] sm:$0x3] }
 0x1c1   : > { %2298 = vmatpush1.bf16.msra.mxu1 %v2278_v36  ;;  %v2388_v37 = vpop.permute.xlu0 %2387  ;;  %2376 = vmatprep.mubr.bf16.mxu0 %v3608_v1 }
 0x1c2   : > { %v2327_v39 = vpop.permute.xlu1 %2326 }
 0x1c3   : > { %v2333_v40 = vsel %vm2332_vm11, %v2327_v39, %v2329_v31 }
 0x1c4   : > { %3498 = vmatmul.mubr.msk.bf16.vlgmr.msra.gmra.mxu1 %vm394_vm1, %v364_v38  ;;  %v2339_v44 = vsel %vm398_vm0, %v2333_v40, 0 }
 0x1c5   : > { %v2392_v41 = vpop.permute.xlu0 %2391  ;;  %2437 = vmatprep.mubr.bf16.mxu1 %v3608_v1 }
 0x1c6   : > { %v2331_v42 = vpop.permute.xlu1 %2330 }
 0x1c7   : > { %v2334_v43 = vsel %vm2332_vm11, %v2329_v31, %v2331_v42 }
 0x1c8   : > { %3499 = vmatprep.subr.msk.bf16.mxu0 %vm398_vm0, %v2334_v43 }
 0x1c9   : > { %2359 = vmatpush1.bf16.msra.mxu0 %v2339_v44  ;;  %v2451_v45 = vpop.permute.xlu0 %2450 }
 0x1ca   : > { %v2390_v47 = vpop.permute.xlu1 %2389 }
 0x1cb   : > { %v2394_v48 = vsel %vm2393_vm12, %v2388_v37, %v2390_v47  ;;  %v2395_v49 = vsel %vm2393_vm12, %v2390_v47, %v2392_v41  ;;  %v370_v41 = vld [vmem:[%s4290_s4 + $0x4a] sm:$0x3] }
 0x1cc   : > { %v2400_v50 = vsel %vm398_vm0, %v2394_v48, 0  ;;  %3500 = vmatmul.mubr.msk.bf16.vlgmr.msra.gmra.mxu0 %vm394_vm1, %v365_v46  ;;  %3501 = vmatprep.subr.msk.bf16.mxu1 %vm398_vm0, %v2395_v49 }
 0x1cd   : > { %2420 = vmatpush1.bf16.msra.mxu1 %v2400_v50  ;;  %v2510_v4 = vpop.permute.xlu0 %2509  ;;  %2498 = vmatprep.mubr.bf16.mxu0 %v3608_v1 }
 0x1ce   : > { %v2449_v55 = vpop.permute.xlu1 %2448 }
 0x1cf   : > { %v2455_v57 = vsel %vm2454_vm13, %v2449_v55, %v2451_v45 }
 0x1d0   : > { %3502 = vmatmul.mubr.msk.bf16.vlgmr.msra.gmra.mxu1 %vm394_vm1, %v366_v51  ;;  %v439_v56 = vpop.f32.mrf.mxu0  ;;  %v2461_v0 = vsel %vm398_vm0, %v2455_v57, 0 }
 0x1d1   : > { %v2514_v59 = vpop.permute.xlu0 %2513  ;;  %2559 = vmatprep.mubr.bf16.mxu1 %v3608_v1  ;;  %v490_v8 = vadd.f32 %v4027_v58, %v439_v56 }
 0x1d2   : > { %v2453_v61 = vpop.permute.xlu1 %2452  ;;  %v441_v24 = vpop.f32.mrf.mxu0 }
 0x1d3   : > { %v2456_v63 = vsel %vm2454_vm13, %v2451_v45, %v2453_v61  ;;  %v492_v12 = vadd.f32 %v4032_v62, %v441_v24 }
 0x1d4   : > { %3503 = vmatprep.subr.msk.bf16.mxu0 %vm398_vm0, %v2456_v63  ;;  %v443_v2 = vpop.f32.mrf.mxu0 }
 0x1d5   : > { %2481 = vmatpush1.bf16.msra.mxu0 %v2461_v0  ;;  %v2573_v3 = vpop.permute.xlu0 %2572  ;;  %v371_v0 = vld [vmem:[%s4290_s4 + $0x4c] sm:$0x3] }
 0x1d6   : > { %v2512_v23 = vpop.permute.xlu1 %2511  ;;  %v444_v11 = vpop.f32.mrf.mxu0 }
 0x1d7   : > { %v2516_v9 = vsel %vm2515_vm14, %v2510_v4, %v2512_v23  ;;  %v2517_v10 = vsel %vm2515_vm14, %v2512_v23, %v2514_v59 }
 0x1d8   : > { %v2522_v15 = vsel %vm398_vm0, %v2516_v9, 0  ;;  %3504 = vmatmul.mubr.msk.bf16.vlgmr.msra.gmra.mxu0 %vm394_vm1, %v367_v7  ;;  %3505 = vmatprep.subr.msk.bf16.mxu1 %vm398_vm0, %v2517_v10  ;;  %v372_v9 = vld [vmem:[%s4290_s4 + $0x4e] sm:$0x3] }
 0x1d9   : > { %2542 = vmatpush1.bf16.msra.mxu1 %v2522_v15  ;;  %v2632_v13 = vpop.permute.xlu0 %2631  ;;  %2620 = vmatprep.mubr.bf16.mxu0 %v3608_v1  ;;  %v548_v58 = vpop.f32.mrf.mxu0 }
 0x1da   : > { %v2571_v16 = vpop.permute.xlu1 %2570  ;;  %v555_v17 = vadd.f32 %v548_v58, %v490_v8 }
 0x1db   : > { %v550_v22 = vpop.f32.mrf.mxu0  ;;  %v2577_v20 = vsel %vm2576_vm15, %v2571_v16, %v2573_v3 }
 0x1dc   : > { %3506 = vmatmul.mubr.msk.bf16.vlgmr.msra.gmra.mxu1 %vm394_vm1, %v368_v14  ;;  %v556_v18 = vadd.f32 %v550_v22, %v492_v12  ;;  %v609_v19 = vpop.f32.mrf.mxu1  ;;  %v2583_v31 = vsel %vm398_vm0, %v2577_v20, 0 }
 0x1dd   : > { %v2636_v21 = vpop.permute.xlu0 %2635  ;;  %2681 = vmatprep.mubr.bf16.mxu1 %v3608_v1  ;;  %v616_v62 = vadd.f32 %v609_v19, %v555_v17  ;;  %v552_v25 = vpop.f32.mrf.mxu0 }
 0x1de   : > { %v2575_v26 = vpop.permute.xlu1 %2574  ;;  %v611_v27 = vpop.f32.mrf.mxu1 }
 0x1df   : > { %v2578_v28 = vsel %vm2576_vm15, %v2573_v3, %v2575_v26  ;;  %v617_v29 = vadd.f32 %v611_v27, %v556_v18  ;;  %v553_v30 = vpop.f32.mrf.mxu0 }
 0x1e0   : > { %3507 = vmatprep.subr.msk.bf16.mxu0 %vm398_vm0, %v2578_v28  ;;  %v613_v32 = vpop.f32.mrf.mxu1 }
 0x1e1   : > { %2603 = vmatpush1.bf16.msra.mxu0 %v2583_v31  ;;  %v2695_v33 = vpop.permute.xlu0 %2694 }
 0x1e2   : > { %v2634_v35 = vpop.permute.xlu1 %2633  ;;  %v614_v36 = vpop.f32.mrf.mxu1 }
 0x1e3   : > { %v2638_v37 = vsel %vm2637_vm2, %v2632_v13, %v2634_v35  ;;  %v2639_v38 = vsel %vm2637_vm2, %v2634_v35, %v2636_v21 }
 0x1e4   : > { %v2644_v39 = vsel %vm398_vm0, %v2638_v37, 0  ;;  %3508 = vmatmul.mubr.msk.bf16.vlgmr.msra.gmra.mxu0 %vm394_vm1, %v369_v34  ;;  %3509 = vmatprep.subr.msk.bf16.mxu1 %vm398_vm0, %v2639_v38  ;;  %v374_v37 = vld [vmem:[%s4290_s4 + $0x52] sm:$0x3] }
 0x1e5   : > { %2664 = vmatpush1.bf16.msra.mxu1 %v2644_v39  ;;  %v2754_v40 = vpop.permute.xlu0 %2753  ;;  %2742 = vmatprep.mubr.bf16.mxu0 %v3608_v1  ;;  %v670_v42 = vpop.f32.mrf.mxu0 }
 0x1e6   : > { %v2693_v43 = vpop.permute.xlu1 %2692  ;;  %v677_v44 = vadd.f32 %v670_v42, %v616_v62 }
 0x1e7   : > { %v672_v45 = vpop.f32.mrf.mxu0  ;;  %v2699_v48 = vsel %vm2698_vm3, %v2693_v43, %v2695_v33  ;;  %v695_v43 = vsel %vm398_vm0, %v3867_v60, 0 }
 0x1e8   : > { %3510 = vmatmul.mubr.msk.bf16.vlgmr.msra.gmra.mxu1 %vm394_vm1, %v370_v41  ;;  %v678_v46 = vadd.f32 %v672_v45, %v617_v29  ;;  %v731_v47 = vpop.f32.mrf.mxu1  ;;  %v2705_v61 = vsel %vm398_vm0, %v2699_v48, 0  ;;  %v373_v29 = vld [vmem:[%s4290_s4 + $0x50] sm:$0x3] }
 0x1e9   : > { %v2758_v49 = vpop.permute.xlu0 %2757  ;;  %2803 = vmatprep.mubr.bf16.mxu1 %v3608_v1  ;;  %v738_v50 = vadd.f32 %v731_v47, %v677_v44  ;;  %v674_v4 = vpop.f32.mrf.mxu0 }
 0x1ea   : > { %v2697_v51 = vpop.permute.xlu1 %2696  ;;  %v733_v55 = vpop.f32.mrf.mxu1 }
 0x1eb   : > { %v2700_v56 = vsel %vm2698_vm3, %v2695_v33, %v2697_v51  ;;  %v739_v57 = vadd.f32 %v733_v55, %v678_v46  ;;  %v675_v59 = vpop.f32.mrf.mxu0  ;;  %v756_v51 = vsel %vm398_vm0, %v3888_v6, 0  ;;  %v377_v6 = vld [vmem:[%s4290_s4 + $0x58] sm:$0x3] }
 0x1ec   : > { %3511 = vmatprep.subr.msk.bf16.mxu0 %vm398_vm0, %v2700_v56  ;;  %v735_v24 = vpop.f32.mrf.mxu1 }
 0x1ed   : > { %2725 = vmatpush1.bf16.msra.mxu0 %v2705_v61  ;;  %v2817_v63 = vpop.permute.xlu0 %2816 }
 0x1ee   : > { %v2756_v2 = vpop.permute.xlu1 %2755  ;;  %v736_v3 = vpop.f32.mrf.mxu1 }
 0x1ef   : > { %v2760_v7 = vsel %vm2759_vm4, %v2754_v40, %v2756_v2  ;;  %v2761_v23 = vsel %vm2759_vm4, %v2756_v2, %v2758_v49 }
 0x1f0   : > { %v2766_v8 = vsel %vm398_vm0, %v2760_v7, 0  ;;  %3512 = vmatmul.mubr.msk.bf16.vlgmr.msra.gmra.mxu0 %vm394_vm1, %v371_v0  ;;  %3513 = vmatprep.subr.msk.bf16.mxu1 %vm398_vm0, %v2761_v23 }
 0x1f1   : > { %2786 = vmatpush1.bf16.msra.mxu1 %v2766_v8  ;;  %v2876_v11 = vpop.permute.xlu0 %2875  ;;  %2864 = vmatprep.mubr.bf16.mxu0 %v3608_v1  ;;  %v792_v10 = vpop.f32.mrf.mxu0 }
 0x1f2   : > { %v2815_v15 = vpop.permute.xlu1 %2814  ;;  %v799_v12 = vadd.f32 %v792_v10, %v738_v50  ;;  %v378_v10 = vld [vmem:[%s4290_s4 + $0x5a] sm:$0x3] }
 0x1f3   : > { %v794_v13 = vpop.f32.mrf.mxu0  ;;  %v2821_v16 = vsel %vm2820_vm8, %v2815_v15, %v2817_v63 }
 0x1f4   : > { %3514 = vmatmul.mubr.msk.bf16.vlgmr.msra.gmra.mxu1 %vm394_vm1, %v372_v9  ;;  %v800_v14 = vadd.f32 %v794_v13, %v739_v57  ;;  %v853_v58 = vpop.f32.mrf.mxu1  ;;  %v2827_v26 = vsel %vm398_vm0, %v2821_v16, 0  ;;  %v376_v57 = vld [vmem:[%s4290_s4 + $0x56] sm:$0x3] }
 0x1f5   : > { %v2880_v17 = vpop.permute.xlu0 %2879  ;;  %2925 = vmatprep.mubr.bf16.mxu1 %v3608_v1  ;;  %v860_v22 = vadd.f32 %v853_v58, %v799_v12  ;;  %v796_v18 = vpop.f32.mrf.mxu0 }
 0x1f6   : > { %v2819_v19 = vpop.permute.xlu1 %2818  ;;  %v855_v20 = vpop.f32.mrf.mxu1 }
 0x1f7   : > { %v2822_v21 = vsel %vm2820_vm8, %v2817_v63, %v2819_v19  ;;  %v861_v62 = vadd.f32 %v855_v20, %v800_v14  ;;  %v797_v25 = vpop.f32.mrf.mxu0  ;;  %v379_v20 = vld [vmem:[%s4290_s4 + $0x5c] sm:$0x3] }
 0x1f8   : > { %3515 = vmatprep.subr.msk.bf16.mxu0 %vm398_vm0, %v2822_v21  ;;  %v857_v27 = vpop.f32.mrf.mxu1 }
 0x1f9   : > { %2847 = vmatpush1.bf16.msra.mxu0 %v2827_v26  ;;  %v2990_v28 = vpop.permute.xlu0 %2989 }
 0x1fa   : > { %v2878_v30 = vpop.permute.xlu1 %2877  ;;  %v858_v31 = vpop.f32.mrf.mxu1  ;;  %v2991_v35 = vsel %vm685_vm6, %v3846_v52, %v2990_v28  ;;  %v634_v52 = vsel %vm398_vm0, %v3854_v54, 0  ;;  %vm3160_vm6 = vcmask 982016   ;;  %v380_v28 = vld [vmem:[%s4290_s4 + $0x5e] sm:$0x3] }
 0x1fb   : > { %v2882_v32 = vsel %vm2881_vm9, %v2876_v11, %v2878_v30  ;;  %v2883_v33 = vsel %vm2881_vm9, %v2878_v30, %v2880_v17 }
 0x1fc   : > { %v2888_v34 = vsel %vm398_vm0, %v2882_v32, 0  ;;  %3516 = vmatmul.mubr.msk.bf16.vlgmr.msra.gmra.mxu0 %vm394_vm1, %v373_v29  ;;  %3517 = vmatprep.subr.msk.bf16.mxu1 %vm398_vm0, %v2883_v33 }
 0x1fd   : > { %2908 = vmatpush1.bf16.msra.mxu1 %v2888_v34  ;;  %v3094_v36 = vpop.permute.xlu0 %3093  ;;  %2978 = vmatprep.mubr.bf16.mxu0 %v3608_v1  ;;  %v914_v38 = vpop.f32.mrf.mxu0 }
 0x1fe   : > { %v2938_v39 = vpop.permute.xlu1 %2937  ;;  %3521 = vmatprep.subr.msk.bf16.mxu1 %vm398_vm0, %v2991_v35  ;;  %v921_v40 = vadd.f32 %v914_v38, %v860_v22 }
 0x1ff   : > { %v2939_v41 = vsel %vm624_vm5, %v3849_v53, %v2938_v39  ;;  %v916_v42 = vpop.f32.mrf.mxu0  ;;  %v375_v53 = vld [vmem:[%s4290_s4 + $0x54] sm:$0x3]  ;;  %vm3099_vm5 = vcmask 990208  }
 0x200   : > { %3518 = vmatmul.mubr.msk.bf16.vlgmr.msra.gmra.mxu1 %vm394_vm1, %v374_v37  ;;  %3519 = vmatprep.subr.msk.bf16.mxu0 %vm398_vm0, %v2939_v41  ;;  %v922_v44 = vadd.f32 %v916_v42, %v861_v62  ;;  %v975_v45 = vpop.f32.mrf.mxu1 }
 0x201   : > { %2961 = vmatpush1.bf16.msra.mxu0 %v634_v52  ;;  %3013 = vmatpush1.bf16.msra.mxu1 %v695_v43  ;;  %v3098_v46 = vpop.permute.xlu0 %3097  ;;  %v982_v47 = vadd.f32 %v975_v45, %v921_v40  ;;  %v918_v48 = vpop.f32.mrf.mxu0 }
 0x202   : > { %v3042_v49 = vpop.permute.xlu1 %3041  ;;  %3030 = vmatprep.mubr.bf16.mxu1 %v3608_v1  ;;  %v977_v50 = vpop.f32.mrf.mxu1 }
 0x203   : > { %v3043_v54 = vsel %vm746_vm7, %v3883_v5, %v3042_v49  ;;  %v983_v4 = vadd.f32 %v977_v50, %v922_v44  ;;  %v919_v60 = vpop.f32.mrf.mxu0  ;;  %vm3221_vm7 = vcmask 973824   ;;  %v381_v44 = vld [vmem:[%s4290_s4 + $0x60] sm:$0x3] }
 0x204   : > { %3520 = vmatmul.mubr.msk.bf16.vlgmr.msra.gmra.mxu0 %vm394_vm1, %v375_v53  ;;  %3523 = vmatprep.subr.msk.bf16.mxu0 %vm398_vm0, %v3043_v54  ;;  %v979_v55 = vpop.f32.mrf.mxu1 }
 0x205   : > { %3065 = vmatpush1.bf16.msra.mxu0 %v756_v51  ;;  %v3157_v56 = vpop.permute.xlu0 %3156  ;;  %3082 = vmatprep.mubr.bf16.mxu0 %v3608_v1 }
 0x206   : > { %v3096_v5 = vpop.permute.xlu1 %3095  ;;  %v980_v59 = vpop.f32.mrf.mxu1 }
 0x207   : > { %v3100_v61 = vsel %vm3099_vm5, %v3094_v36, %v3096_v5  ;;  %v3101_v24 = vsel %vm3099_vm5, %v3096_v5, %v3098_v46 }
 0x208   : > { %v3106_v63 = vsel %vm398_vm0, %v3100_v61, 0  ;;  %3522 = vmatmul.mubr.msk.bf16.vlgmr.msra.gmra.mxu1 %vm394_vm1, %v376_v57  ;;  %3525 = vmatprep.subr.msk.bf16.mxu1 %vm398_vm0, %v3101_v24 }
 0x209   : > { %3126 = vmatpush1.bf16.msra.mxu1 %v3106_v63  ;;  %3143 = vmatprep.mubr.bf16.mxu1 %v3608_v1  ;;  %v1036_v0 = vpop.f32.mrf.mxu0  ;;  %v3216_v7 = vpop.permute.xlu0 %3215 }
 0x20a   : > { %v3155_v2 = vpop.permute.xlu1 %3154  ;;  %v1043_v3 = vadd.f32 %v1036_v0, %v982_v47 }
 0x20b   : > { %v1038_v23 = vpop.f32.mrf.mxu0  ;;  %v3161_v9 = vsel %vm3160_vm6, %v3155_v2, %v3157_v56 }
 0x20c   : > { %3524 = vmatmul.mubr.msk.bf16.vlgmr.msra.gmra.mxu0 %vm394_vm1, %v377_v6  ;;  %v1044_v8 = vadd.f32 %v1038_v23, %v983_v4  ;;  %v1097_v11 = vpop.f32.mrf.mxu1  ;;  %v3167_v22 = vsel %vm398_vm0, %v3161_v9, 0 }
 0x20d   : > { %3204 = vmatprep.mubr.bf16.mxu0 %v3608_v1  ;;  %v1104_v15 = vadd.f32 %v1097_v11, %v1043_v3  ;;  %v1040_v12 = vpop.f32.mrf.mxu0  ;;  %v3220_v19 = vpop.permute.xlu0 %3219 }
 0x20e   : > { %v3159_v13 = vpop.permute.xlu1 %3158  ;;  %v1099_v14 = vpop.f32.mrf.mxu1 }
 0x20f   : > { %v3162_v58 = vsel %vm3160_vm6, %v3157_v56, %v3159_v13  ;;  %v1105_v16 = vadd.f32 %v1099_v14, %v1044_v8  ;;  %v1041_v17 = vpop.f32.mrf.mxu0 }
 0x210   : > { %3526 = vmatmul.mubr.msk.bf16.vlgmr.msra.gmra.mxu1 %vm394_vm1, %v378_v10  ;;  %3527 = vmatprep.subr.msk.bf16.mxu0 %vm398_vm0, %v3162_v58  ;;  %v1101_v18 = vpop.f32.mrf.mxu1 }
 0x211   : > { %3187 = vmatpush1.bf16.msra.mxu0 %v3167_v22  ;;  %3265 = vmatprep.mubr.bf16.mxu1 %v3608_v1  ;;  %v3279_v33 = vpop.permute.xlu0 %3278 }
 0x212   : > { %v3218_v21 = vpop.permute.xlu1 %3217  ;;  %v1102_v62 = vpop.f32.mrf.mxu1 }
 0x213   : > { %v3222_v25 = vsel %vm3221_vm7, %v3216_v7, %v3218_v21  ;;  %v3223_v26 = vsel %vm3221_vm7, %v3218_v21, %v3220_v19 }
 0x214   : > { %v3228_v27 = vsel %vm398_vm0, %v3222_v25, 0  ;;  %3528 = vmatmul.mubr.msk.bf16.vlgmr.msra.gmra.mxu0 %vm394_vm1, %v379_v20  ;;  %3529 = vmatprep.subr.msk.bf16.mxu1 %vm398_vm0, %v3223_v26 }
 0x215   : > { %3248 = vmatpush1.bf16.msra.mxu1 %v3228_v27  ;;  %3326 = vmatprep.mubr.bf16.mxu0 %v3608_v1  ;;  %v1158_v29 = vpop.f32.mrf.mxu0 }
 0x216   : > { %v3277_v30 = vpop.permute.xlu1 %3276  ;;  %v1165_v31 = vadd.f32 %v1158_v29, %v1104_v15 }
 0x217   : > { %v1160_v32 = vpop.f32.mrf.mxu0  ;;  %v3283_v36 = vsel %vm3282_vm10, %v3277_v30, %v3279_v33 }
 0x218   : > { %3530 = vmatmul.mubr.msk.bf16.vlgmr.msra.gmra.mxu1 %vm394_vm1, %v380_v28  ;;  %v1166_v34 = vadd.f32 %v1160_v32, %v1105_v16  ;;  %v1219_v35 = vpop.f32.mrf.mxu1  ;;  %v3289_v1 = vsel %vm398_vm0, %v3283_v36, 0 }
 0x219   : > { %v1226_v37 = vadd.f32 %v1219_v35, %v1165_v31  ;;  %v1162_v38 = vpop.f32.mrf.mxu0 }
 0x21a   : > { %v3281_v39 = vpop.permute.xlu1 %3280  ;;  %v1221_v40 = vpop.f32.mrf.mxu1 }
 0x21b   : > { %v3284_v41 = vsel %vm3282_vm10, %v3279_v33, %v3281_v39  ;;  %v1227_v42 = vadd.f32 %v1221_v40, %v1166_v34  ;;  %v1163_v52 = vpop.f32.mrf.mxu0 }
 0x21c   : > { %3531 = vmatprep.subr.msk.bf16.mxu0 %vm398_vm0, %v3284_v41  ;;  %v1223_v43 = vpop.f32.mrf.mxu1 }
 0x21d   : > { %3309 = vmatpush1.bf16.msra.mxu0 %v3289_v1 }
 0x21e   : > { %v1224_v45 = vpop.f32.mrf.mxu1 }
 0x220   : > { %3532 = vmatmul.mubr.msk.bf16.vlgmr.msra.gmra.mxu0 %vm394_vm1, %v381_v44 }
 0x221   : > { %v1280_v46 = vpop.f32.mrf.mxu0 }
 0x222   : > { %v1287_v53 = vadd.f32 %v1280_v46, %v1226_v37 }
 0x223   : > { %v1282_v47 = vpop.f32.mrf.mxu0 }
 0x224   : > { %v1288_v48 = vadd.f32 %v1282_v47, %v1227_v42  ;;  %v1341_v49 = vpop.f32.mrf.mxu1 }
 0x225   : > { %v1348_v50 = vadd.f32 %v1341_v49, %v1287_v53  ;;  %v1284_v54 = vpop.f32.mrf.mxu0 }
 0x226   : > { %v1343_v4 = vpop.f32.mrf.mxu1 }
 0x227   : > { %v1349_v60 = vadd.f32 %v1343_v4, %v1288_v48  ;;  %v1285_v51 = vpop.f32.mrf.mxu0 }
 0x228   : > { %v1345_v55 = vpop.f32.mrf.mxu1 }
 0x22a   : > { %v1346_v56 = vpop.f32.mrf.mxu1 }
 0x22d   : > { %v1402_v57 = vpop.f32.mrf.mxu0 }
 0x22e   : > { %v1409_v5 = vadd.f32 %v1402_v57, %v1348_v50 }
 0x22f   : > { %v1404_v59 = vpop.f32.mrf.mxu0 }
 0x230   : > { %v1410_v61 = vadd.f32 %v1404_v59, %v1349_v60  ;;  %v1463_v24 = vpop.f32.mrf.mxu1 }
 0x231   : > { %v1470_v63 = vadd.f32 %v1463_v24, %v1409_v5  ;;  %v1406_v6 = vpop.f32.mrf.mxu0 }
 0x232   : > { %v1465_v0 = vpop.f32.mrf.mxu1 }
 0x233   : > { %v1471_v2 = vadd.f32 %v1465_v0, %v1410_v61  ;;  %v1407_v3 = vpop.f32.mrf.mxu0 }
 0x234   : > { %v1467_v7 = vpop.f32.mrf.mxu1 }
 0x236   : > { %v1468_v23 = vpop.f32.mrf.mxu1 }
 0x239   : > { %v1524_v8 = vpop.f32.mrf.mxu0 }
 0x23a   : > { %v1531_v11 = vadd.f32 %v1524_v8, %v1470_v63 }
 0x23b   : > { %v1526_v9 = vpop.f32.mrf.mxu0 }
 0x23c   : > { %v1532_v10 = vadd.f32 %v1526_v9, %v1471_v2  ;;  %v1585_v15 = vpop.f32.mrf.mxu1 }
 0x23d   : > { %v1592_v12 = vadd.f32 %v1585_v15, %v1531_v11  ;;  %v1528_v13 = vpop.f32.mrf.mxu0 }
 0x23e   : > { %v1587_v14 = vpop.f32.mrf.mxu1 }
 0x23f   : > { %v1593_v58 = vadd.f32 %v1587_v14, %v1532_v10  ;;  %v1529_v16 = vpop.f32.mrf.mxu0 }
 0x240   : > { %v1589_v17 = vpop.f32.mrf.mxu1 }
 0x242   : > { %v1590_v22 = vpop.f32.mrf.mxu1 }
 0x245   : > { %v1646_v18 = vpop.f32.mrf.mxu0 }
 0x246   : > { %v1653_v19 = vadd.f32 %v1646_v18, %v1592_v12 }
 0x247   : > { %v1648_v20 = vpop.f32.mrf.mxu0 }
 0x248   : > { %v1654_v21 = vadd.f32 %v1648_v20, %v1593_v58  ;;  %v1707_v62 = vpop.f32.mrf.mxu1 }
 0x249   : > { %v1714_v25 = vadd.f32 %v1707_v62, %v1653_v19  ;;  %v1650_v26 = vpop.f32.mrf.mxu0 }
 0x24a   : > { %v1709_v27 = vpop.f32.mrf.mxu1 }
 0x24b   : > { %v1715_v28 = vadd.f32 %v1709_v27, %v1654_v21  ;;  %v1651_v29 = vpop.f32.mrf.mxu0 }
 0x24c   : > { %v1711_v30 = vpop.f32.mrf.mxu1 }
 0x24e   : > { %v1712_v31 = vpop.f32.mrf.mxu1 }
 0x250   : > { %v1768_v32 = vpop.f32.mrf.mxu0 }
 0x251   : > { %v1775_v33 = vadd.f32 %v1768_v32, %v1714_v25 }
 0x252   : > { %v1770_v34 = vpop.f32.mrf.mxu0 }
 0x253   : > { %v1776_v35 = vadd.f32 %v1770_v34, %v1715_v28 }
 0x254   : > { %v1772_v36 = vpop.f32.mrf.mxu0 }
 0x255   : > { %v1829_v37 = vpop.f32.mrf.mxu1 }
 0x256   : > { %v1836_v38 = vadd.f32 %v1829_v37, %v1775_v33  ;;  %v1773_v39 = vpop.f32.mrf.mxu0 }
 0x257   : > { %v1831_v40 = vpop.f32.mrf.mxu1 }
 0x258   : > { %v1837_v41 = vadd.f32 %v1831_v40, %v1776_v35 }
 0x259   : > { %v1833_v42 = vpop.f32.mrf.mxu1 }
 0x25b   : > { %v1834_v52 = vpop.f32.mrf.mxu1 }
 0x25c   : > { %v1890_v1 = vpop.f32.mrf.mxu0 }
 0x25d   : > { %v1897_v43 = vadd.f32 %v1890_v1, %v1836_v38 }
 0x25e   : > { %v1892_v44 = vpop.f32.mrf.mxu0 }
 0x25f   : > { %v1898_v45 = vadd.f32 %v1892_v44, %v1837_v41 }
 0x260   : > { %v1894_v46 = vpop.f32.mrf.mxu0 }
 0x261   : > { %v1951_v53 = vpop.f32.mrf.mxu1 }
 0x262   : > { %v1958_v47 = vadd.f32 %v1951_v53, %v1897_v43  ;;  %v1895_v48 = vpop.f32.mrf.mxu0 }
 0x263   : > { %v1953_v49 = vpop.f32.mrf.mxu1 }
 0x264   : > { %v1959_v50 = vadd.f32 %v1953_v49, %v1898_v45 }
 0x265   : > { %v1955_v54 = vpop.f32.mrf.mxu1 }
 0x267   : > { %v1956_v4 = vpop.f32.mrf.mxu1 }
 0x268   : > { %v2012_v60 = vpop.f32.mrf.mxu0 }
 0x269   : > { %v2019_v51 = vadd.f32 %v2012_v60, %v1958_v47 }
 0x26a   : > { %v2014_v55 = vpop.f32.mrf.mxu0 }
 0x26b   : > { %v2020_v56 = vadd.f32 %v2014_v55, %v1959_v50 }
 0x26c   : > { %v2016_v57 = vpop.f32.mrf.mxu0 }
 0x26d   : > { %v2073_v5 = vpop.f32.mrf.mxu1 }
 0x26e   : > { %v2080_v59 = vadd.f32 %v2073_v5, %v2019_v51  ;;  %v2017_v61 = vpop.f32.mrf.mxu0 }
 0x26f   : > { %v2075_v24 = vpop.f32.mrf.mxu1 }
 0x270   : > { %v2081_v63 = vadd.f32 %v2075_v24, %v2020_v56 }
 0x271   : > { %v2077_v6 = vpop.f32.mrf.mxu1 }
 0x273   : > { %v2078_v0 = vpop.f32.mrf.mxu1 }
 0x274   : > { %v2134_v2 = vpop.f32.mrf.mxu0 }
 0x275   : > { %v2141_v3 = vadd.f32 %v2134_v2, %v2080_v59 }
 0x276   : > { %v2136_v7 = vpop.f32.mrf.mxu0 }
 0x277   : > { %v2142_v23 = vadd.f32 %v2136_v7, %v2081_v63 }
 0x278   : > { %v2195_v8 = vpop.f32.mrf.mxu1  ;;  %v2138_v11 = vpop.f32.mrf.mxu0 }
 0x279   : > { %v2202_v9 = vadd.f32 %v2195_v8, %v2141_v3 }
 0x27a   : > { %v2197_v10 = vpop.f32.mrf.mxu1  ;;  %v2139_v15 = vpop.f32.mrf.mxu0 }
 0x27b   : > { %v2203_v12 = vadd.f32 %v2197_v10, %v2142_v23 }
 0x27c   : > { %v2199_v13 = vpop.f32.mrf.mxu1 }
 0x27e   : > { %v2200_v14 = vpop.f32.mrf.mxu1 }
 0x280   : > { %v2256_v58 = vpop.f32.mrf.mxu0 }
 0x281   : > { %v2263_v51 = vadd.f32 %v2256_v58, %v2202_v9 }
 0x282   : > { %v2258_v16 = vpop.f32.mrf.mxu0 }
 0x283   : > { %v2264_v56 = vadd.f32 %v2258_v16, %v2203_v12 }
 0x284   : > { %v2317_v17 = vpop.f32.mrf.mxu1  ;;  %v2260_v22 = vpop.f32.mrf.mxu0 }
 0x285   : > { %v2324_v57 = vadd.f32 %v2317_v17, %v2263_v51 }
 0x286   : > { %v2319_v18 = vpop.f32.mrf.mxu1  ;;  %v2261_v19 = vpop.f32.mrf.mxu0 }
 0x287   : > { %v2325_v61 = vadd.f32 %v2319_v18, %v2264_v56 }
 0x288   : > { %v2321_v20 = vpop.f32.mrf.mxu1 }
 0x28a   : > { %v2322_v21 = vpop.f32.mrf.mxu1 }
 0x28c   : > { %v2378_v62 = vpop.f32.mrf.mxu0 }
 0x28d   : > { %v2385_v24 = vadd.f32 %v2378_v62, %v2324_v57 }
 0x28e   : > { %v2380_v25 = vpop.f32.mrf.mxu0 }
 0x28f   : > { %v2386_v0 = vadd.f32 %v2380_v25, %v2325_v61 }
 0x290   : > { %v2439_v26 = vpop.f32.mrf.mxu1  ;;  %v2382_v27 = vpop.f32.mrf.mxu0 }
 0x291   : > { %v2446_v2 = vadd.f32 %v2439_v26, %v2385_v24 }
 0x292   : > { %v2441_v28 = vpop.f32.mrf.mxu1  ;;  %v2383_v29 = vpop.f32.mrf.mxu0 }
 0x293   : > { %v2447_v23 = vadd.f32 %v2441_v28, %v2386_v0 }
 0x294   : > { %v2443_v30 = vpop.f32.mrf.mxu1 }
 0x296   : > { %v2444_v31 = vpop.f32.mrf.mxu1 }
 0x298   : > { %v2500_v32 = vpop.f32.mrf.mxu0 }
 0x299   : > { %v2507_v8 = vadd.f32 %v2500_v32, %v2446_v2 }
 0x29a   : > { %v2502_v33 = vpop.f32.mrf.mxu0 }
 0x29b   : > { %v2508_v15 = vadd.f32 %v2502_v33, %v2447_v23 }
 0x29c   : > { %v2561_v34 = vpop.f32.mrf.mxu1  ;;  %v2504_v35 = vpop.f32.mrf.mxu0 }
 0x29d   : > { %v2568_v13 = vadd.f32 %v2561_v34, %v2507_v8 }
 0x29e   : > { %v2563_v36 = vpop.f32.mrf.mxu1  ;;  %v2505_v37 = vpop.f32.mrf.mxu0 }
 0x29f   : > { %v2569_v12 = vadd.f32 %v2563_v36, %v2508_v15 }
 0x2a0   : > { %v2565_v38 = vpop.f32.mrf.mxu1 }
 0x2a2   : > { %v2566_v39 = vpop.f32.mrf.mxu1 }
 0x2a4   : > { %v2622_v40 = vpop.f32.mrf.mxu0 }
 0x2a5   : > { %v2629_v58 = vadd.f32 %v2622_v40, %v2568_v13 }
 0x2a6   : > { %v2624_v41 = vpop.f32.mrf.mxu0 }
 0x2a7   : > { %v2630_v22 = vadd.f32 %v2624_v41, %v2569_v12 }
 0x2a8   : > { %v2683_v42 = vpop.f32.mrf.mxu1  ;;  %v2626_v52 = vpop.f32.mrf.mxu0 }
 0x2a9   : > { %v2690_v18 = vadd.f32 %v2683_v42, %v2629_v58 }
 0x2aa   : > { %v2685_v1 = vpop.f32.mrf.mxu1  ;;  %v2627_v43 = vpop.f32.mrf.mxu0 }
 0x2ab   : > { %v2691_v21 = vadd.f32 %v2685_v1, %v2630_v22 }
 0x2ac   : > { %v2687_v44 = vpop.f32.mrf.mxu1 }
 0x2ae   : > { %v2688_v45 = vpop.f32.mrf.mxu1 }
 0x2b0   : > { %v2744_v46 = vpop.f32.mrf.mxu0 }
 0x2b1   : > { %v2751_v62 = vadd.f32 %v2744_v46, %v2690_v18 }
 0x2b2   : > { %v2746_v53 = vpop.f32.mrf.mxu0 }
 0x2b3   : > { %v2752_v27 = vadd.f32 %v2746_v53, %v2691_v21 }
 0x2b4   : > { %v2805_v47 = vpop.f32.mrf.mxu1  ;;  %v2748_v48 = vpop.f32.mrf.mxu0 }
 0x2b5   : > { %v2812_v28 = vadd.f32 %v2805_v47, %v2751_v62 }
 0x2b6   : > { %v2807_v49 = vpop.f32.mrf.mxu1  ;;  %v2749_v50 = vpop.f32.mrf.mxu0 }
 0x2b7   : > { %v2813_v31 = vadd.f32 %v2807_v49, %v2752_v27 }
 0x2b8   : > { %v2809_v54 = vpop.f32.mrf.mxu1 }
 0x2ba   : > { %v2810_v4 = vpop.f32.mrf.mxu1 }
 0x2bc   : > { %v2866_v60 = vpop.f32.mrf.mxu0 }
 0x2bd   : > { %v2873_v32 = vadd.f32 %v2866_v60, %v2812_v28 }
 0x2be   : > { %v2868_v55 = vpop.f32.mrf.mxu0 }
 0x2bf   : > { %v2874_v35 = vadd.f32 %v2868_v55, %v2813_v31 }
 0x2c0   : > { %v2870_v5 = vpop.f32.mrf.mxu0  ;;  %v2927_v59 = vpop.f32.mrf.mxu1 }
 0x2c1   : > { %v2934_v36 = vadd.f32 %v2927_v59, %v2873_v32  ;;  %v3341_v59 = vpop.permute.xlu0 %3340 }
 0x2c2   : > { %v2871_v63 = vpop.f32.mrf.mxu0  ;;  %v2929_v6 = vpop.f32.mrf.mxu1 }
 0x2c3   : > { %v2935_v39 = vadd.f32 %v2929_v6, %v2874_v35 }
 0x2c4   : > { %v2931_v3 = vpop.f32.mrf.mxu1  ;;  %v2980_v7 = vpop.f32.mrf.mxu0 }
 0x2c5   : > { %v2987_v40 = vadd.f32 %v2980_v7, %v2934_v36 }
 0x2c6   : > { %v2932_v11 = vpop.f32.mrf.mxu1  ;;  %v2982_v10 = vpop.f32.mrf.mxu0 }
 0x2c7   : > { %v2988_v52 = vadd.f32 %v2982_v10, %v2935_v39 }
 0x2c8   : > { %v2984_v9 = vpop.f32.mrf.mxu0  ;;  %v3032_v14 = vpop.f32.mrf.mxu1 }
 0x2c9   : > { %v3039_v1 = vadd.f32 %v3032_v14, %v2987_v40 }
 0x2ca   : > { %v2985_v16 = vpop.f32.mrf.mxu0  ;;  %v3034_v17 = vpop.f32.mrf.mxu1 }
 0x2cb   : > { %v3040_v45 = vadd.f32 %v3034_v17, %v2988_v52 }
 0x2cc   : > { %v3036_v19 = vpop.f32.mrf.mxu1  ;;  %v3084_v20 = vpop.f32.mrf.mxu0 }
 0x2cd   : > { %v3091_v46 = vadd.f32 %v3084_v20, %v3039_v1 }
 0x2ce   : > { %v3037_v25 = vpop.f32.mrf.mxu1  ;;  %v3086_v26 = vpop.f32.mrf.mxu0 }
 0x2cf   : > { %v3092_v48 = vadd.f32 %v3086_v26, %v3040_v45 }
 0x2d0   : > { %v3088_v29 = vpop.f32.mrf.mxu0  ;;  %v3145_v30 = vpop.f32.mrf.mxu1 }
 0x2d1   : > { %v3152_v49 = vadd.f32 %v3145_v30, %v3091_v46 }
 0x2d2   : > { %v3089_v33 = vpop.f32.mrf.mxu0  ;;  %v3147_v34 = vpop.f32.mrf.mxu1 }
 0x2d3   : > { %v3153_v54 = vadd.f32 %v3147_v34, %v3092_v48 }
 0x2d4   : > { %v3149_v37 = vpop.f32.mrf.mxu1  ;;  %v3206_v38 = vpop.f32.mrf.mxu0 }
 0x2d5   : > { %v3213_v4 = vadd.f32 %v3206_v38, %v3152_v49 }
 0x2d6   : > { %v3150_v41 = vpop.f32.mrf.mxu1  ;;  %v3208_v42 = vpop.f32.mrf.mxu0 }
 0x2d7   : > { %v3214_v51 = vadd.f32 %v3208_v42, %v3153_v54 }
 0x2d8   : > { %v3267_v43 = vpop.f32.mrf.mxu1  ;;  %v3210_v44 = vpop.f32.mrf.mxu0 }
 0x2d9   : > { %v3274_v55 = vadd.f32 %v3267_v43, %v3213_v4 }
 0x2da   : > { %v3269_v53 = vpop.f32.mrf.mxu1  ;;  %v3211_v47 = vpop.f32.mrf.mxu0 }
 0x2db   : > { %v3275_v57 = vadd.f32 %v3269_v53, %v3214_v51 }
 0x2dc   : > { %v3271_v50 = vpop.f32.mrf.mxu1 }
 0x2de   : > { %v3272_v60 = vpop.f32.mrf.mxu1 }
 0x2e0   : > { %v3328_v56 = vpop.f32.mrf.mxu0 }
 0x2e1   : > { %v3335_v5 = vadd.f32 %v3328_v56, %v3274_v55 }
 0x2e2   : > { %v3330_v61 = vpop.f32.mrf.mxu0 }
 0x2e3   : > { %v3343_v24 = vadd.f32 %v3341_v59, %v3335_v5  ;;  %v3336_v63 = vadd.f32 %v3330_v61, %v3275_v57 }
 0x2e4   : > { %v3332_v6 = vpop.f32.mrf.mxu0 }
 0x2e5   : > { %v3344_v0 = vadd.f32 %v3341_v59, %v3336_v63  ;;  %3596 = vtanh.f32 %v3343_v24 }
 0x2e6   : > { %v3333_v2 = vpop.f32.mrf.mxu0 }
 0x2e7   : > { %3598 = vtanh.f32 %v3344_v0 }
 0x2f2   : > { %v3597_v3 = vpop.eup %3596 }
 0x2f4   : > { %v3599_v7 = vpop.eup %3598 }
 0x2f5   : > { %v3349_v23 = vcombine.low %v3597_v3, %v3599_v7 }
 0x2f7   : > { %3351 = vst [vmem:[%s282_s17] sm:$0xff] %v3349_v23 }
 0x2f8 PF: > { %s16_s21 = sadd.s32 1, %s3606_s21  }
 0x2f9   : > { %p13_p6 = scmp.ge.s32.totalorder %s16_s21, 6  }
 0x2fb   :  { %15 = sbr.rel (!%p13_p6) target bundleno = 1 (0x1), region = 77 }

</bundles_post_ra>
